<compile_context>
chip_gen: v7x
topology: tpu7x:2x2x1
jax: 0.10.0
libtpu: 0.0.40
codegen_flags: <defaults>
</compile_context>

<pallas_src>
import numpy as np
import jax
import jax.numpy as jnp
from jax import lax
from jax.experimental import pallas as pl
from jax.experimental.pallas import tpu as pltpu


# ----------------------------- parameter setup ------------------------------
def _gaussian_1d(ksize: int, sigma: float) -> np.ndarray:
    # mirrors SSIMLoss.gaussian: linspace(-half, half), exp(-0.5*(k/sigma)^2), normalize
    half = (ksize - 1) * 0.5
    coords = np.linspace(-half, half, ksize, dtype=np.float64)
    g = np.exp(-0.5 * (coords / sigma) ** 2)
    return g / g.sum()


def create_gaussian_window(kernel_size=(7, 7), sigma=(1.5, 1.5)) -> np.ndarray:
    # mirrors SSIMLoss.create_kernel: matmul(kernel_x.t(), kernel_y) == outer product
    kx = _gaussian_1d(kernel_size[0], sigma[0])
    ky = _gaussian_1d(kernel_size[1], sigma[1])
    return np.outer(kx, ky)


class Normalizer:
    """Deterministic stand-in for the external `normalizer` object."""

    def __init__(self, mean: float = 0.45, std: float = 0.22):
        self.mean = float(mean)
        self.std = float(std)

    def denormalize(self, x):
        return x * self.std + self.mean


def _round_up(v: int, m: int) -> int:
    return -(-v // m) * m


# ------------------------------- Pallas kernel ------------------------------
def _build_ssim_kernel(win_h, win_w, H, W, TB, mean, std, c1, c2):
    """Kernel over one (H, W, TB) block of images stacked along lanes."""
    KH, KW = len(win_h), len(win_w)
    Hv, Wv = H - KH + 1, W - KW + 1          # 'valid' region == crop-by-pad in skimage
    NP = KH * KW
    cov_norm = NP / (NP - 1.0)               # skimage-style unbiased covariance
    wh = [float(v) for v in win_h]
    ww = [float(v) for v in win_w]

    def sep_filter(m):
        # Separable Gaussian.  Row pass slices along H (major / vreg-row axis):
        # no relayout, result (Hv, W, TB).
        t = wh[0] * m[0:Hv]
        for di in range(1, KH):
            t = t + wh[di] * m[di:di + Hv]
        # Column pass: full-width XLU sublane rotates instead of unaligned
        # sublane slices (XLU slot is idle while the VALU is binding; keeps
        # every downstream vreg fully packed).  Columns >= Wv pick up wrapped
        # data and are masked out just before the final reduction.
        r = ww[0] * t
        for dj in range(1, KW):
            r = r + ww[dj] * pltpu.roll(t, W - dj, axis=1)   # == shift by -dj
        return r                                             # (Hv, W, TB)

    def kernel(x_ref, y_ref, o_ref):
        # bf16 inputs -> f32 math: denormalize + clamp(0, 1) in-kernel.
        x = jnp.clip(x_ref[...].astype(jnp.float32) * std + mean, 0.0, 1.0)
        y = jnp.clip(y_ref[...].astype(jnp.float32) * std + mean, 0.0, 1.0)

        # Interleave products with their filters so at most ~3 full-size f32
        # tensors are live at once (x, y, one product) -> fewer vreg spills.
        # TODO(synk): optional v6e micro-opt — run the tap accumulation in bf16
        # (keep the variance/SSIM epilogue in f32) after re-validating accuracy.
        ux = sep_filter(x)
        uy = sep_filter(y)
        uxy = sep_filter(x * y)
        uxx = sep_filter(x * x)
        uyy = sep_filter(y * y)

        vx = cov_norm * (uxx - ux * ux)
        vy = cov_norm * (uyy - uy * uy)
        vxy = cov_norm * (uxy - ux * uy)
        a1 = 2.0 * ux * uy + c1
        a2 = 2.0 * vxy + c2
        b1 = ux * ux + uy * uy + c1
        b2 = vx + vy + c2

        # divide -> EUP approx reciprocal + one Newton step (d > 0 everywhere
        # since c1, c2 > 0 and variances are non-negative, also on wrapped cols)
        d = b1 * b2
        r = pl.reciprocal(d, approx=True)
        r = r * (2.0 - d * r)
        s_map = (a1 * a2) * r                                 # (Hv, W, TB)

        # Reduce rows first (cheap vreg-row adds), then mask the wrapped
        # columns and reduce the sublane axis.  Lane-dense (1, TB) store;
        # padded lanes (zero images) are finite and discarded host-side.
        col_sum = jnp.sum(s_map, axis=0)                      # (W, TB)
        col_idx = lax.broadcasted_iota(jnp.int32, (W, TB), 0)
        col_sum = jnp.where(col_idx < Wv, col_sum, 0.0)
        o_ref[...] = jnp.sum(col_sum, axis=0, keepdims=True)  # (1, TB)

    return kernel


# ------------------------------- module wrapper -----------------------------
class SSIMLossPallas:
    # Per-step VMEM budget used to cap TB: 2 bf16 inputs x 2 pipeline buffers
    # plus ~10 live f32 temporaries.  Kept well under the tightest limits
    # across generations (v5e 16 MiB scoped default raised explicitly below;
    # v7x 64 MiB physical / 32 MiB scoped default).
    _VMEM_BUDGET = 24 << 20
    _VMEM_LIMIT = 48 << 20
    _TB_MAX = 512                     # lane-batch upper bound (multiple of 128)

    def __init__(self, kernel_size=(7, 7), sigma=(1.5, 1.5), k1=0.01, k2=0.03,
                 data_range=1.0, channel=1, size_average=True):
        self.kernel_size = kernel_size
        self.sigma = sigma
        self.win_h = _gaussian_1d(kernel_size[0], sigma[0])   # 1-D row taps
        self.win_w = _gaussian_1d(kernel_size[1], sigma[1])   # 1-D col taps
        self.window = np.outer(self.win_h, self.win_w)        # (7, 7), sums to 1
        self.C1 = (k1 * data_range) ** 2
        self.C2 = (k2 * data_range) ** 2
        self.channel = channel
        # size_average accepted for API parity; skimage-style mean is always used.
        self.size_average = size_average
        self._nonzero_cache = {}

    @staticmethod
    def _vmem_estimate(h, w, tb):
        in_bytes = 2 * 2 * h * w * tb * 2       # 2 inputs x 2 pipeline bufs, bf16
        tmp_bytes = 10 * h * w * tb * 4         # ~10 live f32 temporaries (upper bound)
        out_bytes = 2 * tb * 4
        return in_bytes + tmp_bytes + out_bytes

    def _pick_tb(self, n, h, w):
        tb = min(self._TB_MAX, _round_up(n, 128))
        # v7x megacore: prefer >= 2 grid steps when there is enough work to split.
        if n > 128 and -(-n // tb) < 2:
            tb = _round_up(-(-n // 2), 128)
        # shrink until the per-step VMEM estimate fits the cross-gen budget
        while tb > 128 and self._vmem_estimate(h, w, tb) > self._VMEM_BUDGET:
            tb -= 128
        return tb

    def _mask_indices(self, mask):
        # Boolean mask has a data-dependent output shape, so the index set is
        # computed host-side.  Cached so a static mask costs one nonzero ever.
        m = np.asarray(mask)     # forces a device->host sync if mask lives on-device
        key = (m.shape, m.tobytes())
        hit = self._nonzero_cache.get(key)
        if hit is None:
            hit = np.nonzero(m)
            self._nonzero_cache[key] = hit
        return hit

    def __call__(self, img1, mask, img2, normalizer):
        b, c, h, w = img1.shape
        bidx, cidx = self._mask_indices(mask)
        n = int(bidx.shape[0])
        if n == 0:
            # guard degenerate all-False mask (original would crash inside skimage)
            return jnp.float32(0.0), img1, img2

        tb = self._pick_tb(n, h, w)
        g = -(-n // tb)                    # grid steps
        npad = g * tb

        # Gather masked images and put the image index on the LANE axis; bf16
        # halves HBM traffic and input VMEM (math stays f32 inside the kernel).
        # TODO(synk): for large images (W >= ~256) keep the native (n, h, w)
        # layout (W on lanes, grid over n with a 6-row halo via index_map)
        # instead of this gather+transpose+pad relayout.
        x = jnp.transpose(img1[bidx, cidx], (1, 2, 0)).astype(jnp.bfloat16)
        y = jnp.transpose(img2[bidx, cidx], (1, 2, 0)).astype(jnp.bfloat16)
        if npad > n:
            pad = ((0, 0), (0, 0), (0, npad - n))
            x = jnp.pad(x, pad)
            y = jnp.pad(y, pad)

        kh, kw = self.kernel_size
        hv, wv = h - kh + 1, w - kw + 1

        # TODO(synk): the original forward calls skimage structural_similarity
        # with gaussian_weights=True (11x11 window, truncate=3.5) and, because
        # it passes a 4-D array with channel_axis=1, filters across the
        # flattened batch dim too; here we use the module's own 7x7 Gaussian
        # window with per-image 2-D filtering.
        kern = _build_ssim_kernel(self.win_h, self.win_w, h, w, tb,
                                  float(normalizer.mean), float(normalizer.std),
                                  float(self.C1), float(self.C2))

        partials = pl.pallas_call(
            kern,
            out_shape=jax.ShapeDtypeStruct((g, tb), jnp.float32),
            grid=(g,),
            in_specs=[pl.BlockSpec((h, w, tb), lambda i: (0, 0, i)),
                      pl.BlockSpec((h, w, tb), lambda i: (0, 0, i))],
            out_specs=pl.BlockSpec((1, tb), lambda i: (i, 0)),
            compiler_params=pltpu.CompilerParams(
                dimension_semantics=("parallel",),       # megacore-splittable
                vmem_limit_bytes=self._VMEM_LIMIT),
        )(x, y)

        # epilogue: drop padded lanes, mean over all valid SSIM-map pixels
        per_image = partials.reshape(-1)[:n]
        loss = 1.0 - jnp.sum(per_image) / jnp.float32(n * hv * wv)
        return loss, img1, img2


# ------------------------------ numpy reference -----------------------------
def _reference_loss(x, y, win, mean, std, c1, c2):
    x = np.clip(x * std + mean, 0.0, 1.0).astype(np.float64)
    y = np.clip(y * std + mean, 0.0, 1.0).astype(np.float64)
    N, H, W = x.shape
    KH, KW = win.shape
    Hv, Wv = H - KH + 1, W - KW + 1
    cov_norm = (KH * KW) / (KH * KW - 1.0)
    total = 0.0
    for n in range(N):
        ux = np.zeros((Hv, Wv)); uy = np.zeros((Hv, Wv))
        uxx = np.zeros((Hv, Wv)); uyy = np.zeros((Hv, Wv)); uxy = np.zeros((Hv, Wv))
        for di in range(KH):
            for dj in range(KW):
                cw = win[di, dj]
                xs = x[n, di:di + Hv, dj:dj + Wv]
                ys = y[n, di:di + Hv, dj:dj + Wv]
                ux += cw * xs; uy += cw * ys
                uxx += cw * xs * xs; uyy += cw * ys * ys; uxy += cw * xs * ys
        vx = cov_norm * (uxx - ux * ux)
        vy = cov_norm * (uyy - uy * uy)
        vxy = cov_norm * (uxy - ux * uy)
        s = ((2 * ux * uy + c1) * (2 * vxy + c2)) / ((ux * ux + uy * uy + c1) * (vx + vy + c2))
        total += s.sum()
    return 1.0 - total / (N * Hv * Wv)


# ----------------------------------- main ------------------------------------
if __name__ == "__main__":
    key = jax.random.PRNGKey(0)
    ka, kb = jax.random.split(key)
    b, c, h, w = 2, 4, 16, 16
    img1 = jax.random.normal(ka, (b, c, h, w), jnp.float32)
    img2 = img1 + 0.1 * jax.random.normal(kb, (b, c, h, w), jnp.float32)
    mask = np.array([[True, True, False, True],
                     [True, False, True, True]])
    normalizer = Normalizer(mean=0.45, std=0.22)

    ssim_loss = SSIMLossPallas(channel=1)
    loss, o1, o2 = ssim_loss(img1, mask, img2, normalizer)
    loss = jax.block_until_ready(loss)

    # verify against pure-numpy float64 reference (direct 49-tap correlation);
    # reference consumes the same bf16-quantized pixel values the kernel reads.
    bidx, cidx = np.nonzero(mask)
    img1_q = np.asarray(img1.astype(jnp.bfloat16).astype(jnp.float32))
    img2_q = np.asarray(img2.astype(jnp.bfloat16).astype(jnp.float32))
    xr = img1_q[bidx, cidx]
    yr = img2_q[bidx, cidx]
    ref = _reference_loss(xr, yr, ssim_loss.window,
                          normalizer.mean, normalizer.std,
                          float(ssim_loss.C1), float(ssim_loss.C2))
    # tolerance covers f32 in-kernel math (divide is Newton-refined to ~fp32)
    assert abs(float(loss) - float(ref)) < 2e-3, (float(loss), float(ref))
    print("KERNEL_OK")
</pallas_src>

<mosaic_0001>
module attributes {stable_mosaic.version = 11 : i64} {
  func.func @kernel(%arg0: i32, %arg1: memref<16x16x128xbf16, #tpu.memory_space<vmem>>, %arg2: memref<16x16x128xbf16, #tpu.memory_space<vmem>>, %arg3: memref<1x128xf32, #tpu.memory_space<vmem>>) attributes {dimension_semantics = [#tpu.dimension_semantics<parallel>], iteration_bounds = array<i64: 1>, scalar_prefetch = 0 : i64, scratch_operands = 0 : i64, tpu.core_type = #tpu.core_type<tc>, window_params = [{transform_indices = @transform_0, window_bounds = array<i64: 16, 16, 128>}, {transform_indices = @transform_1, window_bounds = array<i64: 16, 16, 128>}, {transform_indices = @transform_2, window_bounds = array<i64: 1, 128>}]} {
    %c0 = arith.constant 0 : index
    %c0_0 = arith.constant 0 : index
    %c0_1 = arith.constant 0 : index
    %0 = vector.load %arg1[%c0, %c0_0, %c0_1] : memref<16x16x128xbf16, #tpu.memory_space<vmem>>, vector<16x16x128xbf16>
    %1 = arith.extf %0 : vector<16x16x128xbf16> to vector<16x16x128xf32>
    %cst = arith.constant 2.200000e-01 : f32
    %2 = vector.broadcast %cst : f32 to vector<16x16x128xf32>
    %3 = arith.mulf %1, %2 : vector<16x16x128xf32>
    %cst_2 = arith.constant 4.500000e-01 : f32
    %4 = vector.broadcast %cst_2 : f32 to vector<16x16x128xf32>
    %5 = arith.addf %3, %4 : vector<16x16x128xf32>
    %cst_3 = arith.constant 0.000000e+00 : f32
    %cst_4 = arith.constant 1.000000e+00 : f32
    %6 = vector.broadcast %cst_3 : f32 to vector<16x16x128xf32>
    %7 = arith.maximumf %6, %5 : vector<16x16x128xf32>
    %8 = vector.broadcast %cst_4 : f32 to vector<16x16x128xf32>
    %9 = arith.minimumf %8, %7 : vector<16x16x128xf32>
    %c0_5 = arith.constant 0 : index
    %c0_6 = arith.constant 0 : index
    %c0_7 = arith.constant 0 : index
    %10 = vector.load %arg2[%c0_5, %c0_6, %c0_7] : memref<16x16x128xbf16, #tpu.memory_space<vmem>>, vector<16x16x128xbf16>
    %11 = arith.extf %10 : vector<16x16x128xbf16> to vector<16x16x128xf32>
    %cst_8 = arith.constant 2.200000e-01 : f32
    %12 = vector.broadcast %cst_8 : f32 to vector<16x16x128xf32>
    %13 = arith.mulf %11, %12 : vector<16x16x128xf32>
    %cst_9 = arith.constant 4.500000e-01 : f32
    %14 = vector.broadcast %cst_9 : f32 to vector<16x16x128xf32>
    %15 = arith.addf %13, %14 : vector<16x16x128xf32>
    %cst_10 = arith.constant 0.000000e+00 : f32
    %cst_11 = arith.constant 1.000000e+00 : f32
    %16 = vector.broadcast %cst_10 : f32 to vector<16x16x128xf32>
    %17 = arith.maximumf %16, %15 : vector<16x16x128xf32>
    %18 = vector.broadcast %cst_11 : f32 to vector<16x16x128xf32>
    %19 = arith.minimumf %18, %17 : vector<16x16x128xf32>
    %20 = vector.extract_strided_slice %9 {offsets = [0, 0, 0], sizes = [10, 16, 128], strides = [1, 1, 1]} : vector<16x16x128xf32> to vector<10x16x128xf32>
    %cst_12 = arith.constant 0.036632847 : f32
    %21 = vector.broadcast %cst_12 : f32 to vector<10x16x128xf32>
    %22 = arith.mulf %21, %20 : vector<10x16x128xf32>
    %23 = vector.extract_strided_slice %9 {offsets = [1, 0, 0], sizes = [10, 16, 128], strides = [1, 1, 1]} : vector<16x16x128xf32> to vector<10x16x128xf32>
    %cst_13 = arith.constant 0.111280762 : f32
    %24 = vector.broadcast %cst_13 : f32 to vector<10x16x128xf32>
    %25 = arith.mulf %24, %23 : vector<10x16x128xf32>
    %26 = arith.addf %22, %25 : vector<10x16x128xf32>
    %27 = vector.extract_strided_slice %9 {offsets = [2, 0, 0], sizes = [10, 16, 128], strides = [1, 1, 1]} : vector<16x16x128xf32> to vector<10x16x128xf32>
    %cst_14 = arith.constant 0.216745317 : f32
    %28 = vector.broadcast %cst_14 : f32 to vector<10x16x128xf32>
    %29 = arith.mulf %28, %27 : vector<10x16x128xf32>
    %30 = arith.addf %26, %29 : vector<10x16x128xf32>
    %31 = vector.extract_strided_slice %9 {offsets = [3, 0, 0], sizes = [10, 16, 128], strides = [1, 1, 1]} : vector<16x16x128xf32> to vector<10x16x128xf32>
    %cst_15 = arith.constant 0.270682156 : f32
    %32 = vector.broadcast %cst_15 : f32 to vector<10x16x128xf32>
    %33 = arith.mulf %32, %31 : vector<10x16x128xf32>
    %34 = arith.addf %30, %33 : vector<10x16x128xf32>
    %35 = vector.extract_strided_slice %9 {offsets = [4, 0, 0], sizes = [10, 16, 128], strides = [1, 1, 1]} : vector<16x16x128xf32> to vector<10x16x128xf32>
    %cst_16 = arith.constant 0.216745317 : f32
    %36 = vector.broadcast %cst_16 : f32 to vector<10x16x128xf32>
    %37 = arith.mulf %36, %35 : vector<10x16x128xf32>
    %38 = arith.addf %34, %37 : vector<10x16x128xf32>
    %39 = vector.extract_strided_slice %9 {offsets = [5, 0, 0], sizes = [10, 16, 128], strides = [1, 1, 1]} : vector<16x16x128xf32> to vector<10x16x128xf32>
    %cst_17 = arith.constant 0.111280762 : f32
    %40 = vector.broadcast %cst_17 : f32 to vector<10x16x128xf32>
    %41 = arith.mulf %40, %39 : vector<10x16x128xf32>
    %42 = arith.addf %38, %41 : vector<10x16x128xf32>
    %43 = vector.extract_strided_slice %9 {offsets = [6, 0, 0], sizes = [10, 16, 128], strides = [1, 1, 1]} : vector<16x16x128xf32> to vector<10x16x128xf32>
    %cst_18 = arith.constant 0.036632847 : f32
    %44 = vector.broadcast %cst_18 : f32 to vector<10x16x128xf32>
    %45 = arith.mulf %44, %43 : vector<10x16x128xf32>
    %46 = arith.addf %42, %45 : vector<10x16x128xf32>
    %cst_19 = arith.constant 0.036632847 : f32
    %47 = vector.broadcast %cst_19 : f32 to vector<10x16x128xf32>
    %48 = arith.mulf %47, %46 : vector<10x16x128xf32>
    %c15_i32 = arith.constant 15 : i32
    %49 = tpu.dynamic_rotate %46 by %c15_i32 dim 1 : vector<10x16x128xf32>, i32 -> vector<10x16x128xf32>
    %cst_20 = arith.constant 0.111280762 : f32
    %50 = vector.broadcast %cst_20 : f32 to vector<10x16x128xf32>
    %51 = arith.mulf %50, %49 : vector<10x16x128xf32>
    %52 = arith.addf %48, %51 : vector<10x16x128xf32>
    %c14_i32 = arith.constant 14 : i32
    %53 = tpu.dynamic_rotate %46 by %c14_i32 dim 1 : vector<10x16x128xf32>, i32 -> vector<10x16x128xf32>
    %cst_21 = arith.constant 0.216745317 : f32
    %54 = vector.broadcast %cst_21 : f32 to vector<10x16x128xf32>
    %55 = arith.mulf %54, %53 : vector<10x16x128xf32>
    %56 = arith.addf %52, %55 : vector<10x16x128xf32>
    %c13_i32 = arith.constant 13 : i32
    %57 = tpu.dynamic_rotate %46 by %c13_i32 dim 1 : vector<10x16x128xf32>, i32 -> vector<10x16x128xf32>
    %cst_22 = arith.constant 0.270682156 : f32
    %58 = vector.broadcast %cst_22 : f32 to vector<10x16x128xf32>
    %59 = arith.mulf %58, %57 : vector<10x16x128xf32>
    %60 = arith.addf %56, %59 : vector<10x16x128xf32>
    %c12_i32 = arith.constant 12 : i32
    %61 = tpu.dynamic_rotate %46 by %c12_i32 dim 1 : vector<10x16x128xf32>, i32 -> vector<10x16x128xf32>
    %cst_23 = arith.constant 0.216745317 : f32
    %62 = vector.broadcast %cst_23 : f32 to vector<10x16x128xf32>
    %63 = arith.mulf %62, %61 : vector<10x16x128xf32>
    %64 = arith.addf %60, %63 : vector<10x16x128xf32>
    %c11_i32 = arith.constant 11 : i32
    %65 = tpu.dynamic_rotate %46 by %c11_i32 dim 1 : vector<10x16x128xf32>, i32 -> vector<10x16x128xf32>
    %cst_24 = arith.constant 0.111280762 : f32
    %66 = vector.broadcast %cst_24 : f32 to vector<10x16x128xf32>
    %67 = arith.mulf %66, %65 : vector<10x16x128xf32>
    %68 = arith.addf %64, %67 : vector<10x16x128xf32>
    %c10_i32 = arith.constant 10 : i32
    %69 = tpu.dynamic_rotate %46 by %c10_i32 dim 1 : vector<10x16x128xf32>, i32 -> vector<10x16x128xf32>
    %cst_25 = arith.constant 0.036632847 : f32
    %70 = vector.broadcast %cst_25 : f32 to vector<10x16x128xf32>
    %71 = arith.mulf %70, %69 : vector<10x16x128xf32>
    %72 = arith.addf %68, %71 : vector<10x16x128xf32>
    %73 = vector.extract_strided_slice %19 {offsets = [0, 0, 0], sizes = [10, 16, 128], strides = [1, 1, 1]} : vector<16x16x128xf32> to vector<10x16x128xf32>
    %cst_26 = arith.constant 0.036632847 : f32
    %74 = vector.broadcast %cst_26 : f32 to vector<10x16x128xf32>
    %75 = arith.mulf %74, %73 : vector<10x16x128xf32>
    %76 = vector.extract_strided_slice %19 {offsets = [1, 0, 0], sizes = [10, 16, 128], strides = [1, 1, 1]} : vector<16x16x128xf32> to vector<10x16x128xf32>
    %cst_27 = arith.constant 0.111280762 : f32
    %77 = vector.broadcast %cst_27 : f32 to vector<10x16x128xf32>
    %78 = arith.mulf %77, %76 : vector<10x16x128xf32>
    %79 = arith.addf %75, %78 : vector<10x16x128xf32>
    %80 = vector.extract_strided_slice %19 {offsets = [2, 0, 0], sizes = [10, 16, 128], strides = [1, 1, 1]} : vector<16x16x128xf32> to vector<10x16x128xf32>
    %cst_28 = arith.constant 0.216745317 : f32
    %81 = vector.broadcast %cst_28 : f32 to vector<10x16x128xf32>
    %82 = arith.mulf %81, %80 : vector<10x16x128xf32>
    %83 = arith.addf %79, %82 : vector<10x16x128xf32>
    %84 = vector.extract_strided_slice %19 {offsets = [3, 0, 0], sizes = [10, 16, 128], strides = [1, 1, 1]} : vector<16x16x128xf32> to vector<10x16x128xf32>
    %cst_29 = arith.constant 0.270682156 : f32
    %85 = vector.broadcast %cst_29 : f32 to vector<10x16x128xf32>
    %86 = arith.mulf %85, %84 : vector<10x16x128xf32>
    %87 = arith.addf %83, %86 : vector<10x16x128xf32>
    %88 = vector.extract_strided_slice %19 {offsets = [4, 0, 0], sizes = [10, 16, 128], strides = [1, 1, 1]} : vector<16x16x128xf32> to vector<10x16x128xf32>
    %cst_30 = arith.constant 0.216745317 : f32
    %89 = vector.broadcast %cst_30 : f32 to vector<10x16x128xf32>
    %90 = arith.mulf %89, %88 : vector<10x16x128xf32>
    %91 = arith.addf %87, %90 : vector<10x16x128xf32>
    %92 = vector.extract_strided_slice %19 {offsets = [5, 0, 0], sizes = [10, 16, 128], strides = [1, 1, 1]} : vector<16x16x128xf32> to vector<10x16x128xf32>
    %cst_31 = arith.constant 0.111280762 : f32
    %93 = vector.broadcast %cst_31 : f32 to vector<10x16x128xf32>
    %94 = arith.mulf %93, %92 : vector<10x16x128xf32>
    %95 = arith.addf %91, %94 : vector<10x16x128xf32>
    %96 = vector.extract_strided_slice %19 {offsets = [6, 0, 0], sizes = [10, 16, 128], strides = [1, 1, 1]} : vector<16x16x128xf32> to vector<10x16x128xf32>
    %cst_32 = arith.constant 0.036632847 : f32
    %97 = vector.broadcast %cst_32 : f32 to vector<10x16x128xf32>
    %98 = arith.mulf %97, %96 : vector<10x16x128xf32>
    %99 = arith.addf %95, %98 : vector<10x16x128xf32>
    %cst_33 = arith.constant 0.036632847 : f32
    %100 = vector.broadcast %cst_33 : f32 to vector<10x16x128xf32>
    %101 = arith.mulf %100, %99 : vector<10x16x128xf32>
    %c15_i32_34 = arith.constant 15 : i32
    %102 = tpu.dynamic_rotate %99 by %c15_i32_34 dim 1 : vector<10x16x128xf32>, i32 -> vector<10x16x128xf32>
    %cst_35 = arith.constant 0.111280762 : f32
    %103 = vector.broadcast %cst_35 : f32 to vector<10x16x128xf32>
    %104 = arith.mulf %103, %102 : vector<10x16x128xf32>
    %105 = arith.addf %101, %104 : vector<10x16x128xf32>
    %c14_i32_36 = arith.constant 14 : i32
    %106 = tpu.dynamic_rotate %99 by %c14_i32_36 dim 1 : vector<10x16x128xf32>, i32 -> vector<10x16x128xf32>
    %cst_37 = arith.constant 0.216745317 : f32
    %107 = vector.broadcast %cst_37 : f32 to vector<10x16x128xf32>
    %108 = arith.mulf %107, %106 : vector<10x16x128xf32>
    %109 = arith.addf %105, %108 : vector<10x16x128xf32>
    %c13_i32_38 = arith.constant 13 : i32
    %110 = tpu.dynamic_rotate %99 by %c13_i32_38 dim 1 : vector<10x16x128xf32>, i32 -> vector<10x16x128xf32>
    %cst_39 = arith.constant 0.270682156 : f32
    %111 = vector.broadcast %cst_39 : f32 to vector<10x16x128xf32>
    %112 = arith.mulf %111, %110 : vector<10x16x128xf32>
    %113 = arith.addf %109, %112 : vector<10x16x128xf32>
    %c12_i32_40 = arith.constant 12 : i32
    %114 = tpu.dynamic_rotate %99 by %c12_i32_40 dim 1 : vector<10x16x128xf32>, i32 -> vector<10x16x128xf32>
    %cst_41 = arith.constant 0.216745317 : f32
    %115 = vector.broadcast %cst_41 : f32 to vector<10x16x128xf32>
    %116 = arith.mulf %115, %114 : vector<10x16x128xf32>
    %117 = arith.addf %113, %116 : vector<10x16x128xf32>
    %c11_i32_42 = arith.constant 11 : i32
    %118 = tpu.dynamic_rotate %99 by %c11_i32_42 dim 1 : vector<10x16x128xf32>, i32 -> vector<10x16x128xf32>
    %cst_43 = arith.constant 0.111280762 : f32
    %119 = vector.broadcast %cst_43 : f32 to vector<10x16x128xf32>
    %120 = arith.mulf %119, %118 : vector<10x16x128xf32>
    %121 = arith.addf %117, %120 : vector<10x16x128xf32>
    %c10_i32_44 = arith.constant 10 : i32
    %122 = tpu.dynamic_rotate %99 by %c10_i32_44 dim 1 : vector<10x16x128xf32>, i32 -> vector<10x16x128xf32>
    %cst_45 = arith.constant 0.036632847 : f32
    %123 = vector.broadcast %cst_45 : f32 to vector<10x16x128xf32>
    %124 = arith.mulf %123, %122 : vector<10x16x128xf32>
    %125 = arith.addf %121, %124 : vector<10x16x128xf32>
    %126 = arith.mulf %9, %19 : vector<16x16x128xf32>
    %127 = vector.extract_strided_slice %126 {offsets = [0, 0, 0], sizes = [10, 16, 128], strides = [1, 1, 1]} : vector<16x16x128xf32> to vector<10x16x128xf32>
    %cst_46 = arith.constant 0.036632847 : f32
    %128 = vector.broadcast %cst_46 : f32 to vector<10x16x128xf32>
    %129 = arith.mulf %128, %127 : vector<10x16x128xf32>
    %130 = vector.extract_strided_slice %126 {offsets = [1, 0, 0], sizes = [10, 16, 128], strides = [1, 1, 1]} : vector<16x16x128xf32> to vector<10x16x128xf32>
    %cst_47 = arith.constant 0.111280762 : f32
    %131 = vector.broadcast %cst_47 : f32 to vector<10x16x128xf32>
    %132 = arith.mulf %131, %130 : vector<10x16x128xf32>
    %133 = arith.addf %129, %132 : vector<10x16x128xf32>
    %134 = vector.extract_strided_slice %126 {offsets = [2, 0, 0], sizes = [10, 16, 128], strides = [1, 1, 1]} : vector<16x16x128xf32> to vector<10x16x128xf32>
    %cst_48 = arith.constant 0.216745317 : f32
    %135 = vector.broadcast %cst_48 : f32 to vector<10x16x128xf32>
    %136 = arith.mulf %135, %134 : vector<10x16x128xf32>
    %137 = arith.addf %133, %136 : vector<10x16x128xf32>
    %138 = vector.extract_strided_slice %126 {offsets = [3, 0, 0], sizes = [10, 16, 128], strides = [1, 1, 1]} : vector<16x16x128xf32> to vector<10x16x128xf32>
    %cst_49 = arith.constant 0.270682156 : f32
    %139 = vector.broadcast %cst_49 : f32 to vector<10x16x128xf32>
    %140 = arith.mulf %139, %138 : vector<10x16x128xf32>
    %141 = arith.addf %137, %140 : vector<10x16x128xf32>
    %142 = vector.extract_strided_slice %126 {offsets = [4, 0, 0], sizes = [10, 16, 128], strides = [1, 1, 1]} : vector<16x16x128xf32> to vector<10x16x128xf32>
    %cst_50 = arith.constant 0.216745317 : f32
    %143 = vector.broadcast %cst_50 : f32 to vector<10x16x128xf32>
    %144 = arith.mulf %143, %142 : vector<10x16x128xf32>
    %145 = arith.addf %141, %144 : vector<10x16x128xf32>
    %146 = vector.extract_strided_slice %126 {offsets = [5, 0, 0], sizes = [10, 16, 128], strides = [1, 1, 1]} : vector<16x16x128xf32> to vector<10x16x128xf32>
    %cst_51 = arith.constant 0.111280762 : f32
    %147 = vector.broadcast %cst_51 : f32 to vector<10x16x128xf32>
    %148 = arith.mulf %147, %146 : vector<10x16x128xf32>
    %149 = arith.addf %145, %148 : vector<10x16x128xf32>
    %150 = vector.extract_strided_slice %126 {offsets = [6, 0, 0], sizes = [10, 16, 128], strides = [1, 1, 1]} : vector<16x16x128xf32> to vector<10x16x128xf32>
    %cst_52 = arith.constant 0.036632847 : f32
    %151 = vector.broadcast %cst_52 : f32 to vector<10x16x128xf32>
    %152 = arith.mulf %151, %150 : vector<10x16x128xf32>
    %153 = arith.addf %149, %152 : vector<10x16x128xf32>
    %cst_53 = arith.constant 0.036632847 : f32
    %154 = vector.broadcast %cst_53 : f32 to vector<10x16x128xf32>
    %155 = arith.mulf %154, %153 : vector<10x16x128xf32>
    %c15_i32_54 = arith.constant 15 : i32
    %156 = tpu.dynamic_rotate %153 by %c15_i32_54 dim 1 : vector<10x16x128xf32>, i32 -> vector<10x16x128xf32>
    %cst_55 = arith.constant 0.111280762 : f32
    %157 = vector.broadcast %cst_55 : f32 to vector<10x16x128xf32>
    %158 = arith.mulf %157, %156 : vector<10x16x128xf32>
    %159 = arith.addf %155, %158 : vector<10x16x128xf32>
    %c14_i32_56 = arith.constant 14 : i32
    %160 = tpu.dynamic_rotate %153 by %c14_i32_56 dim 1 : vector<10x16x128xf32>, i32 -> vector<10x16x128xf32>
    %cst_57 = arith.constant 0.216745317 : f32
    %161 = vector.broadcast %cst_57 : f32 to vector<10x16x128xf32>
    %162 = arith.mulf %161, %160 : vector<10x16x128xf32>
    %163 = arith.addf %159, %162 : vector<10x16x128xf32>
    %c13_i32_58 = arith.constant 13 : i32
    %164 = tpu.dynamic_rotate %153 by %c13_i32_58 dim 1 : vector<10x16x128xf32>, i32 -> vector<10x16x128xf32>
    %cst_59 = arith.constant 0.270682156 : f32
    %165 = vector.broadcast %cst_59 : f32 to vector<10x16x128xf32>
    %166 = arith.mulf %165, %164 : vector<10x16x128xf32>
    %167 = arith.addf %163, %166 : vector<10x16x128xf32>
    %c12_i32_60 = arith.constant 12 : i32
    %168 = tpu.dynamic_rotate %153 by %c12_i32_60 dim 1 : vector<10x16x128xf32>, i32 -> vector<10x16x128xf32>
    %cst_61 = arith.constant 0.216745317 : f32
    %169 = vector.broadcast %cst_61 : f32 to vector<10x16x128xf32>
    %170 = arith.mulf %169, %168 : vector<10x16x128xf32>
    %171 = arith.addf %167, %170 : vector<10x16x128xf32>
    %c11_i32_62 = arith.constant 11 : i32
    %172 = tpu.dynamic_rotate %153 by %c11_i32_62 dim 1 : vector<10x16x128xf32>, i32 -> vector<10x16x128xf32>
    %cst_63 = arith.constant 0.111280762 : f32
    %173 = vector.broadcast %cst_63 : f32 to vector<10x16x128xf32>
    %174 = arith.mulf %173, %172 : vector<10x16x128xf32>
    %175 = arith.addf %171, %174 : vector<10x16x128xf32>
    %c10_i32_64 = arith.constant 10 : i32
    %176 = tpu.dynamic_rotate %153 by %c10_i32_64 dim 1 : vector<10x16x128xf32>, i32 -> vector<10x16x128xf32>
    %cst_65 = arith.constant 0.036632847 : f32
    %177 = vector.broadcast %cst_65 : f32 to vector<10x16x128xf32>
    %178 = arith.mulf %177, %176 : vector<10x16x128xf32>
    %179 = arith.addf %175, %178 : vector<10x16x128xf32>
    %180 = arith.mulf %9, %9 : vector<16x16x128xf32>
    %181 = vector.extract_strided_slice %180 {offsets = [0, 0, 0], sizes = [10, 16, 128], strides = [1, 1, 1]} : vector<16x16x128xf32> to vector<10x16x128xf32>
    %cst_66 = arith.constant 0.036632847 : f32
    %182 = vector.broadcast %cst_66 : f32 to vector<10x16x128xf32>
    %183 = arith.mulf %182, %181 : vector<10x16x128xf32>
    %184 = vector.extract_strided_slice %180 {offsets = [1, 0, 0], sizes = [10, 16, 128], strides = [1, 1, 1]} : vector<16x16x128xf32> to vector<10x16x128xf32>
    %cst_67 = arith.constant 0.111280762 : f32
    %185 = vector.broadcast %cst_67 : f32 to vector<10x16x128xf32>
    %186 = arith.mulf %185, %184 : vector<10x16x128xf32>
    %187 = arith.addf %183, %186 : vector<10x16x128xf32>
    %188 = vector.extract_strided_slice %180 {offsets = [2, 0, 0], sizes = [10, 16, 128], strides = [1, 1, 1]} : vector<16x16x128xf32> to vector<10x16x128xf32>
    %cst_68 = arith.constant 0.216745317 : f32
    %189 = vector.broadcast %cst_68 : f32 to vector<10x16x128xf32>
    %190 = arith.mulf %189, %188 : vector<10x16x128xf32>
    %191 = arith.addf %187, %190 : vector<10x16x128xf32>
    %192 = vector.extract_strided_slice %180 {offsets = [3, 0, 0], sizes = [10, 16, 128], strides = [1, 1, 1]} : vector<16x16x128xf32> to vector<10x16x128xf32>
    %cst_69 = arith.constant 0.270682156 : f32
    %193 = vector.broadcast %cst_69 : f32 to vector<10x16x128xf32>
    %194 = arith.mulf %193, %192 : vector<10x16x128xf32>
    %195 = arith.addf %191, %194 : vector<10x16x128xf32>
    %196 = vector.extract_strided_slice %180 {offsets = [4, 0, 0], sizes = [10, 16, 128], strides = [1, 1, 1]} : vector<16x16x128xf32> to vector<10x16x128xf32>
    %cst_70 = arith.constant 0.216745317 : f32
    %197 = vector.broadcast %cst_70 : f32 to vector<10x16x128xf32>
    %198 = arith.mulf %197, %196 : vector<10x16x128xf32>
    %199 = arith.addf %195, %198 : vector<10x16x128xf32>
    %200 = vector.extract_strided_slice %180 {offsets = [5, 0, 0], sizes = [10, 16, 128], strides = [1, 1, 1]} : vector<16x16x128xf32> to vector<10x16x128xf32>
    %cst_71 = arith.constant 0.111280762 : f32
    %201 = vector.broadcast %cst_71 : f32 to vector<10x16x128xf32>
    %202 = arith.mulf %201, %200 : vector<10x16x128xf32>
    %203 = arith.addf %199, %202 : vector<10x16x128xf32>
    %204 = vector.extract_strided_slice %180 {offsets = [6, 0, 0], sizes = [10, 16, 128], strides = [1, 1, 1]} : vector<16x16x128xf32> to vector<10x16x128xf32>
    %cst_72 = arith.constant 0.036632847 : f32
    %205 = vector.broadcast %cst_72 : f32 to vector<10x16x128xf32>
    %206 = arith.mulf %205, %204 : vector<10x16x128xf32>
    %207 = arith.addf %203, %206 : vector<10x16x128xf32>
    %cst_73 = arith.constant 0.036632847 : f32
    %208 = vector.broadcast %cst_73 : f32 to vector<10x16x128xf32>
    %209 = arith.mulf %208, %207 : vector<10x16x128xf32>
    %c15_i32_74 = arith.constant 15 : i32
    %210 = tpu.dynamic_rotate %207 by %c15_i32_74 dim 1 : vector<10x16x128xf32>, i32 -> vector<10x16x128xf32>
    %cst_75 = arith.constant 0.111280762 : f32
    %211 = vector.broadcast %cst_75 : f32 to vector<10x16x128xf32>
    %212 = arith.mulf %211, %210 : vector<10x16x128xf32>
    %213 = arith.addf %209, %212 : vector<10x16x128xf32>
    %c14_i32_76 = arith.constant 14 : i32
    %214 = tpu.dynamic_rotate %207 by %c14_i32_76 dim 1 : vector<10x16x128xf32>, i32 -> vector<10x16x128xf32>
    %cst_77 = arith.constant 0.216745317 : f32
    %215 = vector.broadcast %cst_77 : f32 to vector<10x16x128xf32>
    %216 = arith.mulf %215, %214 : vector<10x16x128xf32>
    %217 = arith.addf %213, %216 : vector<10x16x128xf32>
    %c13_i32_78 = arith.constant 13 : i32
    %218 = tpu.dynamic_rotate %207 by %c13_i32_78 dim 1 : vector<10x16x128xf32>, i32 -> vector<10x16x128xf32>
    %cst_79 = arith.constant 0.270682156 : f32
    %219 = vector.broadcast %cst_79 : f32 to vector<10x16x128xf32>
    %220 = arith.mulf %219, %218 : vector<10x16x128xf32>
    %221 = arith.addf %217, %220 : vector<10x16x128xf32>
    %c12_i32_80 = arith.constant 12 : i32
    %222 = tpu.dynamic_rotate %207 by %c12_i32_80 dim 1 : vector<10x16x128xf32>, i32 -> vector<10x16x128xf32>
    %cst_81 = arith.constant 0.216745317 : f32
    %223 = vector.broadcast %cst_81 : f32 to vector<10x16x128xf32>
    %224 = arith.mulf %223, %222 : vector<10x16x128xf32>
    %225 = arith.addf %221, %224 : vector<10x16x128xf32>
    %c11_i32_82 = arith.constant 11 : i32
    %226 = tpu.dynamic_rotate %207 by %c11_i32_82 dim 1 : vector<10x16x128xf32>, i32 -> vector<10x16x128xf32>
    %cst_83 = arith.constant 0.111280762 : f32
    %227 = vector.broadcast %cst_83 : f32 to vector<10x16x128xf32>
    %228 = arith.mulf %227, %226 : vector<10x16x128xf32>
    %229 = arith.addf %225, %228 : vector<10x16x128xf32>
    %c10_i32_84 = arith.constant 10 : i32
    %230 = tpu.dynamic_rotate %207 by %c10_i32_84 dim 1 : vector<10x16x128xf32>, i32 -> vector<10x16x128xf32>
    %cst_85 = arith.constant 0.036632847 : f32
    %231 = vector.broadcast %cst_85 : f32 to vector<10x16x128xf32>
    %232 = arith.mulf %231, %230 : vector<10x16x128xf32>
    %233 = arith.addf %229, %232 : vector<10x16x128xf32>
    %234 = arith.mulf %19, %19 : vector<16x16x128xf32>
    %235 = vector.extract_strided_slice %234 {offsets = [0, 0, 0], sizes = [10, 16, 128], strides = [1, 1, 1]} : vector<16x16x128xf32> to vector<10x16x128xf32>
    %cst_86 = arith.constant 0.036632847 : f32
    %236 = vector.broadcast %cst_86 : f32 to vector<10x16x128xf32>
    %237 = arith.mulf %236, %235 : vector<10x16x128xf32>
    %238 = vector.extract_strided_slice %234 {offsets = [1, 0, 0], sizes = [10, 16, 128], strides = [1, 1, 1]} : vector<16x16x128xf32> to vector<10x16x128xf32>
    %cst_87 = arith.constant 0.111280762 : f32
    %239 = vector.broadcast %cst_87 : f32 to vector<10x16x128xf32>
    %240 = arith.mulf %239, %238 : vector<10x16x128xf32>
    %241 = arith.addf %237, %240 : vector<10x16x128xf32>
    %242 = vector.extract_strided_slice %234 {offsets = [2, 0, 0], sizes = [10, 16, 128], strides = [1, 1, 1]} : vector<16x16x128xf32> to vector<10x16x128xf32>
    %cst_88 = arith.constant 0.216745317 : f32
    %243 = vector.broadcast %cst_88 : f32 to vector<10x16x128xf32>
    %244 = arith.mulf %243, %242 : vector<10x16x128xf32>
    %245 = arith.addf %241, %244 : vector<10x16x128xf32>
    %246 = vector.extract_strided_slice %234 {offsets = [3, 0, 0], sizes = [10, 16, 128], strides = [1, 1, 1]} : vector<16x16x128xf32> to vector<10x16x128xf32>
    %cst_89 = arith.constant 0.270682156 : f32
    %247 = vector.broadcast %cst_89 : f32 to vector<10x16x128xf32>
    %248 = arith.mulf %247, %246 : vector<10x16x128xf32>
    %249 = arith.addf %245, %248 : vector<10x16x128xf32>
    %250 = vector.extract_strided_slice %234 {offsets = [4, 0, 0], sizes = [10, 16, 128], strides = [1, 1, 1]} : vector<16x16x128xf32> to vector<10x16x128xf32>
    %cst_90 = arith.constant 0.216745317 : f32
    %251 = vector.broadcast %cst_90 : f32 to vector<10x16x128xf32>
    %252 = arith.mulf %251, %250 : vector<10x16x128xf32>
    %253 = arith.addf %249, %252 : vector<10x16x128xf32>
    %254 = vector.extract_strided_slice %234 {offsets = [5, 0, 0], sizes = [10, 16, 128], strides = [1, 1, 1]} : vector<16x16x128xf32> to vector<10x16x128xf32>
    %cst_91 = arith.constant 0.111280762 : f32
    %255 = vector.broadcast %cst_91 : f32 to vector<10x16x128xf32>
    %256 = arith.mulf %255, %254 : vector<10x16x128xf32>
    %257 = arith.addf %253, %256 : vector<10x16x128xf32>
    %258 = vector.extract_strided_slice %234 {offsets = [6, 0, 0], sizes = [10, 16, 128], strides = [1, 1, 1]} : vector<16x16x128xf32> to vector<10x16x128xf32>
    %cst_92 = arith.constant 0.036632847 : f32
    %259 = vector.broadcast %cst_92 : f32 to vector<10x16x128xf32>
    %260 = arith.mulf %259, %258 : vector<10x16x128xf32>
    %261 = arith.addf %257, %260 : vector<10x16x128xf32>
    %cst_93 = arith.constant 0.036632847 : f32
    %262 = vector.broadcast %cst_93 : f32 to vector<10x16x128xf32>
    %263 = arith.mulf %262, %261 : vector<10x16x128xf32>
    %c15_i32_94 = arith.constant 15 : i32
    %264 = tpu.dynamic_rotate %261 by %c15_i32_94 dim 1 : vector<10x16x128xf32>, i32 -> vector<10x16x128xf32>
    %cst_95 = arith.constant 0.111280762 : f32
    %265 = vector.broadcast %cst_95 : f32 to vector<10x16x128xf32>
    %266 = arith.mulf %265, %264 : vector<10x16x128xf32>
    %267 = arith.addf %263, %266 : vector<10x16x128xf32>
    %c14_i32_96 = arith.constant 14 : i32
    %268 = tpu.dynamic_rotate %261 by %c14_i32_96 dim 1 : vector<10x16x128xf32>, i32 -> vector<10x16x128xf32>
    %cst_97 = arith.constant 0.216745317 : f32
    %269 = vector.broadcast %cst_97 : f32 to vector<10x16x128xf32>
    %270 = arith.mulf %269, %268 : vector<10x16x128xf32>
    %271 = arith.addf %267, %270 : vector<10x16x128xf32>
    %c13_i32_98 = arith.constant 13 : i32
    %272 = tpu.dynamic_rotate %261 by %c13_i32_98 dim 1 : vector<10x16x128xf32>, i32 -> vector<10x16x128xf32>
    %cst_99 = arith.constant 0.270682156 : f32
    %273 = vector.broadcast %cst_99 : f32 to vector<10x16x128xf32>
    %274 = arith.mulf %273, %272 : vector<10x16x128xf32>
    %275 = arith.addf %271, %274 : vector<10x16x128xf32>
    %c12_i32_100 = arith.constant 12 : i32
    %276 = tpu.dynamic_rotate %261 by %c12_i32_100 dim 1 : vector<10x16x128xf32>, i32 -> vector<10x16x128xf32>
    %cst_101 = arith.constant 0.216745317 : f32
    %277 = vector.broadcast %cst_101 : f32 to vector<10x16x128xf32>
    %278 = arith.mulf %277, %276 : vector<10x16x128xf32>
    %279 = arith.addf %275, %278 : vector<10x16x128xf32>
    %c11_i32_102 = arith.constant 11 : i32
    %280 = tpu.dynamic_rotate %261 by %c11_i32_102 dim 1 : vector<10x16x128xf32>, i32 -> vector<10x16x128xf32>
    %cst_103 = arith.constant 0.111280762 : f32
    %281 = vector.broadcast %cst_103 : f32 to vector<10x16x128xf32>
    %282 = arith.mulf %281, %280 : vector<10x16x128xf32>
    %283 = arith.addf %279, %282 : vector<10x16x128xf32>
    %c10_i32_104 = arith.constant 10 : i32
    %284 = tpu.dynamic_rotate %261 by %c10_i32_104 dim 1 : vector<10x16x128xf32>, i32 -> vector<10x16x128xf32>
    %cst_105 = arith.constant 0.036632847 : f32
    %285 = vector.broadcast %cst_105 : f32 to vector<10x16x128xf32>
    %286 = arith.mulf %285, %284 : vector<10x16x128xf32>
    %287 = arith.addf %283, %286 : vector<10x16x128xf32>
    %288 = arith.mulf %72, %72 : vector<10x16x128xf32>
    %289 = arith.subf %233, %288 : vector<10x16x128xf32>
    %cst_106 = arith.constant 1.02083337 : f32
    %290 = vector.broadcast %cst_106 : f32 to vector<10x16x128xf32>
    %291 = arith.mulf %290, %289 : vector<10x16x128xf32>
    %292 = arith.mulf %125, %125 : vector<10x16x128xf32>
    %293 = arith.subf %287, %292 : vector<10x16x128xf32>
    %cst_107 = arith.constant 1.02083337 : f32
    %294 = vector.broadcast %cst_107 : f32 to vector<10x16x128xf32>
    %295 = arith.mulf %294, %293 : vector<10x16x128xf32>
    %296 = arith.mulf %72, %125 : vector<10x16x128xf32>
    %297 = arith.subf %179, %296 : vector<10x16x128xf32>
    %cst_108 = arith.constant 1.02083337 : f32
    %298 = vector.broadcast %cst_108 : f32 to vector<10x16x128xf32>
    %299 = arith.mulf %298, %297 : vector<10x16x128xf32>
    %cst_109 = arith.constant 2.000000e+00 : f32
    %300 = vector.broadcast %cst_109 : f32 to vector<10x16x128xf32>
    %301 = arith.mulf %300, %72 : vector<10x16x128xf32>
    %302 = arith.mulf %301, %125 : vector<10x16x128xf32>
    %cst_110 = arith.constant 9.99999974E-5 : f32
    %303 = vector.broadcast %cst_110 : f32 to vector<10x16x128xf32>
    %304 = arith.addf %302, %303 : vector<10x16x128xf32>
    %cst_111 = arith.constant 2.000000e+00 : f32
    %305 = vector.broadcast %cst_111 : f32 to vector<10x16x128xf32>
    %306 = arith.mulf %305, %299 : vector<10x16x128xf32>
    %cst_112 = arith.constant 8.99999984E-4 : f32
    %307 = vector.broadcast %cst_112 : f32 to vector<10x16x128xf32>
    %308 = arith.addf %306, %307 : vector<10x16x128xf32>
    %309 = arith.mulf %72, %72 : vector<10x16x128xf32>
    %310 = arith.mulf %125, %125 : vector<10x16x128xf32>
    %311 = arith.addf %309, %310 : vector<10x16x128xf32>
    %cst_113 = arith.constant 9.99999974E-5 : f32
    %312 = vector.broadcast %cst_113 : f32 to vector<10x16x128xf32>
    %313 = arith.addf %311, %312 : vector<10x16x128xf32>
    %314 = arith.addf %291, %295 : vector<10x16x128xf32>
    %cst_114 = arith.constant 8.99999984E-4 : f32
    %315 = vector.broadcast %cst_114 : f32 to vector<10x16x128xf32>
    %316 = arith.addf %314, %315 : vector<10x16x128xf32>
    %317 = arith.mulf %313, %316 : vector<10x16x128xf32>
    %318 = tpu.reciprocal %317 {approx = true} : vector<10x16x128xf32> -> vector<10x16x128xf32>
    %319 = arith.mulf %317, %318 : vector<10x16x128xf32>
    %cst_115 = arith.constant 2.000000e+00 : f32
    %320 = vector.broadcast %cst_115 : f32 to vector<10x16x128xf32>
    %321 = arith.subf %320, %319 : vector<10x16x128xf32>
    %322 = arith.mulf %318, %321 : vector<10x16x128xf32>
    %323 = arith.mulf %304, %308 : vector<10x16x128xf32>
    %324 = arith.mulf %323, %322 : vector<10x16x128xf32>
    %cst_116 = arith.constant dense<0.000000e+00> : vector<16x128xf32>
    %325 = vector.multi_reduction <add>, %324, %cst_116 [0] : vector<10x16x128xf32> to vector<16x128xf32>
    %326 = tpu.iota {dimensions = array<i32: 0>} : vector<16x128xi32>
    %c10_i32_117 = arith.constant 10 : i32
    %327 = vector.broadcast %c10_i32_117 : i32 to vector<16x128xi32>
    %328 = arith.cmpi slt, %326, %327 : vector<16x128xi32>
    %cst_118 = arith.constant 0.000000e+00 : f32
    %329 = vector.broadcast %cst_118 : f32 to vector<16x128xf32>
    %330 = arith.select %328, %325, %329 : vector<16x128xi1>, vector<16x128xf32>
    %cst_119 = arith.constant dense<0.000000e+00> : vector<128xf32>
    %331 = vector.multi_reduction <add>, %330, %cst_119 [0] : vector<16x128xf32> to vector<128xf32>
    %332 = vector.shape_cast %331 : vector<128xf32> to vector<1x128xf32>
    %c0_120 = arith.constant 0 : index
    %c0_121 = arith.constant 0 : index
    %333 = vector.load %arg3[%c0_120, %c0_121] : memref<1x128xf32, #tpu.memory_space<vmem>>, vector<1x128xf32>
    tpu.vector_store %arg3[%c0_120, %c0_121], %332 {strides = array<i32>} : memref<1x128xf32, #tpu.memory_space<vmem>>, vector<1x128xf32>,
    return
  }
  func.func @transform_0(%arg0: i32) -> (i32, i32, i32) {
    %c0_i32 = arith.constant 0 : i32
    %c0_i32_0 = arith.constant 0 : i32
    %c0_i32_1 = arith.constant 0 : i32
    return %c0_i32, %c0_i32_0, %arg0 : i32, i32, i32
  }
  func.func @transform_1(%arg0: i32) -> (i32, i32, i32) {
    %c0_i32 = arith.constant 0 : i32
    %c0_i32_0 = arith.constant 0 : i32
    %c0_i32_1 = arith.constant 0 : i32
    return %c0_i32, %c0_i32_0, %arg0 : i32, i32, i32
  }
  func.func @transform_2(%arg0: i32) -> (i32, i32) {
    %c0_i32 = arith.constant 0 : i32
    %c0_i32_0 = arith.constant 0 : i32
    return %arg0, %c0_i32 : i32, i32
  }
}

</mosaic_0001>

<bundles_post_ra>
// kernel: tpu_custom_call.1
= control target key start
LH: loop header
LB: loop body
LE: loop exit
PB: predicated region body
PF: predicated region fallthrough
CT: control target
= control target key end

     0   :  { %7 = vsyncpa [#allocation3], 0  ;;  %s12025_s0 = inlined_call_operand.hbm [shape: bf16[16,16,128], index: 0, kind: input, shape index: {}]   ;;  %s12026_s1 = inlined_call_operand.hbm [shape: bf16[16,16,128], index: 1, kind: input, shape index: {}]   ;;  %s12027_s2 = inlined_call_operand.hbm [shape: f32[1,128], index: 2, kind: output, shape index: {}]  }
   0x1   :  { %8 = vsyncpa [#allocation6], 0 }
   0x2   :  { %9 = vsyncpa [#allocation4], 0  ;;  %s4970_s9 = smov [#allocation2]   ;;  %s4898_s13 = scalar_lea.hbm %s12025_s0, 2048 }
   0x3   :  { %s15_s10 = sshll.u32 %s4970_s9, 4  ;;  %p4899_p0 = scmp.ne.s32.totalorder %s12025_s0, %s4898_s13  ;;  %s16_s10 = int_to_ptr.vmem [resolvable:$true] %s15_s10 }
   0x4   :  { %p4902_p1 = scmp.lt.u32.totalorder %s4898_s13, %s12025_s0 }
   0x6   :  { %p4904_p2 = pnand %p4902_p1, %p4899_p0 }
   0x8   :  { %4907 = shalt.err (!%p4904_p2)
}
   0x9   :  { %s4908_s18 = scalar_lea.vmem %s16_s10, 2048  ;;  %p4913_p4 = scmp.lt.s32.totalorder %s16_s10, %s16_s10 }
   0xa   :  { %p4909_p3 = scmp.ne.s32.totalorder %s16_s10, %s4908_s18  ;;  %p4914_p5 = scmp.lt.s32.totalorder %s4908_s18, %s4908_s18 }
   0xc   :  { %p4915_p6 = por %p4914_p5, %p4913_p4 }
   0xe   :  { %p4916_p7 = pnand %p4915_p6, %p4909_p3 }
  0x10   :  { %4919 = shalt.err (!%p4916_p7)
}
  0x11   :  { %s4971_s19 = smov 64   ;;  %s4972_s20 = smov 4  }
  0x12   :  { %21 = dma.hbm_to_vmem [thread:$0]  %s12025_s0, 2048, %s16_s10, [#allocation3], %s4971_s19, %s4971_s19, %s4972_s20  }
  0x13   :  { %s4973_s23 = smov [#allocation5]   ;;  %s4920_s27 = scalar_lea.hbm %s12026_s1, 2048 }
  0x14   :  { %s27_s24 = sshll.u32 %s4973_s23, 4  ;;  %p4921_p8 = scmp.ne.s32.totalorder %s12026_s1, %s4920_s27  ;;  %s28_s24 = int_to_ptr.vmem [resolvable:$true] %s27_s24 }
  0x15   :  { %p4924_p9 = scmp.lt.u32.totalorder %s4920_s27, %s12026_s1 }
  0x17   :  { %p4926_p10 = pnand %p4924_p9, %p4921_p8 }
  0x19   :  { %4929 = shalt.err (!%p4926_p10)
}
  0x1a   :  { %s4930_s4 = scalar_lea.vmem %s28_s24, 2048  ;;  %p4935_p12 = scmp.lt.s32.totalorder %s28_s24, %s28_s24 }
  0x1b   :  { %p4931_p11 = scmp.ne.s32.totalorder %s28_s24, %s4930_s4  ;;  %p4936_p13 = scmp.lt.s32.totalorder %s4930_s4, %s4930_s4 }
  0x1d   :  { %p4937_p0 = por %p4936_p13, %p4935_p12 }
  0x1f   :  { %p4938_p1 = pnand %p4937_p0, %p4931_p11 }
  0x21   :  { %4941 = shalt.err (!%p4938_p1)
}
  0x22   :  { %33 = dma.hbm_to_vmem [thread:$0]  %s12026_s1, 2048, %s28_s24, [#allocation6], %s4971_s19, %s4971_s19, %s4972_s20  }
  0x23   :  { %4964 = dma.done.wait [#allocation3], 2048  }
  0x24   :  { %4965 = vsyncadd [#allocation3], 4294965248 }
  0x25   :  { %4966 = dma.done.wait [#allocation6], 2048  }
  0x26   :  { %4967 = vsyncadd [#allocation6], 4294965248  ;;  %v4696_v0 = vld [vmem:[#allocation2] sm:$0xff]   ;;  %v4823_v1 = vld [vmem:[#allocation2 + $0x8] sm:$0xff]   ;;  %s4974_s1 = smov [#allocation7]  }
  0x27   :  { %v4824_v2 = vld [vmem:[#allocation2 + $0x10] sm:$0xff]   ;;  %v4825_v3 = vld [vmem:[#allocation2 + $0x18] sm:$0xff]   ;;  %v4826_v4 = vld [vmem:[#allocation2 + $0x20] sm:$0xff]   ;;  %v4697_v6 = vunpack.c.l.bf16 %v4696_v0  ;;  %v4698_v7 = vunpack.c.h.bf16 %v4696_v0  ;;  %v4701_v8 = vunpack.c.l.bf16 %v4823_v1  ;;  %v4702_v9 = vunpack.c.h.bf16 %v4823_v1  ;;  %s4685_s6 = sshll.u32 %s4974_s1, 4  ;;  %s4686_s6 = int_to_ptr.vmem [resolvable:$true] %s4685_s6 }
  0x28   :  { %v4827_v5 = vld [vmem:[#allocation2 + $0x28] sm:$0xff]   ;;  %v4828_v10 = vld [vmem:[#allocation2 + $0x30] sm:$0xff]   ;;  %v4829_v11 = vld [vmem:[#allocation2 + $0x38] sm:$0xff]   ;;  %v4705_v12 = vunpack.c.l.bf16 %v4824_v2  ;;  %v4706_v13 = vunpack.c.h.bf16 %v4824_v2  ;;  %v4709_v14 = vunpack.c.l.bf16 %v4825_v3  ;;  %v4710_v15 = vunpack.c.h.bf16 %v4825_v3  ;;  %s4942_s7 = scalar_lea.vmem %s4686_s6, 16  ;;  %s4946_s8 = scalar_lea.vmem %s4686_s6, 32 }
  0x29   :  { %v4830_v16 = vld [vmem:[#allocation2 + $0x40] sm:$0xff]   ;;  %v4831_v17 = vld [vmem:[#allocation2 + $0x48] sm:$0xff]   ;;  %v4713_v18 = vunpack.c.l.bf16 %v4826_v4  ;;  %v4714_v19 = vunpack.c.h.bf16 %v4826_v4  ;;  %v4717_v20 = vunpack.c.l.bf16 %v4827_v5  ;;  %v4718_v21 = vunpack.c.h.bf16 %v4827_v5  ;;  %v4832_v22 = vld [vmem:[#allocation2 + $0x50] sm:$0xff]   ;;  %p4943_p2 = scmp.ne.s32.totalorder %s4686_s6, %s4942_s7  ;;  %p4947_p3 = scmp.lt.s32.totalorder %s4686_s6, %s4686_s6 }
  0x2a   :  { %v4833_v23 = vld [vmem:[#allocation2 + $0x58] sm:$0xff]   ;;  %v4721_v24 = vunpack.c.l.bf16 %v4828_v10  ;;  %v4722_v25 = vunpack.c.h.bf16 %v4828_v10  ;;  %v4725_v26 = vunpack.c.l.bf16 %v4829_v11  ;;  %v4726_v27 = vunpack.c.h.bf16 %v4829_v11  ;;  %v4834_v28 = vld [vmem:[#allocation2 + $0x60] sm:$0xff]   ;;  %v4835_v29 = vld [vmem:[#allocation2 + $0x68] sm:$0xff]   ;;  %p4948_p4 = scmp.lt.s32.totalorder %s4946_s8, %s4942_s7 }
  0x2b   :  { %v4729_v30 = vunpack.c.l.bf16 %v4830_v16  ;;  %v4730_v31 = vunpack.c.h.bf16 %v4830_v16  ;;  %v4733_v32 = vunpack.c.l.bf16 %v4831_v17  ;;  %v4734_v33 = vunpack.c.h.bf16 %v4831_v17  ;;  %v4836_v34 = vld [vmem:[#allocation2 + $0x70] sm:$0xff]   ;;  %v4837_v35 = vld [vmem:[#allocation2 + $0x78] sm:$0xff]   ;;  %v5014_v40 = vld [vmem:[#allocation5] sm:$0xff]  }
  0x2c   :  { %v4737_v36 = vunpack.c.l.bf16 %v4832_v22  ;;  %v4738_v37 = vunpack.c.h.bf16 %v4832_v22  ;;  %v4741_v38 = vunpack.c.l.bf16 %v4833_v23  ;;  %v4742_v39 = vunpack.c.h.bf16 %v4833_v23  ;;  %v5016_v49 = vld [vmem:[#allocation5 + $0x8] sm:$0xff]   ;;  %v5018_v50 = vld [vmem:[#allocation5 + $0x10] sm:$0xff]   ;;  %v5022_v59 = vld [vmem:[#allocation5 + $0x18] sm:$0xff]   ;;  %p4949_p5 = por %p4948_p4, %p4947_p3 }
  0x2d   :  { %v4745_v41 = vunpack.c.l.bf16 %v4834_v28  ;;  %v4746_v42 = vunpack.c.h.bf16 %v4834_v28  ;;  %v4749_v43 = vunpack.c.l.bf16 %v4835_v29  ;;  %v4750_v44 = vunpack.c.h.bf16 %v4835_v29  ;;  %v5026_v4 = vld [vmem:[#allocation5 + $0x20] sm:$0xff]   ;;  %v5034_v22 = vld [vmem:[#allocation5 + $0x30] sm:$0xff]   ;;  %v4852_v17 = vld [vmem:[#allocation5 + $0x78] sm:$0xff]  }
  0x2e   :  { %v4753_v45 = vunpack.c.l.bf16 %v4836_v34  ;;  %v4754_v46 = vunpack.c.h.bf16 %v4836_v34  ;;  %v4757_v47 = vunpack.c.l.bf16 %v4837_v35  ;;  %v4758_v48 = vunpack.c.h.bf16 %v4837_v35  ;;  %p4950_p6 = pnand %p4949_p5, %p4943_p2 }
  0x2f   :  { %v104_v51 = vmul.f32 0.22, %v4697_v6  ;;  %v105_v52 = vmul.f32 0.22, %v4698_v7  ;;  %v106_v53 = vmul.f32 0.22, %v4701_v8  ;;  %v4761_v54 = vunpack.c.l.bf16 %v5014_v40 }
  0x30   :  { %v107_v55 = vmul.f32 0.22, %v4702_v9  ;;  %v108_v56 = vmul.f32 0.22, %v4705_v12  ;;  %v109_v57 = vmul.f32 0.22, %v4706_v13  ;;  %v4762_v58 = vunpack.c.h.bf16 %v5014_v40 }
  0x31   :  { %v110_v60 = vmul.f32 0.22, %v4709_v14  ;;  %v111_v61 = vmul.f32 0.22, %v4710_v15  ;;  %v112_v62 = vmul.f32 0.22, %v4713_v18  ;;  %v4765_v63 = vunpack.c.l.bf16 %v5016_v49 }
  0x32   :  { %v113_v0 = vmul.f32 0.22, %v4714_v19  ;;  %v114_v1 = vmul.f32 0.22, %v4717_v20  ;;  %v115_v2 = vmul.f32 0.22, %v4718_v21  ;;  %v4766_v3 = vunpack.c.h.bf16 %v5016_v49 }
  0x33   :  { %v116_v5 = vmul.f32 0.22, %v4721_v24  ;;  %v117_v6 = vmul.f32 0.22, %v4722_v25  ;;  %v118_v7 = vmul.f32 0.22, %v4725_v26  ;;  %v4769_v8 = vunpack.c.l.bf16 %v5018_v50 }
  0x34   :  { %v119_v9 = vmul.f32 0.22, %v4726_v27  ;;  %v120_v10 = vmul.f32 0.22, %v4729_v30  ;;  %v121_v11 = vmul.f32 0.22, %v4730_v31  ;;  %v12641_v40 = vunpack.c.h.bf16 %v5022_v59 }
  0x35   :  { %v5030_v13 = vld [vmem:[#allocation5 + $0x28] sm:$0xff]   ;;  %v122_v14 = vmul.f32 0.22, %v4733_v32  ;;  %v123_v15 = vmul.f32 0.22, %v4734_v33  ;;  %v5038_v31 = vld [vmem:[#allocation5 + $0x38] sm:$0xff]   ;;  %v12643_v49 = vunpack.c.h.bf16 %v5026_v4 }
  0x36   :  { %v124_v16 = vmul.f32 0.22, %v4737_v36  ;;  %v125_v18 = vmul.f32 0.22, %v4738_v37  ;;  %v126_v19 = vmul.f32 0.22, %v4741_v38 }
  0x37   :  { %v127_v20 = vmul.f32 0.22, %v4742_v39  ;;  %v128_v23 = vmul.f32 0.22, %v4745_v41  ;;  %v129_v24 = vmul.f32 0.22, %v4746_v42 }
  0x38   :  { %v130_v25 = vmul.f32 0.22, %v4749_v43  ;;  %v131_v27 = vmul.f32 0.22, %v4750_v44  ;;  %v132_v28 = vmul.f32 0.22, %v4753_v45 }
  0x39   :  { %v133_v29 = vmul.f32 0.22, %v4754_v46  ;;  %v134_v32 = vmul.f32 0.22, %v4757_v47  ;;  %v135_v33 = vmul.f32 0.22, %v4758_v48 }
  0x3a   :  { %v5040_v34 = vadd.f32 0.45, %v104_v51  ;;  %v5043_v36 = vadd.f32 0.45, %v105_v52  ;;  %v5045_v37 = vadd.f32 0.45, %v106_v53 }
  0x3b   :  { %v5047_v38 = vadd.f32 0.45, %v107_v55  ;;  %v5050_v41 = vld [vmem:[#allocation5 + $0x40] sm:$0xff]   ;;  %v5052_v42 = vadd.f32 0.45, %v108_v56  ;;  %v5066_v52 = vld [vmem:[#allocation5 + $0x48] sm:$0xff]  }
  0x3c   :  { %v5054_v43 = vadd.f32 0.45, %v109_v57  ;;  %v5056_v44 = vadd.f32 0.45, %v110_v60  ;;  %v5059_v46 = vadd.f32 0.45, %v111_v61 }
  0x3d   :  { %v5061_v47 = vadd.f32 0.45, %v112_v62  ;;  %v5063_v48 = vadd.f32 0.45, %v113_v0  ;;  %v5068_v53 = vadd.f32 0.45, %v114_v1 }
  0x3e   :  { %v5070_v55 = vadd.f32 0.45, %v115_v2  ;;  %v5072_v56 = vadd.f32 0.45, %v116_v5  ;;  %v5075_v60 = vadd.f32 0.45, %v117_v6 }
  0x3f   :  { %v5077_v61 = vadd.f32 0.45, %v118_v7  ;;  %v5079_v62 = vadd.f32 0.45, %v119_v9  ;;  %v5082_v45 = vld [vmem:[#allocation5 + $0x50] sm:$0xff]  }
  0x40   :  { %v5084_v51 = vadd.f32 0.45, %v120_v10  ;;  %v5086_v1 = vadd.f32 0.45, %v121_v11  ;;  %v5088_v2 = vadd.f32 0.45, %v122_v14 }
  0x41   :  { %v5091_v39 = vadd.f32 0.45, %v123_v15  ;;  %v5093_v6 = vadd.f32 0.45, %v124_v16  ;;  %v5095_v7 = vadd.f32 0.45, %v125_v18 }
  0x42   :  { %v5098_v57 = vadd.f32 0.45, %v126_v19  ;;  %v5100_v0 = vadd.f32 0.45, %v127_v20  ;;  %v5102_v10 = vadd.f32 0.45, %v128_v23 }
  0x43   :  { %v5105_v14 = vadd.f32 0.45, %v129_v24  ;;  %v5107_v35 = vadd.f32 0.45, %v130_v25  ;;  %v5109_v15 = vadd.f32 0.45, %v131_v27 }
  0x44   :  { %v5112_v18 = vadd.f32 0.45, %v132_v28  ;;  %v5114_v5 = vadd.f32 0.45, %v133_v29  ;;  %v5116_v19 = vadd.f32 0.45, %v134_v32 }
  0x45   :  { %v5119_v23 = vadd.f32 0.45, %v135_v33  ;;  %v168_v11 = vmax.f32 %v5040_v34, 0.0  ;;  %v169_v24 = vmax.f32 %v5043_v36, 0.0  ;;  %v170_v25 = vmax.f32 %v5045_v37, 0.0 }
  0x46   :  { %v171_v27 = vmax.f32 %v5047_v38, 0.0  ;;  %v172_v16 = vmax.f32 %v5052_v42, 0.0  ;;  %v173_v28 = vmax.f32 %v5054_v43, 0.0  ;;  %v174_v29 = vmax.f32 %v5056_v44, 0.0 }
  0x47   :  { %v175_v32 = vmax.f32 %v5059_v46, 0.0  ;;  %v176_v20 = vmax.f32 %v5061_v47, 0.0  ;;  %v177_v33 = vmax.f32 %v5063_v48, 0.0  ;;  %v178_v34 = vmax.f32 %v5068_v53, 0.0 }
  0x48   :  { %v179_v36 = vmax.f32 %v5070_v55, 0.0  ;;  %v180_v37 = vmax.f32 %v5072_v56, 0.0  ;;  %v181_v38 = vmax.f32 %v5075_v60, 0.0  ;;  %v182_v42 = vmax.f32 %v5077_v61, 0.0 }
  0x49   :  { %v183_v43 = vmax.f32 %v5079_v62, 0.0  ;;  %v184_v44 = vmax.f32 %v5084_v51, 0.0  ;;  %v185_v46 = vmax.f32 %v5086_v1, 0.0  ;;  %v186_v47 = vmax.f32 %v5088_v2, 0.0 }
  0x4a   :  { %v187_v48 = vmax.f32 %v5091_v39, 0.0  ;;  %v188_v53 = vmax.f32 %v5093_v6, 0.0  ;;  %v189_v55 = vmax.f32 %v5095_v7, 0.0  ;;  %v190_v56 = vmax.f32 %v5098_v57, 0.0 }
  0x4b   :  { %v191_v60 = vmax.f32 %v5100_v0, 0.0  ;;  %v192_v61 = vmax.f32 %v5102_v10, 0.0  ;;  %v193_v62 = vmax.f32 %v5105_v14, 0.0  ;;  %v194_v51 = vmax.f32 %v5107_v35, 0.0 }
  0x4c   :  { %v195_v1 = vmax.f32 %v5109_v15, 0.0  ;;  %v196_v2 = vmax.f32 %v5112_v18, 0.0  ;;  %v197_v39 = vmax.f32 %v5114_v5, 0.0  ;;  %v198_v6 = vmax.f32 %v5116_v19, 0.0 }
  0x4d   :  { %v199_v7 = vmax.f32 %v5119_v23, 0.0  ;;  %v5153_v9 = vmin.f32 %v168_v11, 1.0  ;;  %v5155_v57 = vmin.f32 %v169_v24, 1.0  ;;  %v5157_v0 = vmin.f32 %v170_v25, 1.0 }
  0x4e   :  { %v5159_v10 = vmin.f32 %v171_v27, 1.0  ;;  %v5161_v14 = vmin.f32 %v172_v16, 1.0  ;;  %v5163_v35 = vmin.f32 %v173_v28, 1.0  ;;  %v5165_v15 = vmin.f32 %v174_v29, 1.0 }
  0x4f   :  { %12607 = vst [vmem:[#allocation11_spill] sm:$0xff] %v5153_v9  ;;  %12608 = vst [vmem:[#allocation12_spill] sm:$0xff] %v5155_v57  ;;  %v5167_v18 = vmin.f32 %v175_v32, 1.0  ;;  %v5169_v5 = vmin.f32 %v176_v20, 1.0  ;;  %v5171_v19 = vmin.f32 %v177_v33, 1.0  ;;  %v5173_v11 = vmin.f32 %v178_v34, 1.0 }
  0x50   :  { %12609 = vst [vmem:[#allocation13_spill] sm:$0xff] %v5157_v0  ;;  %12610 = vst [vmem:[#allocation14_spill] sm:$0xff] %v5159_v10  ;;  %v5175_v23 = vmin.f32 %v179_v36, 1.0  ;;  %v5177_v24 = vmin.f32 %v180_v37, 1.0  ;;  %v5179_v25 = vmin.f32 %v181_v38, 1.0  ;;  %v5181_v16 = vmin.f32 %v182_v42, 1.0 }
  0x51   :  { %12611 = vst [vmem:[#allocation15_spill] sm:$0xff] %v5161_v14  ;;  %12612 = vst [vmem:[#allocation16_spill] sm:$0xff] %v5163_v35  ;;  %v5183_v27 = vmin.f32 %v183_v43, 1.0  ;;  %v5185_v28 = vmin.f32 %v184_v44, 1.0  ;;  %v5187_v29 = vmin.f32 %v185_v46, 1.0  ;;  %v5189_v20 = vmin.f32 %v186_v47, 1.0 }
  0x52   :  { %12613 = vst [vmem:[#allocation17_spill] sm:$0xff] %v5165_v15  ;;  %12614 = vst [vmem:[#allocation18_spill] sm:$0xff] %v5167_v18  ;;  %v5191_v32 = vmin.f32 %v187_v48, 1.0  ;;  %v5193_v33 = vmin.f32 %v188_v53, 1.0  ;;  %v5195_v34 = vmin.f32 %v189_v55, 1.0  ;;  %v5197_v36 = vmin.f32 %v190_v56, 1.0 }
  0x53   :  { %12615 = vst [vmem:[#allocation19_spill] sm:$0xff] %v5169_v5  ;;  %12616 = vst [vmem:[#allocation20_spill] sm:$0xff] %v5171_v19  ;;  %v4848_v37 = vld [vmem:[#allocation5 + $0x58] sm:$0xff]   ;;  %v5199_v38 = vmin.f32 %v191_v60, 1.0  ;;  %v5201_v42 = vmin.f32 %v192_v61, 1.0  ;;  %v5203_v43 = vmin.f32 %v193_v62, 1.0  ;;  %v4802_v60 = vunpack.c.h.bf16 %v5082_v45 }
  0x54   :  { %12617 = vst [vmem:[#allocation21_spill] sm:$0xff] %v5173_v11  ;;  %12618 = vst [vmem:[#allocation22_spill] sm:$0xff] %v5175_v23  ;;  %v5205_v44 = vmin.f32 %v194_v51, 1.0  ;;  %v4849_v46 = vld [vmem:[#allocation5 + $0x60] sm:$0xff]   ;;  %v5207_v47 = vmin.f32 %v195_v1, 1.0  ;;  %v5209_v48 = vmin.f32 %v196_v2, 1.0  ;;  %v4805_v61 = vunpack.c.l.bf16 %v4848_v37 }
  0x55   :  { %12619 = vst [vmem:[#allocation23_spill] sm:$0xff] %v5177_v24  ;;  %12620 = vst [vmem:[#allocation24_spill] sm:$0xff] %v5179_v25  ;;  %v5211_v53 = vmin.f32 %v197_v39, 1.0  ;;  %v5213_v55 = vmin.f32 %v198_v6, 1.0  ;;  %v4850_v56 = vld [vmem:[#allocation5 + $0x68] sm:$0xff]   ;;  %v5215_v30 = vmin.f32 %v199_v7, 1.0  ;;  %v4806_v26 = vunpack.c.h.bf16 %v4848_v37 }
  0x56   :  { %12621 = vst [vmem:[#allocation25_spill] sm:$0xff] %v5181_v16  ;;  %12622 = vst [vmem:[#allocation26_spill] sm:$0xff] %v5183_v27  ;;  %v4809_v62 = vunpack.c.l.bf16 %v4849_v46  ;;  %v4810_v21 = vunpack.c.h.bf16 %v4849_v46  ;;  %v4851_v51 = vld [vmem:[#allocation5 + $0x70] sm:$0xff]   ;;  %v296_v1 = vmul.f32 0.22, %v4761_v54  ;;  %v4813_v39 = vunpack.c.l.bf16 %v4850_v56 }
  0x57   :  { %12623 = vst [vmem:[#allocation27_spill] sm:$0xff] %v5185_v28  ;;  %12624 = vst [vmem:[#allocation28_spill] sm:$0xff] %v5187_v29  ;;  %v297_v2 = vmul.f32 0.22, %v4762_v58  ;;  %v298_v6 = vmul.f32 0.22, %v4765_v63  ;;  %v4814_v12 = vunpack.c.h.bf16 %v4850_v56  ;;  %v12639_v46 = vunpack.c.h.bf16 %v5018_v50 }
  0x58   :  { %12625 = vst [vmem:[#allocation29_spill] sm:$0xff] %v5189_v20  ;;  %12626 = vst [vmem:[#allocation30_spill] sm:$0xff] %v5191_v32  ;;  %v299_v7 = vmul.f32 0.22, %v4766_v3  ;;  %v300_v37 = vmul.f32 0.22, %v4769_v8  ;;  %v4818_v56 = vunpack.c.h.bf16 %v4851_v51  ;;  %v12645_v50 = vunpack.c.h.bf16 %v5030_v13 }
  0x59   :  { %12627 = vst [vmem:[#allocation31_spill] sm:$0xff] %v5193_v33  ;;  %12628 = vst [vmem:[#allocation32_spill] sm:$0xff] %v5195_v34  ;;  %v303_v58 = vmul.f32 0.22, %v12641_v40  ;;  %v305_v3 = vmul.f32 0.22, %v12643_v49  ;;  %v12654_v34 = vunpack.c.l.bf16 %v5082_v45 }
  0x5a   :  { %12629 = vst [vmem:[#allocation33_spill] sm:$0xff] %v5197_v36  ;;  %12630 = vst [vmem:[#allocation34_spill] sm:$0xff] %v5199_v38  ;;  %v12650_v38 = vunpack.c.l.bf16 %v5050_v41  ;;  %v12652_v36 = vunpack.c.l.bf16 %v5066_v52  ;;  %v318_v32 = vmul.f32 0.22, %v4805_v61  ;;  %v321_v20 = vmul.f32 0.22, %v4810_v21 }
  0x5b   :  { %12631 = vst [vmem:[#allocation35_spill] sm:$0xff] %v5201_v42  ;;  %12632 = vst [vmem:[#allocation36_spill] sm:$0xff] %v5203_v43  ;;  %v4821_v43 = vunpack.c.l.bf16 %v4852_v17  ;;  %v12648_v42 = vunpack.c.l.bf16 %v5038_v31  ;;  %v316_v33 = vmul.f32 0.22, %v12654_v34  ;;  %v322_v29 = vmul.f32 0.22, %v4813_v39 }
  0x5c   :  { %12633 = vst [vmem:[#allocation37_spill] sm:$0xff] %v5205_v44  ;;  %12634 = vst [vmem:[#allocation38_spill] sm:$0xff] %v5207_v47  ;;  %v12644_v47 = vunpack.c.l.bf16 %v5030_v13  ;;  %v12646_v44 = vunpack.c.l.bf16 %v5034_v22  ;;  %v12651_v13 = vunpack.c.h.bf16 %v5050_v41  ;;  %v325_v28 = vmul.f32 0.22, %v4818_v56 }
  0x5d   :  { %12635 = vst [vmem:[#allocation39_spill] sm:$0xff] %v5209_v48  ;;  %12636 = vst [vmem:[#allocation40_spill] sm:$0xff] %v5211_v53  ;;  %v4817_v53 = vunpack.c.l.bf16 %v4851_v51  ;;  %v12642_v48 = vunpack.c.l.bf16 %v5026_v4  ;;  %v12649_v4 = vunpack.c.h.bf16 %v5038_v31  ;;  %v4822_v51 = vunpack.c.h.bf16 %v4852_v17 }
  0x5e   :  { %12637 = vst [vmem:[#allocation41_spill] sm:$0xff] %v5213_v55  ;;  %12638 = vst [vmem:[#allocation42_spill] sm:$0xff] %v5215_v30  ;;  %v301_v30 = vmul.f32 0.22, %v12639_v46  ;;  %v12640_v55 = vunpack.c.l.bf16 %v5022_v59  ;;  %v306_v8 = vmul.f32 0.22, %v12644_v47  ;;  %v12647_v59 = vunpack.c.h.bf16 %v5034_v22 }
  0x5f   :  { %v304_v63 = vmul.f32 0.22, %v12642_v48  ;;  %v307_v46 = vmul.f32 0.22, %v12645_v50  ;;  %v310_v48 = vmul.f32 0.22, %v12648_v42  ;;  %v12653_v22 = vunpack.c.h.bf16 %v5066_v52 }
  0x60   :  { %v302_v54 = vmul.f32 0.22, %v12640_v55  ;;  %v308_v55 = vmul.f32 0.22, %v12646_v44  ;;  %v309_v40 = vmul.f32 0.22, %v12647_v59 }
  0x61   :  { %v311_v49 = vmul.f32 0.22, %v12649_v4  ;;  %v312_v47 = vmul.f32 0.22, %v12650_v38  ;;  %v313_v50 = vmul.f32 0.22, %v12651_v13 }
  0x62   :  { %v314_v44 = vmul.f32 0.22, %v12652_v36  ;;  %v315_v59 = vmul.f32 0.22, %v12653_v22  ;;  %v317_v42 = vmul.f32 0.22, %v4802_v60 }
  0x63   :  { %v319_v31 = vmul.f32 0.22, %v4806_v26  ;;  %v320_v4 = vmul.f32 0.22, %v4809_v62  ;;  %v323_v38 = vmul.f32 0.22, %v4814_v12 }
  0x64   :  { %v324_v17 = vmul.f32 0.22, %v4817_v53  ;;  %v326_v41 = vmul.f32 0.22, %v4821_v43  ;;  %v327_v13 = vmul.f32 0.22, %v4822_v51 }
  0x65   :  { %v5260_v27 = vadd.f32 0.45, %v296_v1  ;;  %v5262_v36 = vadd.f32 0.45, %v297_v2  ;;  %v5264_v52 = vadd.f32 0.45, %v298_v6 }
  0x66   :  { %v5266_v22 = vadd.f32 0.45, %v299_v7  ;;  %v5268_v45 = vadd.f32 0.45, %v300_v37  ;;  %v5270_v34 = vadd.f32 0.45, %v301_v30 }
  0x67   :  { %v5272_v26 = vadd.f32 0.45, %v302_v54  ;;  %v5274_v21 = vadd.f32 0.45, %v303_v58  ;;  %v5276_v12 = vadd.f32 0.45, %v304_v63 }
  0x68   :  { %v5278_v43 = vadd.f32 0.45, %v305_v3  ;;  %v5280_v53 = vadd.f32 0.45, %v306_v8  ;;  %v5282_v60 = vadd.f32 0.45, %v307_v46 }
  0x69   :  { %v5284_v61 = vadd.f32 0.45, %v308_v55  ;;  %v5286_v62 = vadd.f32 0.45, %v309_v40  ;;  %v5288_v1 = vadd.f32 0.45, %v310_v48 }
  0x6a   :  { %v5290_v30 = vadd.f32 0.45, %v311_v49  ;;  %v5292_v2 = vadd.f32 0.45, %v312_v47  ;;  %v5294_v39 = vadd.f32 0.45, %v313_v50  ;;  %v688_v49 = vlaneseq }
  0x6b   :  { %v5296_v6 = vadd.f32 0.45, %v314_v44  ;;  %v5298_v7 = vadd.f32 0.45, %v315_v59  ;;  %v5300_v37 = vadd.f32 0.45, %v316_v33 }
  0x6c   :  { %v5302_v54 = vadd.f32 0.45, %v317_v42  ;;  %v5304_v58 = vadd.f32 0.45, %v318_v32  ;;  %v5306_v63 = vadd.f32 0.45, %v319_v31 }
  0x6d   :  { %v5308_v3 = vadd.f32 0.45, %v320_v4  ;;  %v5310_v8 = vadd.f32 0.45, %v321_v20  ;;  %v5312_v56 = vadd.f32 0.45, %v322_v29 }
  0x6e   :  { %v5314_v46 = vadd.f32 0.45, %v323_v38  ;;  %v5316_v55 = vadd.f32 0.45, %v324_v17  ;;  %v5318_v40 = vadd.f32 0.45, %v325_v28 }
  0x6f   :  { %v5320_v33 = vadd.f32 0.45, %v326_v41  ;;  %v5322_v48 = vadd.f32 0.45, %v327_v13  ;;  %v360_v32 = vmax.f32 %v5260_v27, 0.0  ;;  %v361_v47 = vmax.f32 %v5262_v36, 0.0 }
  0x70   :  { %v362_v20 = vmax.f32 %v5264_v52, 0.0  ;;  %v363_v29 = vmax.f32 %v5266_v22, 0.0  ;;  %v364_v51 = vmax.f32 %v5268_v45, 0.0  ;;  %v365_v50 = vmax.f32 %v5270_v34, 0.0 }
  0x71   :  { %v366_v28 = vmax.f32 %v5272_v26, 0.0  ;;  %v367_v44 = vmax.f32 %v5274_v21, 0.0  ;;  %v368_v59 = vmax.f32 %v5276_v12, 0.0  ;;  %v369_v42 = vmax.f32 %v5278_v43, 0.0 }
  0x72   :  { %v370_v27 = vmax.f32 %v5280_v53, 0.0  ;;  %v371_v31 = vmax.f32 %v5282_v60, 0.0  ;;  %v372_v4 = vmax.f32 %v5284_v61, 0.0  ;;  %v373_v38 = vmax.f32 %v5286_v62, 0.0 }
  0x73   :  { %v374_v17 = vmax.f32 %v5288_v1, 0.0  ;;  %v375_v41 = vmax.f32 %v5290_v30, 0.0  ;;  %v376_v13 = vmax.f32 %v5292_v2, 0.0  ;;  %v377_v36 = vmax.f32 %v5294_v39, 0.0 }
  0x74   :  { %v378_v52 = vmax.f32 %v5296_v6, 0.0  ;;  %v379_v22 = vmax.f32 %v5298_v7, 0.0  ;;  %v380_v45 = vmax.f32 %v5300_v37, 0.0  ;;  %v381_v34 = vmax.f32 %v5302_v54, 0.0 }
  0x75   :  { %v382_v26 = vmax.f32 %v5304_v58, 0.0  ;;  %v383_v21 = vmax.f32 %v5306_v63, 0.0  ;;  %v384_v12 = vmax.f32 %v5308_v3, 0.0  ;;  %v385_v43 = vmax.f32 %v5310_v8, 0.0 }
  0x76   :  { %v386_v53 = vmax.f32 %v5312_v56, 0.0  ;;  %v387_v60 = vmax.f32 %v5314_v46, 0.0  ;;  %v388_v61 = vmax.f32 %v5316_v55, 0.0  ;;  %v389_v62 = vmax.f32 %v5318_v40, 0.0 }
  0x77   :  { %v390_v1 = vmax.f32 %v5320_v33, 0.0  ;;  %v391_v30 = vmax.f32 %v5322_v48, 0.0  ;;  %v5356_v2 = vmin.f32 %v360_v32, 1.0  ;;  %v5358_v39 = vmin.f32 %v361_v47, 1.0 }
  0x78   :  { %v5360_v6 = vmin.f32 %v362_v20, 1.0  ;;  %v5362_v7 = vmin.f32 %v363_v29, 1.0  ;;  %v5364_v37 = vmin.f32 %v364_v51, 1.0  ;;  %v5366_v54 = vmin.f32 %v365_v50, 1.0 }
  0x79   :  { %12655 = vst [vmem:[#allocation43_spill] sm:$0xff] %v5356_v2  ;;  %12656 = vst [vmem:[#allocation44_spill] sm:$0xff] %v5358_v39  ;;  %v5368_v58 = vmin.f32 %v366_v28, 1.0  ;;  %v5370_v63 = vmin.f32 %v367_v44, 1.0  ;;  %v5372_v3 = vmin.f32 %v368_v59, 1.0  ;;  %v5374_v8 = vmin.f32 %v369_v42, 1.0 }
  0x7a   :  { %12657 = vst [vmem:[#allocation45_spill] sm:$0xff] %v5360_v6  ;;  %12658 = vst [vmem:[#allocation46_spill] sm:$0xff] %v5362_v7  ;;  %v5376_v56 = vmin.f32 %v370_v27, 1.0  ;;  %v5378_v46 = vmin.f32 %v371_v31, 1.0  ;;  %v5380_v55 = vmin.f32 %v372_v4, 1.0  ;;  %v5382_v40 = vmin.f32 %v373_v38, 1.0 }
  0x7b   :  { %12659 = vst [vmem:[#allocation47_spill] sm:$0xff] %v5364_v37  ;;  %12660 = vst [vmem:[#allocation48_spill] sm:$0xff] %v5366_v54  ;;  %v5384_v33 = vmin.f32 %v374_v17, 1.0  ;;  %v5386_v48 = vmin.f32 %v375_v41, 1.0  ;;  %v5388_v32 = vmin.f32 %v376_v13, 1.0  ;;  %v5390_v47 = vmin.f32 %v377_v36, 1.0 }
  0x7c   :  { %12661 = vst [vmem:[#allocation49_spill] sm:$0xff] %v5368_v58  ;;  %12662 = vst [vmem:[#allocation50_spill] sm:$0xff] %v5370_v63  ;;  %v5392_v20 = vmin.f32 %v378_v52, 1.0  ;;  %v5394_v29 = vmin.f32 %v379_v22, 1.0  ;;  %v5396_v51 = vmin.f32 %v380_v45, 1.0  ;;  %v5398_v50 = vmin.f32 %v381_v34, 1.0 }
  0x7d   :  { %12663 = vst [vmem:[#allocation51_spill] sm:$0xff] %v5372_v3  ;;  %12664 = vst [vmem:[#allocation52_spill] sm:$0xff] %v5374_v8  ;;  %v5400_v28 = vmin.f32 %v382_v26, 1.0  ;;  %v5402_v44 = vmin.f32 %v383_v21, 1.0  ;;  %v5404_v59 = vmin.f32 %v384_v12, 1.0  ;;  %v5406_v42 = vmin.f32 %v385_v43, 1.0 }
  0x7e   :  { %12665 = vst [vmem:[#allocation53_spill] sm:$0xff] %v5376_v56  ;;  %12666 = vst [vmem:[#allocation54_spill] sm:$0xff] %v5378_v46  ;;  %v5408_v27 = vmin.f32 %v386_v53, 1.0  ;;  %v5410_v31 = vmin.f32 %v387_v60, 1.0  ;;  %v5412_v4 = vmin.f32 %v388_v61, 1.0  ;;  %v5414_v38 = vmin.f32 %v389_v62, 1.0 }
  0x7f   :  { %12667 = vst [vmem:[#allocation55_spill] sm:$0xff] %v5380_v55  ;;  %12668 = vst [vmem:[#allocation56_spill] sm:$0xff] %v5382_v40  ;;  %v5416_v17 = vmin.f32 %v390_v1, 1.0  ;;  %v424_v41 = vmul.f32 0.036632847, %v5153_v9  ;;  %v5420_v36 = vmin.f32 %v391_v30, 1.0 }
  0x80   :  { %12669 = vst [vmem:[#allocation57_spill] sm:$0xff] %v5384_v33  ;;  %12670 = vst [vmem:[#allocation58_spill] sm:$0xff] %v5386_v48  ;;  %v425_v13 = vmul.f32 0.036632847, %v5155_v57  ;;  %v426_v52 = vmul.f32 0.036632847, %v5157_v0 }
  0x81   :  { %12671 = vst [vmem:[#allocation59_spill] sm:$0xff] %v5388_v32  ;;  %12672 = vst [vmem:[#allocation60_spill] sm:$0xff] %v5390_v47  ;;  %v427_v22 = vmul.f32 0.036632847, %v5159_v10  ;;  %v5425_v45 = vshrl.u32 %v688_v49, 7  ;;  %v12691_v30 = vld [vmem:[#allocation26_spill] sm:$0xff] }
  0x82   :  { %12673 = vst [vmem:[#allocation61_spill] sm:$0xff] %v5392_v20  ;;  %12674 = vst [vmem:[#allocation62_spill] sm:$0xff] %v5394_v29  ;;  %v428_v34 = vmul.f32 0.036632847, %v5161_v14  ;;  %v429_v26 = vmul.f32 0.036632847, %v5163_v35 }
  0x83   :  { %12675 = vst [vmem:[#allocation63_spill] sm:$0xff] %v5396_v51  ;;  %12676 = vst [vmem:[#allocation64_spill] sm:$0xff] %v5398_v50  ;;  %v430_v21 = vmul.f32 0.036632847, %v5165_v15  ;;  %v431_v12 = vmul.f32 0.036632847, %v5167_v18 }
  0x84   :  { %12677 = vst [vmem:[#allocation65_spill] sm:$0xff] %v5400_v28  ;;  %12678 = vst [vmem:[#allocation66_spill] sm:$0xff] %v5402_v44  ;;  %v432_v43 = vmul.f32 0.036632847, %v5169_v5  ;;  %v433_v53 = vmul.f32 0.036632847, %v5171_v19 }
  0x85   :  { %12679 = vst [vmem:[#allocation67_spill] sm:$0xff] %v5404_v59  ;;  %12680 = vst [vmem:[#allocation68_spill] sm:$0xff] %v5406_v42  ;;  %v434_v60 = vmul.f32 0.036632847, %v5173_v11  ;;  %v435_v61 = vmul.f32 0.036632847, %v5175_v23 }
  0x86   :  { %12681 = vst [vmem:[#allocation69_spill] sm:$0xff] %v5408_v27  ;;  %12682 = vst [vmem:[#allocation70_spill] sm:$0xff] %v5410_v31  ;;  %v5436_v62 = vmul.f32 0.036632847, %v5177_v24  ;;  %v5439_v49 = vmul.f32 0.036632847, %v5179_v25 }
  0x87   :  { %12683 = vst [vmem:[#allocation71_spill] sm:$0xff] %v5412_v4  ;;  %12684 = vst [vmem:[#allocation72_spill] sm:$0xff] %v5414_v38  ;;  %v5442_v1 = vmul.f32 0.036632847, %v5181_v16  ;;  %v5445_v57 = vmul.f32 0.036632847, %v12691_v30 }
  0x88   :  { %12685 = vst [vmem:[#allocation73_spill] sm:$0xff] %v5416_v17  ;;  %12686 = vst [vmem:[#allocation74_spill] sm:$0xff] %v5420_v36  ;;  %v12693_v9 = vld [vmem:[#allocation27_spill] sm:$0xff]  ;;  %v12695_v17 = vld [vmem:[#allocation28_spill] sm:$0xff]  ;;  %v444_v4 = vmul.f32 0.11128076, %v5157_v0 }
  0x89   :  { %12687 = vst [vmem:[#allocation75_spill] sm:$0xff] %v5425_v45  ;;  %12688 = vst [vmem:[#allocation76_spill] sm:$0xff] %v5436_v62  ;;  %v5448_v36 = vmul.f32 0.036632847, %v12693_v9  ;;  %v5451_v38 = vmul.f32 0.036632847, %v12695_v17 }
  0x8a   :  { %12689 = vst [vmem:[#allocation77_spill] sm:$0xff] %v5439_v49  ;;  %12690 = vst [vmem:[#allocation78_spill] sm:$0xff] %v5442_v1  ;;  %v12697_v31 = vld [vmem:[#allocation29_spill] sm:$0xff]  ;;  %v12699_v42 = vld [vmem:[#allocation30_spill] sm:$0xff]  ;;  %v445_v44 = vmul.f32 0.11128076, %v5159_v10  ;;  %v464_v48 = vadd.f32 %v444_v4, %v424_v41 }
  0x8b   :  { %12692 = vst [vmem:[#allocation79_spill] sm:$0xff] %v5445_v57  ;;  %12694 = vst [vmem:[#allocation80_spill] sm:$0xff] %v5448_v36  ;;  %v5455_v27 = vmul.f32 0.036632847, %v12697_v31  ;;  %v5458_v59 = vmul.f32 0.036632847, %v12699_v42 }
  0x8c   :  { %12696 = vst [vmem:[#allocation81_spill] sm:$0xff] %v5451_v38  ;;  %v446_v28 = vmul.f32 0.11128076, %v5161_v14  ;;  %v447_v50 = vmul.f32 0.11128076, %v5163_v35  ;;  %v465_v46 = vadd.f32 %v445_v44, %v425_v13  ;;  %v12711_v63 = vld [vmem:[#allocation31_spill] sm:$0xff] }
  0x8d   :  { %12698 = vst [vmem:[#allocation82_spill] sm:$0xff] %v5455_v27  ;;  %12700 = vst [vmem:[#allocation83_spill] sm:$0xff] %v5458_v59  ;;  %v448_v51 = vmul.f32 0.11128076, %v5165_v15  ;;  %v449_v29 = vmul.f32 0.11128076, %v5167_v18 }
  0x8e   :  { %v450_v20 = vmul.f32 0.11128076, %v5169_v5  ;;  %v451_v0 = vmul.f32 0.11128076, %v5171_v19  ;;  %v5468_v47 = vmul.f32 0.11128076, %v5173_v11  ;;  %v466_v4 = vadd.f32 %v446_v28, %v426_v52 }
  0x8f   :  { %v5471_v32 = vmul.f32 0.11128076, %v5175_v23  ;;  %v5474_v10 = vmul.f32 0.11128076, %v5177_v24  ;;  %v5477_v33 = vmul.f32 0.11128076, %v5179_v25  ;;  %v467_v44 = vadd.f32 %v447_v50, %v427_v22 }
  0x90   :  { %12701 = vst [vmem:[#allocation84_spill] sm:$0xff] %v5468_v47  ;;  %v5480_v40 = vmul.f32 0.11128076, %v5181_v16  ;;  %v5483_v55 = vmul.f32 0.11128076, %v12691_v30  ;;  %v12713_v54 = vld [vmem:[#allocation32_spill] sm:$0xff]  ;;  %v468_v13 = vadd.f32 %v448_v51, %v428_v34  ;;  %v469_v7 = vadd.f32 %v449_v29, %v429_v26 }
  0x91   :  { %12702 = vst [vmem:[#allocation85_spill] sm:$0xff] %v5471_v32  ;;  %12703 = vst [vmem:[#allocation86_spill] sm:$0xff] %v5474_v10  ;;  %v5486_v56 = vmul.f32 0.11128076, %v12693_v9  ;;  %v5489_v8 = vmul.f32 0.11128076, %v12695_v17  ;;  %v470_v6 = vadd.f32 %v450_v20, %v430_v21  ;;  %v471_v39 = vadd.f32 %v451_v0, %v431_v12 }
  0x92   :  { %12704 = vst [vmem:[#allocation87_spill] sm:$0xff] %v5477_v33  ;;  %12705 = vst [vmem:[#allocation88_spill] sm:$0xff] %v5480_v40  ;;  %v5492_v3 = vmul.f32 0.11128076, %v12697_v31  ;;  %v5495_v41 = vmul.f32 0.11128076, %v12699_v42  ;;  %v472_v2 = vadd.f32 %v5468_v47, %v432_v43  ;;  %v473_v45 = vadd.f32 %v5471_v32, %v433_v53 }
  0x93   :  { %12706 = vst [vmem:[#allocation89_spill] sm:$0xff] %v5483_v55  ;;  %12707 = vst [vmem:[#allocation90_spill] sm:$0xff] %v5486_v56  ;;  %v5498_v58 = vmul.f32 0.11128076, %v12711_v63  ;;  %v5501_v37 = vmul.f32 0.11128076, %v12713_v54  ;;  %v474_v28 = vadd.f32 %v5474_v10, %v434_v60  ;;  %v475_v52 = vadd.f32 %v5477_v33, %v435_v61 }
  0x94   :  { %12708 = vst [vmem:[#allocation91_spill] sm:$0xff] %v5489_v8  ;;  %12709 = vst [vmem:[#allocation92_spill] sm:$0xff] %v5492_v3  ;;  %v476_v63 = vadd.f32 %v5480_v40, %v5436_v62  ;;  %v477_v54 = vadd.f32 %v5483_v55, %v5439_v49  ;;  %v478_v51 = vadd.f32 %v5486_v56, %v5442_v1  ;;  %v484_v20 = vmul.f32 0.21674532, %v5161_v14  ;;  %v12726_v56 = vld [vmem:[#allocation34_spill] sm:$0xff] }
  0x95   :  { %12710 = vst [vmem:[#allocation93_spill] sm:$0xff] %v5495_v41  ;;  %12712 = vst [vmem:[#allocation94_spill] sm:$0xff] %v5498_v58  ;;  %v479_v0 = vadd.f32 %v5489_v8, %v5445_v57  ;;  %v480_v29 = vadd.f32 %v5492_v3, %v5448_v36  ;;  %v481_v50 = vadd.f32 %v5495_v41, %v5451_v38  ;;  %v485_v22 = vmul.f32 0.21674532, %v5163_v35  ;;  %v12724_v3 = vld [vmem:[#allocation33_spill] sm:$0xff] }
  0x96   :  { %12714 = vst [vmem:[#allocation95_spill] sm:$0xff] %v5501_v37  ;;  %v482_v34 = vadd.f32 %v5498_v58, %v5455_v27  ;;  %v486_v26 = vmul.f32 0.21674532, %v5165_v15  ;;  %v487_v21 = vmul.f32 0.21674532, %v5167_v18  ;;  %v483_v43 = vadd.f32 %v5501_v37, %v5458_v59  ;;  %v12720_v37 = vld [vmem:[#allocation31_spill] sm:$0xff] }
  0x97   :  { %v5526_v12 = vmul.f32 0.21674532, %v5169_v5  ;;  %v5531_v53 = vmul.f32 0.21674532, %v5171_v19  ;;  %v5534_v60 = vmul.f32 0.21674532, %v5173_v11  ;;  %v504_v38 = vadd.f32 %v484_v20, %v464_v48 }
  0x98   :  { %v5537_v61 = vmul.f32 0.21674532, %v5175_v23  ;;  %v5540_v35 = vmul.f32 0.21674532, %v5177_v24  ;;  %v5543_v14 = vmul.f32 0.21674532, %v5179_v25  ;;  %v505_v1 = vadd.f32 %v485_v22, %v465_v46 }
  0x99   :  { %v5546_v27 = vmul.f32 0.21674532, %v5181_v16  ;;  %v5549_v59 = vmul.f32 0.21674532, %v12691_v30  ;;  %v5552_v36 = vmul.f32 0.21674532, %v12693_v9  ;;  %v506_v48 = vadd.f32 %v486_v26, %v466_v4 }
  0x9a   :  { %v5555_v57 = vmul.f32 0.21674532, %v12695_v17  ;;  %v5558_v49 = vmul.f32 0.21674532, %v12697_v31  ;;  %v5561_v62 = vmul.f32 0.21674532, %v12699_v42  ;;  %v507_v46 = vadd.f32 %v487_v21, %v467_v44 }
  0x9b   :  { %12715 = vst [vmem:[#allocation96_spill] sm:$0xff] %v5549_v59  ;;  %12716 = vst [vmem:[#allocation97_spill] sm:$0xff] %v5552_v36  ;;  %v5564_v58 = vmul.f32 0.21674532, %v12720_v37  ;;  %v12722_v20 = vld [vmem:[#allocation32_spill] sm:$0xff]  ;;  %v508_v22 = vadd.f32 %v5526_v12, %v468_v13  ;;  %v509_v40 = vadd.f32 %v5531_v53, %v469_v7  ;;  %v510_v33 = vadd.f32 %v5534_v60, %v470_v6 }
  0x9c   :  { %12717 = vst [vmem:[#allocation98_spill] sm:$0xff] %v5555_v57  ;;  %12718 = vst [vmem:[#allocation99_spill] sm:$0xff] %v5558_v49  ;;  %v5567_v41 = vmul.f32 0.21674532, %v12722_v20  ;;  %v5570_v8 = vmul.f32 0.21674532, %v12724_v3  ;;  %v511_v10 = vadd.f32 %v5537_v61, %v471_v39  ;;  %v512_v4 = vadd.f32 %v5540_v35, %v472_v2 }
  0x9d   :  { %12719 = vst [vmem:[#allocation100_spill] sm:$0xff] %v5561_v62  ;;  %12721 = vst [vmem:[#allocation101_spill] sm:$0xff] %v5564_v58  ;;  %v5573_v55 = vmul.f32 0.21674532, %v12726_v56  ;;  %v513_v26 = vadd.f32 %v5543_v14, %v473_v45  ;;  %v514_v32 = vadd.f32 %v5546_v27, %v474_v28  ;;  %v515_v47 = vadd.f32 %v5549_v59, %v475_v52 }
  0x9e   :  { %12723 = vst [vmem:[#allocation102_spill] sm:$0xff] %v5567_v41  ;;  %12725 = vst [vmem:[#allocation103_spill] sm:$0xff] %v5570_v8  ;;  %v516_v56 = vadd.f32 %v5552_v36, %v476_v63  ;;  %v517_v44 = vadd.f32 %v5555_v57, %v477_v54  ;;  %v518_v13 = vadd.f32 %v5558_v49, %v478_v51  ;;  %v524_v7 = vmul.f32 0.27068216, %v5165_v15 }
  0x9f   :  { %12727 = vst [vmem:[#allocation104_spill] sm:$0xff] %v5573_v55  ;;  %v519_v6 = vadd.f32 %v5561_v62, %v479_v0  ;;  %v520_v39 = vadd.f32 %v5564_v58, %v480_v29  ;;  %v521_v2 = vadd.f32 %v5567_v41, %v481_v50  ;;  %v525_v45 = vmul.f32 0.27068216, %v5167_v18 }
  0xa0   :  { %v522_v28 = vadd.f32 %v5570_v8, %v482_v34  ;;  %v526_v52 = vmul.f32 0.27068216, %v5169_v5  ;;  %v527_v63 = vmul.f32 0.27068216, %v5171_v19  ;;  %v528_v54 = vmul.f32 0.27068216, %v5173_v11 }
  0xa1   :  { %v523_v51 = vadd.f32 %v5573_v55, %v483_v43  ;;  %v529_v21 = vmul.f32 0.27068216, %v5175_v23  ;;  %v530_v0 = vmul.f32 0.27068216, %v5177_v24  ;;  %v531_v29 = vmul.f32 0.27068216, %v5179_v25 }
  0xa2   :  { %v532_v50 = vmul.f32 0.27068216, %v5181_v16  ;;  %v533_v18 = vmul.f32 0.27068216, %v12691_v30  ;;  %v534_v34 = vmul.f32 0.27068216, %v12693_v9  ;;  %v544_v15 = vadd.f32 %v524_v7, %v504_v38 }
  0xa3   :  { %v535_v5 = vmul.f32 0.27068216, %v12695_v17  ;;  %v536_v19 = vmul.f32 0.27068216, %v12697_v31  ;;  %v537_v11 = vmul.f32 0.27068216, %v12699_v42  ;;  %v545_v43 = vadd.f32 %v525_v45, %v505_v1 }
  0xa4   :  { %v538_v23 = vmul.f32 0.27068216, %v12720_v37  ;;  %v539_v24 = vmul.f32 0.27068216, %v12722_v20  ;;  %v540_v25 = vmul.f32 0.27068216, %v12724_v3  ;;  %v546_v55 = vadd.f32 %v526_v52, %v506_v48 }
  0xa5   :  { %v12728_v16 = vld [vmem:[#allocation34_spill] sm:$0xff]  ;;  %v12729_v30 = vld [vmem:[#allocation35_spill] sm:$0xff]  ;;  %v12730_v9 = vld [vmem:[#allocation36_spill] sm:$0xff]  ;;  %v547_v7 = vadd.f32 %v527_v63, %v507_v46  ;;  %v548_v17 = vadd.f32 %v528_v54, %v508_v22  ;;  %v549_v58 = vadd.f32 %v529_v21, %v509_v40  ;;  %v550_v31 = vadd.f32 %v530_v0, %v510_v33 }
  0xa6   :  { %v541_v8 = vmul.f32 0.27068216, %v12728_v16  ;;  %v542_v41 = vmul.f32 0.27068216, %v12729_v30  ;;  %v543_v38 = vmul.f32 0.27068216, %v12730_v9  ;;  %v551_v62 = vadd.f32 %v531_v29, %v511_v10 }
  0xa7   :  { %v552_v42 = vadd.f32 %v532_v50, %v512_v4  ;;  %v553_v1 = vadd.f32 %v533_v18, %v513_v26  ;;  %v554_v45 = vadd.f32 %v534_v34, %v514_v32  ;;  %v555_v37 = vadd.f32 %v535_v5, %v515_v47  ;;  %v12731_v22 = vld [vmem:[#allocation37_spill] sm:$0xff]  ;;  %v12732_v33 = vld [vmem:[#allocation38_spill] sm:$0xff]  ;;  %v12737_v26 = vld [vmem:[#allocation100_spill] sm:$0xff] }
  0xa8   :  { %v556_v49 = vadd.f32 %v536_v19, %v516_v56  ;;  %v557_v20 = vadd.f32 %v537_v11, %v517_v44  ;;  %v558_v57 = vadd.f32 %v538_v23, %v518_v13  ;;  %v559_v3 = vadd.f32 %v539_v24, %v519_v6  ;;  %v12734_v32 = vld [vmem:[#allocation97_spill] sm:$0xff]  ;;  %v12740_v13 = vld [vmem:[#allocation103_spill] sm:$0xff]  ;;  %v12744_v63 = vld [vmem:[#allocation84_spill] sm:$0xff] }
  0xa9   :  { %v560_v48 = vadd.f32 %v540_v25, %v520_v39  ;;  %v561_v52 = vadd.f32 %v541_v8, %v521_v2  ;;  %v562_v16 = vadd.f32 %v542_v41, %v522_v28  ;;  %v563_v36 = vadd.f32 %v543_v38, %v523_v51  ;;  %v12733_v8 = vld [vmem:[#allocation96_spill] sm:$0xff]  ;;  %v12735_v41 = vld [vmem:[#allocation98_spill] sm:$0xff]  ;;  %v12738_v44 = vld [vmem:[#allocation101_spill] sm:$0xff] }
  0xaa   :  { %v564_v59 = vmul.f32 0.21674532, %v12729_v30  ;;  %v565_v46 = vmul.f32 0.21674532, %v12730_v9  ;;  %v566_v40 = vmul.f32 0.21674532, %v12731_v22  ;;  %v568_v10 = vadd.f32 %v544_v15, %v5526_v12 }
  0xab   :  { %v567_v18 = vmul.f32 0.21674532, %v12732_v33  ;;  %v569_v5 = vadd.f32 %v545_v43, %v5531_v53  ;;  %v570_v19 = vadd.f32 %v546_v55, %v5534_v60  ;;  %v571_v11 = vadd.f32 %v547_v7, %v5537_v61  ;;  %v12736_v12 = vld [vmem:[#allocation99_spill] sm:$0xff]  ;;  %v12739_v60 = vld [vmem:[#allocation102_spill] sm:$0xff]  ;;  %v12742_v6 = vld [vmem:[#allocation33_spill] sm:$0xff] }
  0xac   :  { %v572_v23 = vadd.f32 %v548_v17, %v5540_v35  ;;  %v573_v24 = vadd.f32 %v549_v58, %v5543_v14  ;;  %v574_v25 = vadd.f32 %v550_v31, %v5546_v27  ;;  %v575_v56 = vadd.f32 %v551_v62, %v12733_v8  ;;  %v12741_v17 = vld [vmem:[#allocation104_spill] sm:$0xff]  ;;  %v12743_v39 = vld [vmem:[#allocation34_spill] sm:$0xff]  ;;  %v12745_v54 = vld [vmem:[#allocation85_spill] sm:$0xff] }
  0xad   :  { %v576_v47 = vadd.f32 %v552_v42, %v12734_v32  ;;  %v577_v15 = vadd.f32 %v553_v1, %v12735_v41  ;;  %v578_v4 = vadd.f32 %v554_v45, %v12736_v12  ;;  %v579_v53 = vadd.f32 %v555_v37, %v12737_v26  ;;  %v12748_v21 = vld [vmem:[#allocation86_spill] sm:$0xff]  ;;  %v12749_v29 = vld [vmem:[#allocation87_spill] sm:$0xff]  ;;  %v12750_v34 = vld [vmem:[#allocation88_spill] sm:$0xff] }
  0xae   :  { %v580_v55 = vadd.f32 %v556_v49, %v12738_v44  ;;  %v581_v61 = vadd.f32 %v557_v20, %v12739_v60  ;;  %v582_v35 = vadd.f32 %v558_v57, %v12740_v13  ;;  %v583_v14 = vadd.f32 %v559_v3, %v12741_v17  ;;  %v12751_v38 = vld [vmem:[#allocation89_spill] sm:$0xff]  ;;  %v12752_v1 = vld [vmem:[#allocation90_spill] sm:$0xff]  ;;  %v12757_v32 = vld [vmem:[#allocation95_spill] sm:$0xff] }
  0xaf   :  { %v584_v58 = vadd.f32 %v564_v59, %v560_v48  ;;  %v585_v27 = vadd.f32 %v565_v46, %v561_v52  ;;  %v586_v31 = vadd.f32 %v566_v40, %v562_v16  ;;  %v587_v62 = vadd.f32 %v567_v18, %v563_v36  ;;  %v12746_v59 = vld [vmem:[#allocation39_spill] sm:$0xff]  ;;  %v12747_v16 = vld [vmem:[#allocation40_spill] sm:$0xff] }
  0xb0   :  { %v588_v42 = vmul.f32 0.11128076, %v12742_v6  ;;  %v589_v2 = vmul.f32 0.11128076, %v12743_v39  ;;  %v590_v28 = vmul.f32 0.11128076, %v12729_v30  ;;  %v596_v37 = vadd.f32 %v568_v10, %v12744_v63 }
  0xb1   :  { %v591_v49 = vmul.f32 0.11128076, %v12730_v9  ;;  %v592_v20 = vmul.f32 0.11128076, %v12731_v22  ;;  %v593_v57 = vmul.f32 0.11128076, %v12732_v33  ;;  %v597_v3 = vadd.f32 %v569_v5, %v12745_v54 }
  0xb2   :  { %v594_v51 = vmul.f32 0.11128076, %v12746_v59  ;;  %v595_v36 = vmul.f32 0.11128076, %v12747_v16  ;;  %v598_v0 = vadd.f32 %v570_v19, %v12748_v21  ;;  %v599_v50 = vadd.f32 %v571_v11, %v12749_v29  ;;  %v12753_v48 = vld [vmem:[#allocation91_spill] sm:$0xff]  ;;  %v12754_v46 = vld [vmem:[#allocation92_spill] sm:$0xff] }
  0xb3   :  { %v600_v43 = vadd.f32 %v572_v23, %v12750_v34  ;;  %v601_v7 = vadd.f32 %v573_v24, %v12751_v38  ;;  %v602_v45 = vadd.f32 %v574_v25, %v12752_v1  ;;  %v603_v52 = vadd.f32 %v575_v56, %v12753_v48  ;;  %v12755_v10 = vld [vmem:[#allocation93_spill] sm:$0xff]  ;;  %v12756_v5 = vld [vmem:[#allocation94_spill] sm:$0xff]  ;;  %v12758_v13 = vld [vmem:[#allocation31_spill] sm:$0xff] }
  0xb4   :  { %v604_v40 = vadd.f32 %v576_v47, %v12754_v46  ;;  %v605_v18 = vadd.f32 %v577_v15, %v12755_v10  ;;  %v606_v8 = vadd.f32 %v578_v4, %v12756_v5  ;;  %v607_v41 = vadd.f32 %v579_v53, %v12757_v32  ;;  %v12759_v17 = vld [vmem:[#allocation32_spill] sm:$0xff]  ;;  %v12774_v21 = vld [vmem:[#allocation82_spill] sm:$0xff] }
  0xb5   :  { %v608_v12 = vadd.f32 %v588_v42, %v580_v55  ;;  %v609_v19 = vadd.f32 %v589_v2, %v581_v61  ;;  %v610_v26 = vadd.f32 %v590_v28, %v582_v35  ;;  %v611_v11 = vadd.f32 %v591_v49, %v583_v14  ;;  %v12760_v63 = vld [vmem:[#allocation76_spill] sm:$0xff]  ;;  %v12762_v61 = vld [vmem:[#allocation77_spill] sm:$0xff] }
  0xb6   :  { %v612_v44 = vadd.f32 %v592_v20, %v584_v58  ;;  %v613_v23 = vadd.f32 %v593_v57, %v585_v27  ;;  %v614_v60 = vadd.f32 %v594_v51, %v586_v31  ;;  %v615_v24 = vadd.f32 %v595_v36, %v587_v62  ;;  %v12764_v31 = vld [vmem:[#allocation78_spill] sm:$0xff]  ;;  %v12766_v2 = vld [vmem:[#allocation41_spill] sm:$0xff]  ;;  %v12768_v20 = vld [vmem:[#allocation79_spill] sm:$0xff] }
  0xb7   :  { %v616_v25 = vmul.f32 0.036632847, %v12758_v13  ;;  %v617_v56 = vmul.f32 0.036632847, %v12759_v17  ;;  %v618_v47 = vmul.f32 0.036632847, %v12742_v6  ;;  %v5655_v15 = vadd.f32 %v596_v37, %v12760_v63 }
  0xb8   :  { %v619_v4 = vmul.f32 0.036632847, %v12743_v39  ;;  %v620_v53 = vmul.f32 0.036632847, %v12729_v30  ;;  %v621_v55 = vmul.f32 0.036632847, %v12730_v9  ;;  %v5661_v35 = vadd.f32 %v597_v3, %v12762_v61 }
  0xb9   :  { %12761 = vst [vmem:[#allocation96_spill] sm:$0xff] %v5655_v15  ;;  %v622_v14 = vmul.f32 0.036632847, %v12731_v22  ;;  %v623_v58 = vmul.f32 0.036632847, %v12732_v33  ;;  %v5667_v62 = vadd.f32 %v598_v0, %v12764_v31  ;;  %v12767_v37 = vld [vmem:[#allocation42_spill] sm:$0xff]  ;;  %v5673_v57 = vadd.f32 %v599_v50, %v12768_v20 }
  0xba   :  { %12763 = vst [vmem:[#allocation97_spill] sm:$0xff] %v5661_v35  ;;  %v624_v27 = vmul.f32 0.036632847, %v12746_v59  ;;  %v625_v42 = vmul.f32 0.036632847, %v12747_v16  ;;  %v12770_v54 = vld [vmem:[#allocation80_spill] sm:$0xff]  ;;  %v5682_v29 = vadd.f32 %v602_v45, %v12774_v21  ;;  %v5687_v38 = vadd.f32 %v616_v25, %v604_v40 }
  0xbb   :  { %12765 = vst [vmem:[#allocation98_spill] sm:$0xff] %v5667_v62  ;;  %v626_v28 = vmul.f32 0.036632847, %v12766_v2  ;;  %v627_v49 = vmul.f32 0.036632847, %v12767_v37  ;;  %12769 = vst [vmem:[#allocation99_spill] sm:$0xff] %v5673_v57  ;;  %v5676_v3 = vadd.f32 %v600_v43, %v12770_v54  ;;  %v5689_v1 = vadd.f32 %v617_v56, %v605_v18 }
  0xbc   :  { %v12772_v51 = vld [vmem:[#allocation81_spill] sm:$0xff]  ;;  %v12775_v0 = vld [vmem:[#allocation83_spill] sm:$0xff]  ;;  %v5691_v48 = vadd.f32 %v618_v47, %v606_v8  ;;  %v5693_v50 = vadd.f32 %v619_v4, %v607_v41  ;;  %v5695_v46 = vadd.f32 %v620_v53, %v608_v12  ;;  %v5697_v43 = vadd.f32 %v621_v55, %v609_v19 }
  0xbd   :  { %12771 = vst [vmem:[#allocation100_spill] sm:$0xff] %v5676_v3  ;;  %v5679_v36 = vadd.f32 %v601_v7, %v12772_v51  ;;  %v5685_v34 = vadd.f32 %v603_v52, %v12775_v0  ;;  %12777 = vst [vmem:[#allocation103_spill] sm:$0xff] %v5689_v1  ;;  %v5699_v7 = vadd.f32 %v622_v14, %v610_v26  ;;  %v5702_v45 = vmul.f32 0.036632847, %v5655_v15  ;;  %v12785_v0 = vld [vmem:[#allocation75_spill] sm:$0xff] }
  0xbe   :  { %12778 = vst [vmem:[#allocation104_spill] sm:$0xff] %v5693_v50  ;;  %12779 = vst [vmem:[#allocation84_spill] sm:$0xff] %v5697_v43  ;;  %v5704_v10 = vadd.f32 %v623_v58, %v611_v11  ;;  %v5707_v52 = vmul.f32 0.036632847, %v5661_v35  ;;  %v5710_v40 = vmul.f32 0.036632847, %v5667_v62  ;;  %v5715_v5 = vadd.f32 %v624_v27, %v612_v44 }
  0xbf   :  { %12773 = vst [vmem:[#allocation101_spill] sm:$0xff] %v5679_v36  ;;  %12776 = vst [vmem:[#allocation102_spill] sm:$0xff] %v5685_v34  ;;  %v5713_v18 = vmul.f32 0.036632847, %v5673_v57  ;;  %v5718_v8 = vmul.f32 0.036632847, %v5676_v3  ;;  %v5726_v12 = vadd.f32 %v625_v42, %v613_v23  ;;  %v5737_v44 = vadd.f32 %v626_v28, %v614_v60 }
  0xc0   :  { %12780 = vst [vmem:[#allocation85_spill] sm:$0xff] %v5704_v10  ;;  %12781 = vst [vmem:[#allocation86_spill] sm:$0xff] %v5715_v5  ;;  %v5721_v32 = vmul.f32 0.036632847, %v5679_v36  ;;  %v5724_v41 = vmul.f32 0.036632847, %v5682_v29  ;;  %v5748_v47 = vadd.f32 %v627_v49, %v615_v24 }
  0xc1   :  { %12782 = vst [vmem:[#allocation87_spill] sm:$0xff] %v5726_v12  ;;  %v5729_v19 = vmul.f32 0.036632847, %v5685_v34  ;;  %v5732_v26 = vmul.f32 0.036632847, %v5687_v38  ;;  %12783 = vst [vmem:[#allocation88_spill] sm:$0xff] %v5737_v44 }
  0xc2   :  { %v5735_v11 = vmul.f32 0.036632847, %v5689_v1  ;;  %v5740_v25 = vmul.f32 0.036632847, %v5691_v48  ;;  %v5743_v56 = vmul.f32 0.036632847, %v5693_v50 }
  0xc3   :  { %v5746_v23 = vmul.f32 0.036632847, %v5695_v46  ;;  %12784 = vst [vmem:[#allocation89_spill] sm:$0xff] %v5748_v47  ;;  %v5751_v63 = vmul.f32 0.036632847, %v5697_v43  ;;  %v668_v55 = vrot.slane %v5655_v15, 1 }
  0xc4   :  { %v5754_v4 = vmul.f32 0.036632847, %v5699_v7  ;;  %v5757_v60 = vmul.f32 0.036632847, %v5704_v10  ;;  %v5760_v53 = vmul.f32 0.036632847, %v5715_v5 }
  0xc5   :  { %v669_v61 = vrot.slane %v5667_v62, 1  ;;  %v670_v14 = vrot.slane %v5676_v3, 1  ;;  %v671_v24 = vrot.slane %v5682_v29, 1  ;;  %v672_v58 = vrot.slane %v5687_v38, 1 }
  0xc6   :  { %v673_v27 = vrot.slane %v5691_v48, 1  ;;  %v674_v31 = vrot.slane %v5695_v46, 1  ;;  %v675_v42 = vrot.slane %v5699_v7, 1  ;;  %v676_v28 = vrot.slane %v5715_v5, 1 }
  0xc7   :  { %v678_v49 = vrot.slane %v5661_v35, 1  ;;  %v679_v20 = vrot.slane %v5673_v57, 1  ;;  %v680_v54 = vrot.slane %v5679_v36, 1  ;;  %v681_v51 = vrot.slane %v5685_v34, 1 }
  0xc8   :  { %v682_v21 = vrot.slane %v5689_v1, 1  ;;  %vm690_vm0 = vcmp.lt.s32.totalorder %v12785_v0, 7  ;;  %v683_v37 = vrot.slane %v5693_v50, 1  ;;  %v684_v2 = vrot.slane %v5697_v43, 1 }
  0xc9   :  { %v685_v16 = vrot.slane %v5704_v10, 1  ;;  %v686_v59 = vrot.slane %v5726_v12, 1  ;;  %v5782_v33 = vmul.f32 0.036632847, %v5726_v12  ;;  %v5785_v22 = vmul.f32 0.036632847, %v5737_v44 }
  0xca   :  { %v677_v9 = vrot.slane %v5737_v44, 1  ;;  %v687_v30 = vrot.slane %v5748_v47, 1  ;;  %v5790_v39 = vmul.f32 0.036632847, %v5748_v47  ;;  %v691_v6 = vsel %vm690_vm0, %v668_v55, %v678_v49 }
  0xcb   :  { %12786 = vst [vmem:[#allocation90_spill] sm:$0xff] %v5785_v22  ;;  %v692_v17 = vsel %vm690_vm0, %v669_v61, %v679_v20  ;;  %v693_v12 = vsel %vm690_vm0, %v670_v14, %v680_v54  ;;  %v694_v22 = vsel %vm690_vm0, %v671_v24, %v681_v51  ;;  %v695_v10 = vsel %vm690_vm0, %v672_v58, %v682_v21 }
  0xcc   :  { %12787 = vst [vmem:[#allocation91_spill] sm:$0xff] %v5790_v39  ;;  %v701_v39 = vsel %vm690_vm0, %v678_v49, %v668_v55  ;;  %v696_v47 = vsel %vm690_vm0, %v673_v27, %v683_v37  ;;  %v697_v44 = vsel %vm690_vm0, %v674_v31, %v684_v2  ;;  %v698_v13 = vsel %vm690_vm0, %v675_v42, %v685_v16 }
  0xcd   :  { %v699_v15 = vsel %vm690_vm0, %v676_v28, %v686_v59  ;;  %v700_v43 = vsel %vm690_vm0, %v677_v9, %v687_v30  ;;  %v702_v50 = vsel %vm690_vm0, %v679_v20, %v669_v61  ;;  %v703_v55 = vsel %vm690_vm0, %v680_v54, %v670_v14 }
  0xce   :  { %v711_v49 = vmul.f32 0.11128076, %v691_v6  ;;  %v704_v1 = vsel %vm690_vm0, %v681_v51, %v671_v24  ;;  %v705_v34 = vsel %vm690_vm0, %v682_v21, %v672_v58  ;;  %v706_v36 = vsel %vm690_vm0, %v683_v37, %v673_v27 }
  0xcf   :  { %v712_v57 = vmul.f32 0.11128076, %v701_v39  ;;  %v707_v35 = vsel %vm690_vm0, %v684_v2, %v674_v31  ;;  %v708_v61 = vsel %vm690_vm0, %v685_v16, %v675_v42  ;;  %v709_v14 = vsel %vm690_vm0, %v686_v59, %v676_v28 }
  0xd0   :  { %v713_v6 = vmul.f32 0.11128076, %v692_v17  ;;  %v710_v24 = vsel %vm690_vm0, %v687_v30, %v677_v9  ;;  %v714_v20 = vmul.f32 0.11128076, %v702_v50  ;;  %v715_v54 = vmul.f32 0.11128076, %v693_v12 }
  0xd1   :  { %v716_v58 = vmul.f32 0.11128076, %v703_v55  ;;  %v717_v51 = vmul.f32 0.11128076, %v694_v22  ;;  %v718_v21 = vmul.f32 0.11128076, %v704_v1  ;;  %v5834_v39 = vadd.f32 %v711_v49, %v5702_v45 }
  0xd2   :  { %v719_v37 = vmul.f32 0.11128076, %v695_v10  ;;  %v720_v2 = vmul.f32 0.11128076, %v705_v34  ;;  %v721_v27 = vmul.f32 0.11128076, %v696_v47  ;;  %v5837_v16 = vadd.f32 %v712_v57, %v5707_v52 }
  0xd3   :  { %v722_v31 = vmul.f32 0.11128076, %v706_v36  ;;  %v723_v59 = vmul.f32 0.11128076, %v697_v44  ;;  %v724_v17 = vmul.f32 0.11128076, %v707_v35  ;;  %v5840_v9 = vadd.f32 %v713_v6, %v5710_v40 }
  0xd4   :  { %v725_v42 = vmul.f32 0.11128076, %v698_v13  ;;  %v726_v30 = vmul.f32 0.11128076, %v708_v61  ;;  %v727_v50 = vmul.f32 0.11128076, %v699_v15  ;;  %v5843_v1 = vadd.f32 %v714_v20, %v5713_v18 }
  0xd5   :  { %v728_v22 = vmul.f32 0.11128076, %v709_v14  ;;  %v729_v45 = vmul.f32 0.11128076, %v700_v43  ;;  %v730_v10 = vmul.f32 0.11128076, %v710_v24  ;;  %v5846_v34 = vadd.f32 %v715_v54, %v5718_v8 }
  0xd6   :  { %v5849_v57 = vadd.f32 %v716_v58, %v5721_v32  ;;  %v5852_v35 = vadd.f32 %v717_v51, %v5724_v41  ;;  %v5855_v13 = vadd.f32 %v718_v21, %v5729_v19  ;;  %v5858_v15 = vadd.f32 %v719_v37, %v5732_v26  ;;  %v12791_v55 = vld [vmem:[#allocation102_spill] sm:$0xff]  ;;  %v12792_v61 = vld [vmem:[#allocation103_spill] sm:$0xff]  ;;  %v12793_v6 = vld [vmem:[#allocation104_spill] sm:$0xff] }
  0xd7   :  { %v5861_v36 = vadd.f32 %v720_v2, %v5735_v11  ;;  %v5864_v43 = vadd.f32 %v721_v27, %v5740_v25  ;;  %v5867_v52 = vadd.f32 %v722_v31, %v5743_v56  ;;  %v5870_v40 = vadd.f32 %v723_v59, %v5746_v23  ;;  %v12794_v20 = vld [vmem:[#allocation84_spill] sm:$0xff]  ;;  %v12796_v21 = vld [vmem:[#allocation85_spill] sm:$0xff]  ;;  %v12797_v2 = vld [vmem:[#allocation87_spill] sm:$0xff] }
  0xd8   :  { %v5873_v18 = vadd.f32 %v724_v17, %v5751_v63  ;;  %v5876_v8 = vadd.f32 %v725_v42, %v5754_v4  ;;  %v5879_v32 = vadd.f32 %v726_v30, %v5757_v60  ;;  %v5882_v41 = vadd.f32 %v727_v50, %v5760_v53  ;;  %v12788_v63 = vld [vmem:[#allocation97_spill] sm:$0xff]  ;;  %v12795_v58 = vld [vmem:[#allocation88_spill] sm:$0xff]  ;;  %v12799_v17 = vld [vmem:[#allocation90_spill] sm:$0xff] }
  0xd9   :  { %v5885_v12 = vadd.f32 %v728_v22, %v5782_v33  ;;  %v752_v19 = vrot.slane %v5667_v62, 2  ;;  %v753_v26 = vrot.slane %v5676_v3, 2  ;;  %v754_v11 = vrot.slane %v5682_v29, 2  ;;  %v12789_v33 = vld [vmem:[#allocation99_spill] sm:$0xff]  ;;  %v12790_v53 = vld [vmem:[#allocation101_spill] sm:$0xff]  ;;  %v12802_v22 = vld [vmem:[#allocation96_spill] sm:$0xff] }
  0xda   :  { %v755_v44 = vrot.slane %v5687_v38, 2  ;;  %v756_v25 = vrot.slane %v5691_v48, 2  ;;  %v757_v56 = vrot.slane %v5695_v46, 2  ;;  %v758_v23 = vrot.slane %v5699_v7, 2  ;;  %v12798_v31 = vld [vmem:[#allocation89_spill] sm:$0xff]  ;;  %v12800_v30 = vld [vmem:[#allocation91_spill] sm:$0xff] }
  0xdb   :  { %v759_v47 = vrot.slane %v5715_v5, 2  ;;  %v761_v4 = vrot.slane %v12788_v63, 2  ;;  %v762_v60 = vrot.slane %v12789_v33, 2  ;;  %v763_v28 = vrot.slane %v12790_v53, 2 }
  0xdc   :  { %v764_v49 = vrot.slane %v12791_v55, 2  ;;  %v765_v14 = vrot.slane %v12792_v61, 2  ;;  %v766_v24 = vrot.slane %v12793_v6, 2  ;;  %v767_v54 = vrot.slane %v12794_v20, 2 }
  0xdd   :  { %vm771_vm1 = vcmp.lt.s32.totalorder %v12785_v0, 6  ;;  %v760_v51 = vrot.slane %v12795_v58, 2  ;;  %v768_v37 = vrot.slane %v12796_v21, 2  ;;  %v769_v27 = vrot.slane %v12797_v2, 2 }
  0xde   :  { %v770_v59 = vrot.slane %v12798_v31, 2  ;;  %v749_v42 = vadd.f32 %v729_v45, %v12799_v17  ;;  %v5909_v50 = vadd.f32 %v730_v10, %v12800_v30  ;;  %v12803_v20 = vrot.slane %v12802_v22, 2 }
  0xdf   :  { %v773_v21 = vsel %vm771_vm1, %v752_v19, %v762_v60  ;;  %v774_v31 = vsel %vm771_vm1, %v753_v26, %v763_v28  ;;  %v775_v45 = vsel %vm771_vm1, %v754_v11, %v764_v49  ;;  %v776_v10 = vsel %vm771_vm1, %v755_v44, %v765_v14 }
  0xe0   :  { %12801 = vst [vmem:[#allocation92_spill] sm:$0xff] %v5909_v50  ;;  %v772_v58 = vsel %vm771_vm1, %v12803_v20, %v761_v4  ;;  %v777_v17 = vsel %vm771_vm1, %v756_v25, %v766_v24  ;;  %v778_v30 = vsel %vm771_vm1, %v757_v56, %v767_v54  ;;  %v782_v6 = vsel %vm771_vm1, %v761_v4, %v12803_v20 }
  0xe1   :  { %v779_v61 = vsel %vm771_vm1, %v758_v23, %v768_v37  ;;  %v780_v62 = vsel %vm771_vm1, %v759_v47, %v769_v27  ;;  %v781_v50 = vsel %vm771_vm1, %v760_v51, %v770_v59  ;;  %v783_v2 = vsel %vm771_vm1, %v762_v60, %v752_v19 }
  0xe2   :  { %v784_v55 = vsel %vm771_vm1, %v763_v28, %v753_v26  ;;  %v785_v22 = vsel %vm771_vm1, %v764_v49, %v754_v11  ;;  %v786_v4 = vsel %vm771_vm1, %v765_v14, %v755_v44  ;;  %v792_v20 = vmul.f32 0.21674532, %v772_v58 }
  0xe3   :  { %v787_v53 = vsel %vm771_vm1, %v766_v24, %v756_v25  ;;  %v788_v33 = vsel %vm771_vm1, %v767_v54, %v757_v56  ;;  %v789_v63 = vsel %vm771_vm1, %v768_v37, %v758_v23  ;;  %v793_v19 = vmul.f32 0.21674532, %v782_v6 }
  0xe4   :  { %v790_v26 = vsel %vm771_vm1, %v769_v27, %v759_v47  ;;  %v794_v60 = vmul.f32 0.21674532, %v773_v21  ;;  %v795_v28 = vmul.f32 0.21674532, %v783_v2  ;;  %v796_v11 = vmul.f32 0.21674532, %v774_v31 }
  0xe5   :  { %v791_v44 = vsel %vm771_vm1, %v770_v59, %v760_v51  ;;  %v797_v49 = vmul.f32 0.21674532, %v784_v55  ;;  %v798_v14 = vmul.f32 0.21674532, %v775_v45  ;;  %v799_v58 = vmul.f32 0.21674532, %v785_v22 }
  0xe6   :  { %v800_v25 = vmul.f32 0.21674532, %v776_v10  ;;  %v801_v24 = vmul.f32 0.21674532, %v786_v4  ;;  %v802_v5 = vmul.f32 0.21674532, %v777_v17  ;;  %v5958_v56 = vadd.f32 %v792_v20, %v5834_v39 }
  0xe7   :  { %v803_v23 = vmul.f32 0.21674532, %v787_v53  ;;  %v804_v6 = vmul.f32 0.21674532, %v778_v30  ;;  %v805_v54 = vmul.f32 0.21674532, %v788_v33  ;;  %v5961_v47 = vadd.f32 %v793_v19, %v5837_v16 }
  0xe8   :  { %v806_v21 = vmul.f32 0.21674532, %v779_v61  ;;  %v807_v37 = vmul.f32 0.21674532, %v789_v63  ;;  %v808_v2 = vmul.f32 0.21674532, %v780_v62  ;;  %v5964_v51 = vadd.f32 %v794_v60, %v5840_v9 }
  0xe9   :  { %v809_v55 = vmul.f32 0.21674532, %v790_v26  ;;  %v810_v27 = vmul.f32 0.21674532, %v781_v50  ;;  %v811_v31 = vmul.f32 0.21674532, %v791_v44  ;;  %v5967_v59 = vadd.f32 %v795_v28, %v5843_v1 }
  0xea   :  { %v5970_v39 = vadd.f32 %v796_v11, %v5846_v34  ;;  %v5973_v33 = vadd.f32 %v797_v49, %v5849_v57  ;;  %v5976_v16 = vadd.f32 %v798_v14, %v5852_v35  ;;  %v5979_v62 = vadd.f32 %v799_v58, %v5855_v13  ;;  %v12807_v61 = vld [vmem:[#allocation86_spill] sm:$0xff]  ;;  %v12808_v50 = vld [vmem:[#allocation97_spill] sm:$0xff]  ;;  %v12812_v4 = vld [vmem:[#allocation103_spill] sm:$0xff] }
  0xeb   :  { %v5982_v9 = vadd.f32 %v800_v25, %v5858_v15  ;;  %v5985_v63 = vadd.f32 %v801_v24, %v5861_v36  ;;  %v5988_v1 = vadd.f32 %v802_v5, %v5864_v43  ;;  %v5991_v34 = vadd.f32 %v803_v23, %v5867_v52  ;;  %v12811_v17 = vld [vmem:[#allocation102_spill] sm:$0xff]  ;;  %v12813_v19 = vld [vmem:[#allocation104_spill] sm:$0xff]  ;;  %v12815_v11 = vld [vmem:[#allocation85_spill] sm:$0xff] }
  0xec   :  { %v5994_v57 = vadd.f32 %v804_v6, %v5870_v40  ;;  %v5997_v35 = vadd.f32 %v805_v54, %v5873_v18  ;;  %v6000_v13 = vadd.f32 %v806_v21, %v5876_v8  ;;  %v6003_v15 = vadd.f32 %v807_v37, %v5879_v32  ;;  %v12814_v60 = vld [vmem:[#allocation84_spill] sm:$0xff]  ;;  %v12816_v49 = vld [vmem:[#allocation87_spill] sm:$0xff]  ;;  %v12820_v6 = vld [vmem:[#allocation89_spill] sm:$0xff] }
  0xed   :  { %v6006_v36 = vadd.f32 %v808_v2, %v5882_v41  ;;  %v6009_v5 = vadd.f32 %v809_v55, %v5885_v12  ;;  %v6011_v43 = vadd.f32 %v810_v27, %v749_v42  ;;  %v834_v52 = vrot.slane %v5676_v3, 3  ;;  %v12809_v12 = vld [vmem:[#allocation99_spill] sm:$0xff]  ;;  %v12810_v42 = vld [vmem:[#allocation101_spill] sm:$0xff]  ;;  %v12817_v58 = vld [vmem:[#allocation92_spill] sm:$0xff] }
  0xee   :  { %v835_v40 = vrot.slane %v5682_v29, 3  ;;  %v836_v18 = vrot.slane %v5687_v38, 3  ;;  %v837_v8 = vrot.slane %v5691_v48, 3  ;;  %v838_v53 = vrot.slane %v5695_v46, 3  ;;  %v12819_v24 = vld [vmem:[#allocation88_spill] sm:$0xff]  ;;  %v12823_v27 = vld [vmem:[#allocation98_spill] sm:$0xff] }
  0xef   :  { %12804 = vst [vmem:[#allocation93_spill] sm:$0xff] %v6006_v36  ;;  %12805 = vst [vmem:[#allocation94_spill] sm:$0xff] %v6009_v5  ;;  %v839_v32 = vrot.slane %v5699_v7, 3  ;;  %v840_v41 = vrot.slane %v12807_v61, 3  ;;  %v842_v22 = vrot.slane %v12808_v50, 3  ;;  %v843_v45 = vrot.slane %v12809_v12, 3 }
  0xf0   :  { %12806 = vst [vmem:[#allocation95_spill] sm:$0xff] %v6011_v43  ;;  %v844_v10 = vrot.slane %v12810_v42, 3  ;;  %v845_v30 = vrot.slane %v12811_v17, 3  ;;  %v846_v20 = vrot.slane %v12812_v4, 3  ;;  %vm852_vm2 = vcmp.lt.s32.totalorder %v12785_v0, 5  ;;  %v12821_v21 = vld [vmem:[#allocation96_spill] sm:$0xff] }
  0xf1   :  { %v847_v26 = vrot.slane %v12813_v19, 3  ;;  %v848_v28 = vrot.slane %v12814_v60, 3  ;;  %v849_v44 = vrot.slane %v12815_v11, 3  ;;  %v850_v14 = vrot.slane %v12816_v49, 3 }
  0xf2   :  { %v6031_v25 = vadd.f32 %v811_v31, %v12817_v58  ;;  %v841_v23 = vrot.slane %v12819_v24, 3  ;;  %v851_v54 = vrot.slane %v12820_v6, 3  ;;  %v12822_v2 = vrot.slane %v12821_v21, 3 }
  0xf3   :  { %v12824_v43 = vrot.slane %v12823_v27, 3  ;;  %v855_v58 = vsel %vm852_vm2, %v834_v52, %v844_v10  ;;  %v856_v37 = vsel %vm852_vm2, %v835_v40, %v845_v30  ;;  %v859_v31 = vsel %vm852_vm2, %v838_v53, %v848_v28 }
  0xf4   :  { %12818 = vst [vmem:[#allocation76_spill] sm:$0xff] %v6031_v25  ;;  %v853_v55 = vsel %vm852_vm2, %v12822_v2, %v842_v22  ;;  %v857_v25 = vsel %vm852_vm2, %v836_v18, %v846_v20  ;;  %v863_v6 = vsel %vm852_vm2, %v842_v22, %v12822_v2  ;;  %v860_v36 = vsel %vm852_vm2, %v839_v32, %v849_v44 }
  0xf5   :  { %v854_v5 = vsel %vm852_vm2, %v12824_v43, %v843_v45  ;;  %v858_v43 = vsel %vm852_vm2, %v837_v8, %v847_v26  ;;  %v861_v3 = vsel %vm852_vm2, %v840_v41, %v850_v14  ;;  %v862_v49 = vsel %vm852_vm2, %v841_v23, %v851_v54 }
  0xf6   :  { %v12825_v21 = vrot.slane %v12823_v27, 3  ;;  %v865_v2 = vsel %vm852_vm2, %v844_v10, %v834_v52  ;;  %v873_v11 = vmul.f32 0.27068216, %v853_v55  ;;  %v866_v24 = vsel %vm852_vm2, %v845_v30, %v835_v40 }
  0xf7   :  { %v867_v60 = vsel %vm852_vm2, %v846_v20, %v836_v18  ;;  %v868_v19 = vsel %vm852_vm2, %v847_v26, %v837_v8  ;;  %v874_v4 = vmul.f32 0.27068216, %v863_v6  ;;  %v869_v27 = vsel %vm852_vm2, %v848_v28, %v838_v53 }
  0xf8   :  { %v864_v22 = vsel %vm852_vm2, %v843_v45, %v12825_v21  ;;  %v870_v45 = vsel %vm852_vm2, %v849_v44, %v839_v32  ;;  %v871_v52 = vsel %vm852_vm2, %v850_v14, %v840_v41  ;;  %v875_v10 = vmul.f32 0.27068216, %v854_v5 }
  0xf9   :  { %v872_v40 = vsel %vm852_vm2, %v851_v54, %v841_v23  ;;  %v876_v30 = vmul.f32 0.27068216, %v864_v22  ;;  %v877_v21 = vmul.f32 0.27068216, %v855_v58  ;;  %v878_v18 = vmul.f32 0.27068216, %v865_v2 }
  0xfa   :  { %v879_v20 = vmul.f32 0.27068216, %v856_v37  ;;  %v880_v55 = vmul.f32 0.27068216, %v866_v24  ;;  %v881_v8 = vmul.f32 0.27068216, %v857_v25  ;;  %v6087_v26 = vadd.f32 %v873_v11, %v5958_v56 }
  0xfb   :  { %v882_v53 = vmul.f32 0.27068216, %v867_v60  ;;  %v883_v28 = vmul.f32 0.27068216, %v858_v43  ;;  %v884_v6 = vmul.f32 0.27068216, %v868_v19  ;;  %v6090_v32 = vadd.f32 %v874_v4, %v5961_v47 }
  0xfc   :  { %v885_v41 = vmul.f32 0.27068216, %v859_v31  ;;  %v886_v5 = vmul.f32 0.27068216, %v869_v27  ;;  %v887_v44 = vmul.f32 0.27068216, %v860_v36  ;;  %v6093_v14 = vadd.f32 %v875_v10, %v5964_v51 }
  0xfd   :  { %v888_v23 = vmul.f32 0.27068216, %v870_v45  ;;  %v889_v54 = vmul.f32 0.27068216, %v861_v3  ;;  %v890_v37 = vmul.f32 0.27068216, %v871_v52  ;;  %v6096_v25 = vadd.f32 %v876_v30, %v5967_v59 }
  0xfe   :  { %v891_v56 = vmul.f32 0.27068216, %v862_v49  ;;  %v892_v11 = vmul.f32 0.27068216, %v872_v40  ;;  %v6099_v60 = vadd.f32 %v877_v21, %v5970_v39  ;;  %v6102_v47 = vadd.f32 %v878_v18, %v5973_v33  ;;  %v12826_v27 = vld [vmem:[#allocation103_spill] sm:$0xff]  ;;  %v12827_v58 = vld [vmem:[#allocation104_spill] sm:$0xff] }
  0xff   :  { %v6105_v4 = vadd.f32 %v879_v20, %v5976_v16  ;;  %v6108_v51 = vadd.f32 %v880_v55, %v5979_v62  ;;  %v6111_v3 = vadd.f32 %v881_v8, %v5982_v9  ;;  %v6114_v59 = vadd.f32 %v882_v53, %v5985_v63  ;;  %v12828_v22 = vld [vmem:[#allocation84_spill] sm:$0xff]  ;;  %v12830_v10 = vld [vmem:[#allocation85_spill] sm:$0xff]  ;;  %v12831_v30 = vld [vmem:[#allocation87_spill] sm:$0xff] }
 0x100   :  { %v6117_v36 = vadd.f32 %v883_v28, %v5988_v1  ;;  %v6120_v39 = vadd.f32 %v884_v6, %v5991_v34  ;;  %v6123_v33 = vadd.f32 %v885_v41, %v5994_v57  ;;  %v6126_v16 = vadd.f32 %v886_v5, %v5997_v35  ;;  %v12829_v45 = vld [vmem:[#allocation88_spill] sm:$0xff]  ;;  %v12832_v18 = vld [vmem:[#allocation89_spill] sm:$0xff]  ;;  %v12834_v53 = vld [vmem:[#allocation94_spill] sm:$0xff] }
 0x101   :  { %v6129_v62 = vadd.f32 %v887_v44, %v6000_v13  ;;  %v6132_v9 = vadd.f32 %v888_v23, %v6003_v15  ;;  %v916_v63 = vrot.slane %v5682_v29, 4  ;;  %v917_v1 = vrot.slane %v5687_v38, 4  ;;  %v12833_v55 = vld [vmem:[#allocation93_spill] sm:$0xff]  ;;  %v12836_v6 = vld [vmem:[#allocation95_spill] sm:$0xff]  ;;  %v12838_v5 = vld [vmem:[#allocation76_spill] sm:$0xff] }
 0x102   :  { %v918_v19 = vrot.slane %v5691_v48, 4  ;;  %v919_v34 = vrot.slane %v5695_v46, 4  ;;  %v920_v57 = vrot.slane %v5699_v7, 4  ;;  %v921_v49 = vrot.slane %v12807_v61, 4  ;;  %v12840_v23 = vld [vmem:[#allocation96_spill] sm:$0xff] }
 0x103   :  { %v923_v35 = vrot.slane %v12808_v50, 4  ;;  %v924_v13 = vrot.slane %v12809_v12, 4  ;;  %v925_v24 = vrot.slane %v12810_v42, 4  ;;  %v926_v15 = vrot.slane %v12811_v17, 4 }
 0x104   :  { %v927_v31 = vrot.slane %v12826_v27, 4  ;;  %v928_v43 = vrot.slane %v12827_v58, 4  ;;  %v929_v2 = vrot.slane %v12828_v22, 4  ;;  %vm933_vm3 = vcmp.lt.s32.totalorder %v12785_v0, 4 }
 0x105   :  { %v922_v52 = vrot.slane %v12829_v45, 4  ;;  %v930_v40 = vrot.slane %v12830_v10, 4  ;;  %v931_v21 = vrot.slane %v12831_v30, 4  ;;  %v932_v20 = vrot.slane %v12832_v18, 4  ;;  %v12842_v10 = vld [vmem:[#allocation98_spill] sm:$0xff] }
 0x106   :  { %v909_v8 = vadd.f32 %v889_v54, %v12833_v55  ;;  %v6154_v28 = vadd.f32 %v890_v37, %v12834_v53  ;;  %v6157_v41 = vadd.f32 %v891_v56, %v12836_v6  ;;  %v6160_v44 = vadd.f32 %v892_v11, %v12838_v5  ;;  %v12844_v54 = vld [vmem:[#allocation100_spill] sm:$0xff] }
 0x107   :  { %v12841_v22 = vrot.slane %v12840_v23, 4  ;;  %v12843_v30 = vrot.slane %v12842_v10, 4  ;;  %v12845_v55 = vrot.slane %v12844_v54, 4  ;;  %v937_v56 = vsel %vm933_vm3, %v916_v63, %v926_v15 }
 0x108   :  { %12835 = vst [vmem:[#allocation77_spill] sm:$0xff] %v6154_v28  ;;  %12837 = vst [vmem:[#allocation78_spill] sm:$0xff] %v6157_v41  ;;  %v938_v11 = vsel %vm933_vm3, %v917_v1, %v927_v31  ;;  %v939_v53 = vsel %vm933_vm3, %v918_v19, %v928_v43  ;;  %v12846_v6 = vrot.slane %v12840_v23, 4  ;;  %v941_v5 = vsel %vm933_vm3, %v920_v57, %v930_v40 }
 0x109   :  { %12839 = vst [vmem:[#allocation79_spill] sm:$0xff] %v6160_v44  ;;  %v934_v45 = vsel %vm933_vm3, %v12841_v22, %v923_v35  ;;  %v935_v18 = vsel %vm933_vm3, %v12843_v30, %v924_v13  ;;  %v936_v37 = vsel %vm933_vm3, %v12845_v55, %v925_v24  ;;  %v940_v22 = vsel %vm933_vm3, %v919_v34, %v929_v2 }
 0x10a   :  { %v944_v30 = vsel %vm933_vm3, %v923_v35, %v12846_v6  ;;  %v942_v55 = vsel %vm933_vm3, %v921_v49, %v931_v21  ;;  %v943_v44 = vsel %vm933_vm3, %v922_v52, %v932_v20  ;;  %v12847_v41 = vrot.slane %v12842_v10, 4 }
 0x10b   :  { %v12848_v58 = vrot.slane %v12844_v54, 4  ;;  %v947_v35 = vsel %vm933_vm3, %v926_v15, %v916_v63  ;;  %v948_v6 = vsel %vm933_vm3, %v927_v31, %v917_v1  ;;  %v954_v17 = vmul.f32 0.21674532, %v934_v45 }
 0x10c   :  { %v945_v28 = vsel %vm933_vm3, %v924_v13, %v12847_v41  ;;  %v949_v42 = vsel %vm933_vm3, %v928_v43, %v918_v19  ;;  %v950_v12 = vsel %vm933_vm3, %v929_v2, %v919_v34  ;;  %v951_v13 = vsel %vm933_vm3, %v930_v40, %v920_v57 }
 0x10d   :  { %v946_v27 = vsel %vm933_vm3, %v925_v24, %v12848_v58  ;;  %v955_v41 = vmul.f32 0.21674532, %v944_v30  ;;  %v952_v24 = vsel %vm933_vm3, %v931_v21, %v921_v49  ;;  %v956_v58 = vmul.f32 0.21674532, %v935_v18 }
 0x10e   :  { %v957_v50 = vmul.f32 0.21674532, %v945_v28  ;;  %v958_v63 = vmul.f32 0.21674532, %v936_v37  ;;  %v953_v1 = vsel %vm933_vm3, %v932_v20, %v922_v52  ;;  %v959_v15 = vmul.f32 0.21674532, %v946_v27 }
 0x10f   :  { %v960_v31 = vmul.f32 0.21674532, %v937_v56  ;;  %v961_v45 = vmul.f32 0.21674532, %v947_v35  ;;  %v962_v19 = vmul.f32 0.21674532, %v938_v11  ;;  %v6215_v34 = vadd.f32 %v954_v17, %v6087_v26 }
 0x110   :  { %v963_v43 = vmul.f32 0.21674532, %v948_v6  ;;  %v964_v61 = vmul.f32 0.21674532, %v939_v53  ;;  %v965_v57 = vmul.f32 0.21674532, %v949_v42  ;;  %v6218_v49 = vadd.f32 %v955_v41, %v6090_v32 }
 0x111   :  { %v966_v2 = vmul.f32 0.21674532, %v940_v22  ;;  %v967_v40 = vmul.f32 0.21674532, %v950_v12  ;;  %v968_v21 = vmul.f32 0.21674532, %v941_v5  ;;  %v6221_v52 = vadd.f32 %v956_v58, %v6093_v14 }
 0x112   :  { %v969_v18 = vmul.f32 0.21674532, %v951_v13  ;;  %v970_v28 = vmul.f32 0.21674532, %v942_v55  ;;  %v971_v27 = vmul.f32 0.21674532, %v952_v24  ;;  %v6224_v56 = vadd.f32 %v957_v50, %v6096_v25 }
 0x113   :  { %v972_v20 = vmul.f32 0.21674532, %v943_v44  ;;  %v973_v37 = vmul.f32 0.21674532, %v953_v1  ;;  %v6227_v17 = vadd.f32 %v958_v63, %v6099_v60  ;;  %v6230_v12 = vadd.f32 %v959_v15, %v6102_v47  ;;  %v12851_v22 = vld [vmem:[#allocation99_spill] sm:$0xff]  ;;  %v12852_v5 = vld [vmem:[#allocation101_spill] sm:$0xff] }
 0x114   :  { %v6233_v42 = vadd.f32 %v960_v31, %v6105_v4  ;;  %v6236_v26 = vadd.f32 %v961_v45, %v6108_v51  ;;  %v6239_v32 = vadd.f32 %v962_v19, %v6111_v3  ;;  %v6242_v14 = vadd.f32 %v963_v43, %v6114_v59  ;;  %v12853_v35 = vld [vmem:[#allocation102_spill] sm:$0xff]  ;;  %v12854_v13 = vld [vmem:[#allocation103_spill] sm:$0xff]  ;;  %v12855_v24 = vld [vmem:[#allocation104_spill] sm:$0xff] }
 0x115   :  { %v6245_v50 = vadd.f32 %v964_v61, %v6117_v36  ;;  %v6248_v25 = vadd.f32 %v965_v57, %v6120_v39  ;;  %v6251_v60 = vadd.f32 %v966_v2, %v6123_v33  ;;  %v6254_v47 = vadd.f32 %v967_v40, %v6126_v16  ;;  %v12856_v63 = vld [vmem:[#allocation84_spill] sm:$0xff]  ;;  %v12857_v15 = vld [vmem:[#allocation85_spill] sm:$0xff]  ;;  %v12858_v45 = vld [vmem:[#allocation87_spill] sm:$0xff] }
 0x116   :  { %v6257_v4 = vadd.f32 %v968_v21, %v6129_v62  ;;  %v6260_v51 = vadd.f32 %v969_v18, %v6132_v9  ;;  %v6262_v3 = vadd.f32 %v970_v28, %v909_v8  ;;  %v994_v61 = vrot.slane %v12840_v23, 5  ;;  %v12849_v9 = vld [vmem:[#allocation86_spill] sm:$0xff]  ;;  %v12850_v8 = vld [vmem:[#allocation97_spill] sm:$0xff]  ;;  %v12862_v21 = vld [vmem:[#allocation88_spill] sm:$0xff] }
 0x117   :  { %v995_v59 = vrot.slane %v12842_v10, 5  ;;  %v996_v36 = vrot.slane %v12844_v54, 5  ;;  %v997_v39 = vrot.slane %v5682_v29, 5  ;;  %v998_v33 = vrot.slane %v5687_v38, 5  ;;  %v12859_v43 = vld [vmem:[#allocation77_spill] sm:$0xff]  ;;  %v12860_v2 = vld [vmem:[#allocation78_spill] sm:$0xff] }
 0x118   :  { %v999_v16 = vrot.slane %v5691_v48, 5  ;;  %v1000_v62 = vrot.slane %v5695_v46, 5  ;;  %v1001_v44 = vrot.slane %v5699_v7, 5  ;;  %v1002_v11 = vrot.slane %v12849_v9, 5  ;;  %v12863_v28 = vld [vmem:[#allocation89_spill] sm:$0xff] }
 0x119   :  { %v1004_v53 = vrot.slane %v12850_v8, 5  ;;  %v1005_v30 = vrot.slane %v12851_v22, 5  ;;  %v1006_v55 = vrot.slane %v12852_v5, 5  ;;  %v1007_v6 = vrot.slane %v12853_v35, 5  ;;  %v12864_v35 = vld [vmem:[#allocation79_spill] sm:$0xff] }
 0x11a   :  { %v1008_v41 = vrot.slane %v12854_v13, 5  ;;  %vm1014_vm4 = vcmp.lt.s32.totalorder %v12785_v0, 3  ;;  %v1009_v58 = vrot.slane %v12855_v24, 5  ;;  %v1010_v1 = vrot.slane %v12856_v63, 5 }
 0x11b   :  { %v1011_v31 = vrot.slane %v12857_v15, 5  ;;  %v1012_v19 = vrot.slane %v12858_v45, 5  ;;  %v6284_v57 = vadd.f32 %v971_v27, %v12859_v43  ;;  %v6287_v40 = vadd.f32 %v972_v20, %v12860_v2 }
 0x11c   :  { %v1003_v18 = vrot.slane %v12862_v21, 5  ;;  %v1013_v13 = vrot.slane %v12863_v28, 5  ;;  %v6292_v5 = vadd.f32 %v973_v37, %v12864_v35  ;;  %v1015_v63 = vsel %vm1014_vm4, %v994_v61, %v1004_v53 }
 0x11d   :  { %12861 = vst [vmem:[#allocation80_spill] sm:$0xff] %v6287_v40  ;;  %v1016_v15 = vsel %vm1014_vm4, %v995_v59, %v1005_v30  ;;  %v1017_v27 = vsel %vm1014_vm4, %v996_v36, %v1006_v55  ;;  %v1018_v20 = vsel %vm1014_vm4, %v997_v39, %v1007_v6  ;;  %v1019_v43 = vsel %vm1014_vm4, %v998_v33, %v1008_v41 }
 0x11e   :  { %12865 = vst [vmem:[#allocation81_spill] sm:$0xff] %v6292_v5  ;;  %v1025_v37 = vsel %vm1014_vm4, %v1004_v53, %v994_v61  ;;  %v1020_v35 = vsel %vm1014_vm4, %v999_v16, %v1009_v58  ;;  %v1021_v2 = vsel %vm1014_vm4, %v1000_v62, %v1010_v1  ;;  %v1022_v45 = vsel %vm1014_vm4, %v1001_v44, %v1011_v31 }
 0x11f   :  { %v1023_v23 = vsel %vm1014_vm4, %v1002_v11, %v1012_v19  ;;  %v1024_v5 = vsel %vm1014_vm4, %v1003_v18, %v1013_v13  ;;  %v1026_v40 = vsel %vm1014_vm4, %v1005_v30, %v995_v59  ;;  %v1027_v61 = vsel %vm1014_vm4, %v1006_v55, %v996_v36 }
 0x120   :  { %v1035_v53 = vmul.f32 0.11128076, %v1015_v63  ;;  %v1028_v28 = vsel %vm1014_vm4, %v1007_v6, %v997_v39  ;;  %v1029_v21 = vsel %vm1014_vm4, %v1008_v41, %v998_v33  ;;  %v1030_v24 = vsel %vm1014_vm4, %v1009_v58, %v999_v16 }
 0x121   :  { %v1036_v22 = vmul.f32 0.11128076, %v1025_v37  ;;  %v1031_v8 = vsel %vm1014_vm4, %v1010_v1, %v1000_v62  ;;  %v1032_v59 = vsel %vm1014_vm4, %v1011_v31, %v1001_v44  ;;  %v1033_v36 = vsel %vm1014_vm4, %v1012_v19, %v1002_v11 }
 0x122   :  { %v1037_v30 = vmul.f32 0.11128076, %v1016_v15  ;;  %v1034_v39 = vsel %vm1014_vm4, %v1013_v13, %v1003_v18  ;;  %v1038_v55 = vmul.f32 0.11128076, %v1026_v40  ;;  %v1039_v6 = vmul.f32 0.11128076, %v1017_v27 }
 0x123   :  { %v1040_v33 = vmul.f32 0.11128076, %v1027_v61  ;;  %v1041_v41 = vmul.f32 0.11128076, %v1018_v20  ;;  %v1042_v63 = vmul.f32 0.11128076, %v1028_v28  ;;  %v6336_v58 = vadd.f32 %v1035_v53, %v6215_v34 }
 0x124   :  { %v1043_v16 = vmul.f32 0.11128076, %v1019_v43  ;;  %v1044_v62 = vmul.f32 0.11128076, %v1029_v21  ;;  %v1045_v1 = vmul.f32 0.11128076, %v1020_v35  ;;  %v6339_v44 = vadd.f32 %v1036_v22, %v6218_v49 }
 0x125   :  { %v1046_v37 = vmul.f32 0.11128076, %v1030_v24  ;;  %v1047_v11 = vmul.f32 0.11128076, %v1021_v2  ;;  %v1048_v15 = vmul.f32 0.11128076, %v1031_v8  ;;  %v6342_v13 = vadd.f32 %v1037_v30, %v6221_v52 }
 0x126   :  { %v1049_v31 = vmul.f32 0.11128076, %v1022_v45  ;;  %v1050_v19 = vmul.f32 0.11128076, %v1032_v59  ;;  %v1051_v40 = vmul.f32 0.11128076, %v1023_v23  ;;  %v6345_v28 = vadd.f32 %v1038_v55, %v6224_v56 }
 0x127   :  { %v1052_v18 = vmul.f32 0.11128076, %v1033_v36  ;;  %v1053_v34 = vmul.f32 0.11128076, %v1024_v5  ;;  %v1054_v27 = vmul.f32 0.11128076, %v1034_v39  ;;  %v6348_v21 = vadd.f32 %v1039_v6, %v6227_v17 }
 0x128   :  { %v6351_v49 = vadd.f32 %v1040_v33, %v6230_v12  ;;  %v6354_v8 = vadd.f32 %v1041_v41, %v6233_v42  ;;  %v6357_v52 = vadd.f32 %v1042_v63, %v6236_v26  ;;  %v6360_v23 = vadd.f32 %v1043_v16, %v6239_v32  ;;  %v12866_v45 = vld [vmem:[#allocation97_spill] sm:$0xff]  ;;  %v12869_v2 = vld [vmem:[#allocation102_spill] sm:$0xff]  ;;  %v12870_v61 = vld [vmem:[#allocation103_spill] sm:$0xff] }
 0x129   :  { %v6363_v56 = vadd.f32 %v1044_v62, %v6242_v14  ;;  %v6366_v22 = vadd.f32 %v1045_v1, %v6245_v50  ;;  %v6369_v17 = vadd.f32 %v1046_v37, %v6248_v25  ;;  %v6372_v12 = vadd.f32 %v1047_v11, %v6251_v60  ;;  %v12868_v35 = vld [vmem:[#allocation101_spill] sm:$0xff]  ;;  %v12871_v53 = vld [vmem:[#allocation104_spill] sm:$0xff]  ;;  %v12875_v30 = vld [vmem:[#allocation87_spill] sm:$0xff] }
 0x12a   :  { %v6375_v42 = vadd.f32 %v1048_v15, %v6254_v47  ;;  %v6378_v26 = vadd.f32 %v1049_v31, %v6257_v4  ;;  %v6381_v32 = vadd.f32 %v1050_v19, %v6260_v51  ;;  %v6384_v14 = vadd.f32 %v1051_v40, %v6262_v3  ;;  %v12872_v59 = vld [vmem:[#allocation84_spill] sm:$0xff]  ;;  %v12874_v36 = vld [vmem:[#allocation85_spill] sm:$0xff]  ;;  %v12879_v62 = vld [vmem:[#allocation43_spill] sm:$0xff] }
 0x12b   :  { %v6387_v50 = vadd.f32 %v1052_v18, %v6284_v57  ;;  %v1076_v25 = vrot.slane %v12842_v10, 6  ;;  %v1077_v60 = vrot.slane %v12844_v54, 6  ;;  %v1078_v5 = vrot.slane %v5682_v29, 6  ;;  %v12867_v57 = vld [vmem:[#allocation99_spill] sm:$0xff]  ;;  %v12876_v55 = vld [vmem:[#allocation89_spill] sm:$0xff]  ;;  %v12877_v33 = vld [vmem:[#allocation80_spill] sm:$0xff] }
 0x12c   :  { %v1079_v47 = vrot.slane %v5687_v38, 6  ;;  %v1080_v4 = vrot.slane %v5691_v48, 6  ;;  %v1081_v24 = vrot.slane %v5695_v46, 6  ;;  %v1082_v51 = vrot.slane %v5699_v7, 6  ;;  %v12873_v46 = vld [vmem:[#allocation88_spill] sm:$0xff]  ;;  %v12878_v63 = vld [vmem:[#allocation81_spill] sm:$0xff] }
 0x12d   :  { %v1083_v3 = vrot.slane %v12849_v9, 6  ;;  %v1085_v20 = vrot.slane %v12866_v45, 6  ;;  %v1086_v43 = vrot.slane %v12867_v57, 6  ;;  %v1087_v10 = vrot.slane %v12868_v35, 6  ;;  %v12880_v37 = vld [vmem:[#allocation44_spill] sm:$0xff] }
 0x12e   :  { %v1088_v54 = vrot.slane %v12869_v2, 6  ;;  %v1089_v29 = vrot.slane %v12870_v61, 6  ;;  %v1090_v38 = vrot.slane %v12871_v53, 6  ;;  %v1091_v48 = vrot.slane %v12872_v59, 6  ;;  %v12881_v15 = vld [vmem:[#allocation96_spill] sm:$0xff] }
 0x12f   :  { %vm1095_vm5 = vcmp.lt.s32.totalorder %v12785_v0, 2  ;;  %v1084_v7 = vrot.slane %v12873_v46, 6  ;;  %v1092_v9 = vrot.slane %v12874_v36, 6  ;;  %v1093_v39 = vrot.slane %v12875_v30, 6 }
 0x130   :  { %v1094_v6 = vrot.slane %v12876_v55, 6  ;;  %v6410_v41 = vadd.f32 %v1053_v34, %v12877_v33  ;;  %v6413_v16 = vadd.f32 %v1054_v27, %v12878_v63  ;;  %v6416_v1 = vmul.f32 0.036632847, %v12879_v62 }
 0x131   :  { %v6419_v11 = vmul.f32 0.036632847, %v12880_v37  ;;  %v12882_v31 = vrot.slane %v12881_v15, 6  ;;  %v1097_v40 = vsel %vm1095_vm5, %v1076_v25, %v1086_v43  ;;  %v1098_v18 = vsel %vm1095_vm5, %v1077_v60, %v1087_v10 }
 0x132   :  { %v1099_v34 = vsel %vm1095_vm5, %v1078_v5, %v1088_v54  ;;  %v1100_v27 = vsel %vm1095_vm5, %v1079_v47, %v1089_v29  ;;  %v1101_v45 = vsel %vm1095_vm5, %v1080_v4, %v1090_v38  ;;  %v1102_v57 = vsel %vm1095_vm5, %v1081_v24, %v1091_v48 }
 0x133   :  { %v1096_v19 = vsel %vm1095_vm5, %v12882_v31, %v1085_v20  ;;  %v12883_v35 = vmov %v12882_v31  ;;  %v1103_v61 = vsel %vm1095_vm5, %v1082_v51, %v1092_v9  ;;  %v1104_v53 = vsel %vm1095_vm5, %v1083_v3, %v1093_v39 }
 0x134   :  { %v1106_v2 = vsel %vm1095_vm5, %v1085_v20, %v12883_v35  ;;  %v1105_v59 = vsel %vm1095_vm5, %v1084_v7, %v1094_v6  ;;  %v1107_v46 = vsel %vm1095_vm5, %v1086_v43, %v1076_v25  ;;  %v1108_v36 = vsel %vm1095_vm5, %v1087_v10, %v1077_v60 }
 0x135   :  { %v1109_v30 = vsel %vm1095_vm5, %v1088_v54, %v1078_v5  ;;  %v1110_v20 = vsel %vm1095_vm5, %v1089_v29, %v1079_v47  ;;  %v1116_v55 = vmul.f32 0.036632847, %v1096_v19  ;;  %v1111_v33 = vsel %vm1095_vm5, %v1090_v38, %v1080_v4 }
 0x136   :  { %v1112_v63 = vsel %vm1095_vm5, %v1091_v48, %v1081_v24  ;;  %v1113_v15 = vsel %vm1095_vm5, %v1092_v9, %v1082_v51  ;;  %v1117_v25 = vmul.f32 0.036632847, %v1106_v2  ;;  %v1114_v60 = vsel %vm1095_vm5, %v1093_v39, %v1083_v3 }
 0x137   :  { %v1118_v43 = vmul.f32 0.036632847, %v1097_v40  ;;  %v1119_v10 = vmul.f32 0.036632847, %v1107_v46  ;;  %v1120_v5 = vmul.f32 0.036632847, %v1098_v18  ;;  %v1115_v47 = vsel %vm1095_vm5, %v1094_v6, %v1084_v7 }
 0x138   :  { %v1121_v54 = vmul.f32 0.036632847, %v1108_v36  ;;  %v1122_v29 = vmul.f32 0.036632847, %v1099_v34  ;;  %v1123_v31 = vmul.f32 0.036632847, %v1109_v30  ;;  %v6466_v24 = vadd.f32 %v1116_v55, %v6336_v58 }
 0x139   :  { %v1124_v4 = vmul.f32 0.036632847, %v1100_v27  ;;  %v1125_v38 = vmul.f32 0.036632847, %v1110_v20  ;;  %v1126_v19 = vmul.f32 0.036632847, %v1101_v45  ;;  %v6469_v3 = vadd.f32 %v1117_v25, %v6339_v44 }
 0x13a   :  { %12884 = vst [vmem:[#allocation82_spill] sm:$0xff] %v6466_v24  ;;  %v1127_v51 = vmul.f32 0.036632847, %v1111_v33  ;;  %v1128_v48 = vmul.f32 0.036632847, %v1102_v57  ;;  %v6472_v7 = vadd.f32 %v1118_v43, %v6342_v13  ;;  %v6475_v45 = vadd.f32 %v1119_v10, %v6345_v28  ;;  %v12902_v30 = vld [vmem:[#allocation49_spill] sm:$0xff] }
 0x13b   :  { %v1129_v9 = vmul.f32 0.036632847, %v1112_v63  ;;  %12885 = vst [vmem:[#allocation83_spill] sm:$0xff] %v6469_v3  ;;  %v1130_v39 = vmul.f32 0.036632847, %v1103_v61  ;;  %v6478_v58 = vadd.f32 %v1120_v5, %v6348_v21  ;;  %v6481_v57 = vadd.f32 %v1121_v54, %v6351_v49  ;;  %v12903_v20 = vld [vmem:[#allocation50_spill] sm:$0xff] }
 0x13c   :  { %v1131_v40 = vmul.f32 0.036632847, %v1113_v15  ;;  %v1132_v18 = vmul.f32 0.036632847, %v1104_v53  ;;  %12886 = vst [vmem:[#allocation90_spill] sm:$0xff] %v6472_v7  ;;  %12887 = vst [vmem:[#allocation91_spill] sm:$0xff] %v6475_v45  ;;  %v6484_v44 = vadd.f32 %v1122_v29, %v6354_v8  ;;  %v6487_v35 = vadd.f32 %v1123_v31, %v6357_v52 }
 0x13d   :  { %v1133_v6 = vmul.f32 0.036632847, %v1114_v60  ;;  %v1134_v34 = vmul.f32 0.036632847, %v1105_v59  ;;  %v1135_v27 = vmul.f32 0.036632847, %v1115_v47  ;;  %v6490_v13 = vadd.f32 %v1124_v4, %v6360_v23 }
 0x13e   :  { %12888 = vst [vmem:[#allocation92_spill] sm:$0xff] %v6478_v58  ;;  %12889 = vst [vmem:[#allocation93_spill] sm:$0xff] %v6481_v57  ;;  %v6493_v2 = vadd.f32 %v1125_v38, %v6363_v56  ;;  %v6496_v28 = vadd.f32 %v1126_v19, %v6366_v22  ;;  %v6499_v21 = vadd.f32 %v1127_v51, %v6369_v17  ;;  %v12897_v8 = vld [vmem:[#allocation45_spill] sm:$0xff]  ;;  %v12898_v53 = vld [vmem:[#allocation46_spill] sm:$0xff]  ;;  %v1162_v22 = vmul.f32 0.036632847, %v12902_v30 }
 0x13f   :  { %12890 = vst [vmem:[#allocation94_spill] sm:$0xff] %v6484_v44  ;;  %12891 = vst [vmem:[#allocation95_spill] sm:$0xff] %v6487_v35  ;;  %v6502_v49 = vadd.f32 %v1128_v48, %v6372_v12  ;;  %v1158_v61 = vmul.f32 0.036632847, %v12897_v8  ;;  %v1159_v52 = vmul.f32 0.036632847, %v12898_v53  ;;  %v6508_v23 = vadd.f32 %v1129_v9, %v6375_v42 }
 0x140   :  { %12892 = vst [vmem:[#allocation76_spill] sm:$0xff] %v6490_v13  ;;  %12893 = vst [vmem:[#allocation98_spill] sm:$0xff] %v6493_v2  ;;  %v12899_v59 = vld [vmem:[#allocation47_spill] sm:$0xff]  ;;  %v12901_v56 = vld [vmem:[#allocation48_spill] sm:$0xff]  ;;  %v1163_v55 = vmul.f32 0.036632847, %v12903_v20  ;;  %v6514_v17 = vadd.f32 %v1130_v39, %v6378_v26  ;;  %v6520_v43 = vadd.f32 %v1131_v40, %v6381_v32  ;;  %v6530_v26 = vadd.f32 %v1132_v18, %v6384_v14 }
 0x141   :  { %12894 = vst [vmem:[#allocation100_spill] sm:$0xff] %v6496_v28  ;;  %12895 = vst [vmem:[#allocation86_spill] sm:$0xff] %v6499_v21  ;;  %v1160_v46 = vmul.f32 0.036632847, %v12899_v59  ;;  %v1161_v36 = vmul.f32 0.036632847, %v12901_v56  ;;  %v6540_v51 = vadd.f32 %v1133_v6, %v6387_v50  ;;  %v6550_v18 = vadd.f32 %v1134_v34, %v6410_v41 }
 0x142   :  { %12896 = vst [vmem:[#allocation77_spill] sm:$0xff] %v6502_v49  ;;  %12900 = vst [vmem:[#allocation78_spill] sm:$0xff] %v6508_v23  ;;  %v12905_v12 = vld [vmem:[#allocation51_spill] sm:$0xff]  ;;  %v12906_v63 = vld [vmem:[#allocation52_spill] sm:$0xff]  ;;  %v1176_v32 = vmul.f32 0.11128076, %v12897_v8  ;;  %v6560_v6 = vadd.f32 %v1135_v27, %v6413_v16 }
 0x143   :  { %12904 = vst [vmem:[#allocation79_spill] sm:$0xff] %v6514_v17  ;;  %v1164_v33 = vmul.f32 0.036632847, %v12905_v12  ;;  %v1165_v15 = vmul.f32 0.036632847, %v12906_v63  ;;  %v12907_v25 = vld [vmem:[#allocation53_spill] sm:$0xff] }
 0x144   :  { %v1166_v60 = vmul.f32 0.036632847, %v12907_v25  ;;  %12908 = vst [vmem:[#allocation97_spill] sm:$0xff] %v6520_v43  ;;  %v12909_v42 = vld [vmem:[#allocation54_spill] sm:$0xff]  ;;  %v12910_v5 = vld [vmem:[#allocation55_spill] sm:$0xff]  ;;  %v12912_v54 = vld [vmem:[#allocation56_spill] sm:$0xff]  ;;  %v1196_v28 = vadd.f32 %v1176_v32, %v6416_v1 }
 0x145   :  { %v1167_v10 = vmul.f32 0.036632847, %v12909_v42  ;;  %v6524_v47 = vmul.f32 0.036632847, %v12910_v5  ;;  %v6527_v29 = vmul.f32 0.036632847, %v12912_v54 }
 0x146   :  { %12914 = vst [vmem:[#allocation102_spill] sm:$0xff] %v6530_v26  ;;  %v12915_v31 = vld [vmem:[#allocation57_spill] sm:$0xff]  ;;  %v12917_v38 = vld [vmem:[#allocation58_spill] sm:$0xff]  ;;  %12919 = vst [vmem:[#allocation84_spill] sm:$0xff] %v6540_v51  ;;  %v1177_v14 = vmul.f32 0.11128076, %v12898_v53 }
 0x147   :  { %12911 = vst [vmem:[#allocation99_spill] sm:$0xff] %v6524_v47  ;;  %12913 = vst [vmem:[#allocation101_spill] sm:$0xff] %v6527_v29  ;;  %v6533_v4 = vmul.f32 0.036632847, %v12915_v31  ;;  %v6536_v19 = vmul.f32 0.036632847, %v12917_v38 }
 0x148   :  { %v12920_v48 = vld [vmem:[#allocation59_spill] sm:$0xff]  ;;  %v12922_v39 = vld [vmem:[#allocation60_spill] sm:$0xff]  ;;  %12924 = vst [vmem:[#allocation87_spill] sm:$0xff] %v6550_v18  ;;  %v12925_v26 = vld [vmem:[#allocation61_spill] sm:$0xff]  ;;  %v1178_v50 = vmul.f32 0.11128076, %v12899_v59 }
 0x149   :  { %12916 = vst [vmem:[#allocation103_spill] sm:$0xff] %v6533_v4  ;;  %12918 = vst [vmem:[#allocation104_spill] sm:$0xff] %v6536_v19  ;;  %v6543_v9 = vmul.f32 0.036632847, %v12920_v48  ;;  %v6546_v40 = vmul.f32 0.036632847, %v12922_v39 }
 0x14a   :  { %v6553_v43 = vmul.f32 0.036632847, %v12925_v26  ;;  %v12927_v17 = vld [vmem:[#allocation62_spill] sm:$0xff]  ;;  %12929 = vst [vmem:[#allocation81_spill] sm:$0xff] %v6560_v6  ;;  %v1179_v51 = vmul.f32 0.11128076, %v12901_v56  ;;  %v1197_v6 = vadd.f32 %v1177_v14, %v6419_v11  ;;  %v1198_v1 = vadd.f32 %v1178_v50, %v1158_v61 }
 0x14b   :  { %12921 = vst [vmem:[#allocation88_spill] sm:$0xff] %v6543_v9  ;;  %12923 = vst [vmem:[#allocation85_spill] sm:$0xff] %v6546_v40  ;;  %v6556_v23 = vmul.f32 0.036632847, %v12927_v17  ;;  %v1180_v49 = vmul.f32 0.11128076, %v12902_v30 }
 0x14c   :  { %12926 = vst [vmem:[#allocation89_spill] sm:$0xff] %v6553_v43  ;;  %v1181_v21 = vmul.f32 0.11128076, %v12903_v20  ;;  %v1182_v41 = vmul.f32 0.11128076, %v12905_v12  ;;  %v1199_v11 = vadd.f32 %v1179_v51, %v1159_v52  ;;  %v12940_v14 = vld [vmem:[#allocation63_spill] sm:$0xff] }
 0x14d   :  { %12928 = vst [vmem:[#allocation80_spill] sm:$0xff] %v6556_v23  ;;  %v1183_v34 = vmul.f32 0.11128076, %v12906_v63  ;;  %v6568_v18 = vmul.f32 0.11128076, %v12907_v25  ;;  %v12942_v7 = vld [vmem:[#allocation64_spill] sm:$0xff]  ;;  %v1200_v24 = vadd.f32 %v1180_v49, %v1160_v46 }
 0x14e   :  { %v6572_v2 = vmul.f32 0.11128076, %v12909_v42  ;;  %v6575_v16 = vmul.f32 0.11128076, %v12910_v5  ;;  %v6578_v27 = vmul.f32 0.11128076, %v12912_v54  ;;  %v1201_v0 = vadd.f32 %v1181_v21, %v1161_v36 }
 0x14f   :  { %12930 = vst [vmem:[#allocation96_spill] sm:$0xff] %v6568_v18  ;;  %v6582_v13 = vmul.f32 0.11128076, %v12915_v31  ;;  %v6585_v35 = vmul.f32 0.11128076, %v12917_v38  ;;  %v1202_v53 = vadd.f32 %v1182_v41, %v1162_v22  ;;  %v1203_v61 = vadd.f32 %v1183_v34, %v1163_v55 }
 0x150   :  { %12931 = vst [vmem:[#allocation105_spill] sm:$0xff] %v6572_v2  ;;  %12932 = vst [vmem:[#allocation106_spill] sm:$0xff] %v6575_v16  ;;  %v6588_v44 = vmul.f32 0.11128076, %v12920_v48  ;;  %v6591_v32 = vmul.f32 0.11128076, %v12922_v39  ;;  %v1204_v50 = vadd.f32 %v6568_v18, %v1164_v33  ;;  %v1205_v8 = vadd.f32 %v6572_v2, %v1165_v15 }
 0x151   :  { %12933 = vst [vmem:[#allocation107_spill] sm:$0xff] %v6578_v27  ;;  %12934 = vst [vmem:[#allocation108_spill] sm:$0xff] %v6582_v13  ;;  %v6594_v57 = vmul.f32 0.11128076, %v12925_v26  ;;  %v6597_v58 = vmul.f32 0.11128076, %v12927_v17  ;;  %v1206_v37 = vadd.f32 %v6575_v16, %v1166_v60  ;;  %v1207_v62 = vadd.f32 %v6578_v27, %v1167_v10 }
 0x152   :  { %12935 = vst [vmem:[#allocation109_spill] sm:$0xff] %v6585_v35  ;;  %12936 = vst [vmem:[#allocation110_spill] sm:$0xff] %v6588_v44  ;;  %v6600_v45 = vmul.f32 0.11128076, %v12940_v14  ;;  %v6603_v3 = vmul.f32 0.11128076, %v12942_v7  ;;  %v1208_v52 = vadd.f32 %v6582_v13, %v6524_v47  ;;  %v1209_v7 = vadd.f32 %v6585_v35, %v6527_v29 }
 0x153   :  { %12937 = vst [vmem:[#allocation111_spill] sm:$0xff] %v6591_v32  ;;  %12938 = vst [vmem:[#allocation112_spill] sm:$0xff] %v6594_v57  ;;  %v1216_v51 = vmul.f32 0.21674532, %v12899_v59  ;;  %v1210_v21 = vadd.f32 %v6588_v44, %v6533_v4  ;;  %v1211_v49 = vadd.f32 %v6591_v32, %v6536_v19  ;;  %v1217_v46 = vmul.f32 0.21674532, %v12901_v56 }
 0x154   :  { %12939 = vst [vmem:[#allocation113_spill] sm:$0xff] %v6597_v58  ;;  %12941 = vst [vmem:[#allocation114_spill] sm:$0xff] %v6600_v45  ;;  %v1212_v36 = vadd.f32 %v6594_v57, %v6543_v9  ;;  %v1213_v22 = vadd.f32 %v6597_v58, %v6546_v40  ;;  %v1214_v55 = vadd.f32 %v6600_v45, %v6553_v43  ;;  %v1218_v33 = vmul.f32 0.21674532, %v12902_v30  ;;  %v12949_v45 = vld [vmem:[#allocation64_spill] sm:$0xff]  ;;  %v12953_v32 = vld [vmem:[#allocation66_spill] sm:$0xff] }
 0x155   :  { %12943 = vst [vmem:[#allocation115_spill] sm:$0xff] %v6603_v3  ;;  %v1215_v15 = vadd.f32 %v6603_v3, %v6556_v23  ;;  %v1219_v60 = vmul.f32 0.21674532, %v12903_v20  ;;  %v6630_v10 = vmul.f32 0.21674532, %v12905_v12  ;;  %v1236_v43 = vadd.f32 %v1216_v51, %v1196_v28 }
 0x156   :  { %v6633_v41 = vmul.f32 0.21674532, %v12906_v63  ;;  %v6636_v34 = vmul.f32 0.21674532, %v12907_v25  ;;  %v6639_v56 = vmul.f32 0.21674532, %v12909_v42  ;;  %v1237_v19 = vadd.f32 %v1217_v46, %v1197_v6 }
 0x157   :  { %v6642_v59 = vmul.f32 0.21674532, %v12910_v5  ;;  %v6645_v23 = vmul.f32 0.21674532, %v12912_v54  ;;  %v6648_v40 = vmul.f32 0.21674532, %v12915_v31  ;;  %v1238_v28 = vadd.f32 %v1218_v33, %v1198_v1 }
 0x158   :  { %v6651_v9 = vmul.f32 0.21674532, %v12917_v38  ;;  %v6654_v4 = vmul.f32 0.21674532, %v12920_v48  ;;  %v6657_v29 = vmul.f32 0.21674532, %v12922_v39  ;;  %v1239_v6 = vadd.f32 %v1219_v60, %v1199_v11 }
 0x159   :  { %v6660_v47 = vmul.f32 0.21674532, %v12925_v26  ;;  %v6663_v51 = vmul.f32 0.21674532, %v12927_v17  ;;  %v6666_v3 = vmul.f32 0.21674532, %v12940_v14  ;;  %v1240_v35 = vadd.f32 %v6630_v10, %v1200_v24 }
 0x15a   :  { %12944 = vst [vmem:[#allocation116_spill] sm:$0xff] %v6654_v4  ;;  %12945 = vst [vmem:[#allocation117_spill] sm:$0xff] %v6657_v29  ;;  %v6669_v58 = vmul.f32 0.21674532, %v12949_v45  ;;  %v12951_v46 = vld [vmem:[#allocation65_spill] sm:$0xff]  ;;  %v1241_v1 = vadd.f32 %v6633_v41, %v1201_v0  ;;  %v1242_v33 = vadd.f32 %v6636_v34, %v1202_v53  ;;  %v1243_v13 = vadd.f32 %v6639_v56, %v1203_v61 }
 0x15b   :  { %12946 = vst [vmem:[#allocation118_spill] sm:$0xff] %v6660_v47  ;;  %12947 = vst [vmem:[#allocation119_spill] sm:$0xff] %v6663_v51  ;;  %v6672_v57 = vmul.f32 0.21674532, %v12951_v46  ;;  %v6675_v44 = vmul.f32 0.21674532, %v12953_v32  ;;  %v1244_v27 = vadd.f32 %v6642_v59, %v1204_v50  ;;  %v1245_v16 = vadd.f32 %v6645_v23, %v1205_v8 }
 0x15c   :  { %12948 = vst [vmem:[#allocation120_spill] sm:$0xff] %v6666_v3  ;;  %12950 = vst [vmem:[#allocation121_spill] sm:$0xff] %v6669_v58  ;;  %v1246_v11 = vadd.f32 %v6648_v40, %v1206_v37  ;;  %v1247_v60 = vadd.f32 %v6651_v9, %v1207_v62  ;;  %v1248_v2 = vadd.f32 %v6654_v4, %v1208_v52  ;;  %v1256_v18 = vmul.f32 0.27068216, %v12902_v30 }
 0x15d   :  { %12952 = vst [vmem:[#allocation122_spill] sm:$0xff] %v6672_v57  ;;  %12954 = vst [vmem:[#allocation123_spill] sm:$0xff] %v6675_v44  ;;  %v1249_v24 = vadd.f32 %v6657_v29, %v1209_v7  ;;  %v1250_v0 = vadd.f32 %v6660_v47, %v1210_v21  ;;  %v1251_v53 = vadd.f32 %v6663_v51, %v1211_v49  ;;  %v1257_v61 = vmul.f32 0.27068216, %v12903_v20 }
 0x15e   :  { %v1252_v50 = vadd.f32 %v6666_v3, %v1212_v36  ;;  %v1253_v8 = vadd.f32 %v6669_v58, %v1213_v22  ;;  %v1254_v37 = vadd.f32 %v6672_v57, %v1214_v55  ;;  %v1258_v62 = vmul.f32 0.27068216, %v12905_v12 }
 0x15f   :  { %v1255_v52 = vadd.f32 %v6675_v44, %v1215_v15  ;;  %v1259_v30 = vmul.f32 0.27068216, %v12906_v63  ;;  %v1260_v7 = vmul.f32 0.27068216, %v12907_v25  ;;  %v1261_v21 = vmul.f32 0.27068216, %v12909_v42 }
 0x160   :  { %v1262_v49 = vmul.f32 0.27068216, %v12910_v5  ;;  %v1263_v20 = vmul.f32 0.27068216, %v12912_v54  ;;  %v1264_v36 = vmul.f32 0.27068216, %v12915_v31  ;;  %v1276_v3 = vadd.f32 %v1256_v18, %v1236_v43 }
 0x161   :  { %v1265_v22 = vmul.f32 0.27068216, %v12917_v38  ;;  %v1266_v55 = vmul.f32 0.27068216, %v12920_v48  ;;  %v1267_v12 = vmul.f32 0.27068216, %v12922_v39  ;;  %v1277_v15 = vadd.f32 %v1257_v61, %v1237_v19 }
 0x162   :  { %v1268_v63 = vmul.f32 0.27068216, %v12925_v26  ;;  %v1269_v25 = vmul.f32 0.27068216, %v12927_v17  ;;  %v1270_v42 = vmul.f32 0.27068216, %v12940_v14  ;;  %v1278_v44 = vadd.f32 %v1258_v62, %v1238_v28 }
 0x163   :  { %v1271_v5 = vmul.f32 0.27068216, %v12949_v45  ;;  %v1272_v54 = vmul.f32 0.27068216, %v12951_v46  ;;  %v1273_v43 = vmul.f32 0.27068216, %v12953_v32  ;;  %v1279_v18 = vadd.f32 %v1259_v30, %v1239_v6 }
 0x164   :  { %v12955_v38 = vld [vmem:[#allocation67_spill] sm:$0xff]  ;;  %v12956_v48 = vld [vmem:[#allocation68_spill] sm:$0xff]  ;;  %v1280_v39 = vadd.f32 %v1260_v7, %v1240_v35  ;;  %v1281_v19 = vadd.f32 %v1261_v21, %v1241_v1  ;;  %v1282_v61 = vadd.f32 %v1262_v49, %v1242_v33  ;;  %v1283_v26 = vadd.f32 %v1263_v20, %v1243_v13  ;;  %v12957_v35 = vld [vmem:[#allocation69_spill] sm:$0xff] }
 0x165   :  { %v1274_v31 = vmul.f32 0.27068216, %v12955_v38  ;;  %v1275_v57 = vmul.f32 0.27068216, %v12956_v48  ;;  %v1284_v58 = vadd.f32 %v1264_v36, %v1244_v27  ;;  %v1285_v17 = vadd.f32 %v1265_v22, %v1245_v16  ;;  %v12958_v33 = vld [vmem:[#allocation70_spill] sm:$0xff]  ;;  %v12960_v16 = vld [vmem:[#allocation117_spill] sm:$0xff] }
 0x166   :  { %v1286_v51 = vadd.f32 %v1266_v55, %v1246_v11  ;;  %v1287_v14 = vadd.f32 %v1267_v12, %v1247_v60  ;;  %v1288_v28 = vadd.f32 %v1268_v63, %v1248_v2  ;;  %v1289_v62 = vadd.f32 %v1269_v25, %v1249_v24  ;;  %v12961_v11 = vld [vmem:[#allocation118_spill] sm:$0xff]  ;;  %v12963_v60 = vld [vmem:[#allocation120_spill] sm:$0xff]  ;;  %v12970_v7 = vld [vmem:[#allocation71_spill] sm:$0xff] }
 0x167   :  { %v1290_v45 = vadd.f32 %v1270_v42, %v1250_v0  ;;  %v1291_v47 = vadd.f32 %v1271_v5, %v1251_v53  ;;  %v1292_v46 = vadd.f32 %v1272_v54, %v1252_v50  ;;  %v1293_v29 = vadd.f32 %v1273_v43, %v1253_v8  ;;  %v12959_v54 = vld [vmem:[#allocation116_spill] sm:$0xff]  ;;  %v12965_v24 = vld [vmem:[#allocation122_spill] sm:$0xff]  ;;  %v12974_v36 = vld [vmem:[#allocation107_spill] sm:$0xff] }
 0x168   :  { %v1294_v32 = vadd.f32 %v1274_v31, %v1254_v37  ;;  %v1295_v30 = vadd.f32 %v1275_v57, %v1255_v52  ;;  %v1296_v6 = vmul.f32 0.21674532, %v12955_v38  ;;  %v1297_v4 = vmul.f32 0.21674532, %v12956_v48  ;;  %v12968_v50 = vld [vmem:[#allocation66_spill] sm:$0xff]  ;;  %v12969_v37 = vld [vmem:[#allocation96_spill] sm:$0xff] }
 0x169   :  { %v1298_v1 = vmul.f32 0.21674532, %v12957_v35  ;;  %v1299_v13 = vmul.f32 0.21674532, %v12958_v33  ;;  %v1300_v20 = vadd.f32 %v1276_v3, %v6630_v10  ;;  %v1301_v12 = vadd.f32 %v1277_v15, %v6633_v41  ;;  %v12962_v10 = vld [vmem:[#allocation119_spill] sm:$0xff]  ;;  %v12973_v21 = vld [vmem:[#allocation106_spill] sm:$0xff] }
 0x16a   :  { %v1302_v2 = vadd.f32 %v1278_v44, %v6636_v34  ;;  %v1303_v63 = vadd.f32 %v1279_v18, %v6639_v56  ;;  %v1304_v25 = vadd.f32 %v1280_v39, %v6642_v59  ;;  %v1305_v57 = vadd.f32 %v1281_v19, %v6645_v23  ;;  %v12964_v34 = vld [vmem:[#allocation121_spill] sm:$0xff]  ;;  %v12966_v39 = vld [vmem:[#allocation123_spill] sm:$0xff]  ;;  %v12975_v55 = vld [vmem:[#allocation108_spill] sm:$0xff] }
 0x16b   :  { %v1306_v42 = vadd.f32 %v1282_v61, %v6648_v40  ;;  %v1307_v5 = vadd.f32 %v1283_v26, %v6651_v9  ;;  %v1308_v31 = vadd.f32 %v1284_v58, %v12959_v54  ;;  %v1309_v27 = vadd.f32 %v1285_v17, %v12960_v16  ;;  %v12967_v9 = vld [vmem:[#allocation65_spill] sm:$0xff]  ;;  %v12977_v19 = vld [vmem:[#allocation110_spill] sm:$0xff]  ;;  %v12982_v16 = vld [vmem:[#allocation115_spill] sm:$0xff] }
 0x16c   :  { %v1310_v3 = vadd.f32 %v1286_v51, %v12961_v11  ;;  %v1311_v41 = vadd.f32 %v1287_v14, %v12962_v10  ;;  %v1312_v44 = vadd.f32 %v1288_v28, %v12963_v60  ;;  %v1313_v56 = vadd.f32 %v1289_v62, %v12964_v34  ;;  %v12976_v43 = vld [vmem:[#allocation109_spill] sm:$0xff]  ;;  %v12978_v28 = vld [vmem:[#allocation111_spill] sm:$0xff] }
 0x16d   :  { %v1314_v59 = vadd.f32 %v1290_v45, %v12965_v24  ;;  %v1315_v23 = vadd.f32 %v1291_v47, %v12966_v39  ;;  %v1316_v0 = vadd.f32 %v1296_v6, %v1292_v46  ;;  %v1317_v40 = vadd.f32 %v1297_v4, %v1293_v29  ;;  %v12971_v46 = vld [vmem:[#allocation72_spill] sm:$0xff]  ;;  %v12972_v4 = vld [vmem:[#allocation105_spill] sm:$0xff]  ;;  %v12983_v24 = vld [vmem:[#allocation63_spill] sm:$0xff] }
 0x16e   :  { %v1318_v53 = vadd.f32 %v1298_v1, %v1294_v32  ;;  %v1319_v26 = vadd.f32 %v1299_v13, %v1295_v30  ;;  %v1320_v58 = vmul.f32 0.11128076, %v12967_v9  ;;  %v1321_v17 = vmul.f32 0.11128076, %v12968_v50  ;;  %v12979_v30 = vld [vmem:[#allocation112_spill] sm:$0xff]  ;;  %v12980_v1 = vld [vmem:[#allocation113_spill] sm:$0xff] }
 0x16f   :  { %v1322_v51 = vmul.f32 0.11128076, %v12955_v38  ;;  %v1323_v14 = vmul.f32 0.11128076, %v12956_v48  ;;  %v1324_v8 = vmul.f32 0.11128076, %v12957_v35  ;;  %v1328_v52 = vadd.f32 %v1300_v20, %v12969_v37 }
 0x170   :  { %v1325_v45 = vmul.f32 0.11128076, %v12958_v33  ;;  %v1326_v47 = vmul.f32 0.11128076, %v12970_v7  ;;  %v1327_v29 = vmul.f32 0.11128076, %v12971_v46  ;;  %v1329_v32 = vadd.f32 %v1301_v12, %v12972_v4 }
 0x171   :  { %v1330_v49 = vadd.f32 %v1302_v2, %v12973_v21  ;;  %v1331_v22 = vadd.f32 %v1303_v63, %v12974_v36  ;;  %v1332_v15 = vadd.f32 %v1304_v25, %v12975_v55  ;;  %v1333_v18 = vadd.f32 %v1305_v57, %v12976_v43  ;;  %v12981_v20 = vld [vmem:[#allocation114_spill] sm:$0xff]  ;;  %v12984_v39 = vld [vmem:[#allocation64_spill] sm:$0xff]  ;;  %v12985_v37 = vld [vmem:[#allocation99_spill] sm:$0xff] }
 0x172   :  { %v1334_v61 = vadd.f32 %v1306_v42, %v12977_v19  ;;  %v1335_v62 = vadd.f32 %v1307_v5, %v12978_v28  ;;  %v1336_v6 = vadd.f32 %v1308_v31, %v12979_v30  ;;  %v1337_v13 = vadd.f32 %v1309_v27, %v12980_v1  ;;  %v12993_v4 = vld [vmem:[#allocation85_spill] sm:$0xff]  ;;  %v12996_v55 = vld [vmem:[#allocation80_spill] sm:$0xff] }
 0x173   :  { %v1338_v54 = vadd.f32 %v1310_v3, %v12981_v20  ;;  %v1339_v12 = vadd.f32 %v1311_v41, %v12982_v16  ;;  %v1340_v11 = vadd.f32 %v1320_v58, %v1312_v44  ;;  %v1341_v2 = vadd.f32 %v1321_v17, %v1313_v56  ;;  %v12988_v17 = vld [vmem:[#allocation103_spill] sm:$0xff]  ;;  %v12995_v21 = vld [vmem:[#allocation89_spill] sm:$0xff] }
 0x174   :  { %v1342_v10 = vadd.f32 %v1322_v51, %v1314_v59  ;;  %v1343_v63 = vadd.f32 %v1323_v14, %v1315_v23  ;;  %v1344_v60 = vadd.f32 %v1324_v8, %v1316_v0  ;;  %v1345_v25 = vadd.f32 %v1325_v45, %v1317_v40  ;;  %v12986_v23 = vld [vmem:[#allocation101_spill] sm:$0xff]  ;;  %v12989_v14 = vld [vmem:[#allocation74_spill] sm:$0xff] }
 0x175   :  { %v1346_v34 = vadd.f32 %v1326_v47, %v1318_v53  ;;  %v1347_v57 = vadd.f32 %v1327_v29, %v1319_v26  ;;  %v1348_v42 = vmul.f32 0.036632847, %v12983_v24  ;;  %v1349_v5 = vmul.f32 0.036632847, %v12984_v39  ;;  %v12987_v26 = vld [vmem:[#allocation73_spill] sm:$0xff]  ;;  %v12992_v47 = vld [vmem:[#allocation88_spill] sm:$0xff] }
 0x176   :  { %v1350_v31 = vmul.f32 0.036632847, %v12967_v9  ;;  %v1351_v27 = vmul.f32 0.036632847, %v12968_v50  ;;  %v1352_v3 = vmul.f32 0.036632847, %v12955_v38  ;;  %v6759_v41 = vadd.f32 %v1328_v52, %v12985_v37 }
 0x177   :  { %v1353_v44 = vmul.f32 0.036632847, %v12956_v48  ;;  %v1354_v56 = vmul.f32 0.036632847, %v12957_v35  ;;  %v1355_v59 = vmul.f32 0.036632847, %v12958_v33  ;;  %v6765_v0 = vadd.f32 %v1329_v32, %v12986_v23 }
 0x178   :  { %v1356_v40 = vmul.f32 0.036632847, %v12970_v7  ;;  %v1357_v53 = vmul.f32 0.036632847, %v12971_v46  ;;  %v1358_v58 = vmul.f32 0.036632847, %v12987_v26  ;;  %v6771_v51 = vadd.f32 %v1330_v49, %v12988_v17 }
 0x179   :  { %v1359_v8 = vmul.f32 0.036632847, %v12989_v14  ;;  %v12990_v52 = vld [vmem:[#allocation104_spill] sm:$0xff]  ;;  %v6778_v29 = vadd.f32 %v1332_v15, %v12992_v47  ;;  %v6781_v32 = vadd.f32 %v1333_v18, %v12993_v4  ;;  %v6784_v36 = vadd.f32 %v1334_v61, %v12995_v21  ;;  %v13013_v37 = vld [vmem:[#allocation13_spill] sm:$0xff]  ;;  %v13020_v4 = vld [vmem:[#allocation15_spill] sm:$0xff] }
 0x17a   :  { %v6775_v45 = vadd.f32 %v1331_v22, %v12990_v52  ;;  %v6787_v43 = vadd.f32 %v1335_v62, %v12996_v55  ;;  %v6789_v19 = vadd.f32 %v1348_v42, %v1336_v6  ;;  %v6791_v49 = vadd.f32 %v1349_v5, %v1337_v13  ;;  %v13011_v42 = vld [vmem:[#allocation44_spill] sm:$0xff]  ;;  %v13021_v21 = vld [vmem:[#allocation47_spill] sm:$0xff] }
 0x17b   :  { %12994 = vst [vmem:[#allocation117_spill] sm:$0xff] %v6781_v32  ;;  %v6793_v28 = vadd.f32 %v1350_v31, %v1338_v54  ;;  %v6795_v22 = vadd.f32 %v1351_v27, %v1339_v12  ;;  %v6797_v30 = vadd.f32 %v1352_v3, %v1340_v11  ;;  %v6799_v15 = vadd.f32 %v1353_v44, %v1341_v2  ;;  %v13007_v2 = vld [vmem:[#allocation11_spill] sm:$0xff]  ;;  %v13014_v44 = vld [vmem:[#allocation45_spill] sm:$0xff]  ;;  %v13026_v50 = vld [vmem:[#allocation16_spill] sm:$0xff] }
 0x17c   :  { %12991 = vst [vmem:[#allocation116_spill] sm:$0xff] %v6775_v45  ;;  %12997 = vst [vmem:[#allocation118_spill] sm:$0xff] %v6787_v43  ;;  %v6801_v18 = vadd.f32 %v1354_v56, %v1342_v10  ;;  %v6803_v1 = vadd.f32 %v1355_v59, %v1343_v63  ;;  %v6805_v61 = vadd.f32 %v1356_v40, %v1344_v60  ;;  %v6814_v20 = vmul.f32 0.036632847, %v6759_v41  ;;  %v13008_v10 = vld [vmem:[#allocation43_spill] sm:$0xff]  ;;  %v13027_v9 = vld [vmem:[#allocation48_spill] sm:$0xff] }
 0x17d   :  { %12998 = vst [vmem:[#allocation119_spill] sm:$0xff] %v6791_v49  ;;  %12999 = vst [vmem:[#allocation120_spill] sm:$0xff] %v6795_v22  ;;  %v6807_v62 = vadd.f32 %v1357_v53, %v1345_v25  ;;  %v6809_v6 = vadd.f32 %v1358_v58, %v1346_v34  ;;  %v6811_v13 = vadd.f32 %v1359_v8, %v1347_v57  ;;  %v6817_v54 = vmul.f32 0.036632847, %v6765_v0  ;;  %v13010_v57 = vld [vmem:[#allocation12_spill] sm:$0xff]  ;;  %v13016_v53 = vld [vmem:[#allocation14_spill] sm:$0xff] }
 0x17e   :  { %13000 = vst [vmem:[#allocation121_spill] sm:$0xff] %v6799_v15  ;;  %13001 = vst [vmem:[#allocation122_spill] sm:$0xff] %v6801_v18  ;;  %v6820_v16 = vmul.f32 0.036632847, %v6771_v51  ;;  %v6823_v12 = vmul.f32 0.036632847, %v6775_v45  ;;  %v6830_v63 = vmul.f32 %v13008_v10, %v13007_v2  ;;  %v6843_v5 = vmul.f32 %v13011_v42, %v13010_v57 }
 0x17f   :  { %13002 = vst [vmem:[#allocation123_spill] sm:$0xff] %v6803_v1  ;;  %13003 = vst [vmem:[#allocation96_spill] sm:$0xff] %v6805_v61  ;;  %v6826_v11 = vmul.f32 0.036632847, %v6778_v29  ;;  %v6833_v60 = vmul.f32 0.036632847, %v6781_v32  ;;  %v6856_v56 = vmul.f32 %v13014_v44, %v13013_v37  ;;  %v6882_v55 = vmul.f32 %v13021_v21, %v13020_v4 }
 0x180   :  { %13004 = vst [vmem:[#allocation105_spill] sm:$0xff] %v6807_v62  ;;  %13005 = vst [vmem:[#allocation106_spill] sm:$0xff] %v6809_v6  ;;  %v6836_v25 = vmul.f32 0.036632847, %v6784_v36  ;;  %v6839_v34 = vmul.f32 0.036632847, %v6787_v43  ;;  %v6915_v39 = vmul.f32 %v13027_v9, %v13026_v50 }
 0x181   :  { %13006 = vst [vmem:[#allocation107_spill] sm:$0xff] %v6811_v13  ;;  %13009 = vst [vmem:[#allocation108_spill] sm:$0xff] %v6830_v63  ;;  %v6846_v31 = vmul.f32 0.036632847, %v6789_v19  ;;  %v6849_v27 = vmul.f32 0.036632847, %v6791_v49 }
 0x182   :  { %13012 = vst [vmem:[#allocation109_spill] sm:$0xff] %v6843_v5  ;;  %v6852_v3 = vmul.f32 0.036632847, %v6793_v28  ;;  %13015 = vst [vmem:[#allocation110_spill] sm:$0xff] %v6856_v56  ;;  %v6859_v59 = vmul.f32 0.036632847, %v6795_v22 }
 0x183   :  { %v6862_v23 = vmul.f32 0.036632847, %v6797_v30  ;;  %v6865_v40 = vmul.f32 0.036632847, %v6799_v15  ;;  %v13017_v58 = vld [vmem:[#allocation46_spill] sm:$0xff]  ;;  %13022 = vst [vmem:[#allocation113_spill] sm:$0xff] %v6882_v55 }
 0x184   :  { %v6869_v17 = vmul.f32 %v13017_v58, %v13016_v53  ;;  %v6872_v8 = vmul.f32 0.036632847, %v6801_v18  ;;  %v6875_v52 = vmul.f32 0.036632847, %v6803_v1  ;;  %v6878_v47 = vmul.f32 0.036632847, %v6805_v61 }
 0x185   :  { %v1400_v44 = vrot.slane %v6759_v41, 1  ;;  %v1401_v42 = vrot.slane %v6771_v51, 1  ;;  %v1402_v58 = vrot.slane %v6778_v29, 1  ;;  %v1403_v10 = vrot.slane %v6784_v36, 1  ;;  %13028 = vst [vmem:[#allocation101_spill] sm:$0xff] %v6915_v39 }
 0x186   :  { %13018 = vst [vmem:[#allocation111_spill] sm:$0xff] %v6869_v17  ;;  %13019 = vst [vmem:[#allocation112_spill] sm:$0xff] %v6878_v47  ;;  %v1404_v53 = vrot.slane %v6789_v19, 1  ;;  %v1405_v37 = vrot.slane %v6793_v28, 1  ;;  %v1406_v57 = vrot.slane %v6797_v30, 1  ;;  %v1407_v2 = vrot.slane %v6801_v18, 1 }
 0x187   :  { %v1410_v14 = vrot.slane %v6765_v0, 1  ;;  %v1411_v21 = vrot.slane %v6775_v45, 1  ;;  %v1412_v4 = vrot.slane %v6781_v32, 1  ;;  %v1413_v26 = vrot.slane %v6787_v43, 1 }
 0x188   :  { %v1408_v46 = vrot.slane %v6805_v61, 1  ;;  %v1414_v7 = vrot.slane %v6791_v49, 1  ;;  %v1415_v33 = vrot.slane %v6795_v22, 1  ;;  %v1416_v55 = vrot.slane %v6799_v15, 1 }
 0x189   :  { %v1409_v35 = vrot.slane %v6809_v6, 1  ;;  %v1417_v17 = vrot.slane %v6803_v1, 1  ;;  %v1418_v56 = vrot.slane %v6807_v62, 1  ;;  %v1419_v5 = vrot.slane %v6811_v13, 1 }
 0x18a   :  { %v6905_v48 = vmul.f32 0.036632847, %v6807_v62  ;;  %v6908_v63 = vmul.f32 0.036632847, %v6809_v6  ;;  %v6911_v38 = vmul.f32 0.036632847, %v6811_v13  ;;  %v1420_v47 = vsel %vm690_vm0, %v1400_v44, %v1410_v14 }
 0x18b   :  { %v1421_v1 = vsel %vm690_vm0, %v1401_v42, %v1411_v21  ;;  %v1422_v62 = vsel %vm690_vm0, %v1402_v58, %v1412_v4  ;;  %v1423_v6 = vsel %vm690_vm0, %v1403_v10, %v1413_v26  ;;  %v1426_v9 = vsel %vm690_vm0, %v1406_v57, %v1416_v55 }
 0x18c   :  { %13023 = vst [vmem:[#allocation114_spill] sm:$0xff] %v6905_v48  ;;  %13024 = vst [vmem:[#allocation115_spill] sm:$0xff] %v6908_v63  ;;  %v1424_v63 = vsel %vm690_vm0, %v1404_v53, %v1414_v7  ;;  %v1430_v50 = vsel %vm690_vm0, %v1410_v14, %v1400_v44  ;;  %v1427_v39 = vsel %vm690_vm0, %v1407_v2, %v1417_v17  ;;  %v1440_v44 = vmul.f32 0.11128076, %v1420_v47 }
 0x18d   :  { %13025 = vst [vmem:[#allocation99_spill] sm:$0xff] %v6911_v38  ;;  %v1425_v38 = vsel %vm690_vm0, %v1405_v37, %v1415_v33  ;;  %v1428_v13 = vsel %vm690_vm0, %v1408_v46, %v1418_v56  ;;  %v1429_v48 = vsel %vm690_vm0, %v1409_v35, %v1419_v5  ;;  %v1431_v15 = vsel %vm690_vm0, %v1411_v21, %v1401_v42  ;;  %v13033_v21 = vld [vmem:[#allocation18_spill] sm:$0xff] }
 0x18e   :  { %v1432_v22 = vsel %vm690_vm0, %v1412_v4, %v1402_v58  ;;  %v1433_v49 = vsel %vm690_vm0, %v1413_v26, %v1403_v10  ;;  %v1434_v14 = vsel %vm690_vm0, %v1414_v7, %v1404_v53  ;;  %v1435_v43 = vsel %vm690_vm0, %v1415_v33, %v1405_v37  ;;  %v13030_v4 = vld [vmem:[#allocation17_spill] sm:$0xff] }
 0x18f   :  { %v1436_v32 = vsel %vm690_vm0, %v1416_v55, %v1406_v57  ;;  %v1437_v61 = vsel %vm690_vm0, %v1417_v17, %v1407_v2  ;;  %v1441_v42 = vmul.f32 0.11128076, %v1430_v50  ;;  %v1438_v58 = vsel %vm690_vm0, %v1418_v56, %v1408_v46  ;;  %v13031_v7 = vld [vmem:[#allocation49_spill] sm:$0xff]  ;;  %v13034_v57 = vld [vmem:[#allocation50_spill] sm:$0xff] }
 0x190   :  { %v1439_v26 = vsel %vm690_vm0, %v1419_v5, %v1409_v35  ;;  %v1442_v10 = vmul.f32 0.11128076, %v1421_v1  ;;  %v6959_v53 = vmul.f32 %v13031_v7, %v13030_v4  ;;  %v1443_v47 = vmul.f32 0.11128076, %v1431_v15  ;;  %v13047_v4 = vld [vmem:[#allocation106_spill] sm:$0xff] }
 0x191   :  { %v1444_v33 = vmul.f32 0.11128076, %v1422_v62  ;;  %v1445_v37 = vmul.f32 0.11128076, %v1432_v22  ;;  %v6963_v55 = vmul.f32 %v13034_v57, %v13033_v21  ;;  %v1446_v2 = vmul.f32 0.11128076, %v1423_v6 }
 0x192   :  { %13032 = vst [vmem:[#allocation103_spill] sm:$0xff] %v6959_v53  ;;  %v1447_v50 = vmul.f32 0.11128076, %v1433_v49  ;;  %v1448_v17 = vmul.f32 0.11128076, %v1424_v63  ;;  %v6966_v46 = vadd.f32 %v1440_v44, %v6814_v20  ;;  %v6969_v5 = vadd.f32 %v1441_v42, %v6817_v54  ;;  %v13037_v44 = vld [vmem:[#allocation117_spill] sm:$0xff] }
 0x193   :  { %13035 = vst [vmem:[#allocation104_spill] sm:$0xff] %v6963_v55  ;;  %v1449_v56 = vmul.f32 0.11128076, %v1434_v14  ;;  %v1450_v35 = vmul.f32 0.11128076, %v1425_v38  ;;  %v6972_v22 = vadd.f32 %v1442_v10, %v6820_v16  ;;  %v6975_v49 = vadd.f32 %v1443_v47, %v6823_v12  ;;  %v13039_v10 = vld [vmem:[#allocation119_spill] sm:$0xff] }
 0x194   :  { %v1451_v1 = vmul.f32 0.11128076, %v1435_v43  ;;  %v1452_v7 = vmul.f32 0.11128076, %v1426_v9  ;;  %v1453_v15 = vmul.f32 0.11128076, %v1436_v32  ;;  %v6978_v38 = vadd.f32 %v1444_v33, %v6826_v11 }
 0x195   :  { %v1454_v62 = vmul.f32 0.11128076, %v1427_v39  ;;  %v1455_v57 = vmul.f32 0.11128076, %v1437_v61  ;;  %v1456_v21 = vmul.f32 0.11128076, %v1428_v13  ;;  %v6981_v43 = vadd.f32 %v1445_v37, %v6833_v60 }
 0x196   :  { %v1457_v6 = vmul.f32 0.11128076, %v1438_v58  ;;  %v1458_v20 = vmul.f32 0.11128076, %v1429_v48  ;;  %v1459_v63 = vmul.f32 0.11128076, %v1439_v26  ;;  %v6984_v9 = vadd.f32 %v1446_v2, %v6836_v25 }
 0x197   :  { %v6987_v39 = vadd.f32 %v1447_v50, %v6839_v34  ;;  %v6990_v32 = vadd.f32 %v1448_v17, %v6846_v31  ;;  %v6993_v61 = vadd.f32 %v1449_v56, %v6849_v27  ;;  %v6996_v48 = vadd.f32 %v1450_v35, %v6852_v3  ;;  %v13038_v58 = vld [vmem:[#allocation118_spill] sm:$0xff]  ;;  %v13040_v47 = vld [vmem:[#allocation120_spill] sm:$0xff]  ;;  %v13041_v37 = vld [vmem:[#allocation121_spill] sm:$0xff] }
 0x198   :  { %v6999_v13 = vadd.f32 %v1451_v1, %v6859_v59  ;;  %v7002_v54 = vadd.f32 %v1452_v7, %v6862_v23  ;;  %v7005_v16 = vadd.f32 %v1453_v15, %v6865_v40  ;;  %v7008_v12 = vadd.f32 %v1454_v62, %v6872_v8  ;;  %v13042_v2 = vld [vmem:[#allocation123_spill] sm:$0xff]  ;;  %v13043_v17 = vld [vmem:[#allocation105_spill] sm:$0xff]  ;;  %v13044_v35 = vld [vmem:[#allocation112_spill] sm:$0xff] }
 0x199   :  { %v7011_v11 = vadd.f32 %v1455_v57, %v6875_v52  ;;  %v1480_v60 = vrot.slane %v6759_v41, 2  ;;  %v1481_v25 = vrot.slane %v6771_v51, 2  ;;  %v1482_v34 = vrot.slane %v6778_v29, 2  ;;  %v13036_v52 = vld [vmem:[#allocation96_spill] sm:$0xff]  ;;  %v13045_v15 = vld [vmem:[#allocation114_spill] sm:$0xff]  ;;  %v13048_v53 = vld [vmem:[#allocation107_spill] sm:$0xff] }
 0x19a   :  { %v1483_v31 = vrot.slane %v6784_v36, 2  ;;  %v1484_v27 = vrot.slane %v6789_v19, 2  ;;  %v1485_v3 = vrot.slane %v6793_v28, 2  ;;  %v1486_v59 = vrot.slane %v6797_v30, 2 }
 0x19b   :  { %v1487_v23 = vrot.slane %v6801_v18, 2  ;;  %v1490_v40 = vrot.slane %v6765_v0, 2  ;;  %v1491_v8 = vrot.slane %v6775_v45, 2  ;;  %v1488_v14 = vrot.slane %v13036_v52, 2 }
 0x19c   :  { %v1492_v42 = vrot.slane %v13037_v44, 2  ;;  %v1493_v26 = vrot.slane %v13038_v58, 2  ;;  %v1494_v7 = vrot.slane %v13039_v10, 2  ;;  %v1495_v33 = vrot.slane %v13040_v47, 2  ;;  %v13049_v58 = vld [vmem:[#allocation115_spill] sm:$0xff] }
 0x19d   :  { %v1496_v57 = vrot.slane %v13041_v37, 2  ;;  %v1497_v50 = vrot.slane %v13042_v2, 2  ;;  %v1498_v56 = vrot.slane %v13043_v17, 2  ;;  %v7032_v1 = vadd.f32 %v1456_v21, %v13044_v35  ;;  %v13051_v47 = vld [vmem:[#allocation99_spill] sm:$0xff] }
 0x19e   :  { %v7035_v62 = vadd.f32 %v1457_v6, %v13045_v15  ;;  %v1489_v55 = vrot.slane %v13047_v4, 2  ;;  %v1499_v52 = vrot.slane %v13048_v53, 2  ;;  %v7040_v10 = vadd.f32 %v1458_v20, %v13049_v58 }
 0x19f   :  { %v7043_v44 = vadd.f32 %v1459_v63, %v13051_v47  ;;  %v1500_v2 = vsel %vm771_vm1, %v1480_v60, %v1490_v40  ;;  %v1501_v21 = vsel %vm771_vm1, %v1481_v25, %v1491_v8  ;;  %v1502_v6 = vsel %vm771_vm1, %v1482_v34, %v1492_v42 }
 0x1a0   :  { %13046 = vst [vmem:[#allocation88_spill] sm:$0xff] %v7035_v62  ;;  %13050 = vst [vmem:[#allocation85_spill] sm:$0xff] %v7040_v10  ;;  %v1503_v35 = vsel %vm771_vm1, %v1483_v31, %v1493_v26  ;;  %v1504_v15 = vsel %vm771_vm1, %v1484_v27, %v1494_v7  ;;  %v1510_v20 = vsel %vm771_vm1, %v1490_v40, %v1480_v60  ;;  %v1520_v40 = vmul.f32 0.21674532, %v1500_v2 }
 0x1a1   :  { %13052 = vst [vmem:[#allocation89_spill] sm:$0xff] %v7043_v44  ;;  %v1505_v63 = vsel %vm771_vm1, %v1485_v3, %v1495_v33  ;;  %v1506_v58 = vsel %vm771_vm1, %v1486_v59, %v1496_v57  ;;  %v1507_v47 = vsel %vm771_vm1, %v1487_v23, %v1497_v50  ;;  %v1508_v44 = vsel %vm771_vm1, %v1488_v14, %v1498_v56 }
 0x1a2   :  { %v1509_v10 = vsel %vm771_vm1, %v1489_v55, %v1499_v52  ;;  %v1511_v62 = vsel %vm771_vm1, %v1491_v8, %v1481_v25  ;;  %v1512_v60 = vsel %vm771_vm1, %v1492_v42, %v1482_v34  ;;  %v1513_v53 = vsel %vm771_vm1, %v1493_v26, %v1483_v31 }
 0x1a3   :  { %v1514_v17 = vsel %vm771_vm1, %v1494_v7, %v1484_v27  ;;  %v1515_v4 = vsel %vm771_vm1, %v1495_v33, %v1485_v3  ;;  %v1521_v37 = vmul.f32 0.21674532, %v1510_v20  ;;  %v1516_v45 = vsel %vm771_vm1, %v1496_v57, %v1486_v59  ;;  %v13053_v27 = vld [vmem:[#allocation19_spill] sm:$0xff] }
 0x1a4   :  { %v1517_v25 = vsel %vm771_vm1, %v1497_v50, %v1487_v23  ;;  %v1518_v34 = vsel %vm771_vm1, %v1498_v56, %v1488_v14  ;;  %v1522_v8 = vmul.f32 0.21674532, %v1501_v21  ;;  %v1519_v31 = vsel %vm771_vm1, %v1499_v52, %v1489_v55  ;;  %v13054_v7 = vld [vmem:[#allocation51_spill] sm:$0xff] }
 0x1a5   :  { %v1523_v42 = vmul.f32 0.21674532, %v1511_v62  ;;  %v1524_v26 = vmul.f32 0.21674532, %v1502_v6  ;;  %v7087_v2 = vmul.f32 %v13054_v7, %v13053_v27  ;;  %v1525_v3 = vmul.f32 0.21674532, %v1512_v60 }
 0x1a6   :  { %v1526_v33 = vmul.f32 0.21674532, %v1503_v35  ;;  %v1527_v20 = vmul.f32 0.21674532, %v1513_v53  ;;  %v7090_v59 = vadd.f32 %v1520_v40, %v6966_v46  ;;  %v1528_v23 = vmul.f32 0.21674532, %v1504_v15 }
 0x1a7   :  { %13055 = vst [vmem:[#allocation80_spill] sm:$0xff] %v7087_v2  ;;  %v1529_v57 = vmul.f32 0.21674532, %v1514_v17  ;;  %v1530_v50 = vmul.f32 0.21674532, %v1505_v63  ;;  %v7093_v14 = vadd.f32 %v1521_v37, %v6969_v5  ;;  %v7096_v62 = vadd.f32 %v1522_v8, %v6972_v22  ;;  %v13060_v8 = vld [vmem:[#allocation119_spill] sm:$0xff] }
 0x1a8   :  { %v1531_v56 = vmul.f32 0.21674532, %v1515_v4  ;;  %v1532_v55 = vmul.f32 0.21674532, %v1506_v58  ;;  %v1533_v52 = vmul.f32 0.21674532, %v1516_v45  ;;  %v7099_v53 = vadd.f32 %v1523_v42, %v6975_v49 }
 0x1a9   :  { %v1534_v21 = vmul.f32 0.21674532, %v1507_v47  ;;  %v1535_v6 = vmul.f32 0.21674532, %v1517_v25  ;;  %v1536_v60 = vmul.f32 0.21674532, %v1508_v44  ;;  %v7102_v17 = vadd.f32 %v1524_v26, %v6978_v38 }
 0x1aa   :  { %v1537_v46 = vmul.f32 0.21674532, %v1518_v34  ;;  %v1538_v35 = vmul.f32 0.21674532, %v1509_v10  ;;  %v1539_v15 = vmul.f32 0.21674532, %v1519_v31  ;;  %v7105_v5 = vadd.f32 %v1525_v3, %v6981_v43 }
 0x1ab   :  { %v7108_v45 = vadd.f32 %v1526_v33, %v6984_v9  ;;  %v7111_v4 = vadd.f32 %v1527_v20, %v6987_v39  ;;  %v7114_v22 = vadd.f32 %v1528_v23, %v6990_v32  ;;  %v7117_v49 = vadd.f32 %v1529_v57, %v6993_v61  ;;  %v13058_v47 = vld [vmem:[#allocation117_spill] sm:$0xff]  ;;  %v13059_v25 = vld [vmem:[#allocation118_spill] sm:$0xff]  ;;  %v13061_v42 = vld [vmem:[#allocation120_spill] sm:$0xff] }
 0x1ac   :  { %v7120_v44 = vadd.f32 %v1530_v50, %v6996_v48  ;;  %v7123_v38 = vadd.f32 %v1531_v56, %v6999_v13  ;;  %v7126_v43 = vadd.f32 %v1532_v55, %v7002_v54  ;;  %v7129_v9 = vadd.f32 %v1533_v52, %v7005_v16  ;;  %v13062_v3 = vld [vmem:[#allocation121_spill] sm:$0xff]  ;;  %v13063_v20 = vld [vmem:[#allocation123_spill] sm:$0xff]  ;;  %v13064_v57 = vld [vmem:[#allocation96_spill] sm:$0xff] }
 0x1ad   :  { %v7132_v39 = vadd.f32 %v1534_v21, %v7008_v12  ;;  %v7135_v32 = vadd.f32 %v1535_v6, %v7011_v11  ;;  %v7138_v61 = vadd.f32 %v1536_v60, %v7032_v1  ;;  %v1560_v48 = vrot.slane %v6759_v41, 3  ;;  %v13057_v1 = vld [vmem:[#allocation116_spill] sm:$0xff]  ;;  %v13065_v56 = vld [vmem:[#allocation106_spill] sm:$0xff]  ;;  %v13066_v52 = vld [vmem:[#allocation105_spill] sm:$0xff] }
 0x1ae   :  { %v1561_v13 = vrot.slane %v6771_v51, 3  ;;  %v1562_v10 = vrot.slane %v6778_v29, 3  ;;  %v1563_v54 = vrot.slane %v6784_v36, 3  ;;  %v1564_v16 = vrot.slane %v6789_v19, 3  ;;  %v13067_v6 = vld [vmem:[#allocation107_spill] sm:$0xff]  ;;  %v13068_v7 = vld [vmem:[#allocation88_spill] sm:$0xff] }
 0x1af   :  { %13056 = vst [vmem:[#allocation112_spill] sm:$0xff] %v7138_v61  ;;  %v1565_v37 = vrot.slane %v6793_v28, 3  ;;  %v1566_v12 = vrot.slane %v6797_v30, 3  ;;  %v1570_v11 = vrot.slane %v6765_v0, 3  ;;  %v1567_v63 = vrot.slane %v6801_v18, 3  ;;  %v13070_v2 = vld [vmem:[#allocation85_spill] sm:$0xff] }
 0x1b0   :  { %v1571_v58 = vrot.slane %v13057_v1, 3  ;;  %v1572_v40 = vrot.slane %v13058_v47, 3  ;;  %v1573_v34 = vrot.slane %v13059_v25, 3  ;;  %v1574_v31 = vrot.slane %v13060_v8, 3  ;;  %v13072_v8 = vld [vmem:[#allocation89_spill] sm:$0xff] }
 0x1b1   :  { %v1575_v26 = vrot.slane %v13061_v42, 3  ;;  %v1576_v33 = vrot.slane %v13062_v3, 3  ;;  %v1577_v23 = vrot.slane %v13063_v20, 3  ;;  %v1568_v50 = vrot.slane %v13064_v57, 3 }
 0x1b2   :  { %v1569_v55 = vrot.slane %v13065_v56, 3  ;;  %v1578_v21 = vrot.slane %v13066_v52, 3  ;;  %v1579_v60 = vrot.slane %v13067_v6, 3  ;;  %v7161_v27 = vadd.f32 %v1537_v46, %v13068_v7 }
 0x1b3   :  { %v7164_v61 = vadd.f32 %v1538_v35, %v13070_v2  ;;  %v7167_v42 = vadd.f32 %v1539_v15, %v13072_v8  ;;  %v1580_v20 = vsel %vm852_vm2, %v1560_v48, %v1570_v11  ;;  %v1581_v3 = vsel %vm852_vm2, %v1561_v13, %v1571_v58 }
 0x1b4   :  { %13069 = vst [vmem:[#allocation114_spill] sm:$0xff] %v7161_v27  ;;  %v1582_v52 = vsel %vm852_vm2, %v1562_v10, %v1572_v40  ;;  %v1583_v6 = vsel %vm852_vm2, %v1563_v54, %v1573_v34  ;;  %v1590_v7 = vsel %vm852_vm2, %v1570_v11, %v1560_v48  ;;  %v1584_v2 = vsel %vm852_vm2, %v1564_v16, %v1574_v31 }
 0x1b5   :  { %13071 = vst [vmem:[#allocation115_spill] sm:$0xff] %v7164_v61  ;;  %13073 = vst [vmem:[#allocation99_spill] sm:$0xff] %v7167_v42  ;;  %v1585_v46 = vsel %vm852_vm2, %v1565_v37, %v1575_v26  ;;  %v1586_v35 = vsel %vm852_vm2, %v1566_v12, %v1576_v33  ;;  %v1587_v15 = vsel %vm852_vm2, %v1567_v63, %v1577_v23  ;;  %v1600_v11 = vmul.f32 0.27068216, %v1580_v20 }
 0x1b6   :  { %v1588_v8 = vsel %vm852_vm2, %v1568_v50, %v1578_v21  ;;  %v1589_v42 = vsel %vm852_vm2, %v1569_v55, %v1579_v60  ;;  %v1591_v48 = vsel %vm852_vm2, %v1571_v58, %v1561_v13  ;;  %v1592_v61 = vsel %vm852_vm2, %v1572_v40, %v1562_v10 }
 0x1b7   :  { %v1593_v27 = vsel %vm852_vm2, %v1573_v34, %v1563_v54  ;;  %v1594_v56 = vsel %vm852_vm2, %v1574_v31, %v1564_v16  ;;  %v1601_v57 = vmul.f32 0.27068216, %v1590_v7  ;;  %v1595_v25 = vsel %vm852_vm2, %v1575_v26, %v1565_v37  ;;  %v13074_v34 = vld [vmem:[#allocation20_spill] sm:$0xff] }
 0x1b8   :  { %v1596_v47 = vsel %vm852_vm2, %v1576_v33, %v1566_v12  ;;  %v1597_v13 = vsel %vm852_vm2, %v1577_v23, %v1567_v63  ;;  %v1602_v58 = vmul.f32 0.27068216, %v1581_v3  ;;  %v1598_v10 = vsel %vm852_vm2, %v1578_v21, %v1568_v50  ;;  %v13075_v16 = vld [vmem:[#allocation52_spill] sm:$0xff] }
 0x1b9   :  { %v1599_v54 = vsel %vm852_vm2, %v1579_v60, %v1569_v55  ;;  %v1603_v40 = vmul.f32 0.27068216, %v1591_v48  ;;  %v7211_v31 = vmul.f32 %v13075_v16, %v13074_v34  ;;  %v1604_v20 = vmul.f32 0.27068216, %v1582_v52  ;;  %v13087_v16 = vld [vmem:[#allocation112_spill] sm:$0xff] }
 0x1ba   :  { %v1605_v37 = vmul.f32 0.27068216, %v1592_v61  ;;  %v1606_v26 = vmul.f32 0.27068216, %v1583_v6  ;;  %v7214_v12 = vadd.f32 %v1600_v11, %v7090_v59  ;;  %v1607_v33 = vmul.f32 0.27068216, %v1593_v27 }
 0x1bb   :  { %13076 = vst [vmem:[#allocation116_spill] sm:$0xff] %v7211_v31  ;;  %v1608_v63 = vmul.f32 0.27068216, %v1584_v2  ;;  %v1609_v3 = vmul.f32 0.27068216, %v1594_v56  ;;  %v7217_v23 = vadd.f32 %v1601_v57, %v7093_v14  ;;  %v7220_v60 = vadd.f32 %v1602_v58, %v7096_v62  ;;  %v13078_v11 = vld [vmem:[#allocation118_spill] sm:$0xff] }
 0x1bc   :  { %v1610_v50 = vmul.f32 0.27068216, %v1585_v46  ;;  %v1611_v21 = vmul.f32 0.27068216, %v1595_v25  ;;  %v1612_v55 = vmul.f32 0.27068216, %v1586_v35  ;;  %v7223_v61 = vadd.f32 %v1603_v40, %v7099_v53 }
 0x1bd   :  { %v1613_v7 = vmul.f32 0.27068216, %v1596_v47  ;;  %v1614_v48 = vmul.f32 0.27068216, %v1587_v15  ;;  %v1615_v52 = vmul.f32 0.27068216, %v1597_v13  ;;  %v7226_v56 = vadd.f32 %v1604_v20, %v7102_v17 }
 0x1be   :  { %v1616_v59 = vmul.f32 0.27068216, %v1588_v8  ;;  %v1617_v6 = vmul.f32 0.27068216, %v1598_v10  ;;  %v1618_v27 = vmul.f32 0.27068216, %v1589_v42  ;;  %v7229_v57 = vadd.f32 %v1605_v37, %v7105_v5 }
 0x1bf   :  { %v1619_v14 = vmul.f32 0.27068216, %v1599_v54  ;;  %v7232_v25 = vadd.f32 %v1606_v26, %v7108_v45  ;;  %v7235_v62 = vadd.f32 %v1607_v33, %v7111_v4  ;;  %v7238_v47 = vadd.f32 %v1608_v63, %v7114_v22  ;;  %v13077_v15 = vld [vmem:[#allocation117_spill] sm:$0xff]  ;;  %v13079_v58 = vld [vmem:[#allocation96_spill] sm:$0xff]  ;;  %v13080_v54 = vld [vmem:[#allocation119_spill] sm:$0xff] }
 0x1c0   :  { %v7241_v53 = vadd.f32 %v1609_v3, %v7117_v49  ;;  %v7244_v42 = vadd.f32 %v1610_v50, %v7120_v44  ;;  %v7247_v17 = vadd.f32 %v1611_v21, %v7123_v38  ;;  %v7250_v5 = vadd.f32 %v1612_v55, %v7126_v43  ;;  %v13081_v20 = vld [vmem:[#allocation120_spill] sm:$0xff]  ;;  %v13082_v26 = vld [vmem:[#allocation121_spill] sm:$0xff]  ;;  %v13083_v63 = vld [vmem:[#allocation106_spill] sm:$0xff] }
 0x1c1   :  { %v7253_v45 = vadd.f32 %v1613_v7, %v7129_v9  ;;  %v7256_v4 = vadd.f32 %v1614_v48, %v7132_v39  ;;  %v7259_v22 = vadd.f32 %v1615_v52, %v7135_v32  ;;  %v1640_v49 = vrot.slane %v6759_v41, 4  ;;  %v13084_v50 = vld [vmem:[#allocation123_spill] sm:$0xff]  ;;  %v13085_v55 = vld [vmem:[#allocation105_spill] sm:$0xff]  ;;  %v13089_v31 = vld [vmem:[#allocation114_spill] sm:$0xff] }
 0x1c2   :  { %v1641_v44 = vrot.slane %v6771_v51, 4  ;;  %v1642_v2 = vrot.slane %v6778_v29, 4  ;;  %v1643_v38 = vrot.slane %v6784_v36, 4  ;;  %v1644_v43 = vrot.slane %v6789_v19, 4  ;;  %v13086_v48 = vld [vmem:[#allocation107_spill] sm:$0xff] }
 0x1c3   :  { %v1645_v46 = vrot.slane %v6793_v28, 4  ;;  %v1646_v9 = vrot.slane %v6797_v30, 4  ;;  %v1647_v39 = vrot.slane %v6801_v18, 4  ;;  %v1650_v35 = vrot.slane %v6765_v0, 4 }
 0x1c4   :  { %v1651_v32 = vrot.slane %v13057_v1, 4  ;;  %v1652_v8 = vrot.slane %v13077_v15, 4  ;;  %v1653_v13 = vrot.slane %v13078_v11, 4  ;;  %v1648_v10 = vrot.slane %v13079_v58, 4  ;;  %v13091_v15 = vld [vmem:[#allocation115_spill] sm:$0xff] }
 0x1c5   :  { %v1654_v40 = vrot.slane %v13080_v54, 4  ;;  %v1655_v37 = vrot.slane %v13081_v20, 4  ;;  %v1656_v33 = vrot.slane %v13082_v26, 4  ;;  %v1649_v3 = vrot.slane %v13083_v63, 4  ;;  %v13093_v20 = vld [vmem:[#allocation99_spill] sm:$0xff] }
 0x1c6   :  { %v1657_v21 = vrot.slane %v13084_v50, 4  ;;  %v1658_v7 = vrot.slane %v13085_v55, 4  ;;  %v1659_v52 = vrot.slane %v13086_v48, 4  ;;  %v7282_v34 = vadd.f32 %v1616_v59, %v13087_v16 }
 0x1c7   :  { %v7285_v11 = vadd.f32 %v1617_v6, %v13089_v31  ;;  %v7288_v54 = vadd.f32 %v1618_v27, %v13091_v15  ;;  %v7291_v58 = vadd.f32 %v1619_v14, %v13093_v20  ;;  %v1660_v63 = vsel %vm933_vm3, %v1640_v49, %v1650_v35 }
 0x1c8   :  { %13088 = vst [vmem:[#allocation88_spill] sm:$0xff] %v7282_v34  ;;  %v1661_v55 = vsel %vm933_vm3, %v1641_v44, %v1651_v32  ;;  %v1662_v48 = vsel %vm933_vm3, %v1642_v2, %v1652_v8  ;;  %v1663_v16 = vsel %vm933_vm3, %v1643_v38, %v1653_v13  ;;  %v1664_v31 = vsel %vm933_vm3, %v1644_v43, %v1654_v40 }
 0x1c9   :  { %13090 = vst [vmem:[#allocation85_spill] sm:$0xff] %v7285_v11  ;;  %13092 = vst [vmem:[#allocation89_spill] sm:$0xff] %v7288_v54  ;;  %v1665_v59 = vsel %vm933_vm3, %v1645_v46, %v1655_v37  ;;  %v1666_v6 = vsel %vm933_vm3, %v1646_v9, %v1656_v33  ;;  %v1670_v27 = vsel %vm933_vm3, %v1650_v35, %v1640_v49  ;;  %v1680_v35 = vmul.f32 0.21674532, %v1660_v63  ;;  %v13098_v63 = vld [vmem:[#allocation22_spill] sm:$0xff] }
 0x1ca   :  { %13094 = vst [vmem:[#allocation112_spill] sm:$0xff] %v7291_v58  ;;  %v1667_v14 = vsel %vm933_vm3, %v1647_v39, %v1657_v21  ;;  %v1668_v15 = vsel %vm933_vm3, %v1648_v10, %v1658_v7  ;;  %v1669_v20 = vsel %vm933_vm3, %v1649_v3, %v1659_v52  ;;  %v1671_v58 = vsel %vm933_vm3, %v1651_v32, %v1641_v44 }
 0x1cb   :  { %v1672_v54 = vsel %vm933_vm3, %v1652_v8, %v1642_v2  ;;  %v1673_v11 = vsel %vm933_vm3, %v1653_v13, %v1643_v38  ;;  %v1674_v49 = vsel %vm933_vm3, %v1654_v40, %v1644_v43  ;;  %v1675_v34 = vsel %vm933_vm3, %v1655_v37, %v1645_v46  ;;  %v13095_v8 = vld [vmem:[#allocation21_spill] sm:$0xff] }
 0x1cc   :  { %v1676_v50 = vsel %vm933_vm3, %v1656_v33, %v1646_v9  ;;  %v1677_v26 = vsel %vm933_vm3, %v1657_v21, %v1647_v39  ;;  %v1681_v44 = vmul.f32 0.21674532, %v1670_v27  ;;  %v1678_v2 = vsel %vm933_vm3, %v1658_v7, %v1648_v10  ;;  %v13096_v43 = vld [vmem:[#allocation53_spill] sm:$0xff]  ;;  %v13099_v9 = vld [vmem:[#allocation54_spill] sm:$0xff] }
 0x1cd   :  { %v1679_v38 = vsel %vm933_vm3, %v1659_v52, %v1649_v3  ;;  %v1682_v32 = vmul.f32 0.21674532, %v1661_v55  ;;  %v7335_v13 = vmul.f32 %v13096_v43, %v13095_v8  ;;  %v1683_v40 = vmul.f32 0.21674532, %v1671_v58  ;;  %v13112_v8 = vld [vmem:[#allocation106_spill] sm:$0xff] }
 0x1ce   :  { %v1684_v46 = vmul.f32 0.21674532, %v1662_v48  ;;  %v1685_v37 = vmul.f32 0.21674532, %v1672_v54  ;;  %v7339_v33 = vmul.f32 %v13099_v9, %v13098_v63  ;;  %v1686_v39 = vmul.f32 0.21674532, %v1663_v16 }
 0x1cf   :  { %13097 = vst [vmem:[#allocation114_spill] sm:$0xff] %v7335_v13  ;;  %v1687_v21 = vmul.f32 0.21674532, %v1673_v11  ;;  %v1688_v27 = vmul.f32 0.21674532, %v1664_v31  ;;  %v7342_v10 = vadd.f32 %v1680_v35, %v7214_v12  ;;  %v7345_v52 = vadd.f32 %v1681_v44, %v7217_v23  ;;  %v13102_v35 = vld [vmem:[#allocation117_spill] sm:$0xff] }
 0x1d0   :  { %13100 = vst [vmem:[#allocation115_spill] sm:$0xff] %v7339_v33  ;;  %v1689_v7 = vmul.f32 0.21674532, %v1674_v49  ;;  %v1690_v3 = vmul.f32 0.21674532, %v1665_v59  ;;  %v7348_v54 = vadd.f32 %v1682_v32, %v7220_v60  ;;  %v7351_v11 = vadd.f32 %v1683_v40, %v7223_v61  ;;  %v13104_v32 = vld [vmem:[#allocation119_spill] sm:$0xff] }
 0x1d1   :  { %v1691_v55 = vmul.f32 0.21674532, %v1675_v34  ;;  %v1692_v43 = vmul.f32 0.21674532, %v1666_v6  ;;  %v1693_v58 = vmul.f32 0.21674532, %v1676_v50  ;;  %v7354_v59 = vadd.f32 %v1684_v46, %v7226_v56 }
 0x1d2   :  { %v1694_v48 = vmul.f32 0.21674532, %v1667_v14  ;;  %v1695_v9 = vmul.f32 0.21674532, %v1677_v26  ;;  %v1696_v63 = vmul.f32 0.21674532, %v1668_v15  ;;  %v7357_v34 = vadd.f32 %v1685_v37, %v7229_v57 }
 0x1d3   :  { %v1697_v16 = vmul.f32 0.21674532, %v1678_v2  ;;  %v1698_v12 = vmul.f32 0.21674532, %v1669_v20  ;;  %v1699_v31 = vmul.f32 0.21674532, %v1679_v38  ;;  %v7360_v23 = vadd.f32 %v1686_v39, %v7232_v25 }
 0x1d4   :  { %v7363_v60 = vadd.f32 %v1687_v21, %v7235_v62  ;;  %v7366_v26 = vadd.f32 %v1688_v27, %v7238_v47  ;;  %v7369_v61 = vadd.f32 %v1689_v7, %v7241_v53  ;;  %v7372_v50 = vadd.f32 %v1690_v3, %v7244_v42  ;;  %v13101_v20 = vld [vmem:[#allocation96_spill] sm:$0xff]  ;;  %v13103_v2 = vld [vmem:[#allocation118_spill] sm:$0xff]  ;;  %v13106_v37 = vld [vmem:[#allocation121_spill] sm:$0xff] }
 0x1d5   :  { %v7375_v56 = vadd.f32 %v1691_v55, %v7247_v17  ;;  %v7378_v57 = vadd.f32 %v1692_v43, %v7250_v5  ;;  %v7381_v25 = vadd.f32 %v1693_v58, %v7253_v45  ;;  %v7384_v62 = vadd.f32 %v1694_v48, %v7256_v4  ;;  %v13105_v40 = vld [vmem:[#allocation120_spill] sm:$0xff]  ;;  %v13107_v39 = vld [vmem:[#allocation123_spill] sm:$0xff]  ;;  %v13108_v27 = vld [vmem:[#allocation105_spill] sm:$0xff] }
 0x1d6   :  { %v7387_v47 = vadd.f32 %v1695_v9, %v7259_v22  ;;  %v1720_v53 = vrot.slane %v6759_v41, 5  ;;  %v1721_v42 = vrot.slane %v6771_v51, 5  ;;  %v1722_v6 = vrot.slane %v6778_v29, 5  ;;  %v13109_v3 = vld [vmem:[#allocation88_spill] sm:$0xff]  ;;  %v13110_v58 = vld [vmem:[#allocation85_spill] sm:$0xff]  ;;  %v13113_v13 = vld [vmem:[#allocation107_spill] sm:$0xff] }
 0x1d7   :  { %v1723_v17 = vrot.slane %v6784_v36, 5  ;;  %v1724_v5 = vrot.slane %v6789_v19, 5  ;;  %v1725_v14 = vrot.slane %v6793_v28, 5  ;;  %v1726_v45 = vrot.slane %v6797_v30, 5 }
 0x1d8   :  { %v1727_v4 = vrot.slane %v6801_v18, 5  ;;  %v1730_v15 = vrot.slane %v6765_v0, 5  ;;  %v1731_v22 = vrot.slane %v13057_v1, 5  ;;  %v1728_v49 = vrot.slane %v13101_v20, 5  ;;  %v13114_v18 = vld [vmem:[#allocation89_spill] sm:$0xff] }
 0x1d9   :  { %v1732_v44 = vrot.slane %v13102_v35, 5  ;;  %v1733_v38 = vrot.slane %v13103_v2, 5  ;;  %v1734_v43 = vrot.slane %v13104_v32, 5  ;;  %v1735_v46 = vrot.slane %v13105_v40, 5  ;;  %v13116_v40 = vld [vmem:[#allocation112_spill] sm:$0xff] }
 0x1da   :  { %v1736_v9 = vrot.slane %v13106_v37, 5  ;;  %v1737_v21 = vrot.slane %v13107_v39, 5  ;;  %v1738_v7 = vrot.slane %v13108_v27, 5  ;;  %v7408_v55 = vadd.f32 %v1696_v63, %v13109_v3 }
 0x1db   :  { %v7411_v48 = vadd.f32 %v1697_v16, %v13110_v58  ;;  %v1729_v33 = vrot.slane %v13112_v8, 5  ;;  %v1739_v20 = vrot.slane %v13113_v13, 5  ;;  %v7416_v32 = vadd.f32 %v1698_v12, %v13114_v18 }
 0x1dc   :  { %v7419_v2 = vadd.f32 %v1699_v31, %v13116_v40  ;;  %v1740_v39 = vsel %vm1014_vm4, %v1720_v53, %v1730_v15  ;;  %v1741_v63 = vsel %vm1014_vm4, %v1721_v42, %v1731_v22  ;;  %v1742_v16 = vsel %vm1014_vm4, %v1722_v6, %v1732_v44 }
 0x1dd   :  { %13111 = vst [vmem:[#allocation99_spill] sm:$0xff] %v7411_v48  ;;  %13115 = vst [vmem:[#allocation88_spill] sm:$0xff] %v7416_v32  ;;  %v1743_v3 = vsel %vm1014_vm4, %v1723_v17, %v1733_v38  ;;  %v1744_v58 = vsel %vm1014_vm4, %v1724_v5, %v1734_v43  ;;  %v1750_v18 = vsel %vm1014_vm4, %v1730_v15, %v1720_v53  ;;  %v1760_v15 = vmul.f32 0.11128076, %v1740_v39 }
 0x1de   :  { %13117 = vst [vmem:[#allocation85_spill] sm:$0xff] %v7419_v2  ;;  %v1745_v12 = vsel %vm1014_vm4, %v1725_v14, %v1735_v46  ;;  %v1746_v31 = vsel %vm1014_vm4, %v1726_v45, %v1736_v9  ;;  %v1747_v40 = vsel %vm1014_vm4, %v1727_v4, %v1737_v21  ;;  %v1748_v2 = vsel %vm1014_vm4, %v1728_v49, %v1738_v7 }
 0x1df   :  { %v1749_v32 = vsel %vm1014_vm4, %v1729_v33, %v1739_v20  ;;  %v1751_v48 = vsel %vm1014_vm4, %v1731_v22, %v1721_v42  ;;  %v1752_v53 = vsel %vm1014_vm4, %v1732_v44, %v1722_v6  ;;  %v1753_v13 = vsel %vm1014_vm4, %v1733_v38, %v1723_v17 }
 0x1e0   :  { %v1754_v27 = vsel %vm1014_vm4, %v1734_v43, %v1724_v5  ;;  %v1755_v8 = vsel %vm1014_vm4, %v1735_v46, %v1725_v14  ;;  %v1761_v37 = vmul.f32 0.11128076, %v1750_v18  ;;  %v1756_v35 = vsel %vm1014_vm4, %v1736_v9, %v1726_v45  ;;  %v13118_v5 = vld [vmem:[#allocation23_spill] sm:$0xff] }
 0x1e1   :  { %v1757_v42 = vsel %vm1014_vm4, %v1737_v21, %v1727_v4  ;;  %v1758_v6 = vsel %vm1014_vm4, %v1738_v7, %v1728_v49  ;;  %v1762_v22 = vmul.f32 0.11128076, %v1741_v63  ;;  %v1759_v17 = vsel %vm1014_vm4, %v1739_v20, %v1729_v33  ;;  %v13119_v43 = vld [vmem:[#allocation55_spill] sm:$0xff] }
 0x1e2   :  { %v1763_v44 = vmul.f32 0.11128076, %v1751_v48  ;;  %v1764_v38 = vmul.f32 0.11128076, %v1742_v16  ;;  %v7463_v39 = vmul.f32 %v13119_v43, %v13118_v5  ;;  %v1765_v14 = vmul.f32 0.11128076, %v1752_v53 }
 0x1e3   :  { %v1766_v46 = vmul.f32 0.11128076, %v1743_v3  ;;  %v1767_v18 = vmul.f32 0.11128076, %v1753_v13  ;;  %v7466_v45 = vadd.f32 %v1760_v15, %v7342_v10  ;;  %v1768_v4 = vmul.f32 0.11128076, %v1744_v58 }
 0x1e4   :  { %v1769_v9 = vmul.f32 0.11128076, %v1754_v27  ;;  %v1770_v21 = vmul.f32 0.11128076, %v1745_v12  ;;  %v7469_v49 = vadd.f32 %v1761_v37, %v7345_v52  ;;  %v1771_v7 = vmul.f32 0.11128076, %v1755_v8 }
 0x1e5   :  { %v1772_v33 = vmul.f32 0.11128076, %v1746_v31  ;;  %v1773_v20 = vmul.f32 0.11128076, %v1756_v35  ;;  %v7472_v48 = vadd.f32 %v1762_v22, %v7348_v54  ;;  %v1774_v63 = vmul.f32 0.11128076, %v1747_v40 }
 0x1e6   :  { %v1775_v16 = vmul.f32 0.11128076, %v1757_v42  ;;  %v1776_v53 = vmul.f32 0.11128076, %v1748_v2  ;;  %v7475_v13 = vadd.f32 %v1763_v44, %v7351_v11  ;;  %v1777_v10 = vmul.f32 0.11128076, %v1758_v6 }
 0x1e7   :  { %v1778_v3 = vmul.f32 0.11128076, %v1749_v32  ;;  %v1779_v58 = vmul.f32 0.11128076, %v1759_v17  ;;  %v7478_v27 = vadd.f32 %v1764_v38, %v7354_v59  ;;  %v7481_v52 = vadd.f32 %v1765_v14, %v7357_v34  ;;  %v13121_v40 = vld [vmem:[#allocation118_spill] sm:$0xff]  ;;  %v13122_v15 = vld [vmem:[#allocation119_spill] sm:$0xff] }
 0x1e8   :  { %v7484_v8 = vadd.f32 %v1766_v46, %v7360_v23  ;;  %v7487_v54 = vadd.f32 %v1767_v18, %v7363_v60  ;;  %v7490_v35 = vadd.f32 %v1768_v4, %v7366_v26  ;;  %v7493_v11 = vadd.f32 %v1769_v9, %v7369_v61  ;;  %v13123_v42 = vld [vmem:[#allocation122_spill] sm:$0xff]  ;;  %v13124_v6 = vld [vmem:[#allocation120_spill] sm:$0xff]  ;;  %v13125_v22 = vld [vmem:[#allocation121_spill] sm:$0xff] }
 0x1e9   :  { %v7496_v2 = vadd.f32 %v1770_v21, %v7372_v50  ;;  %v7499_v59 = vadd.f32 %v1771_v7, %v7375_v56  ;;  %v7502_v34 = vadd.f32 %v1772_v33, %v7378_v57  ;;  %v7505_v23 = vadd.f32 %v1773_v20, %v7381_v25  ;;  %v13126_v17 = vld [vmem:[#allocation123_spill] sm:$0xff]  ;;  %v13127_v44 = vld [vmem:[#allocation96_spill] sm:$0xff]  ;;  %v13128_v38 = vld [vmem:[#allocation106_spill] sm:$0xff] }
 0x1ea   :  { %v7508_v60 = vadd.f32 %v1774_v63, %v7384_v62  ;;  %v7511_v26 = vadd.f32 %v1775_v16, %v7387_v47  ;;  %v7514_v61 = vadd.f32 %v1776_v53, %v7408_v55  ;;  %v1800_v50 = vrot.slane %v6759_v41, 6  ;;  %v13120_v55 = vld [vmem:[#allocation117_spill] sm:$0xff]  ;;  %v13130_v46 = vld [vmem:[#allocation107_spill] sm:$0xff]  ;;  %v13132_v21 = vld [vmem:[#allocation88_spill] sm:$0xff] }
 0x1eb   :  { %v1801_v56 = vrot.slane %v6771_v51, 6  ;;  %v1802_v32 = vrot.slane %v6778_v29, 6  ;;  %v1803_v57 = vrot.slane %v6784_v36, 6  ;;  %v1804_v25 = vrot.slane %v6789_v19, 6  ;;  %v13129_v14 = vld [vmem:[#allocation105_spill] sm:$0xff]  ;;  %v13131_v4 = vld [vmem:[#allocation99_spill] sm:$0xff] }
 0x1ec   :  { %v1805_v37 = vrot.slane %v6793_v28, 6  ;;  %v1806_v62 = vrot.slane %v6797_v30, 6  ;;  %v1810_v47 = vrot.slane %v6765_v0, 6  ;;  %v1811_v12 = vrot.slane %v13057_v1, 6  ;;  %v13133_v33 = vld [vmem:[#allocation85_spill] sm:$0xff] }
 0x1ed   :  { %v1812_v31 = vrot.slane %v13120_v55, 6  ;;  %v1813_v41 = vrot.slane %v13121_v40, 6  ;;  %v1814_v51 = vrot.slane %v13122_v15, 6  ;;  %v1807_v29 = vrot.slane %v13123_v42, 6 }
 0x1ee   :  { %v1815_v36 = vrot.slane %v13124_v6, 6  ;;  %v1816_v19 = vrot.slane %v13125_v22, 6  ;;  %v1817_v28 = vrot.slane %v13126_v17, 6  ;;  %v1808_v30 = vrot.slane %v13127_v44, 6 }
 0x1ef   :  { %v1809_v0 = vrot.slane %v13128_v38, 6  ;;  %v1818_v1 = vrot.slane %v13129_v14, 6  ;;  %v1819_v18 = vrot.slane %v13130_v46, 6  ;;  %v1797_v9 = vadd.f32 %v1777_v10, %v13131_v4  ;;  %v13135_v4 = vld [vmem:[#allocation56_spill] sm:$0xff] }
 0x1f0   :  { %v1798_v7 = vadd.f32 %v1778_v3, %v13132_v21  ;;  %v1799_v20 = vadd.f32 %v1779_v58, %v13133_v33  ;;  %v1820_v63 = vsel %vm1095_vm5, %v1800_v50, %v1810_v47  ;;  %v1821_v16 = vsel %vm1095_vm5, %v1801_v56, %v1811_v12 }
 0x1f1   :  { %v1822_v53 = vsel %vm1095_vm5, %v1802_v32, %v1812_v31  ;;  %v1823_v55 = vsel %vm1095_vm5, %v1803_v57, %v1813_v41  ;;  %v1824_v40 = vsel %vm1095_vm5, %v1804_v25, %v1814_v51  ;;  %v1825_v10 = vsel %vm1095_vm5, %v1805_v37, %v1815_v36 }
 0x1f2   :  { %v1826_v3 = vsel %vm1095_vm5, %v1806_v62, %v1816_v19  ;;  %v1827_v58 = vsel %vm1095_vm5, %v1807_v29, %v1817_v28  ;;  %v1830_v15 = vsel %vm1095_vm5, %v1810_v47, %v1800_v50  ;;  %v1828_v42 = vsel %vm1095_vm5, %v1808_v30, %v1818_v1 }
 0x1f3   :  { %v1829_v6 = vsel %vm1095_vm5, %v1809_v0, %v1819_v18  ;;  %v1831_v22 = vsel %vm1095_vm5, %v1811_v12, %v1801_v56  ;;  %v1832_v17 = vsel %vm1095_vm5, %v1812_v31, %v1802_v32  ;;  %v1833_v44 = vsel %vm1095_vm5, %v1813_v41, %v1803_v57 }
 0x1f4   :  { %v1834_v38 = vsel %vm1095_vm5, %v1814_v51, %v1804_v25  ;;  %v1835_v50 = vsel %vm1095_vm5, %v1815_v36, %v1805_v37  ;;  %v1840_v47 = vmul.f32 0.036632847, %v1820_v63  ;;  %v1836_v14 = vsel %vm1095_vm5, %v1816_v19, %v1806_v62  ;;  %v13134_v36 = vld [vmem:[#allocation24_spill] sm:$0xff] }
 0x1f5   :  { %v1837_v46 = vsel %vm1095_vm5, %v1817_v28, %v1807_v29  ;;  %v1838_v56 = vsel %vm1095_vm5, %v1818_v1, %v1808_v30  ;;  %v1841_v32 = vmul.f32 0.036632847, %v1830_v15  ;;  %v1839_v57 = vsel %vm1095_vm5, %v1819_v18, %v1809_v0 }
 0x1f6   :  { %v1842_v12 = vmul.f32 0.036632847, %v1821_v16  ;;  %v1843_v31 = vmul.f32 0.036632847, %v1831_v22  ;;  %v1844_v25 = vmul.f32 0.036632847, %v1822_v53  ;;  %v7581_v21 = vmul.f32 %v13135_v4, %v13134_v36 }
 0x1f7   :  { %v1845_v41 = vmul.f32 0.036632847, %v1832_v17  ;;  %v1846_v51 = vmul.f32 0.036632847, %v1823_v55  ;;  %v1847_v37 = vmul.f32 0.036632847, %v1833_v44  ;;  %v7584_v28 = vadd.f32 %v1840_v47, %v7466_v45 }
 0x1f8   :  { %v1848_v62 = vmul.f32 0.036632847, %v1824_v40  ;;  %v1849_v19 = vmul.f32 0.036632847, %v1834_v38  ;;  %v1850_v29 = vmul.f32 0.036632847, %v1825_v10  ;;  %v7587_v0 = vadd.f32 %v1841_v32, %v7469_v49 }
 0x1f9   :  { %13136 = vst [vmem:[#allocation89_spill] sm:$0xff] %v7584_v28  ;;  %v1851_v30 = vmul.f32 0.036632847, %v1835_v50  ;;  %v1852_v1 = vmul.f32 0.036632847, %v1826_v3  ;;  %v7590_v53 = vadd.f32 %v1842_v12, %v7472_v48  ;;  %v7593_v10 = vadd.f32 %v1843_v31, %v7475_v13  ;;  %v13157_v22 = vld [vmem:[#allocation57_spill] sm:$0xff] }
 0x1fa   :  { %v1853_v33 = vmul.f32 0.036632847, %v1836_v14  ;;  %13137 = vst [vmem:[#allocation112_spill] sm:$0xff] %v7587_v0  ;;  %v1854_v18 = vmul.f32 0.036632847, %v1827_v58  ;;  %v7596_v45 = vadd.f32 %v1844_v25, %v7478_v27  ;;  %v7599_v3 = vadd.f32 %v1845_v41, %v7481_v52  ;;  %v13159_v44 = vld [vmem:[#allocation58_spill] sm:$0xff] }
 0x1fb   :  { %v1855_v63 = vmul.f32 0.036632847, %v1837_v46  ;;  %v1856_v16 = vmul.f32 0.036632847, %v1828_v42  ;;  %13138 = vst [vmem:[#allocation117_spill] sm:$0xff] %v7590_v53  ;;  %13139 = vst [vmem:[#allocation118_spill] sm:$0xff] %v7593_v10  ;;  %v7602_v49 = vadd.f32 %v1846_v51, %v7484_v8  ;;  %v7605_v58 = vadd.f32 %v1847_v37, %v7487_v54 }
 0x1fc   :  { %v1857_v55 = vmul.f32 0.036632847, %v1838_v56  ;;  %v1858_v15 = vmul.f32 0.036632847, %v1829_v6  ;;  %v1859_v40 = vmul.f32 0.036632847, %v1839_v57  ;;  %v7608_v48 = vadd.f32 %v1848_v62, %v7490_v35 }
 0x1fd   :  { %13140 = vst [vmem:[#allocation119_spill] sm:$0xff] %v7596_v45  ;;  %13141 = vst [vmem:[#allocation122_spill] sm:$0xff] %v7599_v3  ;;  %v7611_v42 = vadd.f32 %v1849_v19, %v7493_v11  ;;  %v7614_v13 = vadd.f32 %v1850_v29, %v7496_v2  ;;  %v7617_v27 = vadd.f32 %v1851_v30, %v7499_v59  ;;  %v13160_v38 = vld [vmem:[#allocation27_spill] sm:$0xff]  ;;  %v13163_v47 = vld [vmem:[#allocation60_spill] sm:$0xff]  ;;  %v7720_v4 = vmul.f32 0.036632847, %v7581_v21 }
 0x1fe   :  { %13142 = vst [vmem:[#allocation120_spill] sm:$0xff] %v7602_v49  ;;  %13143 = vst [vmem:[#allocation121_spill] sm:$0xff] %v7605_v58  ;;  %v7620_v52 = vadd.f32 %v1852_v1, %v7502_v34  ;;  %v7623_v8 = vadd.f32 %v1853_v33, %v7505_v23  ;;  %v7626_v54 = vadd.f32 %v1854_v18, %v7508_v60  ;;  %v13156_v34 = vld [vmem:[#allocation25_spill] sm:$0xff]  ;;  %v13158_v23 = vld [vmem:[#allocation26_spill] sm:$0xff] }
 0x1ff   :  { %13144 = vst [vmem:[#allocation123_spill] sm:$0xff] %v7608_v48  ;;  %13145 = vst [vmem:[#allocation96_spill] sm:$0xff] %v7611_v42  ;;  %v7629_v35 = vadd.f32 %v1855_v63, %v7511_v26  ;;  %v7632_v11 = vadd.f32 %v1856_v16, %v7514_v61  ;;  %v7634_v2 = vadd.f32 %v1857_v55, %v1797_v9  ;;  %v13161_v26 = vld [vmem:[#allocation59_spill] sm:$0xff]  ;;  %v13162_v61 = vld [vmem:[#allocation28_spill] sm:$0xff] }
 0x200   :  { %13146 = vst [vmem:[#allocation106_spill] sm:$0xff] %v7614_v13  ;;  %13147 = vst [vmem:[#allocation105_spill] sm:$0xff] %v7617_v27  ;;  %v7636_v6 = vadd.f32 %v1858_v15, %v1798_v7  ;;  %v7638_v59 = vadd.f32 %v1859_v40, %v1799_v20  ;;  %v7642_v17 = vmul.f32 %v13157_v22, %v13156_v34  ;;  %v13164_v7 = vld [vmem:[#allocation29_spill] sm:$0xff]  ;;  %v13166_v46 = vld [vmem:[#allocation30_spill] sm:$0xff] }
 0x201   :  { %13148 = vst [vmem:[#allocation107_spill] sm:$0xff] %v7620_v52  ;;  %13149 = vst [vmem:[#allocation99_spill] sm:$0xff] %v7623_v8  ;;  %v7646_v60 = vmul.f32 %v13159_v44, %v13158_v23  ;;  %v7650_v50 = vmul.f32 %v13161_v26, %v13160_v38  ;;  %v7654_v9 = vmul.f32 %v13163_v47, %v13162_v61  ;;  %v13165_v14 = vld [vmem:[#allocation61_spill] sm:$0xff]  ;;  %v13167_v56 = vld [vmem:[#allocation62_spill] sm:$0xff]  ;;  %v7713_v26 = vmul.f32 0.036632847, %v7463_v39 }
 0x202   :  { %13150 = vst [vmem:[#allocation88_spill] sm:$0xff] %v7626_v54  ;;  %13151 = vst [vmem:[#allocation85_spill] sm:$0xff] %v7629_v35  ;;  %v7658_v20 = vmul.f32 %v13165_v14, %v13164_v7  ;;  %v7662_v32 = vmul.f32 %v13167_v56, %v13166_v46  ;;  %v13168_v57 = vld [vmem:[#allocation31_spill] sm:$0xff]  ;;  %v13171_v25 = vld [vmem:[#allocation32_spill] sm:$0xff]  ;;  %v7723_v43 = vmul.f32 0.036632847, %v7642_v17 }
 0x203   :  { %13152 = vst [vmem:[#allocation124_spill] sm:$0xff] %v7632_v11  ;;  %13153 = vst [vmem:[#allocation125_spill] sm:$0xff] %v7634_v2  ;;  %v13169_v12 = vld [vmem:[#allocation63_spill] sm:$0xff]  ;;  %v13172_v41 = vld [vmem:[#allocation64_spill] sm:$0xff]  ;;  %v7781_v24 = vmul.f32 0.11128076, %v7642_v17 }
 0x204   :  { %13154 = vst [vmem:[#allocation126_spill] sm:$0xff] %v7636_v6  ;;  %13155 = vst [vmem:[#allocation127_spill] sm:$0xff] %v7638_v59  ;;  %v7666_v31 = vmul.f32 %v13169_v12, %v13168_v57  ;;  %v7670_v51 = vmul.f32 %v13172_v41, %v13171_v25  ;;  %v13174_v37 = vld [vmem:[#allocation33_spill] sm:$0xff]  ;;  %v13177_v29 = vld [vmem:[#allocation34_spill] sm:$0xff]  ;;  %v7744_v25 = vmul.f32 0.036632847, %v7658_v20 }
 0x205   :  { %v13175_v62 = vld [vmem:[#allocation65_spill] sm:$0xff]  ;;  %v13178_v30 = vld [vmem:[#allocation66_spill] sm:$0xff]  ;;  %v13180_v33 = vld [vmem:[#allocation35_spill] sm:$0xff]  ;;  %v7747_v57 = vmul.f32 0.036632847, %v7662_v32  ;;  %13234 = vst [vmem:[#allocation140_spill] sm:$0xff] %v7781_v24 }
 0x206   :  { %13170 = vst [vmem:[#allocation128_spill] sm:$0xff] %v7666_v31  ;;  %13173 = vst [vmem:[#allocation129_spill] sm:$0xff] %v7670_v51  ;;  %v7674_v19 = vmul.f32 %v13175_v62, %v13174_v37  ;;  %v7678_v1 = vmul.f32 %v13178_v30, %v13177_v29  ;;  %v13181_v18 = vld [vmem:[#allocation67_spill] sm:$0xff]  ;;  %v13183_v16 = vld [vmem:[#allocation108_spill] sm:$0xff] }
 0x207   :  { %v7682_v63 = vmul.f32 %v13181_v18, %v13180_v33  ;;  %v1912_v55 = vmul.f32 0.036632847, %v13183_v16  ;;  %v13184_v15 = vld [vmem:[#allocation36_spill] sm:$0xff]  ;;  %v13187_v6 = vld [vmem:[#allocation109_spill] sm:$0xff]  ;;  %v13188_v11 = vld [vmem:[#allocation110_spill] sm:$0xff]  ;;  %13222 = vst [vmem:[#allocation134_spill] sm:$0xff] %v7744_v25 }
 0x208   :  { %13176 = vst [vmem:[#allocation130_spill] sm:$0xff] %v7674_v19  ;;  %13179 = vst [vmem:[#allocation131_spill] sm:$0xff] %v7678_v1  ;;  %v13185_v40 = vld [vmem:[#allocation68_spill] sm:$0xff]  ;;  %v1913_v2 = vmul.f32 0.036632847, %v13187_v6  ;;  %v13189_v54 = vld [vmem:[#allocation111_spill] sm:$0xff] }
 0x209   :  { %13182 = vst [vmem:[#allocation132_spill] sm:$0xff] %v7682_v63  ;;  %v7687_v59 = vmul.f32 %v13185_v40, %v13184_v15  ;;  %v1914_v35 = vmul.f32 0.036632847, %v13188_v11  ;;  %v1915_v8 = vmul.f32 0.036632847, %v13189_v54  ;;  %v13190_v52 = vld [vmem:[#allocation37_spill] sm:$0xff] }
 0x20a   :  { %v13191_v27 = vld [vmem:[#allocation69_spill] sm:$0xff]  ;;  %v13195_v3 = vld [vmem:[#allocation103_spill] sm:$0xff]  ;;  %v13196_v45 = vld [vmem:[#allocation38_spill] sm:$0xff]  ;;  %v7733_v15 = vmul.f32 0.036632847, %v7650_v50  ;;  %13223 = vst [vmem:[#allocation135_spill] sm:$0xff] %v7747_v57 }
 0x20b   :  { %13186 = vst [vmem:[#allocation108_spill] sm:$0xff] %v7687_v59  ;;  %v7694_v13 = vmul.f32 %v13191_v27, %v13190_v52  ;;  %v13193_v42 = vld [vmem:[#allocation113_spill] sm:$0xff]  ;;  %v1918_v16 = vmul.f32 0.036632847, %v13195_v3  ;;  %v13197_v10 = vld [vmem:[#allocation70_spill] sm:$0xff]  ;;  %v13199_v0 = vld [vmem:[#allocation104_spill] sm:$0xff] }
 0x20c   :  { %v1916_v48 = vmul.f32 0.036632847, %v13193_v42  ;;  %v13194_v58 = vld [vmem:[#allocation101_spill] sm:$0xff]  ;;  %v7701_v53 = vmul.f32 %v13197_v10, %v13196_v45  ;;  %v1919_v6 = vmul.f32 0.036632847, %v13199_v0  ;;  %v13200_v28 = vld [vmem:[#allocation80_spill] sm:$0xff] }
 0x20d   :  { %13192 = vst [vmem:[#allocation109_spill] sm:$0xff] %v7694_v13  ;;  %v1917_v49 = vmul.f32 0.036632847, %v13194_v58  ;;  %v1920_v40 = vmul.f32 0.036632847, %v13200_v28  ;;  %v13201_v18 = vld [vmem:[#allocation116_spill] sm:$0xff] }
 0x20e   :  { %13198 = vst [vmem:[#allocation110_spill] sm:$0xff] %v7701_v53  ;;  %v1921_v30 = vmul.f32 0.036632847, %v13201_v18  ;;  %v13202_v62 = vld [vmem:[#allocation39_spill] sm:$0xff]  ;;  %v13205_v12 = vld [vmem:[#allocation114_spill] sm:$0xff]  ;;  %13207 = vst [vmem:[#allocation113_spill] sm:$0xff] %v7713_v26 }
 0x20f   :  { %v13203_v41 = vld [vmem:[#allocation71_spill] sm:$0xff]  ;;  %v1922_v56 = vmul.f32 0.036632847, %v13205_v12  ;;  %v13208_v44 = vld [vmem:[#allocation40_spill] sm:$0xff]  ;;  %13211 = vst [vmem:[#allocation103_spill] sm:$0xff] %v7720_v4  ;;  %13212 = vst [vmem:[#allocation104_spill] sm:$0xff] %v7723_v43 }
 0x210   :  { %v7708_v27 = vmul.f32 %v13203_v41, %v13202_v62  ;;  %v13206_v14 = vld [vmem:[#allocation115_spill] sm:$0xff]  ;;  %v13209_v10 = vld [vmem:[#allocation72_spill] sm:$0xff]  ;;  %v7726_v41 = vmul.f32 0.036632847, %v7646_v60  ;;  %v13214_v62 = vld [vmem:[#allocation41_spill] sm:$0xff]  ;;  %13217 = vst [vmem:[#allocation114_spill] sm:$0xff] %v7733_v15 }
 0x211   :  { %v1923_v47 = vmul.f32 0.036632847, %v13206_v14  ;;  %v7717_v22 = vmul.f32 %v13209_v10, %v13208_v44  ;;  %v13215_v45 = vld [vmem:[#allocation73_spill] sm:$0xff]  ;;  %v7736_v33 = vmul.f32 0.036632847, %v7654_v9  ;;  %v13219_v44 = vld [vmem:[#allocation42_spill] sm:$0xff] }
 0x212   :  { %13204 = vst [vmem:[#allocation111_spill] sm:$0xff] %v7708_v27  ;;  %13213 = vst [vmem:[#allocation80_spill] sm:$0xff] %v7726_v41  ;;  %v7730_v52 = vmul.f32 %v13215_v45, %v13214_v62  ;;  %v1932_v10 = vmul.f32 0.11128076, %v13188_v11  ;;  %v13220_v29 = vld [vmem:[#allocation74_spill] sm:$0xff]  ;;  %v13224_v7 = vld [vmem:[#allocation11_spill] sm:$0xff] }
 0x213   :  { %13210 = vst [vmem:[#allocation101_spill] sm:$0xff] %v7717_v22  ;;  %13218 = vst [vmem:[#allocation115_spill] sm:$0xff] %v7736_v33  ;;  %v7741_v37 = vmul.f32 %v13220_v29, %v13219_v44  ;;  %v1933_v45 = vmul.f32 0.11128076, %v13189_v54  ;;  %v1934_v62 = vmul.f32 0.11128076, %v13193_v42  ;;  %v7754_v61 = vmul.f32 %v13224_v7, %v13224_v7 }
 0x214   :  { %13216 = vst [vmem:[#allocation116_spill] sm:$0xff] %v7730_v52  ;;  %v1935_v46 = vmul.f32 0.11128076, %v13194_v58  ;;  %v13226_v11 = vld [vmem:[#allocation12_spill] sm:$0xff]  ;;  %v1936_v44 = vmul.f32 0.11128076, %v13195_v3 }
 0x215   :  { %13221 = vst [vmem:[#allocation133_spill] sm:$0xff] %v7741_v37  ;;  %13225 = vst [vmem:[#allocation11_spill] sm:$0xff] %v7754_v61  ;;  %v7758_v29 = vmul.f32 %v13226_v11, %v13226_v11  ;;  %v1937_v38 = vmul.f32 0.11128076, %v13199_v0  ;;  %v1938_v23 = vmul.f32 0.11128076, %v13200_v28  ;;  %v1952_v11 = vadd.f32 %v1932_v10, %v1912_v55 }
 0x216   :  { %v13228_v34 = vld [vmem:[#allocation13_spill] sm:$0xff]  ;;  %v1939_v36 = vmul.f32 0.11128076, %v13201_v18  ;;  %v7769_v5 = vmul.f32 0.11128076, %v13205_v12  ;;  %v1954_v10 = vadd.f32 %v1934_v62, %v1914_v35  ;;  %v1956_v53 = vadd.f32 %v1936_v44, %v1916_v48 }
 0x217   :  { %13227 = vst [vmem:[#allocation12_spill] sm:$0xff] %v7758_v29  ;;  %v7765_v54 = vmul.f32 %v13228_v34, %v13228_v34  ;;  %v7772_v7 = vmul.f32 0.11128076, %v13206_v14  ;;  %v7775_v29 = vmul.f32 0.11128076, %v7463_v39  ;;  %v1953_v34 = vadd.f32 %v1933_v45, %v1913_v2 }
 0x218   :  { %13230 = vst [vmem:[#allocation136_spill] sm:$0xff] %v7769_v5  ;;  %v7778_v61 = vmul.f32 0.11128076, %v7581_v21  ;;  %v7787_v37 = vmul.f32 0.11128076, %v7650_v50  ;;  %v1955_v45 = vadd.f32 %v1935_v46, %v1915_v8  ;;  %v1957_v13 = vadd.f32 %v1937_v38, %v1917_v49 }
 0x219   :  { %13229 = vst [vmem:[#allocation13_spill] sm:$0xff] %v7765_v54  ;;  %13231 = vst [vmem:[#allocation137_spill] sm:$0xff] %v7772_v7  ;;  %v7784_v54 = vmul.f32 0.11128076, %v7646_v60  ;;  %v7790_v52 = vmul.f32 0.11128076, %v7654_v9  ;;  %v1958_v59 = vadd.f32 %v1938_v23, %v1918_v16  ;;  %v1959_v63 = vadd.f32 %v1939_v36, %v1919_v6 }
 0x21a   :  { %13232 = vst [vmem:[#allocation138_spill] sm:$0xff] %v7775_v29  ;;  %13233 = vst [vmem:[#allocation139_spill] sm:$0xff] %v7778_v61  ;;  %v7793_v55 = vmul.f32 0.11128076, %v7658_v20  ;;  %v7796_v22 = vmul.f32 0.11128076, %v7662_v32  ;;  %v1960_v1 = vadd.f32 %v7769_v5, %v1920_v40  ;;  %v1961_v35 = vadd.f32 %v7772_v7, %v1921_v30 }
 0x21b   :  { %13235 = vst [vmem:[#allocation141_spill] sm:$0xff] %v7784_v54  ;;  %13236 = vst [vmem:[#allocation142_spill] sm:$0xff] %v7787_v37  ;;  %v7799_v27 = vmul.f32 0.11128076, %v7666_v31  ;;  %v7802_v2 = vmul.f32 0.11128076, %v7670_v51  ;;  %v1962_v62 = vadd.f32 %v7775_v29, %v1922_v56  ;;  %v1963_v19 = vadd.f32 %v7778_v61, %v1923_v47 }
 0x21c   :  { %13237 = vst [vmem:[#allocation143_spill] sm:$0xff] %v7790_v52  ;;  %13238 = vst [vmem:[#allocation144_spill] sm:$0xff] %v7793_v55  ;;  %v1964_v31 = vadd.f32 %v7781_v24, %v7713_v26  ;;  %v1965_v8 = vadd.f32 %v7784_v54, %v7720_v4  ;;  %v1972_v46 = vmul.f32 0.21674532, %v13193_v42  ;;  %v1966_v49 = vadd.f32 %v7787_v37, %v7723_v43 }
 0x21d   :  { %13239 = vst [vmem:[#allocation145_spill] sm:$0xff] %v7796_v22  ;;  %13240 = vst [vmem:[#allocation146_spill] sm:$0xff] %v7799_v27  ;;  %v1967_v36 = vadd.f32 %v7790_v52, %v7726_v41  ;;  %v1968_v48 = vadd.f32 %v7793_v55, %v7733_v15  ;;  %v1973_v23 = vmul.f32 0.21674532, %v13194_v58  ;;  %v1969_v44 = vadd.f32 %v7796_v22, %v7736_v33  ;;  %v13242_v58 = vld [vmem:[#allocation14_spill] sm:$0xff]  ;;  %v13253_v52 = vld [vmem:[#allocation131_spill] sm:$0xff] }
 0x21e   :  { %13241 = vst [vmem:[#allocation147_spill] sm:$0xff] %v7802_v2  ;;  %v1970_v38 = vadd.f32 %v7799_v27, %v7744_v25  ;;  %v1971_v42 = vadd.f32 %v7802_v2, %v7747_v57  ;;  %v1974_v47 = vmul.f32 0.21674532, %v13195_v3  ;;  %v1975_v56 = vmul.f32 0.21674532, %v13199_v0  ;;  %v13248_v2 = vld [vmem:[#allocation128_spill] sm:$0xff] }
 0x21f   :  { %v7829_v30 = vmul.f32 0.21674532, %v13200_v28  ;;  %v7832_v40 = vmul.f32 0.21674532, %v13201_v18  ;;  %v7836_v16 = vmul.f32 %v13242_v58, %v13242_v58  ;;  %v7839_v6 = vmul.f32 0.21674532, %v13205_v12 }
 0x220   :  { %v7842_v25 = vmul.f32 0.21674532, %v13206_v14  ;;  %v7845_v57 = vmul.f32 0.21674532, %v7463_v39  ;;  %v1992_v33 = vadd.f32 %v1972_v46, %v1952_v11  ;;  %v7848_v15 = vmul.f32 0.21674532, %v7581_v21 }
 0x221   :  { %13243 = vst [vmem:[#allocation14_spill] sm:$0xff] %v7836_v16  ;;  %v7851_v41 = vmul.f32 0.21674532, %v7642_v17  ;;  %v7854_v43 = vmul.f32 0.21674532, %v7646_v60  ;;  %v1993_v58 = vadd.f32 %v1973_v23, %v1953_v34  ;;  %v1994_v11 = vadd.f32 %v1974_v47, %v1954_v10  ;;  %v13251_v23 = vld [vmem:[#allocation130_spill] sm:$0xff] }
 0x222   :  { %v7857_v16 = vmul.f32 0.21674532, %v7650_v50  ;;  %v7860_v4 = vmul.f32 0.21674532, %v7654_v9  ;;  %v7863_v26 = vmul.f32 0.21674532, %v7658_v20  ;;  %v1995_v34 = vadd.f32 %v1975_v56, %v1955_v45 }
 0x223   :  { %v7866_v46 = vmul.f32 0.21674532, %v7662_v32  ;;  %v7869_v27 = vmul.f32 0.21674532, %v13248_v2  ;;  %v7872_v22 = vmul.f32 0.21674532, %v7670_v51  ;;  %v1996_v54 = vadd.f32 %v7829_v30, %v1956_v53 }
 0x224   :  { %13244 = vst [vmem:[#allocation148_spill] sm:$0xff] %v7857_v16  ;;  %13245 = vst [vmem:[#allocation149_spill] sm:$0xff] %v7860_v4  ;;  %v7875_v55 = vmul.f32 0.21674532, %v13251_v23  ;;  %v7878_v37 = vmul.f32 0.21674532, %v13253_v52  ;;  %v1997_v10 = vadd.f32 %v7832_v40, %v1957_v13  ;;  %v1998_v47 = vadd.f32 %v7839_v6, %v1958_v59 }
 0x225   :  { %13246 = vst [vmem:[#allocation150_spill] sm:$0xff] %v7863_v26  ;;  %13247 = vst [vmem:[#allocation151_spill] sm:$0xff] %v7866_v46  ;;  %v1999_v24 = vadd.f32 %v7842_v25, %v1959_v63  ;;  %v2000_v61 = vadd.f32 %v7845_v57, %v1960_v1  ;;  %v2001_v29 = vadd.f32 %v7848_v15, %v1961_v35  ;;  %v2012_v5 = vmul.f32 0.27068216, %v13195_v3 }
 0x226   :  { %13249 = vst [vmem:[#allocation152_spill] sm:$0xff] %v7869_v27  ;;  %13250 = vst [vmem:[#allocation153_spill] sm:$0xff] %v7872_v22  ;;  %v2002_v45 = vadd.f32 %v7851_v41, %v1962_v62  ;;  %v2003_v56 = vadd.f32 %v7854_v43, %v1963_v19  ;;  %v2004_v7 = vadd.f32 %v7857_v16, %v1964_v31  ;;  %v2013_v63 = vmul.f32 0.27068216, %v13199_v0 }
 0x227   :  { %13252 = vst [vmem:[#allocation154_spill] sm:$0xff] %v7875_v55  ;;  %13254 = vst [vmem:[#allocation155_spill] sm:$0xff] %v7878_v37  ;;  %v2005_v53 = vadd.f32 %v7860_v4, %v1965_v8  ;;  %v2006_v13 = vadd.f32 %v7863_v26, %v1966_v49  ;;  %v2007_v59 = vadd.f32 %v7866_v46, %v1967_v36  ;;  %v2014_v19 = vmul.f32 0.27068216, %v13200_v28  ;;  %v13255_v4 = vld [vmem:[#allocation15_spill] sm:$0xff] }
 0x228   :  { %v2008_v1 = vadd.f32 %v7869_v27, %v1968_v48  ;;  %v2009_v35 = vadd.f32 %v7872_v22, %v1969_v44  ;;  %v2010_v62 = vadd.f32 %v7875_v55, %v1970_v38  ;;  %v2011_v31 = vadd.f32 %v7878_v37, %v1971_v42 }
 0x229   :  { %v2015_v3 = vmul.f32 0.27068216, %v13201_v18  ;;  %v2016_v8 = vmul.f32 0.27068216, %v13205_v12  ;;  %v7903_v49 = vmul.f32 %v13255_v4, %v13255_v4  ;;  %v2017_v0 = vmul.f32 0.27068216, %v13206_v14 }
 0x22a   :  { %v2018_v36 = vmul.f32 0.27068216, %v7463_v39  ;;  %v2019_v48 = vmul.f32 0.27068216, %v7581_v21  ;;  %v2032_v44 = vadd.f32 %v2012_v5, %v1992_v33  ;;  %v2020_v38 = vmul.f32 0.27068216, %v7642_v17 }
 0x22b   :  { %13256 = vst [vmem:[#allocation15_spill] sm:$0xff] %v7903_v49  ;;  %v2021_v28 = vmul.f32 0.27068216, %v7646_v60  ;;  %v2022_v42 = vmul.f32 0.27068216, %v7650_v50  ;;  %v2033_v18 = vadd.f32 %v2013_v63, %v1993_v58  ;;  %v2034_v49 = vadd.f32 %v2014_v19, %v1994_v11  ;;  %v13257_v60 = vld [vmem:[#allocation132_spill] sm:$0xff] }
 0x22c   :  { %v2023_v12 = vmul.f32 0.27068216, %v7654_v9  ;;  %v2024_v37 = vmul.f32 0.27068216, %v7658_v20  ;;  %v2025_v4 = vmul.f32 0.27068216, %v7662_v32  ;;  %v2035_v21 = vadd.f32 %v2015_v3, %v1995_v34 }
 0x22d   :  { %v2026_v14 = vmul.f32 0.27068216, %v13248_v2  ;;  %v2027_v39 = vmul.f32 0.27068216, %v7670_v51  ;;  %v2028_v5 = vmul.f32 0.27068216, %v13251_v23  ;;  %v2036_v63 = vadd.f32 %v2016_v8, %v1996_v54 }
 0x22e   :  { %v2029_v17 = vmul.f32 0.27068216, %v13253_v52  ;;  %v2030_v33 = vmul.f32 0.27068216, %v13257_v60  ;;  %v13258_v50 = vld [vmem:[#allocation108_spill] sm:$0xff]  ;;  %v2037_v9 = vadd.f32 %v2017_v0, %v1997_v10  ;;  %v2038_v55 = vadd.f32 %v2018_v36, %v1998_v47  ;;  %v13259_v54 = vld [vmem:[#allocation109_spill] sm:$0xff] }
 0x22f   :  { %v2031_v58 = vmul.f32 0.27068216, %v13258_v50  ;;  %v2039_v20 = vadd.f32 %v2019_v48, %v1999_v24  ;;  %v2040_v22 = vadd.f32 %v2020_v38, %v2000_v61  ;;  %v2041_v32 = vadd.f32 %v2021_v28, %v2001_v29  ;;  %v13260_v47 = vld [vmem:[#allocation110_spill] sm:$0xff]  ;;  %v13264_v8 = vld [vmem:[#allocation151_spill] sm:$0xff]  ;;  %v13265_v0 = vld [vmem:[#allocation152_spill] sm:$0xff] }
 0x230   :  { %v2042_v11 = vadd.f32 %v2022_v42, %v2002_v45  ;;  %v2043_v19 = vadd.f32 %v2023_v12, %v2003_v56  ;;  %v2044_v2 = vadd.f32 %v2024_v37, %v2004_v7  ;;  %v2045_v27 = vadd.f32 %v2025_v4, %v2005_v53  ;;  %v13267_v36 = vld [vmem:[#allocation154_spill] sm:$0xff]  ;;  %v13268_v48 = vld [vmem:[#allocation155_spill] sm:$0xff]  ;;  %v13271_v4 = vld [vmem:[#allocation136_spill] sm:$0xff] }
 0x231   :  { %v2046_v51 = vadd.f32 %v2026_v14, %v2006_v13  ;;  %v2047_v46 = vadd.f32 %v2027_v39, %v2007_v59  ;;  %v2048_v23 = vadd.f32 %v2028_v5, %v2008_v1  ;;  %v2049_v34 = vadd.f32 %v2029_v17, %v2009_v35  ;;  %v13261_v59 = vld [vmem:[#allocation148_spill] sm:$0xff]  ;;  %v13262_v35 = vld [vmem:[#allocation149_spill] sm:$0xff]  ;;  %v13269_v38 = vld [vmem:[#allocation130_spill] sm:$0xff] }
 0x232   :  { %v2050_v3 = vadd.f32 %v2030_v33, %v2010_v62  ;;  %v2051_v52 = vadd.f32 %v2031_v58, %v2011_v31  ;;  %v2052_v26 = vmul.f32 0.21674532, %v13257_v60  ;;  %v2053_v16 = vmul.f32 0.21674532, %v13258_v50  ;;  %v13263_v31 = vld [vmem:[#allocation150_spill] sm:$0xff]  ;;  %v13270_v28 = vld [vmem:[#allocation131_spill] sm:$0xff] }
 0x233   :  { %v2054_v10 = vmul.f32 0.21674532, %v13259_v54  ;;  %v2055_v24 = vmul.f32 0.21674532, %v13260_v47  ;;  %v2056_v61 = vadd.f32 %v2032_v44, %v7829_v30  ;;  %v2057_v29 = vadd.f32 %v2033_v18, %v7832_v40  ;;  %v13272_v14 = vld [vmem:[#allocation111_spill] sm:$0xff]  ;;  %v13275_v39 = vld [vmem:[#allocation138_spill] sm:$0xff] }
 0x234   :  { %v2058_v37 = vadd.f32 %v2034_v49, %v7839_v6  ;;  %v2059_v7 = vadd.f32 %v2035_v21, %v7842_v25  ;;  %v2060_v45 = vadd.f32 %v2036_v63, %v7845_v57  ;;  %v2061_v56 = vadd.f32 %v2037_v9, %v7848_v15  ;;  %v13266_v49 = vld [vmem:[#allocation153_spill] sm:$0xff]  ;;  %v13276_v21 = vld [vmem:[#allocation139_spill] sm:$0xff]  ;;  %v13277_v33 = vld [vmem:[#allocation140_spill] sm:$0xff] }
 0x235   :  { %v2062_v53 = vadd.f32 %v2038_v55, %v7851_v41  ;;  %v2063_v13 = vadd.f32 %v2039_v20, %v7854_v43  ;;  %v2064_v1 = vadd.f32 %v2040_v22, %v13261_v59  ;;  %v2065_v62 = vadd.f32 %v2041_v32, %v13262_v35  ;;  %v13278_v63 = vld [vmem:[#allocation141_spill] sm:$0xff]  ;;  %v13279_v20 = vld [vmem:[#allocation142_spill] sm:$0xff]  ;;  %v13284_v59 = vld [vmem:[#allocation147_spill] sm:$0xff] }
 0x236   :  { %v2066_v30 = vadd.f32 %v2042_v11, %v13263_v31  ;;  %v2067_v40 = vadd.f32 %v2043_v19, %v13264_v8  ;;  %v2068_v6 = vadd.f32 %v2044_v2, %v13265_v0  ;;  %v2069_v25 = vadd.f32 %v2045_v27, %v13266_v49  ;;  %v13280_v11 = vld [vmem:[#allocation143_spill] sm:$0xff] }
 0x237   :  { %v2070_v57 = vadd.f32 %v2046_v51, %v13267_v36  ;;  %v2071_v15 = vadd.f32 %v2047_v46, %v13268_v48  ;;  %v2072_v44 = vadd.f32 %v2052_v26, %v2048_v23  ;;  %v2073_v41 = vadd.f32 %v2053_v16, %v2049_v34  ;;  %v13273_v26 = vld [vmem:[#allocation137_spill] sm:$0xff]  ;;  %v13281_v34 = vld [vmem:[#allocation144_spill] sm:$0xff] }
 0x238   :  { %v2074_v55 = vadd.f32 %v2054_v10, %v2050_v3  ;;  %v2075_v43 = vadd.f32 %v2055_v24, %v2051_v52  ;;  %v2076_v22 = vmul.f32 0.11128076, %v13269_v38  ;;  %v2077_v42 = vmul.f32 0.11128076, %v13270_v28  ;;  %v13274_v23 = vld [vmem:[#allocation101_spill] sm:$0xff]  ;;  %v13285_v36 = vld [vmem:[#allocation128_spill] sm:$0xff] }
 0x239   :  { %v2078_v18 = vmul.f32 0.11128076, %v13257_v60  ;;  %v2079_v12 = vmul.f32 0.11128076, %v13258_v50  ;;  %v2084_v2 = vadd.f32 %v2056_v61, %v13271_v4  ;;  %v2080_v27 = vmul.f32 0.11128076, %v13259_v54 }
 0x23a   :  { %v2081_v51 = vmul.f32 0.11128076, %v13260_v47  ;;  %v2082_v46 = vmul.f32 0.11128076, %v13272_v14  ;;  %v2085_v16 = vadd.f32 %v2057_v29, %v13273_v26  ;;  %v2083_v52 = vmul.f32 0.11128076, %v13274_v23 }
 0x23b   :  { %v2086_v5 = vadd.f32 %v2058_v37, %v13275_v39  ;;  %v2087_v17 = vadd.f32 %v2059_v7, %v13276_v21  ;;  %v2088_v58 = vadd.f32 %v2060_v45, %v13277_v33  ;;  %v2089_v9 = vadd.f32 %v2061_v56, %v13278_v63  ;;  %v13282_v10 = vld [vmem:[#allocation145_spill] sm:$0xff]  ;;  %v13283_v61 = vld [vmem:[#allocation146_spill] sm:$0xff] }
 0x23c   :  { %v2090_v32 = vadd.f32 %v2062_v53, %v13279_v20  ;;  %v2091_v19 = vadd.f32 %v2063_v13, %v13280_v11  ;;  %v2092_v3 = vadd.f32 %v2064_v1, %v13281_v34  ;;  %v2093_v24 = vadd.f32 %v2065_v62, %v13282_v10  ;;  %v13286_v48 = vld [vmem:[#allocation129_spill] sm:$0xff]  ;;  %v13309_v34 = vld [vmem:[#allocation16_spill] sm:$0xff] }
 0x23d   :  { %v2094_v29 = vadd.f32 %v2066_v30, %v13283_v61  ;;  %v2095_v35 = vadd.f32 %v2067_v40, %v13284_v59  ;;  %v2096_v31 = vadd.f32 %v2076_v22, %v2068_v6  ;;  %v2097_v37 = vadd.f32 %v2077_v42, %v2069_v25  ;;  %v13287_v4 = vld [vmem:[#allocation113_spill] sm:$0xff]  ;;  %v13290_v22 = vld [vmem:[#allocation116_spill] sm:$0xff] }
 0x23e   :  { %v2098_v8 = vadd.f32 %v2078_v18, %v2070_v57  ;;  %v2099_v7 = vadd.f32 %v2079_v12, %v2071_v15  ;;  %v2100_v0 = vadd.f32 %v2080_v27, %v2072_v44  ;;  %v2101_v45 = vadd.f32 %v2081_v51, %v2073_v41  ;;  %v13288_v57 = vld [vmem:[#allocation103_spill] sm:$0xff]  ;;  %v13291_v42 = vld [vmem:[#allocation133_spill] sm:$0xff]  ;;  %v13292_v18 = vld [vmem:[#allocation80_spill] sm:$0xff] }
 0x23f   :  { %v2102_v49 = vadd.f32 %v2082_v46, %v2074_v55  ;;  %v2103_v56 = vadd.f32 %v2083_v52, %v2075_v43  ;;  %v2104_v53 = vmul.f32 0.036632847, %v13285_v36  ;;  %v2105_v13 = vmul.f32 0.036632847, %v13286_v48  ;;  %v13289_v43 = vld [vmem:[#allocation104_spill] sm:$0xff] }
 0x240   :  { %v2106_v1 = vmul.f32 0.036632847, %v13269_v38  ;;  %v2107_v62 = vmul.f32 0.036632847, %v13270_v28  ;;  %v7965_v30 = vadd.f32 %v2084_v2, %v13287_v4  ;;  %v2108_v40 = vmul.f32 0.036632847, %v13257_v60 }
 0x241   :  { %v2109_v6 = vmul.f32 0.036632847, %v13258_v50  ;;  %v2110_v25 = vmul.f32 0.036632847, %v13259_v54  ;;  %v7971_v15 = vadd.f32 %v2085_v16, %v13288_v57  ;;  %v2111_v44 = vmul.f32 0.036632847, %v13260_v47 }
 0x242   :  { %v2112_v41 = vmul.f32 0.036632847, %v13272_v14  ;;  %v2113_v55 = vmul.f32 0.036632847, %v13274_v23  ;;  %v7977_v38 = vadd.f32 %v2086_v5, %v13289_v43  ;;  %v2114_v28 = vmul.f32 0.036632847, %v13290_v22 }
 0x243   :  { %v2115_v60 = vmul.f32 0.036632847, %v13291_v42  ;;  %v7982_v50 = vadd.f32 %v2087_v17, %v13292_v18  ;;  %v13294_v54 = vld [vmem:[#allocation114_spill] sm:$0xff]  ;;  %v13295_v2 = vld [vmem:[#allocation115_spill] sm:$0xff]  ;;  %v7996_v26 = vadd.f32 %v2104_v53, %v2092_v3  ;;  %v7998_v16 = vadd.f32 %v2105_v13, %v2093_v24 }
 0x244   :  { %v7985_v12 = vadd.f32 %v2088_v58, %v13294_v54  ;;  %v7988_v27 = vadd.f32 %v2089_v9, %v13295_v2  ;;  %v13297_v47 = vld [vmem:[#allocation134_spill] sm:$0xff]  ;;  %v13298_v14 = vld [vmem:[#allocation135_spill] sm:$0xff]  ;;  %v8000_v23 = vadd.f32 %v2106_v1, %v2094_v29  ;;  %v8002_v52 = vadd.f32 %v2107_v62, %v2095_v35  ;;  %v13311_v29 = vld [vmem:[#allocation17_spill] sm:$0xff] }
 0x245   :  { %13293 = vst [vmem:[#allocation132_spill] sm:$0xff] %v7982_v50  ;;  %v7991_v51 = vadd.f32 %v2090_v32, %v13297_v47  ;;  %v7994_v46 = vadd.f32 %v2091_v19, %v13298_v14  ;;  %13300 = vst [vmem:[#allocation110_spill] sm:$0xff] %v7998_v16  ;;  %v8004_v39 = vadd.f32 %v2108_v40, %v2096_v31  ;;  %v8021_v20 = vmul.f32 0.036632847, %v7965_v30  ;;  %v13317_v1 = vld [vmem:[#allocation20_spill] sm:$0xff] }
 0x246   :  { %13296 = vst [vmem:[#allocation108_spill] sm:$0xff] %v7988_v27  ;;  %13301 = vst [vmem:[#allocation148_spill] sm:$0xff] %v8002_v52  ;;  %v8006_v5 = vadd.f32 %v2109_v6, %v2097_v37  ;;  %v8008_v21 = vadd.f32 %v2110_v25, %v2098_v8  ;;  %v8010_v17 = vadd.f32 %v2111_v44, %v2099_v7  ;;  %v8024_v32 = vmul.f32 0.036632847, %v7971_v15  ;;  %v13313_v8 = vld [vmem:[#allocation18_spill] sm:$0xff] }
 0x247   :  { %13299 = vst [vmem:[#allocation109_spill] sm:$0xff] %v7994_v46  ;;  %v8012_v33 = vadd.f32 %v2112_v41, %v2100_v0  ;;  %v8014_v58 = vadd.f32 %v2113_v55, %v2101_v45  ;;  %v8016_v63 = vadd.f32 %v2114_v28, %v2102_v49  ;;  %v8018_v9 = vadd.f32 %v2115_v60, %v2103_v56  ;;  %v13315_v56 = vld [vmem:[#allocation19_spill] sm:$0xff] }
 0x248   :  { %13302 = vst [vmem:[#allocation149_spill] sm:$0xff] %v8006_v5  ;;  %13303 = vst [vmem:[#allocation150_spill] sm:$0xff] %v8008_v21  ;;  %v8027_v11 = vmul.f32 0.036632847, %v7977_v38  ;;  %v8030_v19 = vmul.f32 0.036632847, %v7982_v50  ;;  %v8034_v3 = vmul.f32 %v13309_v34, %v13309_v34  ;;  %v8047_v59 = vmul.f32 %v13311_v29, %v13311_v29 }
 0x249   :  { %13304 = vst [vmem:[#allocation151_spill] sm:$0xff] %v8010_v17  ;;  %13305 = vst [vmem:[#allocation152_spill] sm:$0xff] %v8012_v33  ;;  %v8037_v10 = vmul.f32 0.036632847, %v7985_v12  ;;  %v8040_v24 = vmul.f32 0.036632847, %v7988_v27  ;;  %v8060_v7 = vmul.f32 %v13313_v8, %v13313_v8  ;;  %v8073_v36 = vmul.f32 %v13315_v56, %v13315_v56 }
 0x24a   :  { %13306 = vst [vmem:[#allocation153_spill] sm:$0xff] %v8014_v58  ;;  %13307 = vst [vmem:[#allocation154_spill] sm:$0xff] %v8016_v63  ;;  %v8043_v61 = vmul.f32 0.036632847, %v7991_v51  ;;  %v8050_v35 = vmul.f32 0.036632847, %v7994_v46  ;;  %v8086_v62 = vmul.f32 %v13317_v1, %v13317_v1 }
 0x24b   :  { %13308 = vst [vmem:[#allocation155_spill] sm:$0xff] %v8018_v9  ;;  %13310 = vst [vmem:[#allocation130_spill] sm:$0xff] %v8034_v3  ;;  %v8053_v31 = vmul.f32 0.036632847, %v7996_v26  ;;  %v8056_v37 = vmul.f32 0.036632847, %v7998_v16 }
 0x24c   :  { %13312 = vst [vmem:[#allocation131_spill] sm:$0xff] %v8047_v59  ;;  %13314 = vst [vmem:[#allocation136_spill] sm:$0xff] %v8060_v7  ;;  %v8063_v0 = vmul.f32 0.036632847, %v8000_v23  ;;  %v8066_v45 = vmul.f32 0.036632847, %v8002_v52 }
 0x24d   :  { %v8069_v49 = vmul.f32 0.036632847, %v8004_v39  ;;  %13316 = vst [vmem:[#allocation111_spill] sm:$0xff] %v8073_v36  ;;  %v8076_v53 = vmul.f32 0.036632847, %v8006_v5  ;;  %13318 = vst [vmem:[#allocation137_spill] sm:$0xff] %v8086_v62 }
 0x24e   :  { %v8079_v48 = vmul.f32 0.036632847, %v8008_v21  ;;  %v8082_v13 = vmul.f32 0.036632847, %v8010_v17  ;;  %v2156_v4 = vrot.slane %v7965_v30, 1  ;;  %v2157_v40 = vrot.slane %v7977_v38, 1 }
 0x24f   :  { %v2158_v6 = vrot.slane %v7985_v12, 1  ;;  %v2159_v25 = vrot.slane %v7991_v51, 1  ;;  %v2160_v57 = vrot.slane %v7996_v26, 1  ;;  %v2161_v44 = vrot.slane %v8000_v23, 1  ;;  %v13322_v62 = vld [vmem:[#allocation21_spill] sm:$0xff] }
 0x250   :  { %v2162_v41 = vrot.slane %v8004_v39, 1  ;;  %v2163_v55 = vrot.slane %v8008_v21, 1  ;;  %v2164_v43 = vrot.slane %v8012_v33, 1  ;;  %v2166_v22 = vrot.slane %v7971_v15, 1 }
 0x251   :  { %v2167_v28 = vrot.slane %v7982_v50, 1  ;;  %v2168_v42 = vrot.slane %v7988_v27, 1  ;;  %v2165_v60 = vrot.slane %v8016_v63, 1  ;;  %v2169_v18 = vrot.slane %v7994_v46, 1 }
 0x252   :  { %v2170_v54 = vrot.slane %v7998_v16, 1  ;;  %v2171_v2 = vrot.slane %v8002_v52, 1  ;;  %v2172_v47 = vrot.slane %v8006_v5, 1  ;;  %v2173_v14 = vrot.slane %v8010_v17, 1 }
 0x253   :  { %v2174_v34 = vrot.slane %v8014_v58, 1  ;;  %v2175_v29 = vrot.slane %v8018_v9, 1  ;;  %v8109_v8 = vmul.f32 0.036632847, %v8012_v33  ;;  %v8112_v56 = vmul.f32 0.036632847, %v8014_v58 }
 0x254   :  { %v8115_v1 = vmul.f32 0.036632847, %v8016_v63  ;;  %v8119_v36 = vmul.f32 %v13322_v62, %v13322_v62  ;;  %v8122_v7 = vmul.f32 0.036632847, %v8018_v9  ;;  %v2176_v3 = vsel %vm690_vm0, %v2156_v4, %v2166_v22 }
 0x255   :  { %13319 = vst [vmem:[#allocation101_spill] sm:$0xff] %v8109_v8  ;;  %13320 = vst [vmem:[#allocation138_spill] sm:$0xff] %v8112_v56  ;;  %v2177_v17 = vsel %vm690_vm0, %v2157_v40, %v2167_v28  ;;  %v2178_v8 = vsel %vm690_vm0, %v2158_v6, %v2168_v42  ;;  %v2179_v63 = vsel %vm690_vm0, %v2159_v25, %v2169_v18 }
 0x256   :  { %13321 = vst [vmem:[#allocation139_spill] sm:$0xff] %v8115_v1  ;;  %13323 = vst [vmem:[#allocation140_spill] sm:$0xff] %v8119_v36  ;;  %v2180_v1 = vsel %vm690_vm0, %v2160_v57, %v2170_v54  ;;  %v2181_v62 = vsel %vm690_vm0, %v2161_v44, %v2171_v2  ;;  %v2186_v36 = vsel %vm690_vm0, %v2166_v22, %v2156_v4  ;;  %v2196_v22 = vmul.f32 0.11128076, %v2176_v3 }
 0x257   :  { %13324 = vst [vmem:[#allocation141_spill] sm:$0xff] %v8122_v7  ;;  %v2182_v7 = vsel %vm690_vm0, %v2162_v41, %v2172_v47  ;;  %v2183_v9 = vsel %vm690_vm0, %v2163_v55, %v2173_v14  ;;  %v2184_v56 = vsel %vm690_vm0, %v2164_v43, %v2174_v34  ;;  %v2185_v58 = vsel %vm690_vm0, %v2165_v60, %v2175_v29 }
 0x258   :  { %v2187_v5 = vsel %vm690_vm0, %v2167_v28, %v2157_v40  ;;  %v2188_v52 = vsel %vm690_vm0, %v2168_v42, %v2158_v6  ;;  %v2189_v4 = vsel %vm690_vm0, %v2169_v18, %v2159_v25  ;;  %v2190_v16 = vsel %vm690_vm0, %v2170_v54, %v2160_v57  ;;  %v13326_v18 = vld [vmem:[#allocation22_spill] sm:$0xff] }
 0x259   :  { %v2191_v46 = vsel %vm690_vm0, %v2171_v2, %v2161_v44  ;;  %v2192_v27 = vsel %vm690_vm0, %v2172_v47, %v2162_v41  ;;  %v2197_v33 = vmul.f32 0.11128076, %v2186_v36  ;;  %v2193_v40 = vsel %vm690_vm0, %v2173_v14, %v2163_v55 }
 0x25a   :  { %v2194_v6 = vsel %vm690_vm0, %v2174_v34, %v2164_v43  ;;  %v2195_v25 = vsel %vm690_vm0, %v2175_v29, %v2165_v60  ;;  %v2198_v3 = vmul.f32 0.11128076, %v2177_v17  ;;  %v2199_v28 = vmul.f32 0.11128076, %v2187_v5 }
 0x25b   :  { %v2200_v42 = vmul.f32 0.11128076, %v2178_v8  ;;  %v2201_v57 = vmul.f32 0.11128076, %v2188_v52  ;;  %v8166_v44 = vmul.f32 %v13326_v18, %v13326_v18  ;;  %v2202_v54 = vmul.f32 0.11128076, %v2179_v63 }
 0x25c   :  { %v2203_v41 = vmul.f32 0.11128076, %v2189_v4  ;;  %v2204_v36 = vmul.f32 0.11128076, %v2180_v1  ;;  %v8169_v2 = vadd.f32 %v2196_v22, %v8021_v20  ;;  %v2205_v55 = vmul.f32 0.11128076, %v2190_v16 }
 0x25d   :  { %13327 = vst [vmem:[#allocation142_spill] sm:$0xff] %v8166_v44  ;;  %v2206_v47 = vmul.f32 0.11128076, %v2181_v62  ;;  %v2207_v43 = vmul.f32 0.11128076, %v2191_v46  ;;  %v8172_v14 = vadd.f32 %v2197_v33, %v8024_v32  ;;  %v8175_v52 = vadd.f32 %v2198_v3, %v8027_v11  ;;  %v13329_v4 = vld [vmem:[#allocation108_spill] sm:$0xff] }
 0x25e   :  { %v2208_v17 = vmul.f32 0.11128076, %v2182_v7  ;;  %v2209_v5 = vmul.f32 0.11128076, %v2192_v27  ;;  %v2210_v60 = vmul.f32 0.11128076, %v2183_v9  ;;  %v8178_v8 = vadd.f32 %v2199_v28, %v8030_v19 }
 0x25f   :  { %v2211_v34 = vmul.f32 0.11128076, %v2193_v40  ;;  %v2212_v29 = vmul.f32 0.11128076, %v2184_v56  ;;  %v2213_v63 = vmul.f32 0.11128076, %v2194_v6  ;;  %v8181_v16 = vadd.f32 %v2200_v42, %v8037_v10 }
 0x260   :  { %v2214_v20 = vmul.f32 0.11128076, %v2185_v58  ;;  %v2215_v1 = vmul.f32 0.11128076, %v2195_v25  ;;  %v8184_v46 = vadd.f32 %v2201_v57, %v8040_v24  ;;  %v8187_v27 = vadd.f32 %v2202_v54, %v8043_v61  ;;  %v13328_v56 = vld [vmem:[#allocation152_spill] sm:$0xff]  ;;  %v13330_v40 = vld [vmem:[#allocation109_spill] sm:$0xff] }
 0x261   :  { %v8190_v33 = vadd.f32 %v2203_v41, %v8050_v35  ;;  %v8193_v9 = vadd.f32 %v2204_v36, %v8053_v31  ;;  %v8196_v32 = vadd.f32 %v2205_v55, %v8056_v37  ;;  %v8199_v58 = vadd.f32 %v2206_v47, %v8063_v0  ;;  %v13331_v25 = vld [vmem:[#allocation110_spill] sm:$0xff]  ;;  %v13332_v28 = vld [vmem:[#allocation148_spill] sm:$0xff]  ;;  %v13333_v57 = vld [vmem:[#allocation149_spill] sm:$0xff] }
 0x262   :  { %v8202_v11 = vadd.f32 %v2207_v43, %v8066_v45  ;;  %v8205_v19 = vadd.f32 %v2208_v17, %v8069_v49  ;;  %v8208_v10 = vadd.f32 %v2209_v5, %v8076_v53  ;;  %v8211_v24 = vadd.f32 %v2210_v60, %v8079_v48  ;;  %v13334_v54 = vld [vmem:[#allocation151_spill] sm:$0xff]  ;;  %v13335_v36 = vld [vmem:[#allocation153_spill] sm:$0xff]  ;;  %v13337_v17 = vld [vmem:[#allocation138_spill] sm:$0xff] }
 0x263   :  { %v8214_v61 = vadd.f32 %v2211_v34, %v8082_v13  ;;  %v2236_v35 = vrot.slane %v7965_v30, 2  ;;  %v2237_v31 = vrot.slane %v7977_v38, 2  ;;  %v2238_v37 = vrot.slane %v7985_v12, 2  ;;  %v13336_v47 = vld [vmem:[#allocation101_spill] sm:$0xff]  ;;  %v13339_v60 = vld [vmem:[#allocation154_spill] sm:$0xff]  ;;  %v13340_v44 = vld [vmem:[#allocation155_spill] sm:$0xff] }
 0x264   :  { %v2239_v7 = vrot.slane %v7991_v51, 2  ;;  %v2240_v0 = vrot.slane %v7996_v26, 2  ;;  %v2241_v45 = vrot.slane %v8000_v23, 2  ;;  %v2242_v49 = vrot.slane %v8004_v39, 2 }
 0x265   :  { %v2243_v53 = vrot.slane %v8008_v21, 2  ;;  %v2246_v48 = vrot.slane %v7971_v15, 2  ;;  %v2247_v13 = vrot.slane %v7982_v50, 2  ;;  %v2244_v62 = vrot.slane %v13328_v56, 2  ;;  %v13341_v21 = vld [vmem:[#allocation139_spill] sm:$0xff] }
 0x266   :  { %v2248_v22 = vrot.slane %v13329_v4, 2  ;;  %v2249_v6 = vrot.slane %v13330_v40, 2  ;;  %v2250_v3 = vrot.slane %v13331_v25, 2  ;;  %v2251_v42 = vrot.slane %v13332_v28, 2  ;;  %v13343_v28 = vld [vmem:[#allocation141_spill] sm:$0xff] }
 0x267   :  { %v2252_v18 = vrot.slane %v13333_v57, 2  ;;  %v2253_v41 = vrot.slane %v13334_v54, 2  ;;  %v2254_v55 = vrot.slane %v13335_v36, 2  ;;  %v8235_v43 = vadd.f32 %v2212_v29, %v13336_v47 }
 0x268   :  { %v8238_v5 = vadd.f32 %v2213_v63, %v13337_v17  ;;  %v2245_v34 = vrot.slane %v13339_v60, 2  ;;  %v2255_v56 = vrot.slane %v13340_v44, 2  ;;  %v8243_v25 = vadd.f32 %v2214_v20, %v13341_v21 }
 0x269   :  { %v8246_v40 = vadd.f32 %v2215_v1, %v13343_v28  ;;  %v2256_v54 = vsel %vm771_vm1, %v2236_v35, %v2246_v48  ;;  %v2257_v29 = vsel %vm771_vm1, %v2237_v31, %v2247_v13  ;;  %v2258_v63 = vsel %vm771_vm1, %v2238_v37, %v2248_v22 }
 0x26a   :  { %13338 = vst [vmem:[#allocation143_spill] sm:$0xff] %v8238_v5  ;;  %13342 = vst [vmem:[#allocation144_spill] sm:$0xff] %v8243_v25  ;;  %v2259_v47 = vsel %vm771_vm1, %v2239_v7, %v2249_v6  ;;  %v2260_v17 = vsel %vm771_vm1, %v2240_v0, %v2250_v3  ;;  %v2266_v21 = vsel %vm771_vm1, %v2246_v48, %v2236_v35  ;;  %v2276_v48 = vmul.f32 0.21674532, %v2256_v54 }
 0x26b   :  { %13344 = vst [vmem:[#allocation145_spill] sm:$0xff] %v8246_v40  ;;  %v2261_v20 = vsel %vm771_vm1, %v2241_v45, %v2251_v42  ;;  %v2262_v1 = vsel %vm771_vm1, %v2242_v49, %v2252_v18  ;;  %v2263_v28 = vsel %vm771_vm1, %v2243_v53, %v2253_v41  ;;  %v2264_v40 = vsel %vm771_vm1, %v2244_v62, %v2254_v55 }
 0x26c   :  { %v2265_v25 = vsel %vm771_vm1, %v2245_v34, %v2255_v56  ;;  %v2267_v5 = vsel %vm771_vm1, %v2247_v13, %v2237_v31  ;;  %v2268_v35 = vsel %vm771_vm1, %v2248_v22, %v2238_v37  ;;  %v2269_v44 = vsel %vm771_vm1, %v2249_v6, %v2239_v7 }
 0x26d   :  { %v2270_v36 = vsel %vm771_vm1, %v2250_v3, %v2240_v0  ;;  %v2271_v60 = vsel %vm771_vm1, %v2251_v42, %v2241_v45  ;;  %v2277_v57 = vmul.f32 0.21674532, %v2266_v21  ;;  %v2272_v4 = vsel %vm771_vm1, %v2252_v18, %v2242_v49  ;;  %v13345_v0 = vld [vmem:[#allocation23_spill] sm:$0xff] }
 0x26e   :  { %v2273_v31 = vsel %vm771_vm1, %v2253_v41, %v2243_v53  ;;  %v2274_v37 = vsel %vm771_vm1, %v2254_v55, %v2244_v62  ;;  %v2278_v13 = vmul.f32 0.21674532, %v2257_v29  ;;  %v2275_v7 = vsel %vm771_vm1, %v2255_v56, %v2245_v34 }
 0x26f   :  { %v2279_v22 = vmul.f32 0.21674532, %v2267_v5  ;;  %v2280_v6 = vmul.f32 0.21674532, %v2258_v63  ;;  %v8290_v3 = vmul.f32 %v13345_v0, %v13345_v0  ;;  %v2281_v45 = vmul.f32 0.21674532, %v2268_v35 }
 0x270   :  { %v2282_v42 = vmul.f32 0.21674532, %v2259_v47  ;;  %v2283_v54 = vmul.f32 0.21674532, %v2269_v44  ;;  %v8293_v49 = vadd.f32 %v2276_v48, %v8169_v2  ;;  %v2284_v53 = vmul.f32 0.21674532, %v2260_v17 }
 0x271   :  { %13346 = vst [vmem:[#allocation146_spill] sm:$0xff] %v8290_v3  ;;  %v2285_v18 = vmul.f32 0.21674532, %v2270_v36  ;;  %v2286_v41 = vmul.f32 0.21674532, %v2261_v20  ;;  %v8296_v62 = vadd.f32 %v2277_v57, %v8172_v14  ;;  %v8299_v34 = vadd.f32 %v2278_v13, %v8175_v52  ;;  %v13351_v48 = vld [vmem:[#allocation110_spill] sm:$0xff] }
 0x272   :  { %v2287_v55 = vmul.f32 0.21674532, %v2271_v60  ;;  %v2288_v56 = vmul.f32 0.21674532, %v2262_v1  ;;  %v2289_v5 = vmul.f32 0.21674532, %v2272_v4  ;;  %v8302_v44 = vadd.f32 %v2279_v22, %v8178_v8 }
 0x273   :  { %v2290_v29 = vmul.f32 0.21674532, %v2263_v28  ;;  %v2291_v63 = vmul.f32 0.21674532, %v2273_v31  ;;  %v2292_v21 = vmul.f32 0.21674532, %v2264_v40  ;;  %v8305_v36 = vadd.f32 %v2280_v6, %v8181_v16 }
 0x274   :  { %v2293_v2 = vmul.f32 0.21674532, %v2274_v37  ;;  %v2294_v47 = vmul.f32 0.21674532, %v2265_v25  ;;  %v2295_v17 = vmul.f32 0.21674532, %v2275_v7  ;;  %v8308_v14 = vadd.f32 %v2281_v45, %v8184_v46 }
 0x275   :  { %v8311_v4 = vadd.f32 %v2282_v42, %v8187_v27  ;;  %v8314_v52 = vadd.f32 %v2283_v54, %v8190_v33  ;;  %v8317_v40 = vadd.f32 %v2284_v53, %v8193_v9  ;;  %v8320_v8 = vadd.f32 %v2285_v18, %v8196_v32  ;;  %v13350_v28 = vld [vmem:[#allocation109_spill] sm:$0xff]  ;;  %v13352_v37 = vld [vmem:[#allocation150_spill] sm:$0xff]  ;;  %v13353_v7 = vld [vmem:[#allocation148_spill] sm:$0xff] }
 0x276   :  { %v8323_v25 = vadd.f32 %v2286_v41, %v8199_v58  ;;  %v8326_v16 = vadd.f32 %v2287_v55, %v8202_v11  ;;  %v8329_v46 = vadd.f32 %v2288_v56, %v8205_v19  ;;  %v8332_v27 = vadd.f32 %v2289_v5, %v8208_v10  ;;  %v13354_v6 = vld [vmem:[#allocation149_spill] sm:$0xff]  ;;  %v13355_v45 = vld [vmem:[#allocation151_spill] sm:$0xff]  ;;  %v13356_v54 = vld [vmem:[#allocation152_spill] sm:$0xff] }
 0x277   :  { %v8335_v33 = vadd.f32 %v2290_v29, %v8211_v24  ;;  %v8338_v9 = vadd.f32 %v2291_v63, %v8214_v61  ;;  %v8341_v32 = vadd.f32 %v2292_v21, %v8235_v43  ;;  %v2316_v58 = vrot.slane %v7965_v30, 3  ;;  %v13349_v43 = vld [vmem:[#allocation108_spill] sm:$0xff]  ;;  %v13357_v18 = vld [vmem:[#allocation154_spill] sm:$0xff]  ;;  %v13358_v55 = vld [vmem:[#allocation153_spill] sm:$0xff] }
 0x278   :  { %v2317_v11 = vrot.slane %v7977_v38, 3  ;;  %v2318_v57 = vrot.slane %v7985_v12, 3  ;;  %v2319_v19 = vrot.slane %v7991_v51, 3  ;;  %v2320_v10 = vrot.slane %v7996_v26, 3  ;;  %v13359_v5 = vld [vmem:[#allocation155_spill] sm:$0xff]  ;;  %v13362_v3 = vld [vmem:[#allocation144_spill] sm:$0xff] }
 0x279   :  { %13347 = vst [vmem:[#allocation147_spill] sm:$0xff] %v8338_v9  ;;  %13348 = vst [vmem:[#allocation128_spill] sm:$0xff] %v8341_v32  ;;  %v2321_v60 = vrot.slane %v8000_v23, 3  ;;  %v2322_v24 = vrot.slane %v8004_v39, 3  ;;  %v2326_v61 = vrot.slane %v7971_v15, 3  ;;  %v2327_v20 = vrot.slane %v7982_v50, 3 }
 0x27a   :  { %v2328_v1 = vrot.slane %v13349_v43, 3  ;;  %v2329_v35 = vrot.slane %v13350_v28, 3  ;;  %v2330_v31 = vrot.slane %v13351_v48, 3  ;;  %v2323_v13 = vrot.slane %v13352_v37, 3  ;;  %v13360_v63 = vld [vmem:[#allocation143_spill] sm:$0xff]  ;;  %v13364_v9 = vld [vmem:[#allocation145_spill] sm:$0xff] }
 0x27b   :  { %v2331_v22 = vrot.slane %v13353_v7, 3  ;;  %v2332_v0 = vrot.slane %v13354_v6, 3  ;;  %v2333_v42 = vrot.slane %v13355_v45, 3  ;;  %v2324_v53 = vrot.slane %v13356_v54, 3 }
 0x27c   :  { %v2325_v41 = vrot.slane %v13357_v18, 3  ;;  %v2334_v56 = vrot.slane %v13358_v55, 3  ;;  %v2335_v29 = vrot.slane %v13359_v5, 3  ;;  %v8364_v21 = vadd.f32 %v2293_v2, %v13360_v63 }
 0x27d   :  { %v8367_v32 = vadd.f32 %v2294_v47, %v13362_v3  ;;  %v8370_v7 = vadd.f32 %v2295_v17, %v13364_v9  ;;  %v2336_v45 = vsel %vm852_vm2, %v2316_v58, %v2326_v61  ;;  %v2337_v6 = vsel %vm852_vm2, %v2317_v11, %v2327_v20 }
 0x27e   :  { %13361 = vst [vmem:[#allocation129_spill] sm:$0xff] %v8364_v21  ;;  %v2338_v55 = vsel %vm852_vm2, %v2318_v57, %v2328_v1  ;;  %v2339_v5 = vsel %vm852_vm2, %v2319_v19, %v2329_v35  ;;  %v2340_v2 = vsel %vm852_vm2, %v2320_v10, %v2330_v31  ;;  %v2341_v3 = vsel %vm852_vm2, %v2321_v60, %v2331_v22 }
 0x27f   :  { %13363 = vst [vmem:[#allocation113_spill] sm:$0xff] %v8367_v32  ;;  %13365 = vst [vmem:[#allocation103_spill] sm:$0xff] %v8370_v7  ;;  %v2342_v47 = vsel %vm852_vm2, %v2322_v24, %v2332_v0  ;;  %v2343_v17 = vsel %vm852_vm2, %v2323_v13, %v2333_v42  ;;  %v2346_v9 = vsel %vm852_vm2, %v2326_v61, %v2316_v58  ;;  %v2356_v61 = vmul.f32 0.27068216, %v2336_v45 }
 0x280   :  { %v2344_v63 = vsel %vm852_vm2, %v2324_v53, %v2334_v56  ;;  %v2345_v7 = vsel %vm852_vm2, %v2325_v41, %v2335_v29  ;;  %v2347_v32 = vsel %vm852_vm2, %v2327_v20, %v2317_v11  ;;  %v2348_v21 = vsel %vm852_vm2, %v2328_v1, %v2318_v57 }
 0x281   :  { %v2349_v48 = vsel %vm852_vm2, %v2329_v35, %v2319_v19  ;;  %v2350_v28 = vsel %vm852_vm2, %v2330_v31, %v2320_v10  ;;  %v2351_v58 = vsel %vm852_vm2, %v2331_v22, %v2321_v60  ;;  %v2352_v18 = vsel %vm852_vm2, %v2332_v0, %v2322_v24  ;;  %v13366_v10 = vld [vmem:[#allocation24_spill] sm:$0xff]  ;;  %v13368_v24 = vld [vmem:[#allocation25_spill] sm:$0xff] }
 0x282   :  { %v2353_v43 = vsel %vm852_vm2, %v2333_v42, %v2323_v13  ;;  %v2354_v11 = vsel %vm852_vm2, %v2334_v56, %v2324_v53  ;;  %v2357_v57 = vmul.f32 0.27068216, %v2346_v9  ;;  %v2355_v19 = vsel %vm852_vm2, %v2335_v29, %v2325_v41 }
 0x283   :  { %v2358_v20 = vmul.f32 0.27068216, %v2337_v6  ;;  %v2359_v1 = vmul.f32 0.27068216, %v2347_v32  ;;  %v8414_v35 = vmul.f32 %v13366_v10, %v13366_v10  ;;  %v2360_v60 = vmul.f32 0.27068216, %v2338_v55 }
 0x284   :  { %v2361_v31 = vmul.f32 0.27068216, %v2348_v21  ;;  %v2362_v22 = vmul.f32 0.27068216, %v2339_v5  ;;  %v8418_v0 = vmul.f32 %v13368_v24, %v13368_v24  ;;  %v2363_v13 = vmul.f32 0.27068216, %v2349_v48 }
 0x285   :  { %13367 = vst [vmem:[#allocation104_spill] sm:$0xff] %v8414_v35  ;;  %v2364_v45 = vmul.f32 0.27068216, %v2340_v2  ;;  %v2365_v42 = vmul.f32 0.27068216, %v2350_v28  ;;  %v8421_v53 = vadd.f32 %v2356_v61, %v8293_v49  ;;  %v8424_v56 = vadd.f32 %v2357_v57, %v8296_v62  ;;  %v13375_v24 = vld [vmem:[#allocation149_spill] sm:$0xff] }
 0x286   :  { %13369 = vst [vmem:[#allocation116_spill] sm:$0xff] %v8418_v0  ;;  %v2366_v41 = vmul.f32 0.27068216, %v2341_v3  ;;  %v2367_v6 = vmul.f32 0.27068216, %v2351_v58  ;;  %v8427_v5 = vadd.f32 %v2358_v20, %v8299_v34  ;;  %v8430_v28 = vadd.f32 %v2359_v1, %v8302_v44  ;;  %v13370_v58 = vld [vmem:[#allocation108_spill] sm:$0xff] }
 0x287   :  { %v2368_v32 = vmul.f32 0.27068216, %v2342_v47  ;;  %v2369_v29 = vmul.f32 0.27068216, %v2352_v18  ;;  %v2370_v55 = vmul.f32 0.27068216, %v2343_v17  ;;  %v8433_v2 = vadd.f32 %v2360_v60, %v8305_v36 }
 0x288   :  { %v2371_v21 = vmul.f32 0.27068216, %v2353_v43  ;;  %v2372_v9 = vmul.f32 0.27068216, %v2344_v63  ;;  %v2373_v10 = vmul.f32 0.27068216, %v2354_v11  ;;  %v8436_v3 = vadd.f32 %v2361_v31, %v8308_v14 }
 0x289   :  { %v2374_v48 = vmul.f32 0.27068216, %v2345_v7  ;;  %v2375_v49 = vmul.f32 0.27068216, %v2355_v19  ;;  %v8439_v62 = vadd.f32 %v2362_v22, %v8311_v4  ;;  %v8442_v43 = vadd.f32 %v2363_v13, %v8314_v52  ;;  %v13371_v11 = vld [vmem:[#allocation154_spill] sm:$0xff]  ;;  %v13372_v19 = vld [vmem:[#allocation109_spill] sm:$0xff] }
 0x28a   :  { %v8445_v34 = vadd.f32 %v2364_v45, %v8317_v40  ;;  %v8448_v7 = vadd.f32 %v2365_v42, %v8320_v8  ;;  %v8451_v44 = vadd.f32 %v2366_v41, %v8323_v25  ;;  %v8454_v36 = vadd.f32 %v2367_v6, %v8326_v16  ;;  %v13373_v1 = vld [vmem:[#allocation110_spill] sm:$0xff]  ;;  %v13374_v31 = vld [vmem:[#allocation148_spill] sm:$0xff]  ;;  %v13376_v45 = vld [vmem:[#allocation151_spill] sm:$0xff] }
 0x28b   :  { %v8457_v14 = vadd.f32 %v2368_v32, %v8329_v46  ;;  %v8460_v4 = vadd.f32 %v2369_v29, %v8332_v27  ;;  %v8463_v52 = vadd.f32 %v2370_v55, %v8335_v33  ;;  %v2396_v40 = vrot.slane %v7965_v30, 4  ;;  %v13377_v41 = vld [vmem:[#allocation153_spill] sm:$0xff]  ;;  %v13378_v32 = vld [vmem:[#allocation155_spill] sm:$0xff]  ;;  %v13380_v35 = vld [vmem:[#allocation128_spill] sm:$0xff] }
 0x28c   :  { %v2397_v8 = vrot.slane %v7977_v38, 4  ;;  %v2398_v18 = vrot.slane %v7985_v12, 4  ;;  %v2399_v25 = vrot.slane %v7991_v51, 4  ;;  %v2400_v16 = vrot.slane %v7996_v26, 4  ;;  %v13379_v55 = vld [vmem:[#allocation147_spill] sm:$0xff] }
 0x28d   :  { %v2401_v47 = vrot.slane %v8000_v23, 4  ;;  %v2402_v46 = vrot.slane %v8004_v39, 4  ;;  %v2403_v27 = vrot.slane %v13352_v37, 4  ;;  %v2404_v17 = vrot.slane %v13356_v54, 4 }
 0x28e   :  { %v2406_v33 = vrot.slane %v7971_v15, 4  ;;  %v2407_v63 = vrot.slane %v7982_v50, 4  ;;  %v2408_v61 = vrot.slane %v13370_v58, 4  ;;  %v2405_v57 = vrot.slane %v13371_v11, 4  ;;  %v13382_v11 = vld [vmem:[#allocation129_spill] sm:$0xff] }
 0x28f   :  { %v2409_v20 = vrot.slane %v13372_v19, 4  ;;  %v2410_v60 = vrot.slane %v13373_v1, 4  ;;  %v2411_v22 = vrot.slane %v13374_v31, 4  ;;  %v2412_v13 = vrot.slane %v13375_v24, 4  ;;  %v13384_v19 = vld [vmem:[#allocation113_spill] sm:$0xff]  ;;  %v13386_v31 = vld [vmem:[#allocation103_spill] sm:$0xff] }
 0x290   :  { %v2413_v42 = vrot.slane %v13376_v45, 4  ;;  %v2414_v6 = vrot.slane %v13377_v41, 4  ;;  %v2415_v29 = vrot.slane %v13378_v32, 4  ;;  %v2391_v0 = vadd.f32 %v2371_v21, %v13379_v55 }
 0x291   :  { %v8487_v58 = vadd.f32 %v2372_v9, %v13380_v35  ;;  %v8490_v54 = vadd.f32 %v2373_v10, %v13382_v11  ;;  %v8493_v1 = vadd.f32 %v2374_v48, %v13384_v19  ;;  %v8496_v50 = vadd.f32 %v2375_v49, %v13386_v31 }
 0x292   :  { %v2416_v45 = vsel %vm933_vm3, %v2396_v40, %v2406_v33  ;;  %v2417_v32 = vsel %vm933_vm3, %v2397_v8, %v2407_v63  ;;  %v2418_v21 = vsel %vm933_vm3, %v2398_v18, %v2408_v61  ;;  %v2419_v35 = vsel %vm933_vm3, %v2399_v25, %v2409_v20 }
 0x293   :  { %13381 = vst [vmem:[#allocation133_spill] sm:$0xff] %v8487_v58  ;;  %13383 = vst [vmem:[#allocation80_spill] sm:$0xff] %v8490_v54  ;;  %v2420_v9 = vsel %vm933_vm3, %v2400_v16, %v2410_v60  ;;  %v2421_v10 = vsel %vm933_vm3, %v2401_v47, %v2411_v22  ;;  %v2426_v48 = vsel %vm933_vm3, %v2406_v33, %v2396_v40  ;;  %v2436_v33 = vmul.f32 0.21674532, %v2416_v45 }
 0x294   :  { %13385 = vst [vmem:[#allocation114_spill] sm:$0xff] %v8493_v1  ;;  %13387 = vst [vmem:[#allocation115_spill] sm:$0xff] %v8496_v50  ;;  %v2422_v49 = vsel %vm933_vm3, %v2402_v46, %v2412_v13  ;;  %v2423_v11 = vsel %vm933_vm3, %v2403_v27, %v2413_v42  ;;  %v2424_v19 = vsel %vm933_vm3, %v2404_v17, %v2414_v6  ;;  %v2437_v41 = vmul.f32 0.21674532, %v2426_v48 }
 0x295   :  { %v2425_v31 = vsel %vm933_vm3, %v2405_v57, %v2415_v29  ;;  %v2427_v55 = vsel %vm933_vm3, %v2407_v63, %v2397_v8  ;;  %v2428_v50 = vsel %vm933_vm3, %v2408_v61, %v2398_v18  ;;  %v2429_v40 = vsel %vm933_vm3, %v2409_v20, %v2399_v25 }
 0x296   :  { %v2430_v1 = vsel %vm933_vm3, %v2410_v60, %v2400_v16  ;;  %v2431_v54 = vsel %vm933_vm3, %v2411_v22, %v2401_v47  ;;  %v2432_v58 = vsel %vm933_vm3, %v2412_v13, %v2402_v46  ;;  %v2433_v8 = vsel %vm933_vm3, %v2413_v42, %v2403_v27  ;;  %v13388_v60 = vld [vmem:[#allocation26_spill] sm:$0xff] }
 0x297   :  { %v2434_v18 = vsel %vm933_vm3, %v2414_v6, %v2404_v17  ;;  %v2435_v25 = vsel %vm933_vm3, %v2415_v29, %v2405_v57  ;;  %v2438_v63 = vmul.f32 0.21674532, %v2417_v32  ;;  %v2439_v61 = vmul.f32 0.21674532, %v2427_v55 }
 0x298   :  { %v2440_v20 = vmul.f32 0.21674532, %v2418_v21  ;;  %v2441_v16 = vmul.f32 0.21674532, %v2428_v50  ;;  %v8540_v47 = vmul.f32 %v13388_v60, %v13388_v60  ;;  %v2442_v22 = vmul.f32 0.21674532, %v2419_v35 }
 0x299   :  { %v2443_v46 = vmul.f32 0.21674532, %v2429_v40  ;;  %v2444_v13 = vmul.f32 0.21674532, %v2420_v9  ;;  %v8543_v45 = vadd.f32 %v2436_v33, %v8421_v53  ;;  %v2445_v27 = vmul.f32 0.21674532, %v2430_v1 }
 0x29a   :  { %13389 = vst [vmem:[#allocation134_spill] sm:$0xff] %v8540_v47  ;;  %v2446_v42 = vmul.f32 0.21674532, %v2421_v10  ;;  %v2447_v17 = vmul.f32 0.21674532, %v2431_v54  ;;  %v8546_v6 = vadd.f32 %v2437_v41, %v8424_v56  ;;  %v8549_v50 = vadd.f32 %v2438_v63, %v8427_v5  ;;  %v13392_v33 = vld [vmem:[#allocation108_spill] sm:$0xff] }
 0x29b   :  { %v2448_v57 = vmul.f32 0.21674532, %v2422_v49  ;;  %v2449_v32 = vmul.f32 0.21674532, %v2432_v58  ;;  %v2450_v29 = vmul.f32 0.21674532, %v2423_v11  ;;  %v8552_v9 = vadd.f32 %v2439_v61, %v8430_v28 }
 0x29c   :  { %v2451_v21 = vmul.f32 0.21674532, %v2433_v8  ;;  %v2452_v48 = vmul.f32 0.21674532, %v2424_v19  ;;  %v2453_v35 = vmul.f32 0.21674532, %v2434_v18  ;;  %v8555_v1 = vadd.f32 %v2440_v20, %v8433_v2 }
 0x29d   :  { %v2454_v53 = vmul.f32 0.21674532, %v2425_v31  ;;  %v2455_v55 = vmul.f32 0.21674532, %v2435_v25  ;;  %v8558_v54 = vadd.f32 %v2441_v16, %v8436_v3  ;;  %v8561_v56 = vadd.f32 %v2442_v22, %v8439_v62  ;;  %v13391_v31 = vld [vmem:[#allocation152_spill] sm:$0xff]  ;;  %v13393_v18 = vld [vmem:[#allocation109_spill] sm:$0xff] }
 0x29e   :  { %v8564_v5 = vadd.f32 %v2443_v46, %v8442_v43  ;;  %v8567_v58 = vadd.f32 %v2444_v13, %v8445_v34  ;;  %v8570_v28 = vadd.f32 %v2445_v27, %v8448_v7  ;;  %v8573_v41 = vadd.f32 %v2446_v42, %v8451_v44  ;;  %v13394_v63 = vld [vmem:[#allocation110_spill] sm:$0xff]  ;;  %v13395_v20 = vld [vmem:[#allocation148_spill] sm:$0xff]  ;;  %v13396_v22 = vld [vmem:[#allocation151_spill] sm:$0xff] }
 0x29f   :  { %v8576_v2 = vadd.f32 %v2447_v17, %v8454_v36  ;;  %v8579_v3 = vadd.f32 %v2448_v57, %v8457_v14  ;;  %v8582_v62 = vadd.f32 %v2449_v32, %v8460_v4  ;;  %v8585_v43 = vadd.f32 %v2450_v29, %v8463_v52  ;;  %v13397_v13 = vld [vmem:[#allocation153_spill] sm:$0xff]  ;;  %v13399_v57 = vld [vmem:[#allocation80_spill] sm:$0xff]  ;;  %v13401_v29 = vld [vmem:[#allocation154_spill] sm:$0xff] }
 0x2a0   :  { %v8587_v34 = vadd.f32 %v2451_v21, %v2391_v0  ;;  %v2476_v7 = vrot.slane %v7965_v30, 5  ;;  %v2477_v10 = vrot.slane %v7977_v38, 5  ;;  %v2478_v44 = vrot.slane %v7985_v12, 5  ;;  %v13390_v0 = vld [vmem:[#allocation132_spill] sm:$0xff]  ;;  %v13398_v42 = vld [vmem:[#allocation133_spill] sm:$0xff]  ;;  %v13402_v47 = vld [vmem:[#allocation155_spill] sm:$0xff] }
 0x2a1   :  { %v2479_v36 = vrot.slane %v7991_v51, 5  ;;  %v2480_v49 = vrot.slane %v7996_v26, 5  ;;  %v2481_v14 = vrot.slane %v8000_v23, 5  ;;  %v2482_v4 = vrot.slane %v8004_v39, 5 }
 0x2a2   :  { %v2483_v11 = vrot.slane %v13352_v37, 5  ;;  %v2486_v52 = vrot.slane %v7971_v15, 5  ;;  %v2487_v19 = vrot.slane %v13390_v0, 5  ;;  %v2484_v40 = vrot.slane %v13391_v31, 5  ;;  %v13403_v37 = vld [vmem:[#allocation114_spill] sm:$0xff] }
 0x2a3   :  { %v2488_v8 = vrot.slane %v13392_v33, 5  ;;  %v2489_v25 = vrot.slane %v13393_v18, 5  ;;  %v2490_v61 = vrot.slane %v13394_v63, 5  ;;  %v2491_v16 = vrot.slane %v13395_v20, 5  ;;  %v13405_v20 = vld [vmem:[#allocation115_spill] sm:$0xff] }
 0x2a4   :  { %v2492_v60 = vrot.slane %v13375_v24, 5  ;;  %v2493_v46 = vrot.slane %v13396_v22, 5  ;;  %v2494_v27 = vrot.slane %v13397_v13, 5  ;;  %v8608_v17 = vadd.f32 %v2452_v48, %v13398_v42 }
 0x2a5   :  { %v8611_v32 = vadd.f32 %v2453_v35, %v13399_v57  ;;  %v2485_v21 = vrot.slane %v13401_v29, 5  ;;  %v2495_v31 = vrot.slane %v13402_v47, 5  ;;  %v8616_v63 = vadd.f32 %v2454_v53, %v13403_v37 }
 0x2a6   :  { %v8619_v18 = vadd.f32 %v2455_v55, %v13405_v20  ;;  %v2496_v22 = vsel %vm1014_vm4, %v2476_v7, %v2486_v52  ;;  %v2497_v48 = vsel %vm1014_vm4, %v2477_v10, %v2487_v19  ;;  %v2498_v35 = vsel %vm1014_vm4, %v2478_v44, %v2488_v8 }
 0x2a7   :  { %13400 = vst [vmem:[#allocation135_spill] sm:$0xff] %v8611_v32  ;;  %13404 = vst [vmem:[#allocation16_spill] sm:$0xff] %v8616_v63  ;;  %v2499_v42 = vsel %vm1014_vm4, %v2479_v36, %v2489_v25  ;;  %v2500_v57 = vsel %vm1014_vm4, %v2480_v49, %v2490_v61  ;;  %v2506_v37 = vsel %vm1014_vm4, %v2486_v52, %v2476_v7  ;;  %v2516_v52 = vmul.f32 0.11128076, %v2496_v22 }
 0x2a8   :  { %13406 = vst [vmem:[#allocation17_spill] sm:$0xff] %v8619_v18  ;;  %v2501_v53 = vsel %vm1014_vm4, %v2481_v14, %v2491_v16  ;;  %v2502_v55 = vsel %vm1014_vm4, %v2482_v4, %v2492_v60  ;;  %v2503_v20 = vsel %vm1014_vm4, %v2483_v11, %v2493_v46  ;;  %v2504_v18 = vsel %vm1014_vm4, %v2484_v40, %v2494_v27 }
 0x2a9   :  { %v2505_v63 = vsel %vm1014_vm4, %v2485_v21, %v2495_v31  ;;  %v2507_v32 = vsel %vm1014_vm4, %v2487_v19, %v2477_v10  ;;  %v2508_v7 = vsel %vm1014_vm4, %v2488_v8, %v2478_v44  ;;  %v2509_v47 = vsel %vm1014_vm4, %v2489_v25, %v2479_v36 }
 0x2aa   :  { %v2510_v13 = vsel %vm1014_vm4, %v2490_v61, %v2480_v49  ;;  %v2511_v29 = vsel %vm1014_vm4, %v2491_v16, %v2481_v14  ;;  %v2517_v24 = vmul.f32 0.11128076, %v2506_v37  ;;  %v2512_v33 = vsel %vm1014_vm4, %v2492_v60, %v2482_v4  ;;  %v13407_v49 = vld [vmem:[#allocation27_spill] sm:$0xff] }
 0x2ab   :  { %v2513_v10 = vsel %vm1014_vm4, %v2493_v46, %v2483_v11  ;;  %v2514_v44 = vsel %vm1014_vm4, %v2494_v27, %v2484_v40  ;;  %v2518_v19 = vmul.f32 0.11128076, %v2497_v48  ;;  %v2515_v36 = vsel %vm1014_vm4, %v2495_v31, %v2485_v21 }
 0x2ac   :  { %v2519_v8 = vmul.f32 0.11128076, %v2507_v32  ;;  %v2520_v25 = vmul.f32 0.11128076, %v2498_v35  ;;  %v8663_v61 = vmul.f32 %v13407_v49, %v13407_v49  ;;  %v2521_v14 = vmul.f32 0.11128076, %v2508_v7 }
 0x2ad   :  { %v2522_v16 = vmul.f32 0.11128076, %v2499_v42  ;;  %v2523_v22 = vmul.f32 0.11128076, %v2509_v47  ;;  %v8666_v4 = vadd.f32 %v2516_v52, %v8543_v45  ;;  %v2524_v11 = vmul.f32 0.11128076, %v2500_v57 }
 0x2ae   :  { %v2525_v60 = vmul.f32 0.11128076, %v2510_v13  ;;  %v2526_v46 = vmul.f32 0.11128076, %v2501_v53  ;;  %v8669_v40 = vadd.f32 %v2517_v24, %v8546_v6  ;;  %v2527_v27 = vmul.f32 0.11128076, %v2511_v29 }
 0x2af   :  { %v2528_v31 = vmul.f32 0.11128076, %v2502_v55  ;;  %v2529_v32 = vmul.f32 0.11128076, %v2512_v33  ;;  %v8672_v21 = vadd.f32 %v2518_v19, %v8549_v50  ;;  %v2530_v48 = vmul.f32 0.11128076, %v2503_v20 }
 0x2b0   :  { %v2531_v35 = vmul.f32 0.11128076, %v2513_v10  ;;  %v2532_v37 = vmul.f32 0.11128076, %v2504_v18  ;;  %v8675_v47 = vadd.f32 %v2519_v8, %v8552_v9  ;;  %v2533_v45 = vmul.f32 0.11128076, %v2514_v44 }
 0x2b1   :  { %v2534_v42 = vmul.f32 0.11128076, %v2505_v63  ;;  %v2535_v57 = vmul.f32 0.11128076, %v2515_v36  ;;  %v8678_v13 = vadd.f32 %v2520_v25, %v8555_v1  ;;  %v8681_v24 = vadd.f32 %v2521_v14, %v8558_v54  ;;  %v13409_v20 = vld [vmem:[#allocation109_spill] sm:$0xff]  ;;  %v13410_v7 = vld [vmem:[#allocation110_spill] sm:$0xff] }
 0x2b2   :  { %v8684_v6 = vadd.f32 %v2522_v16, %v8561_v56  ;;  %v8687_v50 = vadd.f32 %v2523_v22, %v8564_v5  ;;  %v8690_v33 = vadd.f32 %v2524_v11, %v8567_v58  ;;  %v8693_v9 = vadd.f32 %v2525_v60, %v8570_v28  ;;  %v13411_v52 = vld [vmem:[#allocation150_spill] sm:$0xff]  ;;  %v13412_v10 = vld [vmem:[#allocation148_spill] sm:$0xff]  ;;  %v13413_v44 = vld [vmem:[#allocation149_spill] sm:$0xff] }
 0x2b3   :  { %v8696_v18 = vadd.f32 %v2526_v46, %v8573_v41  ;;  %v8699_v1 = vadd.f32 %v2527_v27, %v8576_v2  ;;  %v8702_v54 = vadd.f32 %v2528_v31, %v8579_v3  ;;  %v8705_v56 = vadd.f32 %v2529_v32, %v8582_v62  ;;  %v13414_v19 = vld [vmem:[#allocation151_spill] sm:$0xff]  ;;  %v13415_v36 = vld [vmem:[#allocation152_spill] sm:$0xff]  ;;  %v13416_v8 = vld [vmem:[#allocation154_spill] sm:$0xff] }
 0x2b4   :  { %v8708_v5 = vadd.f32 %v2530_v48, %v8585_v43  ;;  %v8711_v58 = vadd.f32 %v2531_v35, %v8587_v34  ;;  %v8714_v28 = vadd.f32 %v2532_v37, %v8608_v17  ;;  %v2556_v41 = vrot.slane %v7965_v30, 6  ;;  %v13408_v17 = vld [vmem:[#allocation108_spill] sm:$0xff]  ;;  %v13417_v25 = vld [vmem:[#allocation153_spill] sm:$0xff]  ;;  %v13418_v49 = vld [vmem:[#allocation155_spill] sm:$0xff] }
 0x2b5   :  { %v2557_v2 = vrot.slane %v7977_v38, 6  ;;  %v2558_v63 = vrot.slane %v7985_v12, 6  ;;  %v2559_v3 = vrot.slane %v7991_v51, 6  ;;  %v2560_v62 = vrot.slane %v7996_v26, 6  ;;  %v13419_v16 = vld [vmem:[#allocation135_spill] sm:$0xff]  ;;  %v13420_v11 = vld [vmem:[#allocation16_spill] sm:$0xff] }
 0x2b6   :  { %v2561_v29 = vrot.slane %v8000_v23, 6  ;;  %v2562_v43 = vrot.slane %v8004_v39, 6  ;;  %v2566_v34 = vrot.slane %v7971_v15, 6  ;;  %v2567_v53 = vrot.slane %v13390_v0, 6  ;;  %v13421_v46 = vld [vmem:[#allocation17_spill] sm:$0xff] }
 0x2b7   :  { %v2568_v55 = vrot.slane %v13408_v17, 6  ;;  %v2569_v30 = vrot.slane %v13409_v20, 6  ;;  %v2570_v38 = vrot.slane %v13410_v7, 6  ;;  %v2563_v12 = vrot.slane %v13411_v52, 6 }
 0x2b8   :  { %v2571_v51 = vrot.slane %v13412_v10, 6  ;;  %v2572_v26 = vrot.slane %v13413_v44, 6  ;;  %v2573_v23 = vrot.slane %v13414_v19, 6  ;;  %v2564_v39 = vrot.slane %v13415_v36, 6 }
 0x2b9   :  { %v2565_v15 = vrot.slane %v13416_v8, 6  ;;  %v2574_v0 = vrot.slane %v13417_v25, 6  ;;  %v2575_v14 = vrot.slane %v13418_v49, 6  ;;  %v2553_v22 = vadd.f32 %v2533_v45, %v13419_v16 }
 0x2ba   :  { %v2554_v60 = vadd.f32 %v2534_v42, %v13420_v11  ;;  %v2555_v27 = vadd.f32 %v2535_v57, %v13421_v46  ;;  %v2576_v31 = vsel %vm1095_vm5, %v2556_v41, %v2566_v34  ;;  %v2577_v32 = vsel %vm1095_vm5, %v2557_v2, %v2567_v53 }
 0x2bb   :  { %v2578_v48 = vsel %vm1095_vm5, %v2558_v63, %v2568_v55  ;;  %v2579_v35 = vsel %vm1095_vm5, %v2559_v3, %v2569_v30  ;;  %v2580_v37 = vsel %vm1095_vm5, %v2560_v62, %v2570_v38  ;;  %v2581_v45 = vsel %vm1095_vm5, %v2561_v29, %v2571_v51 }
 0x2bc   :  { %v2582_v42 = vsel %vm1095_vm5, %v2562_v43, %v2572_v26  ;;  %v2583_v57 = vsel %vm1095_vm5, %v2563_v12, %v2573_v23  ;;  %v2586_v17 = vsel %vm1095_vm5, %v2566_v34, %v2556_v41  ;;  %v2584_v20 = vsel %vm1095_vm5, %v2564_v39, %v2574_v0 }
 0x2bd   :  { %v2585_v7 = vsel %vm1095_vm5, %v2565_v15, %v2575_v14  ;;  %v2587_v52 = vsel %vm1095_vm5, %v2567_v53, %v2557_v2  ;;  %v2588_v10 = vsel %vm1095_vm5, %v2568_v55, %v2558_v63  ;;  %v2589_v44 = vsel %vm1095_vm5, %v2569_v30, %v2559_v3 }
 0x2be   :  { %v2590_v19 = vsel %vm1095_vm5, %v2570_v38, %v2560_v62  ;;  %v2591_v41 = vsel %vm1095_vm5, %v2571_v51, %v2561_v29  ;;  %v2596_v34 = vmul.f32 0.036632847, %v2576_v31  ;;  %v2592_v36 = vsel %vm1095_vm5, %v2572_v26, %v2562_v43  ;;  %v13422_v62 = vld [vmem:[#allocation28_spill] sm:$0xff]  ;;  %v13423_v43 = vld [vmem:[#allocation29_spill] sm:$0xff] }
 0x2bf   :  { %v2593_v8 = vsel %vm1095_vm5, %v2573_v23, %v2563_v12  ;;  %v2594_v2 = vsel %vm1095_vm5, %v2574_v0, %v2564_v39  ;;  %v2597_v63 = vmul.f32 0.036632847, %v2586_v17  ;;  %v2595_v3 = vsel %vm1095_vm5, %v2575_v14, %v2565_v15 }
 0x2c0   :  { %v2598_v53 = vmul.f32 0.036632847, %v2577_v32  ;;  %v2599_v55 = vmul.f32 0.036632847, %v2587_v52  ;;  %v8781_v30 = vmul.f32 %v13422_v62, %v13422_v62  ;;  %v2600_v29 = vmul.f32 0.036632847, %v2578_v48 }
 0x2c1   :  { %v2601_v38 = vmul.f32 0.036632847, %v2588_v10  ;;  %v2602_v51 = vmul.f32 0.036632847, %v2579_v35  ;;  %v8785_v26 = vmul.f32 %v13423_v43, %v13423_v43  ;;  %v2603_v12 = vmul.f32 0.036632847, %v2589_v44 }
 0x2c2   :  { %v2604_v23 = vmul.f32 0.036632847, %v2580_v37  ;;  %v2605_v39 = vmul.f32 0.036632847, %v2590_v19  ;;  %v8788_v25 = vadd.f32 %v2596_v34, %v8666_v4  ;;  %v2606_v15 = vmul.f32 0.036632847, %v2581_v45 }
 0x2c3   :  { %v2607_v0 = vmul.f32 0.036632847, %v2591_v41  ;;  %v2608_v49 = vmul.f32 0.036632847, %v2582_v42  ;;  %v8791_v14 = vadd.f32 %v2597_v63, %v8669_v40  ;;  %v2609_v16 = vmul.f32 0.036632847, %v2592_v36 }
 0x2c4   :  { %13424 = vst [vmem:[#allocation18_spill] sm:$0xff] %v8788_v25  ;;  %v2610_v11 = vmul.f32 0.036632847, %v2583_v57  ;;  %v2611_v46 = vmul.f32 0.036632847, %v2593_v8  ;;  %v8794_v31 = vadd.f32 %v2598_v53, %v8672_v21  ;;  %v8797_v37 = vadd.f32 %v2599_v55, %v8675_v47  ;;  %v13447_v52 = vld [vmem:[#allocation32_spill] sm:$0xff] }
 0x2c5   :  { %13425 = vst [vmem:[#allocation19_spill] sm:$0xff] %v8791_v14  ;;  %v2612_v32 = vmul.f32 0.036632847, %v2584_v20  ;;  %v2613_v48 = vmul.f32 0.036632847, %v2594_v2  ;;  %v8800_v45 = vadd.f32 %v2600_v29, %v8678_v13  ;;  %v8803_v42 = vadd.f32 %v2601_v38, %v8681_v24  ;;  %v13453_v10 = vld [vmem:[#allocation11_spill] sm:$0xff] }
 0x2c6   :  { %13426 = vst [vmem:[#allocation20_spill] sm:$0xff] %v8794_v31  ;;  %v2614_v35 = vmul.f32 0.036632847, %v2585_v7  ;;  %13427 = vst [vmem:[#allocation21_spill] sm:$0xff] %v8797_v37  ;;  %v2615_v4 = vmul.f32 0.036632847, %v2595_v3  ;;  %v8806_v40 = vadd.f32 %v2602_v51, %v8684_v6  ;;  %v8809_v57 = vadd.f32 %v2603_v12, %v8687_v50 }
 0x2c7   :  { %13428 = vst [vmem:[#allocation22_spill] sm:$0xff] %v8800_v45  ;;  %13429 = vst [vmem:[#allocation101_spill] sm:$0xff] %v8803_v42  ;;  %v8812_v21 = vadd.f32 %v2604_v23, %v8690_v33  ;;  %v8815_v17 = vadd.f32 %v2605_v39, %v8693_v9  ;;  %v8818_v47 = vadd.f32 %v2606_v15, %v8696_v18  ;;  %v2668_v44 = vmul.f32 0.036632847, %v13453_v10  ;;  %v13454_v19 = vld [vmem:[#allocation12_spill] sm:$0xff]  ;;  %v13455_v34 = vld [vmem:[#allocation35_spill] sm:$0xff] }
 0x2c8   :  { %13430 = vst [vmem:[#allocation138_spill] sm:$0xff] %v8806_v40  ;;  %13431 = vst [vmem:[#allocation139_spill] sm:$0xff] %v8809_v57  ;;  %v8821_v13 = vadd.f32 %v2607_v0, %v8699_v1  ;;  %v8824_v24 = vadd.f32 %v2608_v49, %v8702_v54  ;;  %v8827_v6 = vadd.f32 %v2609_v16, %v8705_v56  ;;  %v13444_v54 = vld [vmem:[#allocation30_spill] sm:$0xff]  ;;  %v13445_v56 = vld [vmem:[#allocation31_spill] sm:$0xff]  ;;  %v2669_v41 = vmul.f32 0.036632847, %v13454_v19 }
 0x2c9   :  { %13432 = vst [vmem:[#allocation141_spill] sm:$0xff] %v8812_v21  ;;  %13433 = vst [vmem:[#allocation23_spill] sm:$0xff] %v8815_v17  ;;  %v8830_v50 = vadd.f32 %v2610_v11, %v8708_v5  ;;  %v8833_v33 = vadd.f32 %v2611_v46, %v8711_v58  ;;  %v8836_v9 = vadd.f32 %v2612_v32, %v8714_v28  ;;  %v13449_v28 = vld [vmem:[#allocation33_spill] sm:$0xff]  ;;  %v13458_v63 = vld [vmem:[#allocation14_spill] sm:$0xff] }
 0x2ca   :  { %13434 = vst [vmem:[#allocation143_spill] sm:$0xff] %v8818_v47  ;;  %13435 = vst [vmem:[#allocation144_spill] sm:$0xff] %v8821_v13  ;;  %v8838_v18 = vadd.f32 %v2613_v48, %v2553_v22  ;;  %v8840_v20 = vadd.f32 %v2614_v35, %v2554_v60  ;;  %v8842_v1 = vadd.f32 %v2615_v4, %v2555_v27  ;;  %v13451_v60 = vld [vmem:[#allocation34_spill] sm:$0xff]  ;;  %v13457_v8 = vld [vmem:[#allocation13_spill] sm:$0xff]  ;;  %v2671_v3 = vmul.f32 0.036632847, %v13458_v63 }
 0x2cb   :  { %13436 = vst [vmem:[#allocation145_spill] sm:$0xff] %v8824_v24  ;;  %13437 = vst [vmem:[#allocation24_spill] sm:$0xff] %v8827_v6  ;;  %v8846_v7 = vmul.f32 %v13444_v54, %v13444_v54  ;;  %v8850_v5 = vmul.f32 %v13445_v56, %v13445_v56  ;;  %v8854_v58 = vmul.f32 %v13447_v52, %v13447_v52  ;;  %v2670_v2 = vmul.f32 0.036632847, %v13457_v8  ;;  %v13459_v53 = vld [vmem:[#allocation15_spill] sm:$0xff]  ;;  %v13460_v62 = vld [vmem:[#allocation36_spill] sm:$0xff] }
 0x2cc   :  { %13438 = vst [vmem:[#allocation25_spill] sm:$0xff] %v8830_v50  ;;  %13439 = vst [vmem:[#allocation147_spill] sm:$0xff] %v8833_v33  ;;  %v8858_v22 = vmul.f32 %v13449_v28, %v13449_v28  ;;  %v8862_v27 = vmul.f32 %v13451_v60, %v13451_v60  ;;  %v8868_v36 = vmul.f32 %v13455_v34, %v13455_v34  ;;  %v2672_v55 = vmul.f32 0.036632847, %v13459_v53  ;;  %v13462_v38 = vld [vmem:[#allocation130_spill] sm:$0xff]  ;;  %v13463_v43 = vld [vmem:[#allocation131_spill] sm:$0xff] }
 0x2cd   :  { %13440 = vst [vmem:[#allocation128_spill] sm:$0xff] %v8836_v9  ;;  %13441 = vst [vmem:[#allocation129_spill] sm:$0xff] %v8838_v18  ;;  %v8875_v29 = vmul.f32 %v13460_v62, %v13460_v62  ;;  %v2673_v51 = vmul.f32 0.036632847, %v13462_v38  ;;  %v2674_v12 = vmul.f32 0.036632847, %v13463_v43 }
 0x2ce   :  { %13442 = vst [vmem:[#allocation113_spill] sm:$0xff] %v8840_v20  ;;  %13443 = vst [vmem:[#allocation103_spill] sm:$0xff] %v8842_v1  ;;  %v13464_v23 = vld [vmem:[#allocation136_spill] sm:$0xff]  ;;  %v13465_v15 = vld [vmem:[#allocation37_spill] sm:$0xff]  ;;  %v8914_v33 = vmul.f32 0.036632847, %v8663_v61 }
 0x2cf   :  { %13446 = vst [vmem:[#allocation26_spill] sm:$0xff] %v8850_v5  ;;  %13448 = vst [vmem:[#allocation132_spill] sm:$0xff] %v8854_v58  ;;  %v2675_v39 = vmul.f32 0.036632847, %v13464_v23  ;;  %v8882_v0 = vmul.f32 %v13465_v15, %v13465_v15  ;;  %v13467_v49 = vld [vmem:[#allocation111_spill] sm:$0xff]  ;;  %v13468_v11 = vld [vmem:[#allocation137_spill] sm:$0xff] }
 0x2d0   :  { %13450 = vst [vmem:[#allocation133_spill] sm:$0xff] %v8858_v22  ;;  %13452 = vst [vmem:[#allocation80_spill] sm:$0xff] %v8862_v27  ;;  %v2676_v16 = vmul.f32 0.036632847, %v13467_v49  ;;  %v2677_v46 = vmul.f32 0.036632847, %v13468_v11 }
 0x2d1   :  { %13456 = vst [vmem:[#allocation114_spill] sm:$0xff] %v8868_v36  ;;  %13461 = vst [vmem:[#allocation115_spill] sm:$0xff] %v8875_v29  ;;  %v13469_v32 = vld [vmem:[#allocation140_spill] sm:$0xff]  ;;  %v13470_v35 = vld [vmem:[#allocation38_spill] sm:$0xff]  ;;  %v8917_v50 = vmul.f32 0.036632847, %v8781_v30 }
 0x2d2   :  { %13466 = vst [vmem:[#allocation27_spill] sm:$0xff] %v8882_v0  ;;  %v2678_v48 = vmul.f32 0.036632847, %v13469_v32  ;;  %v8889_v4 = vmul.f32 %v13470_v35, %v13470_v35  ;;  %v13472_v54 = vld [vmem:[#allocation142_spill] sm:$0xff]  ;;  %v13475_v60 = vld [vmem:[#allocation104_spill] sm:$0xff]  ;;  %v13477_v19 = vld [vmem:[#allocation39_spill] sm:$0xff] }
 0x2d3   :  { %v2679_v56 = vmul.f32 0.036632847, %v13472_v54  ;;  %v13473_v52 = vld [vmem:[#allocation146_spill] sm:$0xff]  ;;  %v8896_v10 = vmul.f32 0.036632847, %v13475_v60  ;;  %v8900_v34 = vmul.f32 %v13477_v19, %v13477_v19  ;;  %v13479_v62 = vld [vmem:[#allocation116_spill] sm:$0xff] }
 0x2d4   :  { %13471 = vst [vmem:[#allocation108_spill] sm:$0xff] %v8889_v4  ;;  %v8893_v28 = vmul.f32 0.036632847, %v13473_v52  ;;  %v8903_v15 = vmul.f32 0.036632847, %v13479_v62  ;;  %v13481_v1 = vld [vmem:[#allocation134_spill] sm:$0xff] }
 0x2d5   :  { %13476 = vst [vmem:[#allocation110_spill] sm:$0xff] %v8896_v10  ;;  %13478 = vst [vmem:[#allocation150_spill] sm:$0xff] %v8900_v34  ;;  %v8906_v20 = vmul.f32 0.036632847, %v13481_v1  ;;  %v2688_v35 = vmul.f32 0.11128076, %v13457_v8 }
 0x2d6   :  { %13474 = vst [vmem:[#allocation109_spill] sm:$0xff] %v8893_v28  ;;  %13480 = vst [vmem:[#allocation148_spill] sm:$0xff] %v8903_v15  ;;  %v13483_v18 = vld [vmem:[#allocation40_spill] sm:$0xff]  ;;  %v2689_v19 = vmul.f32 0.11128076, %v13458_v63  ;;  %v13487_v6 = vld [vmem:[#allocation41_spill] sm:$0xff] }
 0x2d7   :  { %13482 = vst [vmem:[#allocation149_spill] sm:$0xff] %v8906_v20  ;;  %v8911_v9 = vmul.f32 %v13483_v18, %v13483_v18  ;;  %13485 = vst [vmem:[#allocation152_spill] sm:$0xff] %v8914_v33  ;;  %v8922_v24 = vmul.f32 %v13487_v6, %v13487_v6  ;;  %v8925_v13 = vmul.f32 0.036632847, %v8785_v26  ;;  %v8928_v8 = vmul.f32 0.036632847, %v8846_v7 }
 0x2d8   :  { %13486 = vst [vmem:[#allocation154_spill] sm:$0xff] %v8917_v50  ;;  %v2690_v18 = vmul.f32 0.11128076, %v13459_v53  ;;  %v13491_v47 = vld [vmem:[#allocation42_spill] sm:$0xff]  ;;  %v2691_v21 = vmul.f32 0.11128076, %v13462_v38  ;;  %v2708_v45 = vadd.f32 %v2688_v35, %v2668_v44  ;;  %v2709_v14 = vadd.f32 %v2689_v19, %v2669_v41 }
 0x2d9   :  { %13484 = vst [vmem:[#allocation151_spill] sm:$0xff] %v8911_v9  ;;  %13488 = vst [vmem:[#allocation153_spill] sm:$0xff] %v8922_v24  ;;  %v8933_v17 = vmul.f32 %v13491_v47, %v13491_v47  ;;  %v2692_v63 = vmul.f32 0.11128076, %v13463_v43  ;;  %v2693_v57 = vmul.f32 0.11128076, %v13464_v23 }
 0x2da   :  { %13489 = vst [vmem:[#allocation155_spill] sm:$0xff] %v8925_v13  ;;  %13490 = vst [vmem:[#allocation135_spill] sm:$0xff] %v8928_v8  ;;  %v2694_v6 = vmul.f32 0.11128076, %v13467_v49  ;;  %v2695_v40 = vmul.f32 0.11128076, %v13468_v11  ;;  %v2710_v44 = vadd.f32 %v2690_v18, %v2670_v2  ;;  %v2711_v41 = vadd.f32 %v2691_v21, %v2671_v3 }
 0x2db   :  { %13492 = vst [vmem:[#allocation16_spill] sm:$0xff] %v8933_v17  ;;  %v8941_v42 = vmul.f32 0.11128076, %v13469_v32  ;;  %v8944_v37 = vmul.f32 0.11128076, %v13472_v54  ;;  %v2712_v4 = vadd.f32 %v2692_v63, %v2672_v55  ;;  %v2713_v0 = vadd.f32 %v2693_v57, %v2673_v51 }
 0x2dc   :  { %v8947_v47 = vmul.f32 0.11128076, %v13473_v52  ;;  %v8950_v31 = vmul.f32 0.11128076, %v13475_v60  ;;  %v8953_v25 = vmul.f32 0.11128076, %v13479_v62  ;;  %v2714_v29 = vadd.f32 %v2694_v6, %v2674_v12 }
 0x2dd   :  { %13493 = vst [vmem:[#allocation17_spill] sm:$0xff] %v8941_v42  ;;  %13494 = vst [vmem:[#allocation28_spill] sm:$0xff] %v8944_v37  ;;  %v8956_v59 = vmul.f32 0.11128076, %v13481_v1  ;;  %v8959_v17 = vmul.f32 0.11128076, %v8663_v61  ;;  %v2715_v2 = vadd.f32 %v2695_v40, %v2675_v39  ;;  %v2716_v18 = vadd.f32 %v8941_v42, %v2676_v16 }
 0x2de   :  { %13495 = vst [vmem:[#allocation29_spill] sm:$0xff] %v8947_v47  ;;  %13496 = vst [vmem:[#allocation30_spill] sm:$0xff] %v8950_v31  ;;  %v8962_v35 = vmul.f32 0.11128076, %v8781_v30  ;;  %v8965_v24 = vmul.f32 0.11128076, %v8785_v26  ;;  %v2717_v36 = vadd.f32 %v8944_v37, %v2677_v46  ;;  %v2718_v27 = vadd.f32 %v8947_v47, %v2678_v48 }
 0x2df   :  { %13497 = vst [vmem:[#allocation31_spill] sm:$0xff] %v8953_v25  ;;  %13498 = vst [vmem:[#allocation32_spill] sm:$0xff] %v8956_v59  ;;  %v8968_v9 = vmul.f32 0.11128076, %v8846_v7  ;;  %v8971_v19 = vmul.f32 0.11128076, %v8850_v5  ;;  %v2719_v22 = vadd.f32 %v8950_v31, %v2679_v56  ;;  %v2720_v21 = vadd.f32 %v8953_v25, %v8893_v28 }
 0x2e0   :  { %13499 = vst [vmem:[#allocation33_spill] sm:$0xff] %v8959_v17  ;;  %13500 = vst [vmem:[#allocation34_spill] sm:$0xff] %v8962_v35  ;;  %v8974_v34 = vmul.f32 0.11128076, %v8854_v58  ;;  %v2728_v3 = vmul.f32 0.21674532, %v13459_v53  ;;  %v2721_v58 = vadd.f32 %v8956_v59, %v8896_v10  ;;  %v2722_v57 = vadd.f32 %v8959_v17, %v8903_v15 }
 0x2e1   :  { %13501 = vst [vmem:[#allocation11_spill] sm:$0xff] %v8965_v24  ;;  %13502 = vst [vmem:[#allocation12_spill] sm:$0xff] %v8968_v9  ;;  %v2723_v40 = vadd.f32 %v8962_v35, %v8906_v20  ;;  %v2729_v55 = vmul.f32 0.21674532, %v13462_v38  ;;  %v2724_v51 = vadd.f32 %v8965_v24, %v8914_v33  ;;  %v2725_v12 = vadd.f32 %v8968_v9, %v8917_v50  ;;  %v13515_v35 = vld [vmem:[#allocation80_spill] sm:$0xff] }
 0x2e2   :  { %13503 = vst [vmem:[#allocation35_spill] sm:$0xff] %v8971_v19  ;;  %13504 = vst [vmem:[#allocation13_spill] sm:$0xff] %v8974_v34  ;;  %v2726_v53 = vadd.f32 %v8971_v19, %v8925_v13  ;;  %v2730_v39 = vmul.f32 0.21674532, %v13463_v43  ;;  %v2727_v16 = vadd.f32 %v8974_v34, %v8928_v8  ;;  %v2731_v46 = vmul.f32 0.21674532, %v13464_v23 }
 0x2e3   :  { %v9001_v48 = vmul.f32 0.21674532, %v13467_v49  ;;  %v9004_v38 = vmul.f32 0.21674532, %v13468_v11  ;;  %v9007_v56 = vmul.f32 0.21674532, %v13469_v32  ;;  %v2748_v13 = vadd.f32 %v2728_v3, %v2708_v45 }
 0x2e4   :  { %v9010_v63 = vmul.f32 0.21674532, %v13472_v54  ;;  %v9013_v6 = vmul.f32 0.21674532, %v13473_v52  ;;  %v9016_v8 = vmul.f32 0.21674532, %v13475_v60  ;;  %v2749_v20 = vadd.f32 %v2729_v55, %v2709_v14 }
 0x2e5   :  { %v9019_v50 = vmul.f32 0.21674532, %v13479_v62  ;;  %v9022_v33 = vmul.f32 0.21674532, %v13481_v1  ;;  %v9025_v15 = vmul.f32 0.21674532, %v8663_v61  ;;  %v2750_v45 = vadd.f32 %v2730_v39, %v2710_v44 }
 0x2e6   :  { %v9028_v10 = vmul.f32 0.21674532, %v8781_v30  ;;  %v9031_v28 = vmul.f32 0.21674532, %v8785_v26  ;;  %v9034_v3 = vmul.f32 0.21674532, %v8846_v7  ;;  %v2751_v14 = vadd.f32 %v2731_v46, %v2711_v41 }
 0x2e7   :  { %13505 = vst [vmem:[#allocation14_spill] sm:$0xff] %v9022_v33  ;;  %13506 = vst [vmem:[#allocation15_spill] sm:$0xff] %v9025_v15  ;;  %v9037_v34 = vmul.f32 0.21674532, %v8850_v5  ;;  %v13511_v19 = vld [vmem:[#allocation132_spill] sm:$0xff]  ;;  %v13513_v55 = vld [vmem:[#allocation133_spill] sm:$0xff]  ;;  %v2752_v59 = vadd.f32 %v9001_v48, %v2712_v4  ;;  %v2753_v44 = vadd.f32 %v9004_v38, %v2713_v0  ;;  %v2754_v39 = vadd.f32 %v9007_v56, %v2714_v29 }
 0x2e8   :  { %13507 = vst [vmem:[#allocation36_spill] sm:$0xff] %v9028_v10  ;;  %13508 = vst [vmem:[#allocation130_spill] sm:$0xff] %v9031_v28  ;;  %v9040_v9 = vmul.f32 0.21674532, %v13511_v19  ;;  %v9043_v24 = vmul.f32 0.21674532, %v13513_v55  ;;  %v2755_v25 = vadd.f32 %v9010_v63, %v2715_v2  ;;  %v2756_v31 = vadd.f32 %v9013_v6, %v2716_v18 }
 0x2e9   :  { %13509 = vst [vmem:[#allocation131_spill] sm:$0xff] %v9034_v3  ;;  %13510 = vst [vmem:[#allocation136_spill] sm:$0xff] %v9037_v34  ;;  %v9046_v17 = vmul.f32 0.21674532, %v13515_v35  ;;  %v2757_v47 = vadd.f32 %v9016_v8, %v2717_v36  ;;  %v2758_v41 = vadd.f32 %v9019_v50, %v2718_v27  ;;  %v2759_v46 = vadd.f32 %v9022_v33, %v2719_v22 }
 0x2ea   :  { %13512 = vst [vmem:[#allocation37_spill] sm:$0xff] %v9040_v9  ;;  %13514 = vst [vmem:[#allocation111_spill] sm:$0xff] %v9043_v24  ;;  %v2760_v37 = vadd.f32 %v9025_v15, %v2720_v21  ;;  %v2761_v42 = vadd.f32 %v9028_v10, %v2721_v58  ;;  %v2762_v4 = vadd.f32 %v9031_v28, %v2722_v57  ;;  %v2768_v2 = vmul.f32 0.27068216, %v13463_v43  ;;  %v13517_v28 = vld [vmem:[#allocation43_spill] sm:$0xff] }
 0x2eb   :  { %13516 = vst [vmem:[#allocation137_spill] sm:$0xff] %v9046_v17  ;;  %v2763_v0 = vadd.f32 %v9034_v3, %v2723_v40  ;;  %v2764_v29 = vadd.f32 %v9037_v34, %v2724_v51  ;;  %v2765_v18 = vadd.f32 %v9040_v9, %v2725_v12  ;;  %v2766_v36 = vadd.f32 %v9043_v24, %v2726_v53  ;;  %v13519_v53 = vld [vmem:[#allocation44_spill] sm:$0xff] }
 0x2ec   :  { %v2767_v27 = vadd.f32 %v9046_v17, %v2727_v16  ;;  %v2769_v22 = vmul.f32 0.27068216, %v13464_v23  ;;  %v2770_v21 = vmul.f32 0.27068216, %v13467_v49  ;;  %v2771_v58 = vmul.f32 0.27068216, %v13468_v11 }
 0x2ed   :  { %v2772_v57 = vmul.f32 0.27068216, %v13469_v32  ;;  %v9071_v40 = vmul.f32 %v13517_v28, %v13517_v28  ;;  %v2773_v43 = vmul.f32 0.27068216, %v13472_v54  ;;  %v2774_v51 = vmul.f32 0.27068216, %v13473_v52 }
 0x2ee   :  { %v2775_v12 = vmul.f32 0.27068216, %v13475_v60  ;;  %v9078_v16 = vmul.f32 %v13519_v53, %v13519_v53  ;;  %v2776_v23 = vmul.f32 0.27068216, %v13479_v62  ;;  %v2777_v49 = vmul.f32 0.27068216, %v13481_v1 }
 0x2ef   :  { %13518 = vst [vmem:[#allocation140_spill] sm:$0xff] %v9071_v40  ;;  %v2778_v11 = vmul.f32 0.27068216, %v8663_v61  ;;  %v2788_v32 = vadd.f32 %v2768_v2, %v2748_v13  ;;  %v2779_v28 = vmul.f32 0.27068216, %v8781_v30  ;;  %v2789_v52 = vadd.f32 %v2769_v22, %v2749_v20  ;;  %v13521_v1 = vld [vmem:[#allocation114_spill] sm:$0xff] }
 0x2f0   :  { %13520 = vst [vmem:[#allocation38_spill] sm:$0xff] %v9078_v16  ;;  %v2780_v40 = vmul.f32 0.27068216, %v8785_v26  ;;  %v2781_v54 = vmul.f32 0.27068216, %v8846_v7  ;;  %v2790_v16 = vadd.f32 %v2770_v21, %v2750_v45  ;;  %v13522_v61 = vld [vmem:[#allocation115_spill] sm:$0xff]  ;;  %v2791_v2 = vadd.f32 %v2771_v58, %v2751_v14 }
 0x2f1   :  { %v2782_v60 = vmul.f32 0.27068216, %v8850_v5  ;;  %v2783_v17 = vmul.f32 0.27068216, %v13511_v19  ;;  %v2784_v53 = vmul.f32 0.27068216, %v13513_v55  ;;  %v2792_v30 = vadd.f32 %v2772_v57, %v2752_v59 }
 0x2f2   :  { %v2785_v62 = vmul.f32 0.27068216, %v13515_v35  ;;  %v2786_v24 = vmul.f32 0.27068216, %v13521_v1  ;;  %v2787_v13 = vmul.f32 0.27068216, %v13522_v61  ;;  %v2793_v9 = vadd.f32 %v2773_v43, %v2753_v44 }
 0x2f3   :  { %v2794_v26 = vadd.f32 %v2774_v51, %v2754_v39  ;;  %v2795_v34 = vadd.f32 %v2775_v12, %v2755_v25  ;;  %v2796_v7 = vadd.f32 %v2776_v23, %v2756_v31  ;;  %v2797_v20 = vadd.f32 %v2777_v49, %v2757_v47  ;;  %v13523_v59 = vld [vmem:[#allocation27_spill] sm:$0xff]  ;;  %v13524_v39 = vld [vmem:[#allocation108_spill] sm:$0xff]  ;;  %v13533_v51 = vld [vmem:[#allocation137_spill] sm:$0xff] }
 0x2f4   :  { %v2798_v22 = vadd.f32 %v2778_v11, %v2758_v41  ;;  %v2799_v5 = vadd.f32 %v2779_v28, %v2759_v46  ;;  %v2800_v3 = vadd.f32 %v2780_v40, %v2760_v37  ;;  %v2801_v19 = vadd.f32 %v2781_v54, %v2761_v42  ;;  %v13525_v46 = vld [vmem:[#allocation14_spill] sm:$0xff]  ;;  %v13529_v58 = vld [vmem:[#allocation131_spill] sm:$0xff]  ;;  %v13530_v57 = vld [vmem:[#allocation136_spill] sm:$0xff] }
 0x2f5   :  { %v2802_v10 = vadd.f32 %v2782_v60, %v2762_v4  ;;  %v2803_v55 = vadd.f32 %v2783_v17, %v2763_v0  ;;  %v2804_v45 = vadd.f32 %v2784_v53, %v2764_v29  ;;  %v2805_v21 = vadd.f32 %v2785_v62, %v2765_v18  ;;  %v13526_v0 = vld [vmem:[#allocation15_spill] sm:$0xff]  ;;  %v13527_v18 = vld [vmem:[#allocation36_spill] sm:$0xff]  ;;  %v13531_v40 = vld [vmem:[#allocation37_spill] sm:$0xff] }
 0x2f6   :  { %v2806_v35 = vadd.f32 %v2786_v24, %v2766_v36  ;;  %v2808_v15 = vmul.f32 0.21674532, %v13521_v1  ;;  %v2807_v33 = vadd.f32 %v2787_v13, %v2767_v27  ;;  %v2809_v14 = vmul.f32 0.21674532, %v13522_v61  ;;  %v13528_v27 = vld [vmem:[#allocation130_spill] sm:$0xff]  ;;  %v13532_v43 = vld [vmem:[#allocation111_spill] sm:$0xff] }
 0x2f7   :  { %v2810_v44 = vmul.f32 0.21674532, %v13523_v59  ;;  %v2811_v25 = vmul.f32 0.21674532, %v13524_v39  ;;  %v2812_v31 = vadd.f32 %v2788_v32, %v9001_v48  ;;  %v2813_v47 = vadd.f32 %v2789_v52, %v9004_v38  ;;  %v13535_v49 = vld [vmem:[#allocation80_spill] sm:$0xff]  ;;  %v13536_v28 = vld [vmem:[#allocation150_spill] sm:$0xff] }
 0x2f8   :  { %v2814_v37 = vadd.f32 %v2790_v16, %v9007_v56  ;;  %v2815_v42 = vadd.f32 %v2791_v2, %v9010_v63  ;;  %v2816_v17 = vadd.f32 %v2792_v30, %v9013_v6  ;;  %v2817_v24 = vadd.f32 %v2793_v9, %v9016_v8  ;;  %v13537_v54 = vld [vmem:[#allocation17_spill] sm:$0xff]  ;;  %v13541_v62 = vld [vmem:[#allocation30_spill] sm:$0xff]  ;;  %v13542_v2 = vld [vmem:[#allocation31_spill] sm:$0xff] }
 0x2f9   :  { %v2818_v41 = vadd.f32 %v2794_v26, %v9019_v50  ;;  %v2819_v4 = vadd.f32 %v2795_v34, %v13525_v46  ;;  %v2820_v29 = vadd.f32 %v2796_v7, %v13526_v0  ;;  %v2821_v36 = vadd.f32 %v2797_v20, %v13527_v18  ;;  %v13534_v34 = vld [vmem:[#allocation133_spill] sm:$0xff]  ;;  %v13543_v26 = vld [vmem:[#allocation32_spill] sm:$0xff]  ;;  %v13548_v46 = vld [vmem:[#allocation35_spill] sm:$0xff] }
 0x2fa   :  { %v2822_v48 = vadd.f32 %v2798_v22, %v13528_v27  ;;  %v2823_v38 = vadd.f32 %v2799_v5, %v13529_v58  ;;  %v2824_v56 = vadd.f32 %v2800_v3, %v13530_v57  ;;  %v2825_v63 = vadd.f32 %v2801_v19, %v13531_v40  ;;  %v13540_v53 = vld [vmem:[#allocation29_spill] sm:$0xff] }
 0x2fb   :  { %v2826_v6 = vadd.f32 %v2802_v10, %v13532_v43  ;;  %v2827_v9 = vadd.f32 %v2803_v55, %v13533_v51  ;;  %v2828_v8 = vadd.f32 %v2808_v15, %v2804_v45  ;;  %v2829_v50 = vadd.f32 %v2809_v14, %v2805_v21  ;;  %v13538_v15 = vld [vmem:[#allocation151_spill] sm:$0xff]  ;;  %v13544_v20 = vld [vmem:[#allocation33_spill] sm:$0xff]  ;;  %v13545_v45 = vld [vmem:[#allocation34_spill] sm:$0xff] }
 0x2fc   :  { %v2830_v12 = vadd.f32 %v2810_v44, %v2806_v35  ;;  %v2832_v16 = vmul.f32 0.11128076, %v13534_v34  ;;  %v2831_v23 = vadd.f32 %v2811_v25, %v2807_v33  ;;  %v2833_v11 = vmul.f32 0.11128076, %v13535_v49  ;;  %v13539_v35 = vld [vmem:[#allocation28_spill] sm:$0xff]  ;;  %v13546_v14 = vld [vmem:[#allocation11_spill] sm:$0xff] }
 0x2fd   :  { %v2834_v32 = vmul.f32 0.11128076, %v13521_v1  ;;  %v2835_v5 = vmul.f32 0.11128076, %v13522_v61  ;;  %v2836_v3 = vmul.f32 0.11128076, %v13523_v59  ;;  %v2840_v55 = vadd.f32 %v2812_v31, %v13537_v54 }
 0x2fe   :  { %v2837_v19 = vmul.f32 0.11128076, %v13524_v39  ;;  %v2838_v10 = vmul.f32 0.11128076, %v13536_v28  ;;  %v2839_v52 = vmul.f32 0.11128076, %v13538_v15  ;;  %v2841_v60 = vadd.f32 %v2813_v47, %v13539_v35 }
 0x2ff   :  { %v2842_v33 = vadd.f32 %v2814_v37, %v13540_v53  ;;  %v2843_v13 = vadd.f32 %v2815_v42, %v13541_v62  ;;  %v2844_v30 = vadd.f32 %v2816_v17, %v13542_v2  ;;  %v2845_v7 = vadd.f32 %v2817_v24, %v13543_v26  ;;  %v13547_v25 = vld [vmem:[#allocation12_spill] sm:$0xff]  ;;  %v13549_v18 = vld [vmem:[#allocation13_spill] sm:$0xff]  ;;  %v13550_v24 = vld [vmem:[#allocation26_spill] sm:$0xff] }
 0x300   :  { %v2846_v22 = vadd.f32 %v2818_v41, %v13544_v20  ;;  %v2847_v21 = vadd.f32 %v2819_v4, %v13545_v45  ;;  %v2848_v44 = vadd.f32 %v2820_v29, %v13546_v14  ;;  %v2849_v31 = vadd.f32 %v2821_v36, %v13547_v25  ;;  %v13551_v51 = vld [vmem:[#allocation132_spill] sm:$0xff]  ;;  %v13563_v54 = vld [vmem:[#allocation135_spill] sm:$0xff] }
 0x301   :  { %v2850_v0 = vadd.f32 %v2822_v48, %v13548_v46  ;;  %v2851_v47 = vadd.f32 %v2823_v38, %v13549_v18  ;;  %v2852_v27 = vadd.f32 %v2832_v16, %v2824_v56  ;;  %v2853_v37 = vadd.f32 %v2833_v11, %v2825_v63  ;;  %v13552_v63 = vld [vmem:[#allocation109_spill] sm:$0xff]  ;;  %v13556_v11 = vld [vmem:[#allocation148_spill] sm:$0xff] }
 0x302   :  { %v2854_v58 = vadd.f32 %v2834_v32, %v2826_v6  ;;  %v2855_v42 = vadd.f32 %v2835_v5, %v2827_v9  ;;  %v2856_v57 = vadd.f32 %v2836_v3, %v2828_v8  ;;  %v2857_v17 = vadd.f32 %v2837_v19, %v2829_v50  ;;  %v13559_v5 = vld [vmem:[#allocation152_spill] sm:$0xff] }
 0x303   :  { %v2858_v40 = vadd.f32 %v2838_v10, %v2830_v12  ;;  %v2860_v43 = vmul.f32 0.036632847, %v13550_v24  ;;  %v2859_v41 = vadd.f32 %v2839_v52, %v2831_v23  ;;  %v2861_v4 = vmul.f32 0.036632847, %v13551_v51  ;;  %v13553_v12 = vld [vmem:[#allocation110_spill] sm:$0xff]  ;;  %v13579_v51 = vld [vmem:[#allocation48_spill] sm:$0xff] }
 0x304   :  { %v2862_v29 = vmul.f32 0.036632847, %v13534_v34  ;;  %v2863_v36 = vmul.f32 0.036632847, %v13535_v49  ;;  %v2864_v48 = vmul.f32 0.036632847, %v13521_v1  ;;  %v9140_v6 = vadd.f32 %v2840_v55, %v13552_v63 }
 0x305   :  { %v2865_v38 = vmul.f32 0.036632847, %v13522_v61  ;;  %v2866_v56 = vmul.f32 0.036632847, %v13523_v59  ;;  %v2867_v9 = vmul.f32 0.036632847, %v13524_v39  ;;  %v9146_v16 = vadd.f32 %v2841_v60, %v13553_v12 }
 0x306   :  { %v2868_v8 = vmul.f32 0.036632847, %v13536_v28  ;;  %v2869_v50 = vmul.f32 0.036632847, %v13538_v15  ;;  %v13554_v34 = vld [vmem:[#allocation153_spill] sm:$0xff]  ;;  %v13555_v49 = vld [vmem:[#allocation16_spill] sm:$0xff]  ;;  %v9151_v61 = vadd.f32 %v2842_v33, %v13556_v11  ;;  %v9157_v3 = vadd.f32 %v2844_v30, %v13559_v5 }
 0x307   :  { %v2870_v23 = vmul.f32 0.036632847, %v13554_v34  ;;  %v2871_v1 = vmul.f32 0.036632847, %v13555_v49  ;;  %v13557_v59 = vld [vmem:[#allocation149_spill] sm:$0xff]  ;;  %v13560_v39 = vld [vmem:[#allocation154_spill] sm:$0xff]  ;;  %v9166_v55 = vadd.f32 %v2847_v21, %v13563_v54  ;;  %v9168_v15 = vadd.f32 %v2860_v43, %v2848_v44 }
 0x308   :  { %v9154_v32 = vadd.f32 %v2843_v13, %v13557_v59  ;;  %v9160_v19 = vadd.f32 %v2845_v7, %v13560_v39  ;;  %v13562_v28 = vld [vmem:[#allocation155_spill] sm:$0xff]  ;;  %v9170_v52 = vadd.f32 %v2861_v4, %v2849_v31  ;;  %v9172_v35 = vadd.f32 %v2862_v29, %v2850_v0  ;;  %v13573_v31 = vld [vmem:[#allocation45_spill] sm:$0xff] }
 0x309   :  { %v9163_v10 = vadd.f32 %v2846_v22, %v13562_v28  ;;  %13564 = vst [vmem:[#allocation104_spill] sm:$0xff] %v9166_v55  ;;  %v9174_v60 = vadd.f32 %v2863_v36, %v2851_v47  ;;  %v9176_v53 = vadd.f32 %v2864_v48, %v2852_v27  ;;  %v9178_v33 = vadd.f32 %v2865_v38, %v2853_v37  ;;  %v13575_v27 = vld [vmem:[#allocation46_spill] sm:$0xff]  ;;  %v13582_v38 = vld [vmem:[#allocation49_spill] sm:$0xff] }
 0x30a   :  { %13558 = vst [vmem:[#allocation142_spill] sm:$0xff] %v9154_v32  ;;  %13561 = vst [vmem:[#allocation146_spill] sm:$0xff] %v9160_v19  ;;  %v9180_v62 = vadd.f32 %v2866_v56, %v2854_v58  ;;  %v9182_v13 = vadd.f32 %v2867_v9, %v2855_v42  ;;  %v9184_v2 = vadd.f32 %v2868_v8, %v2856_v57  ;;  %v9191_v7 = vmul.f32 0.036632847, %v9140_v6 }
 0x30b   :  { %13565 = vst [vmem:[#allocation39_spill] sm:$0xff] %v9170_v52  ;;  %13566 = vst [vmem:[#allocation116_spill] sm:$0xff] %v9174_v60  ;;  %v9186_v30 = vadd.f32 %v2869_v50, %v2857_v17  ;;  %v9188_v26 = vadd.f32 %v2870_v23, %v2858_v40  ;;  %v9193_v20 = vadd.f32 %v2871_v1, %v2859_v41  ;;  %v9196_v22 = vmul.f32 0.036632847, %v9146_v16  ;;  %v13577_v17 = vld [vmem:[#allocation47_spill] sm:$0xff] }
 0x30c   :  { %13567 = vst [vmem:[#allocation134_spill] sm:$0xff] %v9178_v33  ;;  %13568 = vst [vmem:[#allocation40_spill] sm:$0xff] %v9182_v13  ;;  %v9199_v45 = vmul.f32 0.036632847, %v9151_v61  ;;  %v9202_v21 = vmul.f32 0.036632847, %v9154_v32  ;;  %v9215_v46 = vmul.f32 %v13573_v31, %v13573_v31  ;;  %v9228_v37 = vmul.f32 %v13575_v27, %v13575_v27 }
 0x30d   :  { %13569 = vst [vmem:[#allocation41_spill] sm:$0xff] %v9184_v2  ;;  %13570 = vst [vmem:[#allocation42_spill] sm:$0xff] %v9186_v30  ;;  %v9205_v14 = vmul.f32 0.036632847, %v9157_v3  ;;  %v9208_v44 = vmul.f32 0.036632847, %v9160_v19  ;;  %v9241_v40 = vmul.f32 %v13577_v17, %v13577_v17  ;;  %v9254_v4 = vmul.f32 %v13579_v51, %v13579_v51 }
 0x30e   :  { %13571 = vst [vmem:[#allocation43_spill] sm:$0xff] %v9188_v26  ;;  %13572 = vst [vmem:[#allocation44_spill] sm:$0xff] %v9193_v20  ;;  %v9211_v25 = vmul.f32 0.036632847, %v9163_v10  ;;  %v9218_v0 = vmul.f32 0.036632847, %v9166_v55  ;;  %v9263_v56 = vmul.f32 %v13582_v38, %v13582_v38 }
 0x30f   :  { %13574 = vst [vmem:[#allocation114_spill] sm:$0xff] %v9215_v46  ;;  %v9221_v18 = vmul.f32 0.036632847, %v9168_v15  ;;  %v9224_v47 = vmul.f32 0.036632847, %v9170_v52  ;;  %13576 = vst [vmem:[#allocation115_spill] sm:$0xff] %v9228_v37 }
 0x310   :  { %v9231_v58 = vmul.f32 0.036632847, %v9172_v35  ;;  %v9234_v42 = vmul.f32 0.036632847, %v9174_v60  ;;  %v9237_v57 = vmul.f32 0.036632847, %v9176_v53 }
 0x311   :  { %13578 = vst [vmem:[#allocation27_spill] sm:$0xff] %v9241_v40  ;;  %v9244_v24 = vmul.f32 0.036632847, %v9178_v33  ;;  %v9247_v43 = vmul.f32 0.036632847, %v9180_v62  ;;  %13580 = vst [vmem:[#allocation108_spill] sm:$0xff] %v9254_v4 }
 0x312   :  { %v9250_v41 = vmul.f32 0.036632847, %v9182_v13  ;;  %v9257_v29 = vmul.f32 0.036632847, %v9184_v2  ;;  %v2912_v36 = vrot.slane %v9140_v6, 1  ;;  %v2913_v48 = vrot.slane %v9151_v61, 1 }
 0x313   :  { %13583 = vst [vmem:[#allocation15_spill] sm:$0xff] %v9263_v56  ;;  %v2914_v63 = vrot.slane %v9157_v3, 1  ;;  %v2915_v9 = vrot.slane %v9163_v10, 1  ;;  %v2916_v8 = vrot.slane %v9168_v15, 1  ;;  %v2917_v50 = vrot.slane %v9172_v35, 1  ;;  %v13588_v46 = vld [vmem:[#allocation50_spill] sm:$0xff] }
 0x314   :  { %13581 = vst [vmem:[#allocation14_spill] sm:$0xff] %v9257_v29  ;;  %v2918_v12 = vrot.slane %v9176_v53, 1  ;;  %v2919_v34 = vrot.slane %v9180_v62, 1  ;;  %v2922_v23 = vrot.slane %v9146_v16, 1  ;;  %v2923_v49 = vrot.slane %v9154_v32, 1 }
 0x315   :  { %v2924_v1 = vrot.slane %v9160_v19, 1  ;;  %v2925_v11 = vrot.slane %v9166_v55, 1  ;;  %v2926_v59 = vrot.slane %v9170_v52, 1  ;;  %v2927_v5 = vrot.slane %v9174_v60, 1 }
 0x316   :  { %v2920_v39 = vrot.slane %v9184_v2, 1  ;;  %v2928_v28 = vrot.slane %v9178_v33, 1  ;;  %v2929_v54 = vrot.slane %v9182_v13, 1  ;;  %v2930_v31 = vrot.slane %v9186_v30, 1 }
 0x317   :  { %v9282_v27 = vmul.f32 0.036632847, %v9186_v30  ;;  %v9285_v17 = vmul.f32 0.036632847, %v9188_v26  ;;  %v2921_v51 = vrot.slane %v9188_v26, 1  ;;  %v2931_v38 = vrot.slane %v9193_v20, 1 }
 0x318   :  { %v9290_v56 = vmul.f32 0.036632847, %v9193_v20  ;;  %v2932_v40 = vsel %vm690_vm0, %v2912_v36, %v2922_v23  ;;  %v2933_v37 = vsel %vm690_vm0, %v2913_v48, %v2923_v49  ;;  %v9298_v29 = vmul.f32 %v13588_v46, %v13588_v46 }
 0x319   :  { %13584 = vst [vmem:[#allocation36_spill] sm:$0xff] %v9282_v27  ;;  %13585 = vst [vmem:[#allocation130_spill] sm:$0xff] %v9285_v17  ;;  %v2934_v17 = vsel %vm690_vm0, %v2914_v63, %v2924_v1  ;;  %v2935_v27 = vsel %vm690_vm0, %v2915_v9, %v2925_v11  ;;  %v2936_v20 = vsel %vm690_vm0, %v2916_v8, %v2926_v59 }
 0x31a   :  { %13586 = vst [vmem:[#allocation131_spill] sm:$0xff] %v9290_v56  ;;  %13589 = vst [vmem:[#allocation136_spill] sm:$0xff] %v9298_v29  ;;  %v2937_v56 = vsel %vm690_vm0, %v2917_v50, %v2927_v5  ;;  %v2938_v30 = vsel %vm690_vm0, %v2918_v12, %v2928_v28  ;;  %v2939_v13 = vsel %vm690_vm0, %v2919_v34, %v2929_v54 }
 0x31b   :  { %v2940_v46 = vsel %vm690_vm0, %v2920_v39, %v2930_v31  ;;  %v2942_v29 = vsel %vm690_vm0, %v2922_v23, %v2912_v36  ;;  %v2941_v26 = vsel %vm690_vm0, %v2921_v51, %v2931_v38  ;;  %v2943_v33 = vsel %vm690_vm0, %v2923_v49, %v2913_v48 }
 0x31c   :  { %v2944_v60 = vsel %vm690_vm0, %v2924_v1, %v2914_v63  ;;  %v2945_v52 = vsel %vm690_vm0, %v2925_v11, %v2915_v9  ;;  %v2946_v2 = vsel %vm690_vm0, %v2926_v59, %v2916_v8  ;;  %v2947_v55 = vsel %vm690_vm0, %v2927_v5, %v2917_v50  ;;  %v13590_v11 = vld [vmem:[#allocation51_spill] sm:$0xff]  ;;  %v13592_v5 = vld [vmem:[#allocation52_spill] sm:$0xff] }
 0x31d   :  { %v2948_v36 = vsel %vm690_vm0, %v2928_v28, %v2918_v12  ;;  %v2952_v23 = vmul.f32 0.11128076, %v2932_v40  ;;  %v2949_v19 = vsel %vm690_vm0, %v2929_v54, %v2919_v34  ;;  %v2950_v48 = vsel %vm690_vm0, %v2930_v31, %v2920_v39 }
 0x31e   :  { %v2951_v63 = vsel %vm690_vm0, %v2931_v38, %v2921_v51  ;;  %v2953_v9 = vmul.f32 0.11128076, %v2942_v29  ;;  %v2954_v49 = vmul.f32 0.11128076, %v2933_v37  ;;  %v2955_v1 = vmul.f32 0.11128076, %v2943_v33 }
 0x31f   :  { %v2956_v8 = vmul.f32 0.11128076, %v2934_v17  ;;  %v9338_v50 = vmul.f32 %v13590_v11, %v13590_v11  ;;  %v2957_v59 = vmul.f32 0.11128076, %v2944_v60  ;;  %v2958_v12 = vmul.f32 0.11128076, %v2935_v27 }
 0x320   :  { %v2959_v40 = vmul.f32 0.11128076, %v2945_v52  ;;  %v9342_v34 = vmul.f32 %v13592_v5, %v13592_v5  ;;  %v2960_v28 = vmul.f32 0.11128076, %v2936_v20  ;;  %v2961_v39 = vmul.f32 0.11128076, %v2946_v2 }
 0x321   :  { %13591 = vst [vmem:[#allocation37_spill] sm:$0xff] %v9338_v50  ;;  %v2962_v54 = vmul.f32 0.11128076, %v2937_v56  ;;  %v9345_v31 = vadd.f32 %v2952_v23, %v9191_v7  ;;  %v2963_v37 = vmul.f32 0.11128076, %v2947_v55  ;;  %v9348_v17 = vadd.f32 %v2953_v9, %v9196_v22  ;;  %v13596_v23 = vld [vmem:[#allocation104_spill] sm:$0xff] }
 0x322   :  { %13593 = vst [vmem:[#allocation111_spill] sm:$0xff] %v9342_v34  ;;  %v2964_v33 = vmul.f32 0.11128076, %v2938_v30  ;;  %v2965_v29 = vmul.f32 0.11128076, %v2948_v36  ;;  %v9351_v52 = vadd.f32 %v2954_v49, %v9199_v45  ;;  %v9354_v2 = vadd.f32 %v2955_v1, %v9202_v21  ;;  %v13598_v49 = vld [vmem:[#allocation39_spill] sm:$0xff] }
 0x323   :  { %v2966_v51 = vmul.f32 0.11128076, %v2939_v13  ;;  %v2967_v60 = vmul.f32 0.11128076, %v2949_v19  ;;  %v2968_v27 = vmul.f32 0.11128076, %v2940_v46  ;;  %v9357_v7 = vadd.f32 %v2956_v8, %v9205_v14 }
 0x324   :  { %v2969_v38 = vmul.f32 0.11128076, %v2950_v48  ;;  %v2970_v11 = vmul.f32 0.11128076, %v2941_v26  ;;  %v2971_v20 = vmul.f32 0.11128076, %v2951_v63  ;;  %v9360_v55 = vadd.f32 %v2957_v59, %v9208_v44 }
 0x325   :  { %v9363_v30 = vadd.f32 %v2958_v12, %v9211_v25  ;;  %v9366_v19 = vadd.f32 %v2959_v40, %v9218_v0  ;;  %v9369_v13 = vadd.f32 %v2960_v28, %v9221_v18  ;;  %v9372_v26 = vadd.f32 %v2961_v39, %v9224_v47  ;;  %v13595_v46 = vld [vmem:[#allocation146_spill] sm:$0xff]  ;;  %v13597_v63 = vld [vmem:[#allocation41_spill] sm:$0xff]  ;;  %v13599_v8 = vld [vmem:[#allocation116_spill] sm:$0xff] }
 0x326   :  { %v9375_v22 = vadd.f32 %v2962_v54, %v9231_v58  ;;  %v9378_v45 = vadd.f32 %v2963_v37, %v9234_v42  ;;  %v9381_v21 = vadd.f32 %v2964_v33, %v9237_v57  ;;  %v9384_v14 = vadd.f32 %v2965_v29, %v9244_v24  ;;  %v13600_v12 = vld [vmem:[#allocation134_spill] sm:$0xff]  ;;  %v13601_v5 = vld [vmem:[#allocation43_spill] sm:$0xff]  ;;  %v13602_v39 = vld [vmem:[#allocation40_spill] sm:$0xff] }
 0x327   :  { %v9387_v44 = vadd.f32 %v2966_v51, %v9247_v43  ;;  %v9390_v25 = vadd.f32 %v2967_v60, %v9250_v41  ;;  %v2992_v0 = vrot.slane %v9140_v6, 2  ;;  %v2993_v18 = vrot.slane %v9151_v61, 2  ;;  %v13603_v37 = vld [vmem:[#allocation42_spill] sm:$0xff]  ;;  %v13604_v29 = vld [vmem:[#allocation44_spill] sm:$0xff] }
 0x328   :  { %v2994_v47 = vrot.slane %v9157_v3, 2  ;;  %v2995_v58 = vrot.slane %v9163_v10, 2  ;;  %v2996_v42 = vrot.slane %v9168_v15, 2  ;;  %v2997_v57 = vrot.slane %v9172_v35, 2  ;;  %v13605_v60 = vld [vmem:[#allocation14_spill] sm:$0xff]  ;;  %v13607_v50 = vld [vmem:[#allocation36_spill] sm:$0xff] }
 0x329   :  { %13594 = vst [vmem:[#allocation137_spill] sm:$0xff] %v9390_v25  ;;  %v2998_v24 = vrot.slane %v9176_v53, 2  ;;  %v2999_v43 = vrot.slane %v9180_v62, 2  ;;  %v3002_v56 = vrot.slane %v9146_v16, 2  ;;  %v3003_v41 = vrot.slane %v9154_v32, 2 }
 0x32a   :  { %v3004_v36 = vrot.slane %v13595_v46, 2  ;;  %v3005_v48 = vrot.slane %v13596_v23, 2  ;;  %v3000_v9 = vrot.slane %v13597_v63, 2  ;;  %v3006_v1 = vrot.slane %v13598_v49, 2  ;;  %v13609_v23 = vld [vmem:[#allocation130_spill] sm:$0xff] }
 0x32b   :  { %v3007_v59 = vrot.slane %v13599_v8, 2  ;;  %v3008_v40 = vrot.slane %v13600_v12, 2  ;;  %v3001_v28 = vrot.slane %v13601_v5, 2  ;;  %v3009_v54 = vrot.slane %v13602_v39, 2  ;;  %v13611_v8 = vld [vmem:[#allocation131_spill] sm:$0xff] }
 0x32c   :  { %v3010_v33 = vrot.slane %v13603_v37, 2  ;;  %v3011_v51 = vrot.slane %v13604_v29, 2  ;;  %v9413_v34 = vadd.f32 %v2968_v27, %v13605_v60  ;;  %v9416_v25 = vadd.f32 %v2969_v38, %v13607_v50 }
 0x32d   :  { %v9419_v49 = vadd.f32 %v2970_v11, %v13609_v23  ;;  %v9422_v46 = vadd.f32 %v2971_v20, %v13611_v8  ;;  %v3012_v12 = vsel %vm771_vm1, %v2992_v0, %v3002_v56  ;;  %v3013_v37 = vsel %vm771_vm1, %v2993_v18, %v3003_v41 }
 0x32e   :  { %13606 = vst [vmem:[#allocation133_spill] sm:$0xff] %v9413_v34  ;;  %13608 = vst [vmem:[#allocation80_spill] sm:$0xff] %v9416_v25  ;;  %v3014_v29 = vsel %vm771_vm1, %v2994_v47, %v3004_v36  ;;  %v3015_v27 = vsel %vm771_vm1, %v2995_v58, %v3005_v48  ;;  %v3016_v50 = vsel %vm771_vm1, %v2996_v42, %v3006_v1 }
 0x32f   :  { %13610 = vst [vmem:[#allocation150_spill] sm:$0xff] %v9419_v49  ;;  %13612 = vst [vmem:[#allocation17_spill] sm:$0xff] %v9422_v46  ;;  %v3017_v38 = vsel %vm771_vm1, %v2997_v57, %v3007_v59  ;;  %v3018_v11 = vsel %vm771_vm1, %v2998_v24, %v3008_v40  ;;  %v3022_v20 = vsel %vm771_vm1, %v3002_v56, %v2992_v0  ;;  %v3032_v56 = vmul.f32 0.21674532, %v3012_v12  ;;  %v13613_v12 = vld [vmem:[#allocation53_spill] sm:$0xff] }
 0x330   :  { %v3019_v23 = vsel %vm771_vm1, %v2999_v43, %v3009_v54  ;;  %v3020_v8 = vsel %vm771_vm1, %v3000_v9, %v3010_v33  ;;  %v3021_v60 = vsel %vm771_vm1, %v3001_v28, %v3011_v51  ;;  %v3023_v46 = vsel %vm771_vm1, %v3003_v41, %v2993_v18 }
 0x331   :  { %v3024_v49 = vsel %vm771_vm1, %v3004_v36, %v2994_v47  ;;  %v3025_v25 = vsel %vm771_vm1, %v3005_v48, %v2995_v58  ;;  %v3026_v0 = vsel %vm771_vm1, %v3006_v1, %v2996_v42  ;;  %v3027_v34 = vsel %vm771_vm1, %v3007_v59, %v2997_v57 }
 0x332   :  { %v3028_v39 = vsel %vm771_vm1, %v3008_v40, %v2998_v24  ;;  %v3029_v5 = vsel %vm771_vm1, %v3009_v54, %v2999_v43  ;;  %v3033_v18 = vmul.f32 0.21674532, %v3022_v20  ;;  %v3030_v47 = vsel %vm771_vm1, %v3010_v33, %v3000_v9 }
 0x333   :  { %v3031_v58 = vsel %vm771_vm1, %v3011_v51, %v3001_v28  ;;  %v3034_v41 = vmul.f32 0.21674532, %v3013_v37  ;;  %v3035_v36 = vmul.f32 0.21674532, %v3023_v46  ;;  %v3036_v42 = vmul.f32 0.21674532, %v3014_v29 }
 0x334   :  { %v3037_v48 = vmul.f32 0.21674532, %v3024_v49  ;;  %v3038_v1 = vmul.f32 0.21674532, %v3015_v27  ;;  %v9466_v57 = vmul.f32 %v13613_v12, %v13613_v12  ;;  %v3039_v24 = vmul.f32 0.21674532, %v3025_v25 }
 0x335   :  { %v3040_v59 = vmul.f32 0.21674532, %v3016_v50  ;;  %v3041_v40 = vmul.f32 0.21674532, %v3026_v0  ;;  %v9469_v43 = vadd.f32 %v3032_v56, %v9345_v31  ;;  %v3042_v54 = vmul.f32 0.21674532, %v3017_v38 }
 0x336   :  { %13614 = vst [vmem:[#allocation151_spill] sm:$0xff] %v9466_v57  ;;  %v3043_v9 = vmul.f32 0.21674532, %v3027_v34  ;;  %v3044_v33 = vmul.f32 0.21674532, %v3018_v11  ;;  %v9472_v28 = vadd.f32 %v3033_v18, %v9348_v17  ;;  %v9475_v29 = vadd.f32 %v3034_v41, %v9351_v52  ;;  %v13616_v56 = vld [vmem:[#allocation43_spill] sm:$0xff] }
 0x337   :  { %v3045_v46 = vmul.f32 0.21674532, %v3028_v39  ;;  %v3046_v37 = vmul.f32 0.21674532, %v3019_v23  ;;  %v3047_v49 = vmul.f32 0.21674532, %v3029_v5  ;;  %v9478_v50 = vadd.f32 %v3035_v36, %v9354_v2 }
 0x338   :  { %v3048_v51 = vmul.f32 0.21674532, %v3020_v8  ;;  %v3049_v27 = vmul.f32 0.21674532, %v3030_v47  ;;  %v3050_v25 = vmul.f32 0.21674532, %v3021_v60  ;;  %v9481_v38 = vadd.f32 %v3036_v42, %v9357_v7 }
 0x339   :  { %v3051_v31 = vmul.f32 0.21674532, %v3031_v58  ;;  %v9484_v34 = vadd.f32 %v3037_v48, %v9360_v55  ;;  %v9487_v17 = vadd.f32 %v3038_v1, %v9363_v30  ;;  %v9490_v5 = vadd.f32 %v3039_v24, %v9366_v19  ;;  %v13615_v60 = vld [vmem:[#allocation146_spill] sm:$0xff]  ;;  %v13617_v47 = vld [vmem:[#allocation104_spill] sm:$0xff]  ;;  %v13618_v41 = vld [vmem:[#allocation39_spill] sm:$0xff] }
 0x33a   :  { %v9493_v52 = vadd.f32 %v3040_v59, %v9369_v13  ;;  %v9496_v39 = vadd.f32 %v3041_v40, %v9372_v26  ;;  %v9499_v2 = vadd.f32 %v3042_v54, %v9375_v22  ;;  %v9502_v7 = vadd.f32 %v3043_v9, %v9378_v45  ;;  %v13619_v42 = vld [vmem:[#allocation116_spill] sm:$0xff]  ;;  %v13620_v1 = vld [vmem:[#allocation134_spill] sm:$0xff]  ;;  %v13625_v57 = vld [vmem:[#allocation133_spill] sm:$0xff] }
 0x33b   :  { %v9505_v55 = vadd.f32 %v3044_v33, %v9381_v21  ;;  %v9508_v30 = vadd.f32 %v3045_v46, %v9384_v14  ;;  %v9511_v19 = vadd.f32 %v3046_v37, %v9387_v44  ;;  %v3072_v13 = vrot.slane %v9140_v6, 3  ;;  %v13621_v24 = vld [vmem:[#allocation40_spill] sm:$0xff]  ;;  %v13622_v40 = vld [vmem:[#allocation42_spill] sm:$0xff]  ;;  %v13624_v46 = vld [vmem:[#allocation137_spill] sm:$0xff] }
 0x33c   :  { %v3073_v26 = vrot.slane %v9151_v61, 3  ;;  %v3074_v11 = vrot.slane %v9157_v3, 3  ;;  %v3075_v22 = vrot.slane %v9163_v10, 3  ;;  %v3076_v45 = vrot.slane %v9168_v15, 3  ;;  %v13623_v9 = vld [vmem:[#allocation44_spill] sm:$0xff] }
 0x33d   :  { %v3077_v20 = vrot.slane %v9172_v35, 3  ;;  %v3078_v21 = vrot.slane %v9176_v53, 3  ;;  %v3079_v14 = vrot.slane %v9180_v62, 3  ;;  %v3080_v23 = vrot.slane %v13597_v63, 3 }
 0x33e   :  { %v3082_v44 = vrot.slane %v9146_v16, 3  ;;  %v3083_v8 = vrot.slane %v9154_v32, 3  ;;  %v3084_v0 = vrot.slane %v13615_v60, 3  ;;  %v3081_v18 = vrot.slane %v13616_v56, 3  ;;  %v13627_v56 = vld [vmem:[#allocation80_spill] sm:$0xff] }
 0x33f   :  { %v3085_v58 = vrot.slane %v13617_v47, 3  ;;  %v3086_v36 = vrot.slane %v13618_v41, 3  ;;  %v3087_v48 = vrot.slane %v13619_v42, 3  ;;  %v3088_v12 = vrot.slane %v13620_v1, 3  ;;  %v13629_v47 = vld [vmem:[#allocation150_spill] sm:$0xff]  ;;  %v13631_v42 = vld [vmem:[#allocation17_spill] sm:$0xff] }
 0x340   :  { %v3089_v59 = vrot.slane %v13621_v24, 3  ;;  %v3090_v54 = vrot.slane %v13622_v40, 3  ;;  %v3091_v33 = vrot.slane %v13623_v9, 3  ;;  %v3067_v37 = vadd.f32 %v3047_v49, %v13624_v46 }
 0x341   :  { %v9535_v63 = vadd.f32 %v3048_v51, %v13625_v57  ;;  %v9538_v60 = vadd.f32 %v3049_v27, %v13627_v56  ;;  %v9541_v41 = vadd.f32 %v3050_v25, %v13629_v47  ;;  %v9544_v32 = vadd.f32 %v3051_v31, %v13631_v42 }
 0x342   :  { %v3092_v24 = vsel %vm852_vm2, %v3072_v13, %v3082_v44  ;;  %v3093_v9 = vsel %vm852_vm2, %v3073_v26, %v3083_v8  ;;  %v3094_v49 = vsel %vm852_vm2, %v3074_v11, %v3084_v0  ;;  %v3095_v57 = vsel %vm852_vm2, %v3075_v22, %v3085_v58 }
 0x343   :  { %13626 = vst [vmem:[#allocation28_spill] sm:$0xff] %v9535_v63  ;;  %13628 = vst [vmem:[#allocation29_spill] sm:$0xff] %v9538_v60  ;;  %v3096_v51 = vsel %vm852_vm2, %v3076_v45, %v3086_v36  ;;  %v3097_v27 = vsel %vm852_vm2, %v3077_v20, %v3087_v48  ;;  %v3102_v25 = vsel %vm852_vm2, %v3082_v44, %v3072_v13  ;;  %v3112_v44 = vmul.f32 0.27068216, %v3092_v24 }
 0x344   :  { %13630 = vst [vmem:[#allocation30_spill] sm:$0xff] %v9541_v41  ;;  %13632 = vst [vmem:[#allocation31_spill] sm:$0xff] %v9544_v32  ;;  %v3098_v31 = vsel %vm852_vm2, %v3078_v21, %v3088_v12  ;;  %v3099_v56 = vsel %vm852_vm2, %v3079_v14, %v3089_v59  ;;  %v3100_v47 = vsel %vm852_vm2, %v3080_v23, %v3090_v54  ;;  %v3113_v40 = vmul.f32 0.27068216, %v3102_v25 }
 0x345   :  { %v3101_v42 = vsel %vm852_vm2, %v3081_v18, %v3091_v33  ;;  %v3103_v46 = vsel %vm852_vm2, %v3083_v8, %v3073_v26  ;;  %v3104_v32 = vsel %vm852_vm2, %v3084_v0, %v3074_v11  ;;  %v3105_v13 = vsel %vm852_vm2, %v3085_v58, %v3075_v22 }
 0x346   :  { %v3106_v41 = vsel %vm852_vm2, %v3086_v36, %v3076_v45  ;;  %v3107_v60 = vsel %vm852_vm2, %v3087_v48, %v3077_v20  ;;  %v3108_v63 = vsel %vm852_vm2, %v3088_v12, %v3078_v21  ;;  %v3109_v26 = vsel %vm852_vm2, %v3089_v59, %v3079_v14  ;;  %v13633_v36 = vld [vmem:[#allocation54_spill] sm:$0xff] }
 0x347   :  { %v3110_v11 = vsel %vm852_vm2, %v3090_v54, %v3080_v23  ;;  %v3111_v22 = vsel %vm852_vm2, %v3091_v33, %v3081_v18  ;;  %v3114_v8 = vmul.f32 0.27068216, %v3093_v9  ;;  %v3115_v0 = vmul.f32 0.27068216, %v3103_v46 }
 0x348   :  { %v3116_v58 = vmul.f32 0.27068216, %v3094_v49  ;;  %v3117_v45 = vmul.f32 0.27068216, %v3104_v32  ;;  %v9588_v20 = vmul.f32 %v13633_v36, %v13633_v36  ;;  %v3118_v48 = vmul.f32 0.27068216, %v3095_v57 }
 0x349   :  { %v3119_v21 = vmul.f32 0.27068216, %v3105_v13  ;;  %v3120_v12 = vmul.f32 0.27068216, %v3096_v51  ;;  %v9591_v24 = vadd.f32 %v3112_v44, %v9469_v43  ;;  %v3121_v14 = vmul.f32 0.27068216, %v3106_v41 }
 0x34a   :  { %13634 = vst [vmem:[#allocation32_spill] sm:$0xff] %v9588_v20  ;;  %v3122_v59 = vmul.f32 0.27068216, %v3097_v27  ;;  %v3123_v23 = vmul.f32 0.27068216, %v3107_v60  ;;  %v9594_v54 = vadd.f32 %v3113_v40, %v9472_v28  ;;  %v9597_v32 = vadd.f32 %v3114_v8, %v9475_v29  ;;  %v13637_v44 = vld [vmem:[#allocation104_spill] sm:$0xff] }
 0x34b   :  { %v3124_v18 = vmul.f32 0.27068216, %v3098_v31  ;;  %v3125_v9 = vmul.f32 0.27068216, %v3108_v63  ;;  %v3126_v33 = vmul.f32 0.27068216, %v3099_v56  ;;  %v9600_v51 = vadd.f32 %v3115_v0, %v9478_v50 }
 0x34c   :  { %v3127_v49 = vmul.f32 0.27068216, %v3109_v26  ;;  %v3128_v25 = vmul.f32 0.27068216, %v3100_v47  ;;  %v3129_v57 = vmul.f32 0.27068216, %v3110_v11  ;;  %v9603_v41 = vadd.f32 %v3116_v58, %v9481_v38 }
 0x34d   :  { %v3130_v43 = vmul.f32 0.27068216, %v3101_v42  ;;  %v3131_v46 = vmul.f32 0.27068216, %v3111_v22  ;;  %v9606_v28 = vadd.f32 %v3117_v45, %v9484_v34  ;;  %v9609_v63 = vadd.f32 %v3118_v48, %v9487_v17  ;;  %v13636_v42 = vld [vmem:[#allocation146_spill] sm:$0xff]  ;;  %v13638_v11 = vld [vmem:[#allocation39_spill] sm:$0xff] }
 0x34e   :  { %v9612_v29 = vadd.f32 %v3119_v21, %v9490_v5  ;;  %v9615_v60 = vadd.f32 %v3120_v12, %v9493_v52  ;;  %v9618_v50 = vadd.f32 %v3121_v14, %v9496_v39  ;;  %v9621_v40 = vadd.f32 %v3122_v59, %v9499_v2  ;;  %v13639_v8 = vld [vmem:[#allocation116_spill] sm:$0xff]  ;;  %v13640_v58 = vld [vmem:[#allocation41_spill] sm:$0xff]  ;;  %v13642_v12 = vld [vmem:[#allocation42_spill] sm:$0xff] }
 0x34f   :  { %v9624_v38 = vadd.f32 %v3123_v23, %v9502_v7  ;;  %v9627_v34 = vadd.f32 %v3124_v18, %v9505_v55  ;;  %v9630_v17 = vadd.f32 %v3125_v9, %v9508_v30  ;;  %v9633_v5 = vadd.f32 %v3126_v33, %v9511_v19  ;;  %v13641_v48 = vld [vmem:[#allocation40_spill] sm:$0xff]  ;;  %v13645_v18 = vld [vmem:[#allocation29_spill] sm:$0xff]  ;;  %v13647_v33 = vld [vmem:[#allocation43_spill] sm:$0xff] }
 0x350   :  { %v9635_v52 = vadd.f32 %v3127_v49, %v3067_v37  ;;  %v3152_v39 = vrot.slane %v9140_v6, 4  ;;  %v3153_v27 = vrot.slane %v9151_v61, 4  ;;  %v3154_v2 = vrot.slane %v9157_v3, 4  ;;  %v13635_v37 = vld [vmem:[#allocation142_spill] sm:$0xff]  ;;  %v13643_v59 = vld [vmem:[#allocation28_spill] sm:$0xff] }
 0x351   :  { %v3155_v7 = vrot.slane %v9163_v10, 4  ;;  %v3156_v31 = vrot.slane %v9168_v15, 4  ;;  %v3157_v55 = vrot.slane %v9172_v35, 4  ;;  %v3158_v30 = vrot.slane %v9176_v53, 4  ;;  %v13648_v20 = vld [vmem:[#allocation44_spill] sm:$0xff] }
 0x352   :  { %v3159_v56 = vrot.slane %v9180_v62, 4  ;;  %v3162_v19 = vrot.slane %v9146_v16, 4  ;;  %v3163_v47 = vrot.slane %v13635_v37, 4  ;;  %v3164_v13 = vrot.slane %v13636_v42, 4 }
 0x353   :  { %v3165_v26 = vrot.slane %v13637_v44, 4  ;;  %v3166_v22 = vrot.slane %v13638_v11, 4  ;;  %v3167_v0 = vrot.slane %v13639_v8, 4  ;;  %v3160_v45 = vrot.slane %v13640_v58, 4  ;;  %v13649_v44 = vld [vmem:[#allocation30_spill] sm:$0xff]  ;;  %v13651_v58 = vld [vmem:[#allocation31_spill] sm:$0xff] }
 0x354   :  { %v3168_v36 = vrot.slane %v13620_v1, 4  ;;  %v3169_v21 = vrot.slane %v13641_v48, 4  ;;  %v3170_v14 = vrot.slane %v13642_v12, 4  ;;  %v9656_v23 = vadd.f32 %v3128_v25, %v13643_v59 }
 0x355   :  { %v9659_v9 = vadd.f32 %v3129_v57, %v13645_v18  ;;  %v3161_v49 = vrot.slane %v13647_v33, 4  ;;  %v3171_v11 = vrot.slane %v13648_v20, 4  ;;  %v9664_v8 = vadd.f32 %v3130_v43, %v13649_v44 }
 0x356   :  { %13644 = vst [vmem:[#allocation33_spill] sm:$0xff] %v9656_v23  ;;  %v9667_v42 = vadd.f32 %v3131_v46, %v13651_v58  ;;  %v3172_v48 = vsel %vm933_vm3, %v3152_v39, %v3162_v19  ;;  %v3173_v25 = vsel %vm933_vm3, %v3153_v27, %v3163_v47  ;;  %v3174_v57 = vsel %vm933_vm3, %v3154_v2, %v3164_v13 }
 0x357   :  { %13646 = vst [vmem:[#allocation34_spill] sm:$0xff] %v9659_v9  ;;  %13650 = vst [vmem:[#allocation11_spill] sm:$0xff] %v9664_v8  ;;  %v3175_v59 = vsel %vm933_vm3, %v3155_v7, %v3165_v26  ;;  %v3176_v18 = vsel %vm933_vm3, %v3156_v31, %v3166_v22  ;;  %v3177_v43 = vsel %vm933_vm3, %v3157_v55, %v3167_v0 }
 0x358   :  { %13652 = vst [vmem:[#allocation12_spill] sm:$0xff] %v9667_v42  ;;  %v3178_v46 = vsel %vm933_vm3, %v3158_v30, %v3168_v36  ;;  %v3179_v44 = vsel %vm933_vm3, %v3159_v56, %v3169_v21  ;;  %v3180_v58 = vsel %vm933_vm3, %v3160_v45, %v3170_v14  ;;  %v3182_v42 = vsel %vm933_vm3, %v3162_v19, %v3152_v39 }
 0x359   :  { %v3181_v8 = vsel %vm933_vm3, %v3161_v49, %v3171_v11  ;;  %v3183_v9 = vsel %vm933_vm3, %v3163_v47, %v3153_v27  ;;  %v3184_v23 = vsel %vm933_vm3, %v3164_v13, %v3154_v2  ;;  %v3185_v20 = vsel %vm933_vm3, %v3165_v26, %v3155_v7  ;;  %v13653_v26 = vld [vmem:[#allocation55_spill] sm:$0xff] }
 0x35a   :  { %v3186_v12 = vsel %vm933_vm3, %v3166_v22, %v3156_v31  ;;  %v3187_v33 = vsel %vm933_vm3, %v3167_v0, %v3157_v55  ;;  %v3188_v39 = vsel %vm933_vm3, %v3168_v36, %v3158_v30  ;;  %v3192_v19 = vmul.f32 0.21674532, %v3172_v48  ;;  %v13655_v36 = vld [vmem:[#allocation56_spill] sm:$0xff] }
 0x35b   :  { %v3189_v1 = vsel %vm933_vm3, %v3169_v21, %v3159_v56  ;;  %v3190_v27 = vsel %vm933_vm3, %v3170_v14, %v3160_v45  ;;  %v3191_v2 = vsel %vm933_vm3, %v3171_v11, %v3161_v49  ;;  %v3193_v7 = vmul.f32 0.21674532, %v3182_v42 }
 0x35c   :  { %v3194_v47 = vmul.f32 0.21674532, %v3173_v25  ;;  %v3195_v13 = vmul.f32 0.21674532, %v3183_v9  ;;  %v3196_v31 = vmul.f32 0.21674532, %v3174_v57  ;;  %v9711_v55 = vmul.f32 %v13653_v26, %v13653_v26 }
 0x35d   :  { %v3197_v22 = vmul.f32 0.21674532, %v3184_v23  ;;  %v3198_v30 = vmul.f32 0.21674532, %v3175_v59  ;;  %v3199_v0 = vmul.f32 0.21674532, %v3185_v20  ;;  %v9715_v56 = vmul.f32 %v13655_v36, %v13655_v36 }
 0x35e   :  { %13654 = vst [vmem:[#allocation35_spill] sm:$0xff] %v9711_v55  ;;  %v3200_v48 = vmul.f32 0.21674532, %v3176_v18  ;;  %v3201_v45 = vmul.f32 0.21674532, %v3186_v12  ;;  %v9718_v11 = vadd.f32 %v3192_v19, %v9591_v24  ;;  %v9721_v49 = vadd.f32 %v3193_v7, %v9594_v54  ;;  %v13659_v19 = vld [vmem:[#allocation104_spill] sm:$0xff] }
 0x35f   :  { %13656 = vst [vmem:[#allocation13_spill] sm:$0xff] %v9715_v56  ;;  %v3202_v21 = vmul.f32 0.21674532, %v3177_v43  ;;  %v3203_v42 = vmul.f32 0.21674532, %v3187_v33  ;;  %v9724_v20 = vadd.f32 %v3194_v47, %v9597_v32  ;;  %v9727_v12 = vadd.f32 %v3195_v13, %v9600_v51  ;;  %v13661_v47 = vld [vmem:[#allocation39_spill] sm:$0xff] }
 0x360   :  { %v3204_v14 = vmul.f32 0.21674532, %v3178_v46  ;;  %v3205_v9 = vmul.f32 0.21674532, %v3188_v39  ;;  %v3206_v25 = vmul.f32 0.21674532, %v3179_v44  ;;  %v9730_v24 = vadd.f32 %v3196_v31, %v9603_v41 }
 0x361   :  { %v3207_v23 = vmul.f32 0.21674532, %v3189_v1  ;;  %v3208_v57 = vmul.f32 0.21674532, %v3180_v58  ;;  %v3209_v59 = vmul.f32 0.21674532, %v3190_v27  ;;  %v9733_v33 = vadd.f32 %v3197_v22, %v9606_v28 }
 0x362   :  { %v3210_v26 = vmul.f32 0.21674532, %v3181_v8  ;;  %v3211_v18 = vmul.f32 0.21674532, %v3191_v2  ;;  %v9736_v54 = vadd.f32 %v3198_v30, %v9609_v63  ;;  %v9739_v1 = vadd.f32 %v3199_v0, %v9612_v29  ;;  %v13658_v58 = vld [vmem:[#allocation146_spill] sm:$0xff]  ;;  %v13660_v2 = vld [vmem:[#allocation41_spill] sm:$0xff] }
 0x363   :  { %v9742_v32 = vadd.f32 %v3200_v48, %v9615_v60  ;;  %v9745_v8 = vadd.f32 %v3201_v45, %v9618_v50  ;;  %v9748_v51 = vadd.f32 %v3202_v21, %v9621_v40  ;;  %v9751_v41 = vadd.f32 %v3203_v42, %v9624_v38  ;;  %v13662_v31 = vld [vmem:[#allocation116_spill] sm:$0xff]  ;;  %v13663_v30 = vld [vmem:[#allocation134_spill] sm:$0xff]  ;;  %v13664_v36 = vld [vmem:[#allocation43_spill] sm:$0xff] }
 0x364   :  { %v9754_v28 = vadd.f32 %v3204_v14, %v9627_v34  ;;  %v9757_v63 = vadd.f32 %v3205_v9, %v9630_v17  ;;  %v9760_v29 = vadd.f32 %v3206_v25, %v9633_v5  ;;  %v9763_v60 = vadd.f32 %v3207_v23, %v9635_v52  ;;  %v13665_v45 = vld [vmem:[#allocation40_spill] sm:$0xff]  ;;  %v13666_v42 = vld [vmem:[#allocation42_spill] sm:$0xff]  ;;  %v13668_v23 = vld [vmem:[#allocation33_spill] sm:$0xff] }
 0x365   :  { %v3232_v50 = vrot.slane %v9140_v6, 5  ;;  %v3233_v40 = vrot.slane %v9151_v61, 5  ;;  %v3234_v43 = vrot.slane %v9157_v3, 5  ;;  %v3235_v38 = vrot.slane %v9163_v10, 5  ;;  %v13667_v9 = vld [vmem:[#allocation44_spill] sm:$0xff]  ;;  %v13670_v55 = vld [vmem:[#allocation34_spill] sm:$0xff] }
 0x366   :  { %13657 = vst [vmem:[#allocation26_spill] sm:$0xff] %v9763_v60  ;;  %v3236_v34 = vrot.slane %v9168_v15, 5  ;;  %v3237_v46 = vrot.slane %v9172_v35, 5  ;;  %v3238_v17 = vrot.slane %v9176_v53, 5  ;;  %v3239_v5 = vrot.slane %v9180_v62, 5 }
 0x367   :  { %v3242_v44 = vrot.slane %v9146_v16, 5  ;;  %v3243_v52 = vrot.slane %v13635_v37, 5  ;;  %v3244_v39 = vrot.slane %v13658_v58, 5  ;;  %v3245_v27 = vrot.slane %v13659_v19, 5  ;;  %v13672_v19 = vld [vmem:[#allocation11_spill] sm:$0xff] }
 0x368   :  { %v3240_v7 = vrot.slane %v13660_v2, 5  ;;  %v3246_v13 = vrot.slane %v13661_v47, 5  ;;  %v3247_v22 = vrot.slane %v13662_v31, 5  ;;  %v3248_v0 = vrot.slane %v13663_v30, 5  ;;  %v13674_v31 = vld [vmem:[#allocation12_spill] sm:$0xff] }
 0x369   :  { %v3241_v48 = vrot.slane %v13664_v36, 5  ;;  %v3249_v21 = vrot.slane %v13665_v45, 5  ;;  %v3250_v14 = vrot.slane %v13666_v42, 5  ;;  %v3251_v25 = vrot.slane %v13667_v9, 5 }
 0x36a   :  { %v9786_v56 = vadd.f32 %v3208_v57, %v13668_v23  ;;  %v9789_v60 = vadd.f32 %v3209_v59, %v13670_v55  ;;  %v9792_v47 = vadd.f32 %v3210_v26, %v13672_v19  ;;  %v9795_v58 = vadd.f32 %v3211_v18, %v13674_v31 }
 0x36b   :  { %v3252_v30 = vsel %vm1014_vm4, %v3232_v50, %v3242_v44  ;;  %v3253_v42 = vsel %vm1014_vm4, %v3233_v40, %v3243_v52  ;;  %v3254_v9 = vsel %vm1014_vm4, %v3234_v43, %v3244_v39  ;;  %v3255_v57 = vsel %vm1014_vm4, %v3235_v38, %v3245_v27 }
 0x36c   :  { %13669 = vst [vmem:[#allocation132_spill] sm:$0xff] %v9786_v56  ;;  %13671 = vst [vmem:[#allocation109_spill] sm:$0xff] %v9789_v60  ;;  %v3256_v55 = vsel %vm1014_vm4, %v3236_v34, %v3246_v13  ;;  %v3257_v59 = vsel %vm1014_vm4, %v3237_v46, %v3247_v22  ;;  %v3258_v26 = vsel %vm1014_vm4, %v3238_v17, %v3248_v0 }
 0x36d   :  { %13673 = vst [vmem:[#allocation110_spill] sm:$0xff] %v9792_v47  ;;  %13675 = vst [vmem:[#allocation153_spill] sm:$0xff] %v9795_v58  ;;  %v3262_v18 = vsel %vm1014_vm4, %v3242_v44, %v3232_v50  ;;  %v3259_v19 = vsel %vm1014_vm4, %v3239_v5, %v3249_v21  ;;  %v3260_v31 = vsel %vm1014_vm4, %v3240_v7, %v3250_v14  ;;  %v3272_v44 = vmul.f32 0.11128076, %v3252_v30  ;;  %v13676_v30 = vld [vmem:[#allocation57_spill] sm:$0xff] }
 0x36e   :  { %v3261_v23 = vsel %vm1014_vm4, %v3241_v48, %v3251_v25  ;;  %v3263_v58 = vsel %vm1014_vm4, %v3243_v52, %v3233_v40  ;;  %v3264_v47 = vsel %vm1014_vm4, %v3244_v39, %v3234_v43  ;;  %v3265_v60 = vsel %vm1014_vm4, %v3245_v27, %v3235_v38 }
 0x36f   :  { %v3266_v50 = vsel %vm1014_vm4, %v3246_v13, %v3236_v34  ;;  %v3267_v56 = vsel %vm1014_vm4, %v3247_v22, %v3237_v46  ;;  %v3268_v45 = vsel %vm1014_vm4, %v3248_v0, %v3238_v17  ;;  %v3269_v36 = vsel %vm1014_vm4, %v3249_v21, %v3239_v5 }
 0x370   :  { %v3273_v40 = vmul.f32 0.11128076, %v3262_v18  ;;  %v3270_v43 = vsel %vm1014_vm4, %v3250_v14, %v3240_v7  ;;  %v3271_v38 = vsel %vm1014_vm4, %v3251_v25, %v3241_v48  ;;  %v3274_v52 = vmul.f32 0.11128076, %v3253_v42 }
 0x371   :  { %v3275_v39 = vmul.f32 0.11128076, %v3263_v58  ;;  %v3276_v34 = vmul.f32 0.11128076, %v3254_v9  ;;  %v3277_v27 = vmul.f32 0.11128076, %v3264_v47  ;;  %v9839_v46 = vmul.f32 %v13676_v30, %v13676_v30 }
 0x372   :  { %v3278_v13 = vmul.f32 0.11128076, %v3255_v57  ;;  %v3279_v17 = vmul.f32 0.11128076, %v3265_v60  ;;  %v3280_v22 = vmul.f32 0.11128076, %v3256_v55  ;;  %v9842_v5 = vadd.f32 %v3272_v44, %v9718_v11 }
 0x373   :  { %v3281_v0 = vmul.f32 0.11128076, %v3266_v50  ;;  %v3282_v21 = vmul.f32 0.11128076, %v3257_v59  ;;  %v3283_v7 = vmul.f32 0.11128076, %v3267_v56  ;;  %v9845_v48 = vadd.f32 %v3273_v40, %v9721_v49 }
 0x374   :  { %v3284_v14 = vmul.f32 0.11128076, %v3258_v26  ;;  %v3285_v58 = vmul.f32 0.11128076, %v3268_v45  ;;  %v3286_v42 = vmul.f32 0.11128076, %v3259_v19  ;;  %v9848_v9 = vadd.f32 %v3274_v52, %v9724_v20 }
 0x375   :  { %v3287_v47 = vmul.f32 0.11128076, %v3269_v36  ;;  %v3288_v25 = vmul.f32 0.11128076, %v3260_v31  ;;  %v3289_v57 = vmul.f32 0.11128076, %v3270_v43  ;;  %v9851_v55 = vadd.f32 %v3275_v39, %v9727_v12 }
 0x376   :  { %v3290_v60 = vmul.f32 0.11128076, %v3261_v23  ;;  %v3291_v11 = vmul.f32 0.11128076, %v3271_v38  ;;  %v9854_v59 = vadd.f32 %v3276_v34, %v9730_v24  ;;  %v9857_v56 = vadd.f32 %v3277_v27, %v9733_v33  ;;  %v13677_v31 = vld [vmem:[#allocation146_spill] sm:$0xff]  ;;  %v13678_v23 = vld [vmem:[#allocation43_spill] sm:$0xff] }
 0x377   :  { %v9860_v49 = vadd.f32 %v3278_v13, %v9736_v54  ;;  %v9863_v36 = vadd.f32 %v3279_v17, %v9739_v1  ;;  %v9866_v20 = vadd.f32 %v3280_v22, %v9742_v32  ;;  %v9869_v45 = vadd.f32 %v3281_v0, %v9745_v8  ;;  %v13679_v50 = vld [vmem:[#allocation104_spill] sm:$0xff]  ;;  %v13680_v44 = vld [vmem:[#allocation39_spill] sm:$0xff]  ;;  %v13682_v43 = vld [vmem:[#allocation134_spill] sm:$0xff] }
 0x378   :  { %v9872_v12 = vadd.f32 %v3282_v21, %v9748_v51  ;;  %v9875_v24 = vadd.f32 %v3283_v7, %v9751_v41  ;;  %v9878_v33 = vadd.f32 %v3284_v14, %v9754_v28  ;;  %v9881_v54 = vadd.f32 %v3285_v58, %v9757_v63  ;;  %v13681_v40 = vld [vmem:[#allocation116_spill] sm:$0xff]  ;;  %v13684_v52 = vld [vmem:[#allocation42_spill] sm:$0xff]  ;;  %v13688_v30 = vld [vmem:[#allocation109_spill] sm:$0xff] }
 0x379   :  { %v9884_v1 = vadd.f32 %v3286_v42, %v9760_v29  ;;  %v3312_v32 = vrot.slane %v9140_v6, 6  ;;  %v3313_v8 = vrot.slane %v9151_v61, 6  ;;  %v3314_v26 = vrot.slane %v9157_v3, 6  ;;  %v13683_v38 = vld [vmem:[#allocation40_spill] sm:$0xff]  ;;  %v13686_v34 = vld [vmem:[#allocation26_spill] sm:$0xff]  ;;  %v13690_v21 = vld [vmem:[#allocation153_spill] sm:$0xff] }
 0x37a   :  { %v3315_v51 = vrot.slane %v9163_v10, 6  ;;  %v3316_v41 = vrot.slane %v9168_v15, 6  ;;  %v3317_v18 = vrot.slane %v9172_v35, 6  ;;  %v3318_v28 = vrot.slane %v9176_v53, 6  ;;  %v13685_v39 = vld [vmem:[#allocation44_spill] sm:$0xff]  ;;  %v13689_v22 = vld [vmem:[#allocation110_spill] sm:$0xff] }
 0x37b   :  { %v3319_v63 = vrot.slane %v9180_v62, 6  ;;  %v3320_v19 = vrot.slane %v13660_v2, 6  ;;  %v3322_v29 = vrot.slane %v9146_v16, 6  ;;  %v3323_v6 = vrot.slane %v13635_v37, 6  ;;  %v13687_v27 = vld [vmem:[#allocation132_spill] sm:$0xff] }
 0x37c   :  { %v3324_v61 = vrot.slane %v13677_v31, 6  ;;  %v3321_v3 = vrot.slane %v13678_v23, 6  ;;  %v3325_v10 = vrot.slane %v13679_v50, 6  ;;  %v3326_v15 = vrot.slane %v13680_v44, 6 }
 0x37d   :  { %v3327_v35 = vrot.slane %v13681_v40, 6  ;;  %v3328_v53 = vrot.slane %v13682_v43, 6  ;;  %v3329_v62 = vrot.slane %v13683_v38, 6  ;;  %v3330_v2 = vrot.slane %v13684_v52, 6 }
 0x37e   :  { %v3331_v16 = vrot.slane %v13685_v39, 6  ;;  %v3307_v37 = vadd.f32 %v3287_v47, %v13686_v34  ;;  %v3308_v13 = vadd.f32 %v3288_v25, %v13687_v27  ;;  %v3309_v17 = vadd.f32 %v3289_v57, %v13688_v30 }
 0x37f   :  { %v3310_v0 = vadd.f32 %v3290_v60, %v13689_v22  ;;  %v3311_v7 = vadd.f32 %v3291_v11, %v13690_v21  ;;  %v3332_v14 = vsel %vm1095_vm5, %v3312_v32, %v3322_v29  ;;  %v3333_v58 = vsel %vm1095_vm5, %v3313_v8, %v3323_v6 }
 0x380   :  { %v3334_v42 = vsel %vm1095_vm5, %v3314_v26, %v3324_v61  ;;  %v3335_v47 = vsel %vm1095_vm5, %v3315_v51, %v3325_v10  ;;  %v3336_v25 = vsel %vm1095_vm5, %v3316_v41, %v3326_v15  ;;  %v3337_v57 = vsel %vm1095_vm5, %v3317_v18, %v3327_v35 }
 0x381   :  { %v3342_v60 = vsel %vm1095_vm5, %v3322_v29, %v3312_v32  ;;  %v3338_v11 = vsel %vm1095_vm5, %v3318_v28, %v3328_v53  ;;  %v3339_v31 = vsel %vm1095_vm5, %v3319_v63, %v3329_v62  ;;  %v3340_v23 = vsel %vm1095_vm5, %v3320_v19, %v3330_v2 }
 0x382   :  { %v3341_v50 = vsel %vm1095_vm5, %v3321_v3, %v3331_v16  ;;  %v3343_v44 = vsel %vm1095_vm5, %v3323_v6, %v3313_v8  ;;  %v3344_v40 = vsel %vm1095_vm5, %v3324_v61, %v3314_v26  ;;  %v3345_v32 = vsel %vm1095_vm5, %v3325_v10, %v3315_v51 }
 0x383   :  { %v3352_v29 = vmul.f32 0.036632847, %v3332_v14  ;;  %v3346_v43 = vsel %vm1095_vm5, %v3326_v15, %v3316_v41  ;;  %v3347_v38 = vsel %vm1095_vm5, %v3327_v35, %v3317_v18  ;;  %v3348_v52 = vsel %vm1095_vm5, %v3328_v53, %v3318_v28  ;;  %v13691_v15 = vld [vmem:[#allocation58_spill] sm:$0xff] }
 0x384   :  { %v3353_v39 = vmul.f32 0.036632847, %v3342_v60  ;;  %v3349_v8 = vsel %vm1095_vm5, %v3329_v62, %v3319_v63  ;;  %v3350_v26 = vsel %vm1095_vm5, %v3330_v2, %v3320_v19  ;;  %v3351_v51 = vsel %vm1095_vm5, %v3331_v16, %v3321_v3 }
 0x385   :  { %v3354_v6 = vmul.f32 0.036632847, %v3333_v58  ;;  %v3355_v61 = vmul.f32 0.036632847, %v3343_v44  ;;  %v3356_v10 = vmul.f32 0.036632847, %v3334_v42  ;;  %v9953_v18 = vmul.f32 %v13691_v15, %v13691_v15 }
 0x386   :  { %v3357_v41 = vmul.f32 0.036632847, %v3344_v40  ;;  %v3358_v35 = vmul.f32 0.036632847, %v3335_v47  ;;  %v3359_v28 = vmul.f32 0.036632847, %v3345_v32  ;;  %v9956_v34 = vadd.f32 %v3352_v29, %v9842_v5 }
 0x387   :  { %v3360_v53 = vmul.f32 0.036632847, %v3336_v25  ;;  %v3361_v63 = vmul.f32 0.036632847, %v3346_v43  ;;  %v3362_v62 = vmul.f32 0.036632847, %v3337_v57  ;;  %v9959_v2 = vadd.f32 %v3353_v39, %v9845_v48 }
 0x388   :  { %13692 = vst [vmem:[#allocation16_spill] sm:$0xff] %v9956_v34  ;;  %v3363_v19 = vmul.f32 0.036632847, %v3347_v38  ;;  %v3364_v3 = vmul.f32 0.036632847, %v3338_v11  ;;  %v9962_v30 = vadd.f32 %v3354_v6, %v9848_v9  ;;  %v9965_v58 = vadd.f32 %v3355_v61, %v9851_v55  ;;  %v13720_v40 = vld [vmem:[#allocation65_spill] sm:$0xff] }
 0x389   :  { %13693 = vst [vmem:[#allocation148_spill] sm:$0xff] %v9959_v2  ;;  %v3365_v16 = vmul.f32 0.036632847, %v3348_v52  ;;  %v3366_v27 = vmul.f32 0.036632847, %v3339_v31  ;;  %v9968_v47 = vadd.f32 %v3356_v10, %v9854_v59  ;;  %v9971_v48 = vadd.f32 %v3357_v41, %v9857_v56  ;;  %v13722_v29 = vld [vmem:[#allocation66_spill] sm:$0xff] }
 0x38a   :  { %13694 = vst [vmem:[#allocation149_spill] sm:$0xff] %v9962_v30  ;;  %v3367_v22 = vmul.f32 0.036632847, %v3349_v8  ;;  %v3368_v21 = vmul.f32 0.036632847, %v3340_v23  ;;  %13695 = vst [vmem:[#allocation152_spill] sm:$0xff] %v9965_v58  ;;  %v9974_v25 = vadd.f32 %v3358_v35, %v9860_v49  ;;  %v9977_v9 = vadd.f32 %v3359_v28, %v9863_v36 }
 0x38b   :  { %v3369_v14 = vmul.f32 0.036632847, %v3350_v26  ;;  %v3370_v5 = vmul.f32 0.036632847, %v3341_v50  ;;  %v3371_v42 = vmul.f32 0.036632847, %v3351_v51  ;;  %v9980_v57 = vadd.f32 %v3360_v53, %v9866_v20 }
 0x38c   :  { %13696 = vst [vmem:[#allocation154_spill] sm:$0xff] %v9968_v47  ;;  %13697 = vst [vmem:[#allocation155_spill] sm:$0xff] %v9971_v48  ;;  %v9983_v55 = vadd.f32 %v3361_v63, %v9869_v45  ;;  %v9986_v60 = vadd.f32 %v3362_v62, %v9872_v12  ;;  %v9989_v59 = vadd.f32 %v3363_v19, %v9875_v24  ;;  %v13712_v24 = vld [vmem:[#allocation59_spill] sm:$0xff]  ;;  %v13713_v23 = vld [vmem:[#allocation60_spill] sm:$0xff]  ;;  %v10131_v34 = vmul.f32 0.11128076, %v9839_v46 }
 0x38d   :  { %13698 = vst [vmem:[#allocation135_spill] sm:$0xff] %v9974_v25  ;;  %13699 = vst [vmem:[#allocation45_spill] sm:$0xff] %v9977_v9  ;;  %v9992_v56 = vadd.f32 %v3364_v3, %v9878_v33  ;;  %v9995_v49 = vadd.f32 %v3365_v16, %v9881_v54  ;;  %v9998_v36 = vadd.f32 %v3366_v27, %v9884_v1  ;;  %v13714_v1 = vld [vmem:[#allocation61_spill] sm:$0xff]  ;;  %v13718_v50 = vld [vmem:[#allocation64_spill] sm:$0xff]  ;;  %v10134_v4 = vmul.f32 0.11128076, %v9953_v18 }
 0x38e   :  { %13700 = vst [vmem:[#allocation46_spill] sm:$0xff] %v9980_v57  ;;  %13701 = vst [vmem:[#allocation47_spill] sm:$0xff] %v9983_v55  ;;  %v10000_v20 = vadd.f32 %v3367_v22, %v3307_v37  ;;  %v10002_v11 = vadd.f32 %v3368_v21, %v3308_v13  ;;  %v10004_v45 = vadd.f32 %v3369_v14, %v3309_v17  ;;  %v13715_v13 = vld [vmem:[#allocation62_spill] sm:$0xff]  ;;  %v13724_v38 = vld [vmem:[#allocation140_spill] sm:$0xff] }
 0x38f   :  { %13702 = vst [vmem:[#allocation48_spill] sm:$0xff] %v9986_v60  ;;  %13703 = vst [vmem:[#allocation49_spill] sm:$0xff] %v9989_v59  ;;  %v10006_v12 = vadd.f32 %v3370_v5, %v3310_v0  ;;  %v10008_v31 = vadd.f32 %v3371_v42, %v3311_v7  ;;  %v10012_v33 = vmul.f32 %v13712_v24, %v13712_v24  ;;  %v13716_v0 = vld [vmem:[#allocation63_spill] sm:$0xff]  ;;  %v3424_v52 = vmul.f32 0.036632847, %v13724_v38  ;;  %v13725_v39 = vld [vmem:[#allocation38_spill] sm:$0xff] }
 0x390   :  { %13704 = vst [vmem:[#allocation50_spill] sm:$0xff] %v9992_v56  ;;  %13705 = vst [vmem:[#allocation51_spill] sm:$0xff] %v9995_v49  ;;  %v10016_v54 = vmul.f32 %v13713_v23, %v13713_v23  ;;  %v10020_v37 = vmul.f32 %v13714_v1, %v13714_v1  ;;  %v10024_v17 = vmul.f32 %v13715_v13, %v13715_v13  ;;  %v3425_v8 = vmul.f32 0.036632847, %v13725_v39  ;;  %v13726_v26 = vld [vmem:[#allocation67_spill] sm:$0xff]  ;;  %v13728_v6 = vld [vmem:[#allocation114_spill] sm:$0xff] }
 0x391   :  { %13706 = vst [vmem:[#allocation52_spill] sm:$0xff] %v9998_v36  ;;  %13707 = vst [vmem:[#allocation14_spill] sm:$0xff] %v10000_v20  ;;  %v10028_v7 = vmul.f32 %v13716_v0, %v13716_v0  ;;  %v10032_v44 = vmul.f32 %v13718_v50, %v13718_v50  ;;  %v10036_v32 = vmul.f32 %v13720_v40, %v13720_v40  ;;  %v3426_v61 = vmul.f32 0.036632847, %v13728_v6  ;;  %v13729_v10 = vld [vmem:[#allocation115_spill] sm:$0xff]  ;;  %v13731_v28 = vld [vmem:[#allocation68_spill] sm:$0xff] }
 0x392   :  { %13708 = vst [vmem:[#allocation36_spill] sm:$0xff] %v10002_v11  ;;  %13709 = vst [vmem:[#allocation130_spill] sm:$0xff] %v10004_v45  ;;  %v10040_v43 = vmul.f32 %v13722_v29, %v13722_v29  ;;  %v10046_v51 = vmul.f32 %v13726_v26, %v13726_v26  ;;  %v3427_v41 = vmul.f32 0.036632847, %v13729_v10  ;;  %v13730_v15 = vld [vmem:[#allocation27_spill] sm:$0xff]  ;;  %v10053_v53 = vmul.f32 %v13731_v28, %v13731_v28  ;;  %v13733_v63 = vld [vmem:[#allocation108_spill] sm:$0xff] }
 0x393   :  { %13710 = vst [vmem:[#allocation131_spill] sm:$0xff] %v10006_v12  ;;  %13711 = vst [vmem:[#allocation53_spill] sm:$0xff] %v10008_v31  ;;  %v3428_v35 = vmul.f32 0.036632847, %v13730_v15  ;;  %v3429_v62 = vmul.f32 0.036632847, %v13733_v63 }
 0x394   :  { %13717 = vst [vmem:[#allocation137_spill] sm:$0xff] %v10028_v7  ;;  %13719 = vst [vmem:[#allocation133_spill] sm:$0xff] %v10032_v44  ;;  %v13734_v19 = vld [vmem:[#allocation15_spill] sm:$0xff]  ;;  %v13735_v16 = vld [vmem:[#allocation136_spill] sm:$0xff]  ;;  %v10081_v31 = vmul.f32 0.036632847, %v9839_v46 }
 0x395   :  { %13721 = vst [vmem:[#allocation80_spill] sm:$0xff] %v10036_v32  ;;  %13723 = vst [vmem:[#allocation150_spill] sm:$0xff] %v10040_v43  ;;  %v3430_v3 = vmul.f32 0.036632847, %v13734_v19  ;;  %v3431_v27 = vmul.f32 0.036632847, %v13735_v16 }
 0x396   :  { %13727 = vst [vmem:[#allocation17_spill] sm:$0xff] %v10046_v51  ;;  %13732 = vst [vmem:[#allocation54_spill] sm:$0xff] %v10053_v53  ;;  %v13736_v22 = vld [vmem:[#allocation69_spill] sm:$0xff]  ;;  %v13739_v42 = vld [vmem:[#allocation111_spill] sm:$0xff]  ;;  %v10084_v12 = vmul.f32 0.036632847, %v9953_v18 }
 0x397   :  { %v10060_v21 = vmul.f32 %v13736_v22, %v13736_v22  ;;  %v13738_v14 = vld [vmem:[#allocation37_spill] sm:$0xff]  ;;  %v3433_v24 = vmul.f32 0.036632847, %v13739_v42  ;;  %v13740_v23 = vld [vmem:[#allocation151_spill] sm:$0xff]  ;;  %v13741_v13 = vld [vmem:[#allocation70_spill] sm:$0xff]  ;;  %13750 = vst [vmem:[#allocation55_spill] sm:$0xff] %v10081_v31 }
 0x398   :  { %v3432_v5 = vmul.f32 0.036632847, %v13738_v14  ;;  %v3434_v1 = vmul.f32 0.036632847, %v13740_v23  ;;  %v10067_v0 = vmul.f32 %v13741_v13, %v13741_v13  ;;  %v13743_v50 = vld [vmem:[#allocation32_spill] sm:$0xff]  ;;  %v13744_v29 = vld [vmem:[#allocation35_spill] sm:$0xff] }
 0x399   :  { %13737 = vst [vmem:[#allocation142_spill] sm:$0xff] %v10060_v21  ;;  %v3435_v40 = vmul.f32 0.036632847, %v13743_v50  ;;  %v10071_v38 = vmul.f32 0.036632847, %v13744_v29  ;;  %v13746_v39 = vld [vmem:[#allocation13_spill] sm:$0xff] }
 0x39a   :  { %13742 = vst [vmem:[#allocation28_spill] sm:$0xff] %v10067_v0  ;;  %v10074_v26 = vmul.f32 0.036632847, %v13746_v39  ;;  %v13748_v28 = vld [vmem:[#allocation71_spill] sm:$0xff]  ;;  %13751 = vst [vmem:[#allocation56_spill] sm:$0xff] %v10084_v12  ;;  %v13752_v45 = vld [vmem:[#allocation72_spill] sm:$0xff] }
 0x39b   :  { %13745 = vst [vmem:[#allocation29_spill] sm:$0xff] %v10071_v38  ;;  %v10078_v22 = vmul.f32 %v13748_v28, %v13748_v28  ;;  %v3444_v13 = vmul.f32 0.11128076, %v13728_v6  ;;  %v10089_v11 = vmul.f32 %v13752_v45, %v13752_v45  ;;  %v10092_v20 = vmul.f32 0.036632847, %v10012_v33  ;;  %v13756_v49 = vld [vmem:[#allocation73_spill] sm:$0xff] }
 0x39c   :  { %13747 = vst [vmem:[#allocation30_spill] sm:$0xff] %v10074_v26  ;;  %v10095_v36 = vmul.f32 0.036632847, %v10016_v54  ;;  %v3445_v28 = vmul.f32 0.11128076, %v13729_v10  ;;  %v10100_v56 = vmul.f32 %v13756_v49, %v13756_v49  ;;  %v13760_v60 = vld [vmem:[#allocation74_spill] sm:$0xff] }
 0x39d   :  { %13749 = vst [vmem:[#allocation31_spill] sm:$0xff] %v10078_v22  ;;  %13753 = vst [vmem:[#allocation41_spill] sm:$0xff] %v10089_v11  ;;  %v10103_v59 = vmul.f32 0.036632847, %v10020_v37  ;;  %v10106_v6 = vmul.f32 0.036632847, %v10024_v17  ;;  %v10111_v55 = vmul.f32 %v13760_v60, %v13760_v60  ;;  %v3464_v47 = vadd.f32 %v3444_v13, %v3424_v52 }
 0x39e   :  { %13754 = vst [vmem:[#allocation33_spill] sm:$0xff] %v10092_v20  ;;  %13755 = vst [vmem:[#allocation34_spill] sm:$0xff] %v10095_v36  ;;  %v3446_v45 = vmul.f32 0.11128076, %v13730_v15  ;;  %v3447_v57 = vmul.f32 0.11128076, %v13733_v63  ;;  %v3465_v2 = vadd.f32 %v3445_v28, %v3425_v8 }
 0x39f   :  { %13757 = vst [vmem:[#allocation11_spill] sm:$0xff] %v10100_v56  ;;  %13758 = vst [vmem:[#allocation12_spill] sm:$0xff] %v10103_v59  ;;  %v3448_v10 = vmul.f32 0.11128076, %v13734_v19  ;;  %v3449_v9 = vmul.f32 0.11128076, %v13735_v16 }
 0x3a0   :  { %13759 = vst [vmem:[#allocation57_spill] sm:$0xff] %v10106_v6  ;;  %13761 = vst [vmem:[#allocation146_spill] sm:$0xff] %v10111_v55  ;;  %v3450_v49 = vmul.f32 0.11128076, %v13738_v14  ;;  %v3451_v25 = vmul.f32 0.11128076, %v13739_v42  ;;  %v3466_v52 = vadd.f32 %v3446_v45, %v3426_v61  ;;  %v3467_v8 = vadd.f32 %v3447_v57, %v3427_v41 }
 0x3a1   :  { %v10119_v48 = vmul.f32 0.11128076, %v13740_v23  ;;  %v10122_v58 = vmul.f32 0.11128076, %v13743_v50  ;;  %v10125_v60 = vmul.f32 0.11128076, %v13744_v29  ;;  %v3468_v0 = vadd.f32 %v3448_v10, %v3428_v35 }
 0x3a2   :  { %v10128_v30 = vmul.f32 0.11128076, %v13746_v39  ;;  %13766 = vst [vmem:[#allocation134_spill] sm:$0xff] %v10131_v34  ;;  %13767 = vst [vmem:[#allocation40_spill] sm:$0xff] %v10134_v4  ;;  %v10137_v55 = vmul.f32 0.11128076, %v10012_v33  ;;  %v3469_v21 = vadd.f32 %v3449_v9, %v3429_v62  ;;  %v3470_v53 = vadd.f32 %v3450_v49, %v3430_v3 }
 0x3a3   :  { %13762 = vst [vmem:[#allocation43_spill] sm:$0xff] %v10119_v48  ;;  %13763 = vst [vmem:[#allocation104_spill] sm:$0xff] %v10122_v58  ;;  %v10140_v13 = vmul.f32 0.11128076, %v10016_v54  ;;  %v10143_v56 = vmul.f32 0.11128076, %v10020_v37  ;;  %v3471_v61 = vadd.f32 %v3451_v25, %v3431_v27  ;;  %v3472_v45 = vadd.f32 %v10119_v48, %v3432_v5 }
 0x3a4   :  { %13764 = vst [vmem:[#allocation39_spill] sm:$0xff] %v10125_v60  ;;  %13765 = vst [vmem:[#allocation116_spill] sm:$0xff] %v10128_v30  ;;  %v10146_v11 = vmul.f32 0.11128076, %v10024_v17  ;;  %v10149_v28 = vmul.f32 0.11128076, %v10028_v7  ;;  %v3473_v51 = vadd.f32 %v10122_v58, %v3433_v24  ;;  %v3474_v43 = vadd.f32 %v10125_v60, %v3434_v1 }
 0x3a5   :  { %13768 = vst [vmem:[#allocation42_spill] sm:$0xff] %v10137_v55  ;;  %13769 = vst [vmem:[#allocation44_spill] sm:$0xff] %v10140_v13  ;;  %v10152_v22 = vmul.f32 0.11128076, %v10032_v44  ;;  %v3475_v32 = vadd.f32 %v10128_v30, %v3435_v40  ;;  %v3476_v57 = vadd.f32 %v10131_v34, %v10071_v38  ;;  %v3484_v41 = vmul.f32 0.21674532, %v13730_v15 }
 0x3a6   :  { %13770 = vst [vmem:[#allocation26_spill] sm:$0xff] %v10143_v56  ;;  %13771 = vst [vmem:[#allocation132_spill] sm:$0xff] %v10146_v11  ;;  %v3477_v44 = vadd.f32 %v10134_v4, %v10074_v26  ;;  %v3478_v9 = vadd.f32 %v10137_v55, %v10081_v31  ;;  %v3479_v25 = vadd.f32 %v10140_v13, %v10084_v12  ;;  %v3485_v35 = vmul.f32 0.21674532, %v13733_v63  ;;  %v13783_v13 = vld [vmem:[#allocation150_spill] sm:$0xff] }
 0x3a7   :  { %13772 = vst [vmem:[#allocation109_spill] sm:$0xff] %v10149_v28  ;;  %13773 = vst [vmem:[#allocation110_spill] sm:$0xff] %v10152_v22  ;;  %v3480_v62 = vadd.f32 %v10143_v56, %v10092_v20  ;;  %v3481_v3 = vadd.f32 %v10146_v11, %v10095_v36  ;;  %v3482_v15 = vadd.f32 %v10149_v28, %v10103_v59  ;;  %v3486_v27 = vmul.f32 0.21674532, %v13734_v19  ;;  %v13779_v28 = vld [vmem:[#allocation133_spill] sm:$0xff] }
 0x3a8   :  { %v3483_v5 = vadd.f32 %v10152_v22, %v10106_v6  ;;  %v3487_v24 = vmul.f32 0.21674532, %v13735_v16  ;;  %v10179_v1 = vmul.f32 0.21674532, %v13738_v14  ;;  %v10182_v63 = vmul.f32 0.21674532, %v13739_v42 }
 0x3a9   :  { %v10185_v40 = vmul.f32 0.21674532, %v13740_v23  ;;  %v10188_v10 = vmul.f32 0.21674532, %v13743_v50  ;;  %v10191_v49 = vmul.f32 0.21674532, %v13744_v29  ;;  %v3504_v59 = vadd.f32 %v3484_v41, %v3464_v47 }
 0x3aa   :  { %v10194_v6 = vmul.f32 0.21674532, %v13746_v39  ;;  %v10197_v36 = vmul.f32 0.21674532, %v9839_v46  ;;  %v10200_v20 = vmul.f32 0.21674532, %v9953_v18  ;;  %v3505_v12 = vadd.f32 %v3485_v35, %v3465_v2 }
 0x3ab   :  { %v10203_v31 = vmul.f32 0.21674532, %v10012_v33  ;;  %v10206_v26 = vmul.f32 0.21674532, %v10016_v54  ;;  %v10209_v38 = vmul.f32 0.21674532, %v10020_v37  ;;  %v3506_v47 = vadd.f32 %v3486_v27, %v3466_v52 }
 0x3ac   :  { %v10212_v41 = vmul.f32 0.21674532, %v10024_v17  ;;  %v10215_v22 = vmul.f32 0.21674532, %v10028_v7  ;;  %v10218_v11 = vmul.f32 0.21674532, %v13779_v28  ;;  %v3507_v2 = vadd.f32 %v3487_v24, %v3467_v8 }
 0x3ad   :  { %13774 = vst [vmem:[#allocation153_spill] sm:$0xff] %v10203_v31  ;;  %13775 = vst [vmem:[#allocation58_spill] sm:$0xff] %v10206_v26  ;;  %v13781_v35 = vld [vmem:[#allocation80_spill] sm:$0xff]  ;;  %v10224_v55 = vmul.f32 0.21674532, %v13783_v13  ;;  %v3508_v4 = vadd.f32 %v10179_v1, %v3468_v0  ;;  %v3509_v52 = vadd.f32 %v10182_v63, %v3469_v21  ;;  %v3510_v27 = vadd.f32 %v10185_v40, %v3470_v53 }
 0x3ae   :  { %13776 = vst [vmem:[#allocation59_spill] sm:$0xff] %v10209_v38  ;;  %13777 = vst [vmem:[#allocation60_spill] sm:$0xff] %v10212_v41  ;;  %v10221_v56 = vmul.f32 0.21674532, %v13781_v35  ;;  %v3511_v34 = vadd.f32 %v10188_v10, %v3471_v61  ;;  %v3512_v30 = vadd.f32 %v10191_v49, %v3472_v45  ;;  %v3513_v60 = vadd.f32 %v10194_v6, %v3473_v51 }
 0x3af   :  { %13778 = vst [vmem:[#allocation61_spill] sm:$0xff] %v10215_v22  ;;  %13780 = vst [vmem:[#allocation62_spill] sm:$0xff] %v10218_v11  ;;  %v3514_v8 = vadd.f32 %v10197_v36, %v3474_v43  ;;  %v3515_v24 = vadd.f32 %v10200_v20, %v3475_v32  ;;  %v3516_v58 = vadd.f32 %v10203_v31, %v3476_v57  ;;  %v3524_v48 = vmul.f32 0.27068216, %v13734_v19 }
 0x3b0   :  { %13782 = vst [vmem:[#allocation63_spill] sm:$0xff] %v10221_v56  ;;  %13784 = vst [vmem:[#allocation64_spill] sm:$0xff] %v10224_v55  ;;  %v3517_v0 = vadd.f32 %v10206_v26, %v3477_v44  ;;  %v3518_v21 = vadd.f32 %v10209_v38, %v3478_v9  ;;  %v3519_v53 = vadd.f32 %v10212_v41, %v3479_v25  ;;  %v3525_v61 = vmul.f32 0.27068216, %v13735_v16 }
 0x3b1   :  { %v3520_v45 = vadd.f32 %v10215_v22, %v3480_v62  ;;  %v3521_v51 = vadd.f32 %v10218_v11, %v3481_v3  ;;  %v3522_v43 = vadd.f32 %v10221_v56, %v3482_v15  ;;  %v3526_v32 = vmul.f32 0.27068216, %v13738_v14 }
 0x3b2   :  { %v3523_v57 = vadd.f32 %v10224_v55, %v3483_v5  ;;  %v3527_v19 = vmul.f32 0.27068216, %v13739_v42  ;;  %v3528_v44 = vmul.f32 0.27068216, %v13740_v23  ;;  %v3529_v9 = vmul.f32 0.27068216, %v13743_v50 }
 0x3b3   :  { %v3530_v25 = vmul.f32 0.27068216, %v13744_v29  ;;  %v3531_v16 = vmul.f32 0.27068216, %v13746_v39  ;;  %v3532_v62 = vmul.f32 0.27068216, %v9839_v46  ;;  %v3544_v22 = vadd.f32 %v3524_v48, %v3504_v59 }
 0x3b4   :  { %v3533_v3 = vmul.f32 0.27068216, %v9953_v18  ;;  %v3534_v15 = vmul.f32 0.27068216, %v10012_v33  ;;  %v3535_v14 = vmul.f32 0.27068216, %v10016_v54  ;;  %v3545_v5 = vadd.f32 %v3525_v61, %v3505_v12 }
 0x3b5   :  { %v3536_v42 = vmul.f32 0.27068216, %v10020_v37  ;;  %v3537_v23 = vmul.f32 0.27068216, %v10024_v17  ;;  %v3538_v50 = vmul.f32 0.27068216, %v10028_v7  ;;  %v3546_v55 = vadd.f32 %v3526_v32, %v3506_v47 }
 0x3b6   :  { %v3539_v29 = vmul.f32 0.27068216, %v13779_v28  ;;  %v3540_v39 = vmul.f32 0.27068216, %v13781_v35  ;;  %v3541_v46 = vmul.f32 0.27068216, %v13783_v13  ;;  %v3547_v48 = vadd.f32 %v3527_v19, %v3507_v2 }
 0x3b7   :  { %v13785_v18 = vld [vmem:[#allocation17_spill] sm:$0xff]  ;;  %v13786_v33 = vld [vmem:[#allocation54_spill] sm:$0xff]  ;;  %v3548_v54 = vadd.f32 %v3528_v44, %v3508_v4  ;;  %v3549_v12 = vadd.f32 %v3529_v9, %v3509_v52  ;;  %v3550_v61 = vadd.f32 %v3530_v25, %v3510_v27  ;;  %v3551_v37 = vadd.f32 %v3531_v16, %v3511_v34  ;;  %v13788_v27 = vld [vmem:[#allocation28_spill] sm:$0xff] }
 0x3b8   :  { %v3542_v59 = vmul.f32 0.27068216, %v13785_v18  ;;  %v3543_v56 = vmul.f32 0.27068216, %v13786_v33  ;;  %v3552_v11 = vadd.f32 %v3532_v62, %v3512_v30  ;;  %v3553_v17 = vadd.f32 %v3533_v3, %v3513_v60  ;;  %v13787_v4 = vld [vmem:[#allocation142_spill] sm:$0xff]  ;;  %v13793_v44 = vld [vmem:[#allocation61_spill] sm:$0xff] }
 0x3b9   :  { %v3554_v41 = vadd.f32 %v3534_v15, %v3514_v8  ;;  %v3555_v7 = vadd.f32 %v3535_v14, %v3515_v24  ;;  %v3556_v47 = vadd.f32 %v3536_v42, %v3516_v58  ;;  %v3557_v32 = vadd.f32 %v3537_v23, %v3517_v0  ;;  %v13795_v9 = vld [vmem:[#allocation63_spill] sm:$0xff]  ;;  %v13796_v25 = vld [vmem:[#allocation64_spill] sm:$0xff]  ;;  %v13798_v15 = vld [vmem:[#allocation150_spill] sm:$0xff] }
 0x3ba   :  { %v3558_v28 = vadd.f32 %v3538_v50, %v3518_v21  ;;  %v3559_v38 = vadd.f32 %v3539_v29, %v3519_v53  ;;  %v3560_v35 = vadd.f32 %v3540_v39, %v3520_v45  ;;  %v3561_v26 = vadd.f32 %v3541_v46, %v3521_v51  ;;  %v13789_v53 = vld [vmem:[#allocation153_spill] sm:$0xff]  ;;  %v13790_v51 = vld [vmem:[#allocation58_spill] sm:$0xff]  ;;  %v13797_v3 = vld [vmem:[#allocation80_spill] sm:$0xff] }
 0x3bb   :  { %v3562_v13 = vadd.f32 %v3542_v59, %v3522_v43  ;;  %v3563_v2 = vadd.f32 %v3543_v56, %v3523_v57  ;;  %v3564_v19 = vmul.f32 0.21674532, %v13785_v18  ;;  %v3565_v31 = vmul.f32 0.21674532, %v13786_v33  ;;  %v13791_v57 = vld [vmem:[#allocation59_spill] sm:$0xff]  ;;  %v13804_v46 = vld [vmem:[#allocation116_spill] sm:$0xff] }
 0x3bc   :  { %v3566_v52 = vmul.f32 0.21674532, %v13787_v4  ;;  %v3567_v34 = vmul.f32 0.21674532, %v13788_v27  ;;  %v3568_v30 = vadd.f32 %v3544_v22, %v10179_v1  ;;  %v3569_v60 = vadd.f32 %v3545_v5, %v10182_v63  ;;  %v13792_v1 = vld [vmem:[#allocation60_spill] sm:$0xff]  ;;  %v13799_v42 = vld [vmem:[#allocation43_spill] sm:$0xff] }
 0x3bd   :  { %v3570_v58 = vadd.f32 %v3546_v55, %v10185_v40  ;;  %v3571_v8 = vadd.f32 %v3547_v48, %v10188_v10  ;;  %v3572_v24 = vadd.f32 %v3548_v54, %v10191_v49  ;;  %v3573_v56 = vadd.f32 %v3549_v12, %v10194_v6  ;;  %v13794_v40 = vld [vmem:[#allocation62_spill] sm:$0xff]  ;;  %v13800_v50 = vld [vmem:[#allocation31_spill] sm:$0xff]  ;;  %v13806_v12 = vld [vmem:[#allocation40_spill] sm:$0xff] }
 0x3be   :  { %v3574_v0 = vadd.f32 %v3550_v61, %v10197_v36  ;;  %v3575_v21 = vadd.f32 %v3551_v37, %v10200_v20  ;;  %v3576_v45 = vadd.f32 %v3552_v11, %v13789_v53  ;;  %v3577_v43 = vadd.f32 %v3553_v17, %v13790_v51  ;;  %v13803_v29 = vld [vmem:[#allocation39_spill] sm:$0xff]  ;;  %v13805_v59 = vld [vmem:[#allocation134_spill] sm:$0xff] }
 0x3bf   :  { %v3578_v22 = vadd.f32 %v3554_v41, %v13791_v57  ;;  %v3579_v63 = vadd.f32 %v3555_v7, %v13792_v1  ;;  %v3580_v55 = vadd.f32 %v3556_v47, %v13793_v44  ;;  %v3581_v10 = vadd.f32 %v3557_v32, %v13794_v40  ;;  %v13807_v37 = vld [vmem:[#allocation42_spill] sm:$0xff]  ;;  %v13808_v47 = vld [vmem:[#allocation44_spill] sm:$0xff] }
 0x3c0   :  { %v3582_v49 = vadd.f32 %v3558_v28, %v13795_v9  ;;  %v3583_v6 = vadd.f32 %v3559_v38, %v13796_v25  ;;  %v3584_v16 = vadd.f32 %v3564_v19, %v3560_v35  ;;  %v3585_v36 = vadd.f32 %v3565_v31, %v3561_v26  ;;  %v13801_v35 = vld [vmem:[#allocation41_spill] sm:$0xff]  ;;  %v13802_v26 = vld [vmem:[#allocation104_spill] sm:$0xff]  ;;  %v13812_v51 = vld [vmem:[#allocation110_spill] sm:$0xff] }
 0x3c1   :  { %v3586_v62 = vadd.f32 %v3566_v52, %v3562_v13  ;;  %v3587_v20 = vadd.f32 %v3567_v34, %v3563_v2  ;;  %v3588_v11 = vmul.f32 0.11128076, %v13797_v3  ;;  %v3589_v14 = vmul.f32 0.11128076, %v13798_v15  ;;  %v13809_v2 = vld [vmem:[#allocation26_spill] sm:$0xff]  ;;  %v13810_v52 = vld [vmem:[#allocation132_spill] sm:$0xff] }
 0x3c2   :  { %v3590_v41 = vmul.f32 0.11128076, %v13785_v18  ;;  %v3591_v7 = vmul.f32 0.11128076, %v13786_v33  ;;  %v3592_v5 = vmul.f32 0.11128076, %v13787_v4  ;;  %v3596_v23 = vadd.f32 %v3568_v30, %v13799_v42 }
 0x3c3   :  { %v3593_v28 = vmul.f32 0.11128076, %v13788_v27  ;;  %v3594_v38 = vmul.f32 0.11128076, %v13800_v50  ;;  %v3595_v31 = vmul.f32 0.11128076, %v13801_v35  ;;  %v3597_v13 = vadd.f32 %v3569_v60, %v13802_v26 }
 0x3c4   :  { %v3598_v39 = vadd.f32 %v3570_v58, %v13803_v29  ;;  %v3599_v48 = vadd.f32 %v3571_v8, %v13804_v46  ;;  %v3600_v54 = vadd.f32 %v3572_v24, %v13805_v59  ;;  %v3601_v61 = vadd.f32 %v3573_v56, %v13806_v12  ;;  %v13811_v30 = vld [vmem:[#allocation109_spill] sm:$0xff] }
 0x3c5   :  { %v3602_v17 = vadd.f32 %v3574_v0, %v13807_v37  ;;  %v3603_v32 = vadd.f32 %v3575_v21, %v13808_v47  ;;  %v3604_v19 = vadd.f32 %v3576_v45, %v13809_v2  ;;  %v3605_v34 = vadd.f32 %v3577_v43, %v13810_v52  ;;  %v13813_v9 = vld [vmem:[#allocation137_spill] sm:$0xff] }
 0x3c6   :  { %v3606_v53 = vadd.f32 %v3578_v22, %v13811_v30  ;;  %v3607_v60 = vadd.f32 %v3579_v63, %v13812_v51  ;;  %v3608_v57 = vadd.f32 %v3588_v11, %v3580_v55  ;;  %v3609_v58 = vadd.f32 %v3589_v14, %v3581_v10  ;;  %v13814_v25 = vld [vmem:[#allocation133_spill] sm:$0xff]  ;;  %v13818_v11 = vld [vmem:[#allocation55_spill] sm:$0xff] }
 0x3c7   :  { %v3610_v1 = vadd.f32 %v3590_v41, %v3582_v49  ;;  %v3611_v8 = vadd.f32 %v3591_v7, %v3583_v6  ;;  %v3612_v44 = vadd.f32 %v3592_v5, %v3584_v16  ;;  %v3613_v24 = vadd.f32 %v3593_v28, %v3585_v36  ;;  %v13815_v42 = vld [vmem:[#allocation29_spill] sm:$0xff]  ;;  %v13816_v6 = vld [vmem:[#allocation30_spill] sm:$0xff]  ;;  %v13820_v41 = vld [vmem:[#allocation56_spill] sm:$0xff] }
 0x3c8   :  { %v3614_v40 = vadd.f32 %v3594_v38, %v3586_v62  ;;  %v3615_v56 = vadd.f32 %v3595_v31, %v3587_v20  ;;  %v3616_v0 = vmul.f32 0.036632847, %v13813_v9  ;;  %v3617_v21 = vmul.f32 0.036632847, %v13814_v25  ;;  %v13817_v20 = vld [vmem:[#allocation11_spill] sm:$0xff] }
 0x3c9   :  { %v3618_v45 = vmul.f32 0.036632847, %v13797_v3  ;;  %v3619_v43 = vmul.f32 0.036632847, %v13798_v15  ;;  %v3620_v22 = vmul.f32 0.036632847, %v13785_v18  ;;  %v10308_v63 = vadd.f32 %v3596_v23, %v13815_v42 }
 0x3ca   :  { %v3621_v55 = vmul.f32 0.036632847, %v13786_v33  ;;  %v3622_v10 = vmul.f32 0.036632847, %v13787_v4  ;;  %v3623_v49 = vmul.f32 0.036632847, %v13788_v27  ;;  %v10314_v16 = vadd.f32 %v3597_v13, %v13816_v6 }
 0x3cb   :  { %v3624_v36 = vmul.f32 0.036632847, %v13800_v50  ;;  %v3625_v62 = vmul.f32 0.036632847, %v13801_v35  ;;  %v3626_v3 = vmul.f32 0.036632847, %v13817_v20  ;;  %v10320_v18 = vadd.f32 %v3598_v39, %v13818_v11 }
 0x3cc   :  { %v13819_v15 = vld [vmem:[#allocation146_spill] sm:$0xff]  ;;  %v10324_v33 = vadd.f32 %v3599_v48, %v13820_v41  ;;  %v13822_v4 = vld [vmem:[#allocation33_spill] sm:$0xff]  ;;  %v13825_v23 = vld [vmem:[#allocation12_spill] sm:$0xff]  ;;  %v10338_v35 = vadd.f32 %v3616_v0, %v3604_v19  ;;  %v10340_v31 = vadd.f32 %v3617_v21, %v3605_v34  ;;  %v10342_v26 = vadd.f32 %v3618_v45, %v3606_v53 }
 0x3cd   :  { %v3627_v14 = vmul.f32 0.036632847, %v13819_v15  ;;  %v10327_v7 = vadd.f32 %v3600_v54, %v13822_v4  ;;  %v13823_v27 = vld [vmem:[#allocation34_spill] sm:$0xff]  ;;  %v10333_v28 = vadd.f32 %v3602_v17, %v13825_v23  ;;  %v13826_v50 = vld [vmem:[#allocation57_spill] sm:$0xff]  ;;  %v10344_v13 = vadd.f32 %v3619_v43, %v3607_v60  ;;  %v13839_v51 = vld [vmem:[#allocation83_spill] sm:$0xff] }
 0x3ce   :  { %13821 = vst [vmem:[#allocation65_spill] sm:$0xff] %v10324_v33  ;;  %v10330_v5 = vadd.f32 %v3601_v61, %v13823_v27  ;;  %v10336_v38 = vadd.f32 %v3603_v32, %v13826_v50  ;;  %13828 = vst [vmem:[#allocation38_spill] sm:$0xff] %v10340_v31  ;;  %v10346_v29 = vadd.f32 %v3620_v22, %v3608_v57  ;;  %v10363_v37 = vmul.f32 0.036632847, %v10308_v63  ;;  %v13837_v19 = vld [vmem:[#allocation82_spill] sm:$0xff]  ;;  %v13843_v9 = vld [vmem:[#allocation91_spill] sm:$0xff] }
 0x3cf   :  { %13829 = vst [vmem:[#allocation67_spill] sm:$0xff] %v10344_v13  ;;  %v10348_v39 = vadd.f32 %v3621_v55, %v3609_v58  ;;  %v10350_v46 = vadd.f32 %v3622_v10, %v3610_v1  ;;  %v10352_v48 = vadd.f32 %v3623_v49, %v3611_v8  ;;  %v10354_v59 = vadd.f32 %v3624_v36, %v3612_v44  ;;  %v13841_v8 = vld [vmem:[#allocation90_spill] sm:$0xff]  ;;  %v13847_v43 = vld [vmem:[#allocation92_spill] sm:$0xff] }
 0x3d0   :  { %13824 = vst [vmem:[#allocation66_spill] sm:$0xff] %v10330_v5  ;;  %13827 = vst [vmem:[#allocation140_spill] sm:$0xff] %v10336_v38  ;;  %v10356_v54 = vadd.f32 %v3625_v62, %v3613_v24  ;;  %v10358_v12 = vadd.f32 %v3626_v3, %v3614_v40  ;;  %v10360_v61 = vadd.f32 %v3627_v14, %v3615_v56  ;;  %v10366_v17 = vmul.f32 0.036632847, %v10314_v16 }
 0x3d1   :  { %13830 = vst [vmem:[#allocation114_spill] sm:$0xff] %v10348_v39  ;;  %13831 = vst [vmem:[#allocation115_spill] sm:$0xff] %v10350_v46  ;;  %v10369_v47 = vmul.f32 0.036632847, %v10320_v18  ;;  %v10372_v32 = vmul.f32 0.036632847, %v10324_v33  ;;  %v10379_v52 = vmul.f32 %v13837_v19, %v13837_v19  ;;  %v10392_v60 = vmul.f32 %v13839_v51, %v13839_v51 }
 0x3d2   :  { %13832 = vst [vmem:[#allocation27_spill] sm:$0xff] %v10352_v48  ;;  %13833 = vst [vmem:[#allocation68_spill] sm:$0xff] %v10354_v59  ;;  %v10375_v2 = vmul.f32 0.036632847, %v10327_v7  ;;  %v10382_v34 = vmul.f32 0.036632847, %v10330_v5  ;;  %v10405_v44 = vmul.f32 %v13841_v8, %v13841_v8  ;;  %v10418_v0 = vmul.f32 %v13843_v9, %v13843_v9 }
 0x3d3   :  { %13834 = vst [vmem:[#allocation108_spill] sm:$0xff] %v10356_v54  ;;  %13835 = vst [vmem:[#allocation15_spill] sm:$0xff] %v10358_v12  ;;  %v10385_v30 = vmul.f32 0.036632847, %v10333_v28  ;;  %v10388_v53 = vmul.f32 0.036632847, %v10336_v38  ;;  %v10431_v22 = vmul.f32 %v13847_v43, %v13847_v43 }
 0x3d4   :  { %13836 = vst [vmem:[#allocation136_spill] sm:$0xff] %v10360_v61  ;;  %13838 = vst [vmem:[#allocation69_spill] sm:$0xff] %v10379_v52  ;;  %v10395_v57 = vmul.f32 0.036632847, %v10338_v35  ;;  %v10398_v58 = vmul.f32 0.036632847, %v10340_v31 }
 0x3d5   :  { %13840 = vst [vmem:[#allocation37_spill] sm:$0xff] %v10392_v60  ;;  %v10401_v1 = vmul.f32 0.036632847, %v10342_v26  ;;  %13842 = vst [vmem:[#allocation111_spill] sm:$0xff] %v10405_v44  ;;  %v10408_v24 = vmul.f32 0.036632847, %v10344_v13 }
 0x3d6   :  { %v10411_v40 = vmul.f32 0.036632847, %v10346_v29  ;;  %v10414_v56 = vmul.f32 0.036632847, %v10348_v39  ;;  %13844 = vst [vmem:[#allocation151_spill] sm:$0xff] %v10418_v0  ;;  %13848 = vst [vmem:[#allocation35_spill] sm:$0xff] %v10431_v22 }
 0x3d7   :  { %v10421_v25 = vmul.f32 0.036632847, %v10350_v46  ;;  %v10424_v21 = vmul.f32 0.036632847, %v10352_v48  ;;  %v10427_v45 = vmul.f32 0.036632847, %v10354_v59 }
 0x3d8   :  { %v3668_v42 = vrot.slane %v10308_v63, 1  ;;  %v3669_v55 = vrot.slane %v10320_v18, 1  ;;  %v3670_v10 = vrot.slane %v10327_v7, 1  ;;  %v3671_v49 = vrot.slane %v10333_v28, 1  ;;  %v13852_v0 = vld [vmem:[#allocation93_spill] sm:$0xff] }
 0x3d9   :  { %13845 = vst [vmem:[#allocation70_spill] sm:$0xff] %v10424_v21  ;;  %13846 = vst [vmem:[#allocation32_spill] sm:$0xff] %v10427_v45  ;;  %v3672_v6 = vrot.slane %v10338_v35, 1  ;;  %v3673_v36 = vrot.slane %v10342_v26, 1  ;;  %v3674_v62 = vrot.slane %v10346_v29, 1  ;;  %v3675_v20 = vrot.slane %v10350_v46, 1 }
 0x3da   :  { %v3678_v3 = vrot.slane %v10314_v16, 1  ;;  %v3679_v11 = vrot.slane %v10324_v33, 1  ;;  %v3680_v15 = vrot.slane %v10330_v5, 1  ;;  %v3681_v14 = vrot.slane %v10336_v38, 1 }
 0x3db   :  { %v3676_v41 = vrot.slane %v10354_v59, 1  ;;  %v3682_v4 = vrot.slane %v10340_v31, 1  ;;  %v3683_v27 = vrot.slane %v10344_v13, 1  ;;  %v3684_v23 = vrot.slane %v10348_v39, 1 }
 0x3dc   :  { %v3677_v50 = vrot.slane %v10358_v12, 1  ;;  %v3685_v43 = vrot.slane %v10352_v48, 1  ;;  %v3686_v9 = vrot.slane %v10356_v54, 1  ;;  %v3687_v8 = vrot.slane %v10360_v61, 1 }
 0x3dd   :  { %v10454_v51 = vmul.f32 0.036632847, %v10356_v54  ;;  %v10457_v19 = vmul.f32 0.036632847, %v10358_v12  ;;  %v10460_v22 = vmul.f32 0.036632847, %v10360_v61  ;;  %v10464_v44 = vmul.f32 %v13852_v0, %v13852_v0 }
 0x3de   :  { %v3688_v52 = vsel %vm690_vm0, %v3668_v42, %v3678_v3  ;;  %v3689_v45 = vsel %vm690_vm0, %v3669_v55, %v3679_v11  ;;  %v3690_v21 = vsel %vm690_vm0, %v3670_v10, %v3680_v15  ;;  %v3694_v0 = vsel %vm690_vm0, %v3674_v62, %v3684_v23 }
 0x3df   :  { %13849 = vst [vmem:[#allocation13_spill] sm:$0xff] %v10454_v51  ;;  %13850 = vst [vmem:[#allocation71_spill] sm:$0xff] %v10457_v19  ;;  %v3691_v51 = vsel %vm690_vm0, %v3671_v49, %v3681_v14  ;;  %v3692_v19 = vsel %vm690_vm0, %v3672_v6, %v3682_v4  ;;  %v3695_v61 = vsel %vm690_vm0, %v3675_v20, %v3685_v43 }
 0x3e0   :  { %13851 = vst [vmem:[#allocation72_spill] sm:$0xff] %v10460_v22  ;;  %13853 = vst [vmem:[#allocation73_spill] sm:$0xff] %v10464_v44  ;;  %v3693_v22 = vsel %vm690_vm0, %v3673_v36, %v3683_v27  ;;  %v3698_v44 = vsel %vm690_vm0, %v3678_v3, %v3668_v42  ;;  %v3696_v54 = vsel %vm690_vm0, %v3676_v41, %v3686_v9  ;;  %v3708_v3 = vmul.f32 0.11128076, %v3688_v52 }
 0x3e1   :  { %v3697_v48 = vsel %vm690_vm0, %v3677_v50, %v3687_v8  ;;  %v3699_v39 = vsel %vm690_vm0, %v3679_v11, %v3669_v55  ;;  %v3700_v13 = vsel %vm690_vm0, %v3680_v15, %v3670_v10  ;;  %v3701_v31 = vsel %vm690_vm0, %v3681_v14, %v3671_v49 }
 0x3e2   :  { %v3702_v42 = vsel %vm690_vm0, %v3682_v4, %v3672_v6  ;;  %v3703_v38 = vsel %vm690_vm0, %v3683_v27, %v3673_v36  ;;  %v3704_v12 = vsel %vm690_vm0, %v3684_v23, %v3674_v62  ;;  %v3705_v5 = vsel %vm690_vm0, %v3685_v43, %v3675_v20  ;;  %v13855_v4 = vld [vmem:[#allocation94_spill] sm:$0xff] }
 0x3e3   :  { %v3709_v55 = vmul.f32 0.11128076, %v3698_v44  ;;  %v3706_v10 = vsel %vm690_vm0, %v3686_v9, %v3676_v41  ;;  %v3707_v49 = vsel %vm690_vm0, %v3687_v8, %v3677_v50  ;;  %v3710_v11 = vmul.f32 0.11128076, %v3689_v45  ;;  %v13857_v50 = vld [vmem:[#allocation66_spill] sm:$0xff] }
 0x3e4   :  { %v3711_v15 = vmul.f32 0.11128076, %v3699_v39  ;;  %v3712_v6 = vmul.f32 0.11128076, %v3690_v21  ;;  %v3713_v52 = vmul.f32 0.11128076, %v3700_v13  ;;  %v10508_v36 = vmul.f32 %v13855_v4, %v13855_v4 }
 0x3e5   :  { %v3714_v14 = vmul.f32 0.11128076, %v3691_v51  ;;  %v3715_v62 = vmul.f32 0.11128076, %v3701_v31  ;;  %v3716_v27 = vmul.f32 0.11128076, %v3692_v19  ;;  %v10511_v44 = vadd.f32 %v3708_v3, %v10363_v37 }
 0x3e6   :  { %13856 = vst [vmem:[#allocation74_spill] sm:$0xff] %v10508_v36  ;;  %v3717_v23 = vmul.f32 0.11128076, %v3702_v42  ;;  %v3718_v43 = vmul.f32 0.11128076, %v3693_v22  ;;  %v10514_v8 = vadd.f32 %v3709_v55, %v10366_v17  ;;  %v10517_v51 = vadd.f32 %v3710_v11, %v10369_v47  ;;  %v13858_v3 = vld [vmem:[#allocation15_spill] sm:$0xff] }
 0x3e7   :  { %v3719_v9 = vmul.f32 0.11128076, %v3703_v38  ;;  %v3720_v20 = vmul.f32 0.11128076, %v3694_v0  ;;  %v3721_v39 = vmul.f32 0.11128076, %v3704_v12  ;;  %v10520_v19 = vadd.f32 %v3711_v15, %v10372_v32 }
 0x3e8   :  { %v3722_v21 = vmul.f32 0.11128076, %v3695_v61  ;;  %v3723_v13 = vmul.f32 0.11128076, %v3705_v5  ;;  %v3724_v45 = vmul.f32 0.11128076, %v3696_v54  ;;  %v10523_v22 = vadd.f32 %v3712_v6, %v10375_v2 }
 0x3e9   :  { %v3725_v41 = vmul.f32 0.11128076, %v3706_v10  ;;  %v3726_v31 = vmul.f32 0.11128076, %v3697_v48  ;;  %v3727_v37 = vmul.f32 0.11128076, %v3707_v49  ;;  %v10526_v38 = vadd.f32 %v3713_v52, %v10382_v34 }
 0x3ea   :  { %v10529_v12 = vadd.f32 %v3714_v14, %v10385_v30  ;;  %v10532_v5 = vadd.f32 %v3715_v62, %v10388_v53  ;;  %v10535_v54 = vadd.f32 %v3716_v27, %v10395_v57  ;;  %v10538_v48 = vadd.f32 %v3717_v23, %v10398_v58  ;;  %v13859_v10 = vld [vmem:[#allocation140_spill] sm:$0xff]  ;;  %v13860_v11 = vld [vmem:[#allocation38_spill] sm:$0xff]  ;;  %v13861_v6 = vld [vmem:[#allocation67_spill] sm:$0xff] }
 0x3eb   :  { %v10541_v61 = vadd.f32 %v3718_v43, %v10401_v1  ;;  %v10544_v17 = vadd.f32 %v3719_v9, %v10408_v24  ;;  %v10547_v47 = vadd.f32 %v3720_v20, %v10411_v40  ;;  %v10550_v32 = vadd.f32 %v3721_v39, %v10414_v56  ;;  %v13862_v14 = vld [vmem:[#allocation114_spill] sm:$0xff]  ;;  %v13863_v27 = vld [vmem:[#allocation27_spill] sm:$0xff]  ;;  %v13864_v43 = vld [vmem:[#allocation108_spill] sm:$0xff] }
 0x3ec   :  { %v10553_v2 = vadd.f32 %v3722_v21, %v10421_v25  ;;  %v3748_v34 = vrot.slane %v10308_v63, 2  ;;  %v3749_v30 = vrot.slane %v10320_v18, 2  ;;  %v3750_v53 = vrot.slane %v10327_v7, 2  ;;  %v13865_v20 = vld [vmem:[#allocation136_spill] sm:$0xff]  ;;  %v13866_v21 = vld [vmem:[#allocation70_spill] sm:$0xff] }
 0x3ed   :  { %v3751_v57 = vrot.slane %v10333_v28, 2  ;;  %v3752_v58 = vrot.slane %v10338_v35, 2  ;;  %v3753_v1 = vrot.slane %v10342_v26, 2  ;;  %v3754_v24 = vrot.slane %v10346_v29, 2  ;;  %v13867_v36 = vld [vmem:[#allocation32_spill] sm:$0xff] }
 0x3ee   :  { %v3755_v40 = vrot.slane %v10350_v46, 2  ;;  %v3756_v56 = vrot.slane %v10354_v59, 2  ;;  %v3758_v0 = vrot.slane %v10314_v16, 2  ;;  %v3759_v25 = vrot.slane %v10324_v33, 2 }
 0x3ef   :  { %v3760_v42 = vrot.slane %v13857_v50, 2  ;;  %v3757_v55 = vrot.slane %v13858_v3, 2  ;;  %v3761_v49 = vrot.slane %v13859_v10, 2  ;;  %v3762_v15 = vrot.slane %v13860_v11, 2  ;;  %v13869_v3 = vld [vmem:[#allocation13_spill] sm:$0xff]  ;;  %v13871_v10 = vld [vmem:[#allocation71_spill] sm:$0xff] }
 0x3f0   :  { %v3763_v52 = vrot.slane %v13861_v6, 2  ;;  %v3764_v62 = vrot.slane %v13862_v14, 2  ;;  %v3765_v23 = vrot.slane %v13863_v27, 2  ;;  %v3766_v9 = vrot.slane %v13864_v43, 2  ;;  %v13873_v6 = vld [vmem:[#allocation72_spill] sm:$0xff] }
 0x3f1   :  { %v3767_v39 = vrot.slane %v13865_v20, 2  ;;  %v3743_v4 = vadd.f32 %v3723_v13, %v13866_v21  ;;  %v10577_v50 = vadd.f32 %v3724_v45, %v13867_v36  ;;  %v10580_v59 = vadd.f32 %v3725_v41, %v13869_v3 }
 0x3f2   :  { %v10583_v11 = vadd.f32 %v3726_v31, %v13871_v10  ;;  %v10586_v33 = vadd.f32 %v3727_v37, %v13873_v6  ;;  %v3768_v27 = vsel %vm771_vm1, %v3748_v34, %v3758_v0  ;;  %v3769_v20 = vsel %vm771_vm1, %v3749_v30, %v3759_v25 }
 0x3f3   :  { %13868 = vst [vmem:[#allocation17_spill] sm:$0xff] %v10577_v50  ;;  %13870 = vst [vmem:[#allocation54_spill] sm:$0xff] %v10580_v59  ;;  %v3770_v13 = vsel %vm771_vm1, %v3750_v53, %v3760_v42  ;;  %v3771_v36 = vsel %vm771_vm1, %v3751_v57, %v3761_v49  ;;  %v3772_v45 = vsel %vm771_vm1, %v3752_v58, %v3762_v15 }
 0x3f4   :  { %13872 = vst [vmem:[#allocation142_spill] sm:$0xff] %v10583_v11  ;;  %13874 = vst [vmem:[#allocation28_spill] sm:$0xff] %v10586_v33  ;;  %v3773_v41 = vsel %vm771_vm1, %v3753_v1, %v3763_v52  ;;  %v3778_v31 = vsel %vm771_vm1, %v3758_v0, %v3748_v34  ;;  %v3774_v37 = vsel %vm771_vm1, %v3754_v24, %v3764_v62  ;;  %v3788_v0 = vmul.f32 0.21674532, %v3768_v27 }
 0x3f5   :  { %v3775_v3 = vsel %vm771_vm1, %v3755_v40, %v3765_v23  ;;  %v3776_v10 = vsel %vm771_vm1, %v3756_v56, %v3766_v9  ;;  %v3777_v6 = vsel %vm771_vm1, %v3757_v55, %v3767_v39  ;;  %v3779_v21 = vsel %vm771_vm1, %v3759_v25, %v3749_v30 }
 0x3f6   :  { %v3780_v33 = vsel %vm771_vm1, %v3760_v42, %v3750_v53  ;;  %v3781_v34 = vsel %vm771_vm1, %v3761_v49, %v3751_v57  ;;  %v3782_v11 = vsel %vm771_vm1, %v3762_v15, %v3752_v58  ;;  %v3783_v59 = vsel %vm771_vm1, %v3763_v52, %v3753_v1  ;;  %v13875_v15 = vld [vmem:[#allocation95_spill] sm:$0xff] }
 0x3f7   :  { %v3784_v50 = vsel %vm771_vm1, %v3764_v62, %v3754_v24  ;;  %v3789_v43 = vmul.f32 0.21674532, %v3778_v31  ;;  %v3785_v30 = vsel %vm771_vm1, %v3765_v23, %v3755_v40  ;;  %v3786_v53 = vsel %vm771_vm1, %v3766_v9, %v3756_v56 }
 0x3f8   :  { %v3787_v57 = vsel %vm771_vm1, %v3767_v39, %v3757_v55  ;;  %v3790_v25 = vmul.f32 0.21674532, %v3769_v20  ;;  %v3791_v42 = vmul.f32 0.21674532, %v3779_v21  ;;  %v3792_v49 = vmul.f32 0.21674532, %v3770_v13 }
 0x3f9   :  { %v3793_v58 = vmul.f32 0.21674532, %v3780_v33  ;;  %v10630_v1 = vmul.f32 %v13875_v15, %v13875_v15  ;;  %v3794_v52 = vmul.f32 0.21674532, %v3771_v36  ;;  %v3795_v24 = vmul.f32 0.21674532, %v3781_v34 }
 0x3fa   :  { %v3796_v62 = vmul.f32 0.21674532, %v3772_v45  ;;  %v10633_v27 = vadd.f32 %v3788_v0, %v10511_v44  ;;  %v3797_v40 = vmul.f32 0.21674532, %v3782_v11  ;;  %v3798_v23 = vmul.f32 0.21674532, %v3773_v41 }
 0x3fb   :  { %13876 = vst [vmem:[#allocation153_spill] sm:$0xff] %v10630_v1  ;;  %v3799_v56 = vmul.f32 0.21674532, %v3783_v59  ;;  %v10636_v9 = vadd.f32 %v3789_v43, %v10514_v8  ;;  %v3800_v55 = vmul.f32 0.21674532, %v3774_v37  ;;  %v10639_v33 = vadd.f32 %v3790_v25, %v10517_v51  ;;  %v13879_v0 = vld [vmem:[#allocation66_spill] sm:$0xff] }
 0x3fc   :  { %v3801_v20 = vmul.f32 0.21674532, %v3784_v50  ;;  %v3802_v39 = vmul.f32 0.21674532, %v3775_v3  ;;  %v3803_v13 = vmul.f32 0.21674532, %v3785_v30  ;;  %v10642_v45 = vadd.f32 %v3791_v42, %v10520_v19 }
 0x3fd   :  { %v3804_v31 = vmul.f32 0.21674532, %v3776_v10  ;;  %v3805_v36 = vmul.f32 0.21674532, %v3786_v53  ;;  %v3806_v44 = vmul.f32 0.21674532, %v3777_v6  ;;  %v10645_v11 = vadd.f32 %v3792_v49, %v10523_v22 }
 0x3fe   :  { %v3807_v21 = vmul.f32 0.21674532, %v3787_v57  ;;  %v10648_v59 = vadd.f32 %v3793_v58, %v10526_v38  ;;  %v10651_v8 = vadd.f32 %v3794_v52, %v10529_v12  ;;  %v10654_v51 = vadd.f32 %v3795_v24, %v10532_v5  ;;  %v13878_v6 = vld [vmem:[#allocation68_spill] sm:$0xff]  ;;  %v13881_v25 = vld [vmem:[#allocation38_spill] sm:$0xff]  ;;  %v13882_v49 = vld [vmem:[#allocation67_spill] sm:$0xff] }
 0x3ff   :  { %v10657_v50 = vadd.f32 %v3796_v62, %v10535_v54  ;;  %v10660_v19 = vadd.f32 %v3797_v40, %v10538_v48  ;;  %v10663_v43 = vadd.f32 %v3798_v23, %v10541_v61  ;;  %v10666_v22 = vadd.f32 %v3799_v56, %v10544_v17  ;;  %v13880_v53 = vld [vmem:[#allocation140_spill] sm:$0xff]  ;;  %v13883_v24 = vld [vmem:[#allocation27_spill] sm:$0xff]  ;;  %v13885_v56 = vld [vmem:[#allocation17_spill] sm:$0xff] }
 0x400   :  { %v10669_v38 = vadd.f32 %v3800_v55, %v10547_v47  ;;  %v10672_v12 = vadd.f32 %v3801_v20, %v10550_v32  ;;  %v10675_v5 = vadd.f32 %v3802_v39, %v10553_v2  ;;  %v10677_v54 = vadd.f32 %v3803_v13, %v3743_v4  ;;  %v13877_v4 = vld [vmem:[#allocation65_spill] sm:$0xff]  ;;  %v13884_v40 = vld [vmem:[#allocation108_spill] sm:$0xff]  ;;  %v13886_v20 = vld [vmem:[#allocation54_spill] sm:$0xff] }
 0x401   :  { %v3828_v48 = vrot.slane %v10308_v63, 3  ;;  %v3829_v41 = vrot.slane %v10320_v18, 3  ;;  %v3830_v61 = vrot.slane %v10327_v7, 3  ;;  %v3831_v17 = vrot.slane %v10333_v28, 3  ;;  %v13888_v13 = vld [vmem:[#allocation15_spill] sm:$0xff]  ;;  %v13889_v1 = vld [vmem:[#allocation136_spill] sm:$0xff] }
 0x402   :  { %v3832_v37 = vrot.slane %v10338_v35, 3  ;;  %v3833_v47 = vrot.slane %v10342_v26, 3  ;;  %v3834_v32 = vrot.slane %v10346_v29, 3  ;;  %v3835_v3 = vrot.slane %v10350_v46, 3  ;;  %v13890_v46 = vld [vmem:[#allocation142_spill] sm:$0xff] }
 0x403   :  { %v3838_v2 = vrot.slane %v10314_v16, 3  ;;  %v3839_v10 = vrot.slane %v13877_v4, 3  ;;  %v3836_v34 = vrot.slane %v13878_v6, 3  ;;  %v3840_v30 = vrot.slane %v13879_v0, 3 }
 0x404   :  { %v3841_v57 = vrot.slane %v13880_v53, 3  ;;  %v3842_v42 = vrot.slane %v13881_v25, 3  ;;  %v3843_v58 = vrot.slane %v13882_v49, 3  ;;  %v3844_v52 = vrot.slane %v13862_v14, 3  ;;  %v13892_v49 = vld [vmem:[#allocation28_spill] sm:$0xff] }
 0x405   :  { %v3845_v62 = vrot.slane %v13883_v24, 3  ;;  %v3846_v23 = vrot.slane %v13884_v40, 3  ;;  %v10698_v55 = vadd.f32 %v3804_v31, %v13885_v56  ;;  %v10701_v39 = vadd.f32 %v3805_v36, %v13886_v20 }
 0x406   :  { %v3837_v15 = vrot.slane %v13888_v13, 3  ;;  %v3847_v6 = vrot.slane %v13889_v1, 3  ;;  %v10706_v25 = vadd.f32 %v3806_v44, %v13890_v46  ;;  %v10709_v53 = vadd.f32 %v3807_v21, %v13892_v49 }
 0x407   :  { %13887 = vst [vmem:[#allocation58_spill] sm:$0xff] %v10701_v39  ;;  %v3848_v24 = vsel %vm852_vm2, %v3828_v48, %v3838_v2  ;;  %v3849_v31 = vsel %vm852_vm2, %v3829_v41, %v3839_v10  ;;  %v3850_v36 = vsel %vm852_vm2, %v3830_v61, %v3840_v30  ;;  %v3851_v56 = vsel %vm852_vm2, %v3831_v17, %v3841_v57 }
 0x408   :  { %13891 = vst [vmem:[#allocation59_spill] sm:$0xff] %v10706_v25  ;;  %13893 = vst [vmem:[#allocation60_spill] sm:$0xff] %v10709_v53  ;;  %v3852_v20 = vsel %vm852_vm2, %v3832_v37, %v3842_v42  ;;  %v3858_v46 = vsel %vm852_vm2, %v3838_v2, %v3828_v48  ;;  %v3853_v44 = vsel %vm852_vm2, %v3833_v47, %v3843_v58  ;;  %v3868_v2 = vmul.f32 0.27068216, %v3848_v24 }
 0x409   :  { %v3854_v21 = vsel %vm852_vm2, %v3834_v32, %v3844_v52  ;;  %v3855_v49 = vsel %vm852_vm2, %v3835_v3, %v3845_v62  ;;  %v3856_v53 = vsel %vm852_vm2, %v3836_v34, %v3846_v23  ;;  %v3857_v25 = vsel %vm852_vm2, %v3837_v15, %v3847_v6 }
 0x40a   :  { %v3859_v39 = vsel %vm852_vm2, %v3839_v10, %v3829_v41  ;;  %v3860_v48 = vsel %vm852_vm2, %v3840_v30, %v3830_v61  ;;  %v3861_v1 = vsel %vm852_vm2, %v3841_v57, %v3831_v17  ;;  %v3862_v40 = vsel %vm852_vm2, %v3842_v42, %v3832_v37  ;;  %v13894_v37 = vld [vmem:[#allocation76_spill] sm:$0xff] }
 0x40b   :  { %v3863_v13 = vsel %vm852_vm2, %v3843_v58, %v3833_v47  ;;  %v3869_v14 = vmul.f32 0.27068216, %v3858_v46  ;;  %v3864_v0 = vsel %vm852_vm2, %v3844_v52, %v3834_v32  ;;  %v3865_v41 = vsel %vm852_vm2, %v3845_v62, %v3835_v3 }
 0x40c   :  { %v3866_v61 = vsel %vm852_vm2, %v3846_v23, %v3836_v34  ;;  %v3870_v10 = vmul.f32 0.27068216, %v3849_v31  ;;  %v3867_v17 = vsel %vm852_vm2, %v3847_v6, %v3837_v15  ;;  %v3871_v30 = vmul.f32 0.27068216, %v3859_v39 }
 0x40d   :  { %v3872_v57 = vmul.f32 0.27068216, %v3850_v36  ;;  %v10753_v42 = vmul.f32 %v13894_v37, %v13894_v37  ;;  %v3873_v47 = vmul.f32 0.27068216, %v3860_v48  ;;  %v3874_v58 = vmul.f32 0.27068216, %v3851_v56 }
 0x40e   :  { %v3875_v24 = vmul.f32 0.27068216, %v3861_v1  ;;  %v10756_v32 = vadd.f32 %v3868_v2, %v10633_v27  ;;  %v3876_v3 = vmul.f32 0.27068216, %v3852_v20  ;;  %v3877_v52 = vmul.f32 0.27068216, %v3862_v40 }
 0x40f   :  { %13895 = vst [vmem:[#allocation61_spill] sm:$0xff] %v10753_v42  ;;  %v3878_v62 = vmul.f32 0.27068216, %v3853_v44  ;;  %v10759_v34 = vadd.f32 %v3869_v14, %v10636_v9  ;;  %v3879_v23 = vmul.f32 0.27068216, %v3863_v13  ;;  %v10762_v39 = vadd.f32 %v3870_v10, %v10639_v33  ;;  %v13900_v2 = vld [vmem:[#allocation38_spill] sm:$0xff] }
 0x410   :  { %v3880_v15 = vmul.f32 0.27068216, %v3854_v21  ;;  %v3881_v6 = vmul.f32 0.27068216, %v3864_v0  ;;  %v3882_v31 = vmul.f32 0.27068216, %v3855_v49  ;;  %v10765_v1 = vadd.f32 %v3871_v30, %v10642_v45 }
 0x411   :  { %v3883_v36 = vmul.f32 0.27068216, %v3865_v41  ;;  %v3884_v46 = vmul.f32 0.27068216, %v3856_v53  ;;  %v3885_v27 = vmul.f32 0.27068216, %v3866_v61  ;;  %v10768_v40 = vadd.f32 %v3872_v57, %v10645_v11 }
 0x412   :  { %v3886_v56 = vmul.f32 0.27068216, %v3857_v25  ;;  %v3887_v20 = vmul.f32 0.27068216, %v3867_v17  ;;  %v10771_v14 = vadd.f32 %v3873_v47, %v10648_v59  ;;  %v10774_v9 = vadd.f32 %v3874_v58, %v10651_v8  ;;  %v13899_v49 = vld [vmem:[#allocation140_spill] sm:$0xff]  ;;  %v13901_v61 = vld [vmem:[#allocation115_spill] sm:$0xff] }
 0x413   :  { %v10777_v33 = vadd.f32 %v3875_v24, %v10654_v51  ;;  %v10780_v0 = vadd.f32 %v3876_v3, %v10657_v50  ;;  %v10783_v45 = vadd.f32 %v3877_v52, %v10660_v19  ;;  %v10786_v53 = vadd.f32 %v3878_v62, %v10663_v43  ;;  %v13902_v17 = vld [vmem:[#allocation67_spill] sm:$0xff]  ;;  %v13903_v57 = vld [vmem:[#allocation114_spill] sm:$0xff]  ;;  %v13905_v3 = vld [vmem:[#allocation68_spill] sm:$0xff] }
 0x414   :  { %v10789_v11 = vadd.f32 %v3879_v23, %v10666_v22  ;;  %v10792_v59 = vadd.f32 %v3880_v15, %v10669_v38  ;;  %v10795_v8 = vadd.f32 %v3881_v6, %v10672_v12  ;;  %v10798_v51 = vadd.f32 %v3882_v31, %v10675_v5  ;;  %v13904_v58 = vld [vmem:[#allocation27_spill] sm:$0xff]  ;;  %v13907_v15 = vld [vmem:[#allocation108_spill] sm:$0xff] }
 0x415   :  { %v10801_v50 = vadd.f32 %v3883_v36, %v10677_v54  ;;  %v10804_v19 = vadd.f32 %v3884_v46, %v10698_v55  ;;  %v3908_v43 = vrot.slane %v10308_v63, 4  ;;  %v3909_v22 = vrot.slane %v10320_v18, 4  ;;  %v13898_v55 = vld [vmem:[#allocation66_spill] sm:$0xff]  ;;  %v13906_v62 = vld [vmem:[#allocation15_spill] sm:$0xff]  ;;  %v13908_v31 = vld [vmem:[#allocation136_spill] sm:$0xff] }
 0x416   :  { %v3910_v25 = vrot.slane %v10327_v7, 4  ;;  %v3911_v38 = vrot.slane %v10333_v28, 4  ;;  %v3912_v12 = vrot.slane %v10338_v35, 4  ;;  %v3913_v13 = vrot.slane %v10342_v26, 4  ;;  %v13909_v46 = vld [vmem:[#allocation58_spill] sm:$0xff]  ;;  %v13911_v42 = vld [vmem:[#allocation59_spill] sm:$0xff] }
 0x417   :  { %13896 = vst [vmem:[#allocation62_spill] sm:$0xff] %v10801_v50  ;;  %13897 = vst [vmem:[#allocation63_spill] sm:$0xff] %v10804_v19  ;;  %v3914_v5 = vrot.slane %v10346_v29, 4  ;;  %v3918_v54 = vrot.slane %v10314_v16, 4  ;;  %v3919_v44 = vrot.slane %v13877_v4, 4  ;;  %v3920_v21 = vrot.slane %v13898_v55, 4 }
 0x418   :  { %v3921_v48 = vrot.slane %v13899_v49, 4  ;;  %v3922_v41 = vrot.slane %v13900_v2, 4  ;;  %v3915_v10 = vrot.slane %v13901_v61, 4  ;;  %v3923_v30 = vrot.slane %v13902_v17, 4  ;;  %v13913_v50 = vld [vmem:[#allocation60_spill] sm:$0xff] }
 0x419   :  { %v3924_v47 = vrot.slane %v13903_v57, 4  ;;  %v3925_v24 = vrot.slane %v13904_v58, 4  ;;  %v3916_v52 = vrot.slane %v13905_v3, 4  ;;  %v3917_v23 = vrot.slane %v13906_v62, 4 }
 0x41a   :  { %v3926_v6 = vrot.slane %v13907_v15, 4  ;;  %v3927_v36 = vrot.slane %v13908_v31, 4  ;;  %v10827_v37 = vadd.f32 %v3885_v27, %v13909_v46  ;;  %v10830_v19 = vadd.f32 %v3886_v56, %v13911_v42 }
 0x41b   :  { %v10833_v17 = vadd.f32 %v3887_v20, %v13913_v50  ;;  %v3928_v58 = vsel %vm933_vm3, %v3908_v43, %v3918_v54  ;;  %v3929_v57 = vsel %vm933_vm3, %v3909_v22, %v3919_v44  ;;  %v3930_v15 = vsel %vm933_vm3, %v3910_v25, %v3920_v21 }
 0x41c   :  { %13910 = vst [vmem:[#allocation64_spill] sm:$0xff] %v10827_v37  ;;  %13912 = vst [vmem:[#allocation80_spill] sm:$0xff] %v10830_v19  ;;  %v3931_v31 = vsel %vm933_vm3, %v3911_v38, %v3921_v48  ;;  %v3932_v27 = vsel %vm933_vm3, %v3912_v12, %v3922_v41  ;;  %v3933_v42 = vsel %vm933_vm3, %v3913_v13, %v3923_v30 }
 0x41d   :  { %13914 = vst [vmem:[#allocation150_spill] sm:$0xff] %v10833_v17  ;;  %v3934_v56 = vsel %vm933_vm3, %v3914_v5, %v3924_v47  ;;  %v3935_v20 = vsel %vm933_vm3, %v3915_v10, %v3925_v24  ;;  %v3938_v50 = vsel %vm933_vm3, %v3918_v54, %v3908_v43  ;;  %v3936_v46 = vsel %vm933_vm3, %v3916_v52, %v3926_v6 }
 0x41e   :  { %v3937_v17 = vsel %vm933_vm3, %v3917_v23, %v3927_v36  ;;  %v3939_v19 = vsel %vm933_vm3, %v3919_v44, %v3909_v22  ;;  %v3940_v37 = vsel %vm933_vm3, %v3920_v21, %v3910_v25  ;;  %v3941_v2 = vsel %vm933_vm3, %v3921_v48, %v3911_v38 }
 0x41f   :  { %v3942_v49 = vsel %vm933_vm3, %v3922_v41, %v3912_v12  ;;  %v3943_v43 = vsel %vm933_vm3, %v3923_v30, %v3913_v13  ;;  %v3948_v54 = vmul.f32 0.21674532, %v3928_v58  ;;  %v3944_v62 = vsel %vm933_vm3, %v3924_v47, %v3914_v5  ;;  %v13915_v12 = vld [vmem:[#allocation98_spill] sm:$0xff]  ;;  %v13917_v5 = vld [vmem:[#allocation100_spill] sm:$0xff] }
 0x420   :  { %v3945_v55 = vsel %vm933_vm3, %v3925_v24, %v3915_v10  ;;  %v3946_v22 = vsel %vm933_vm3, %v3926_v6, %v3916_v52  ;;  %v3949_v25 = vmul.f32 0.21674532, %v3938_v50  ;;  %v3947_v38 = vsel %vm933_vm3, %v3927_v36, %v3917_v23 }
 0x421   :  { %v3950_v44 = vmul.f32 0.21674532, %v3929_v57  ;;  %v3951_v21 = vmul.f32 0.21674532, %v3939_v19  ;;  %v10877_v48 = vmul.f32 %v13915_v12, %v13915_v12  ;;  %v3952_v13 = vmul.f32 0.21674532, %v3930_v15 }
 0x422   :  { %v3953_v41 = vmul.f32 0.21674532, %v3940_v37  ;;  %v3954_v30 = vmul.f32 0.21674532, %v3931_v31  ;;  %v10881_v47 = vmul.f32 %v13917_v5, %v13917_v5  ;;  %v3955_v10 = vmul.f32 0.21674532, %v3941_v2 }
 0x423   :  { %13916 = vst [vmem:[#allocation43_spill] sm:$0xff] %v10877_v48  ;;  %v3956_v58 = vmul.f32 0.21674532, %v3932_v27  ;;  %v3957_v24 = vmul.f32 0.21674532, %v3942_v49  ;;  %v10884_v52 = vadd.f32 %v3948_v54, %v10756_v32  ;;  %v10887_v6 = vadd.f32 %v3949_v25, %v10759_v34  ;;  %v13928_v12 = vld [vmem:[#allocation62_spill] sm:$0xff] }
 0x424   :  { %13918 = vst [vmem:[#allocation31_spill] sm:$0xff] %v10881_v47  ;;  %v3958_v23 = vmul.f32 0.21674532, %v3933_v42  ;;  %v3959_v57 = vmul.f32 0.21674532, %v3943_v43  ;;  %v10890_v31 = vadd.f32 %v3950_v44, %v10762_v39  ;;  %v10893_v49 = vadd.f32 %v3951_v21, %v10765_v1  ;;  %v13919_v43 = vld [vmem:[#allocation66_spill] sm:$0xff] }
 0x425   :  { %v3960_v19 = vmul.f32 0.21674532, %v3934_v56  ;;  %v3961_v36 = vmul.f32 0.21674532, %v3944_v62  ;;  %v3962_v15 = vmul.f32 0.21674532, %v3935_v20  ;;  %v10896_v27 = vadd.f32 %v3952_v13, %v10768_v40 }
 0x426   :  { %v3963_v37 = vmul.f32 0.21674532, %v3945_v55  ;;  %v3964_v50 = vmul.f32 0.21674532, %v3936_v46  ;;  %v3965_v5 = vmul.f32 0.21674532, %v3946_v22  ;;  %v10899_v42 = vadd.f32 %v3953_v41, %v10771_v14 }
 0x427   :  { %v3966_v2 = vmul.f32 0.21674532, %v3937_v17  ;;  %v3967_v32 = vmul.f32 0.21674532, %v3947_v38  ;;  %v10902_v34 = vadd.f32 %v3954_v30, %v10774_v9  ;;  %v10905_v55 = vadd.f32 %v3955_v10, %v10777_v33  ;;  %v13920_v22 = vld [vmem:[#allocation15_spill] sm:$0xff]  ;;  %v13921_v38 = vld [vmem:[#allocation140_spill] sm:$0xff] }
 0x428   :  { %v10908_v39 = vadd.f32 %v3956_v58, %v10780_v0  ;;  %v10911_v17 = vadd.f32 %v3957_v24, %v10783_v45  ;;  %v10914_v1 = vadd.f32 %v3958_v23, %v10786_v53  ;;  %v10917_v40 = vadd.f32 %v3959_v57, %v10789_v11  ;;  %v13922_v21 = vld [vmem:[#allocation38_spill] sm:$0xff]  ;;  %v13923_v41 = vld [vmem:[#allocation67_spill] sm:$0xff]  ;;  %v13926_v57 = vld [vmem:[#allocation108_spill] sm:$0xff] }
 0x429   :  { %v10920_v14 = vadd.f32 %v3960_v19, %v10792_v59  ;;  %v10923_v9 = vadd.f32 %v3961_v36, %v10795_v8  ;;  %v10926_v33 = vadd.f32 %v3962_v15, %v10798_v51  ;;  %v3988_v0 = vrot.slane %v10308_v63, 5  ;;  %v13924_v10 = vld [vmem:[#allocation114_spill] sm:$0xff]  ;;  %v13925_v24 = vld [vmem:[#allocation27_spill] sm:$0xff]  ;;  %v13927_v36 = vld [vmem:[#allocation136_spill] sm:$0xff] }
 0x42a   :  { %v3989_v45 = vrot.slane %v10320_v18, 5  ;;  %v3990_v62 = vrot.slane %v10327_v7, 5  ;;  %v3991_v53 = vrot.slane %v10333_v28, 5  ;;  %v3992_v11 = vrot.slane %v10338_v35, 5  ;;  %v13929_v48 = vld [vmem:[#allocation63_spill] sm:$0xff] }
 0x42b   :  { %v3993_v56 = vrot.slane %v10342_v26, 5  ;;  %v3994_v59 = vrot.slane %v10346_v29, 5  ;;  %v3995_v8 = vrot.slane %v13901_v61, 5  ;;  %v3996_v20 = vrot.slane %v13905_v3, 5  ;;  %v13987_v60 = vld [vmem:[#allocation43_spill] sm:$0xff] }
 0x42c   :  { %v3998_v51 = vrot.slane %v10314_v16, 5  ;;  %v3999_v46 = vrot.slane %v13877_v4, 5  ;;  %v4000_v54 = vrot.slane %v13919_v43, 5  ;;  %v3997_v25 = vrot.slane %v13920_v22, 5  ;;  %v13931_v22 = vld [vmem:[#allocation64_spill] sm:$0xff] }
 0x42d   :  { %v4001_v44 = vrot.slane %v13921_v38, 5  ;;  %v4002_v13 = vrot.slane %v13922_v21, 5  ;;  %v4003_v30 = vrot.slane %v13923_v41, 5  ;;  %v4004_v58 = vrot.slane %v13924_v10, 5  ;;  %v13933_v38 = vld [vmem:[#allocation80_spill] sm:$0xff]  ;;  %v13935_v41 = vld [vmem:[#allocation150_spill] sm:$0xff] }
 0x42e   :  { %v4005_v23 = vrot.slane %v13925_v24, 5  ;;  %v4006_v19 = vrot.slane %v13926_v57, 5  ;;  %v4007_v15 = vrot.slane %v13927_v36, 5  ;;  %v3983_v47 = vadd.f32 %v3963_v37, %v13928_v12 }
 0x42f   :  { %v10950_v43 = vadd.f32 %v3964_v50, %v13929_v48  ;;  %v10953_v3 = vadd.f32 %v3965_v5, %v13931_v22  ;;  %v10956_v21 = vadd.f32 %v3966_v2, %v13933_v38  ;;  %v10959_v4 = vadd.f32 %v3967_v32, %v13935_v41 }
 0x430   :  { %v4008_v24 = vsel %vm1014_vm4, %v3988_v0, %v3998_v51  ;;  %v4009_v36 = vsel %vm1014_vm4, %v3989_v45, %v3999_v46  ;;  %v4010_v12 = vsel %vm1014_vm4, %v3990_v62, %v4000_v54  ;;  %v4011_v48 = vsel %vm1014_vm4, %v3991_v53, %v4001_v44 }
 0x431   :  { %13930 = vst [vmem:[#allocation41_spill] sm:$0xff] %v10950_v43  ;;  %13932 = vst [vmem:[#allocation104_spill] sm:$0xff] %v10953_v3  ;;  %v4012_v5 = vsel %vm1014_vm4, %v3992_v11, %v4002_v13  ;;  %v4013_v37 = vsel %vm1014_vm4, %v3993_v56, %v4003_v30  ;;  %v4018_v50 = vsel %vm1014_vm4, %v3998_v51, %v3988_v0  ;;  %v4028_v51 = vmul.f32 0.11128076, %v4008_v24 }
 0x432   :  { %13934 = vst [vmem:[#allocation39_spill] sm:$0xff] %v10956_v21  ;;  %13936 = vst [vmem:[#allocation116_spill] sm:$0xff] %v10959_v4  ;;  %v4014_v2 = vsel %vm1014_vm4, %v3994_v59, %v4004_v58  ;;  %v4015_v32 = vsel %vm1014_vm4, %v3995_v8, %v4005_v23  ;;  %v4016_v22 = vsel %vm1014_vm4, %v3996_v20, %v4006_v19  ;;  %v4029_v57 = vmul.f32 0.11128076, %v4018_v50 }
 0x433   :  { %v4017_v38 = vsel %vm1014_vm4, %v3997_v25, %v4007_v15  ;;  %v4019_v41 = vsel %vm1014_vm4, %v3999_v46, %v3989_v45  ;;  %v4020_v4 = vsel %vm1014_vm4, %v4000_v54, %v3990_v62  ;;  %v4021_v0 = vsel %vm1014_vm4, %v4001_v44, %v3991_v53 }
 0x434   :  { %v4022_v21 = vsel %vm1014_vm4, %v4002_v13, %v3992_v11  ;;  %v4023_v3 = vsel %vm1014_vm4, %v4003_v30, %v3993_v56  ;;  %v4024_v43 = vsel %vm1014_vm4, %v4004_v58, %v3994_v59  ;;  %v4025_v45 = vsel %vm1014_vm4, %v4005_v23, %v3995_v8  ;;  %v13937_v13 = vld [vmem:[#allocation86_spill] sm:$0xff] }
 0x435   :  { %v4026_v62 = vsel %vm1014_vm4, %v4006_v19, %v3996_v20  ;;  %v4027_v53 = vsel %vm1014_vm4, %v4007_v15, %v3997_v25  ;;  %v4030_v46 = vmul.f32 0.11128076, %v4009_v36  ;;  %v4031_v54 = vmul.f32 0.11128076, %v4019_v41 }
 0x436   :  { %v4032_v44 = vmul.f32 0.11128076, %v4010_v12  ;;  %v4033_v11 = vmul.f32 0.11128076, %v4020_v4  ;;  %v11003_v56 = vmul.f32 %v13937_v13, %v13937_v13  ;;  %v4034_v30 = vmul.f32 0.11128076, %v4011_v48 }
 0x437   :  { %v4035_v59 = vmul.f32 0.11128076, %v4021_v0  ;;  %v4036_v58 = vmul.f32 0.11128076, %v4012_v5  ;;  %v11006_v24 = vadd.f32 %v4028_v51, %v10884_v52  ;;  %v4037_v8 = vmul.f32 0.11128076, %v4022_v21 }
 0x438   :  { %13938 = vst [vmem:[#allocation134_spill] sm:$0xff] %v11003_v56  ;;  %v4038_v23 = vmul.f32 0.11128076, %v4013_v37  ;;  %v4039_v20 = vmul.f32 0.11128076, %v4023_v3  ;;  %v11009_v19 = vadd.f32 %v4029_v57, %v10887_v6  ;;  %v11012_v4 = vadd.f32 %v4030_v46, %v10890_v31  ;;  %v13941_v0 = vld [vmem:[#allocation66_spill] sm:$0xff] }
 0x439   :  { %v4040_v25 = vmul.f32 0.11128076, %v4014_v2  ;;  %v4041_v36 = vmul.f32 0.11128076, %v4024_v43  ;;  %v4042_v15 = vmul.f32 0.11128076, %v4015_v32  ;;  %v11015_v5 = vadd.f32 %v4031_v54, %v10893_v49 }
 0x43a   :  { %v4043_v12 = vmul.f32 0.11128076, %v4025_v45  ;;  %v4044_v50 = vmul.f32 0.11128076, %v4016_v22  ;;  %v4045_v48 = vmul.f32 0.11128076, %v4026_v62  ;;  %v11018_v21 = vadd.f32 %v4032_v44, %v10896_v27 }
 0x43b   :  { %v4046_v52 = vmul.f32 0.11128076, %v4017_v38  ;;  %v4047_v41 = vmul.f32 0.11128076, %v4027_v53  ;;  %v11021_v3 = vadd.f32 %v4033_v11, %v10899_v42  ;;  %v11024_v6 = vadd.f32 %v4034_v30, %v10902_v34  ;;  %v13940_v38 = vld [vmem:[#allocation68_spill] sm:$0xff]  ;;  %v13943_v45 = vld [vmem:[#allocation38_spill] sm:$0xff] }
 0x43c   :  { %v11027_v31 = vadd.f32 %v4035_v59, %v10905_v55  ;;  %v11030_v43 = vadd.f32 %v4036_v58, %v10908_v39  ;;  %v11033_v49 = vadd.f32 %v4037_v8, %v10911_v17  ;;  %v11036_v57 = vadd.f32 %v4038_v23, %v10914_v1  ;;  %v13942_v51 = vld [vmem:[#allocation140_spill] sm:$0xff]  ;;  %v13944_v62 = vld [vmem:[#allocation67_spill] sm:$0xff]  ;;  %v13947_v54 = vld [vmem:[#allocation41_spill] sm:$0xff] }
 0x43d   :  { %v11039_v27 = vadd.f32 %v4039_v20, %v10917_v40  ;;  %v11042_v42 = vadd.f32 %v4040_v25, %v10920_v14  ;;  %v11045_v34 = vadd.f32 %v4041_v36, %v10923_v9  ;;  %v11048_v55 = vadd.f32 %v4042_v15, %v10926_v33  ;;  %v13945_v53 = vld [vmem:[#allocation27_spill] sm:$0xff]  ;;  %v13946_v46 = vld [vmem:[#allocation108_spill] sm:$0xff] }
 0x43e   :  { %v11050_v39 = vadd.f32 %v4043_v12, %v3983_v47  ;;  %v4068_v17 = vrot.slane %v10308_v63, 6  ;;  %v4069_v37 = vrot.slane %v10320_v18, 6  ;;  %v4070_v1 = vrot.slane %v10327_v7, 6  ;;  %v13939_v47 = vld [vmem:[#allocation65_spill] sm:$0xff]  ;;  %v13948_v44 = vld [vmem:[#allocation104_spill] sm:$0xff]  ;;  %v13949_v30 = vld [vmem:[#allocation15_spill] sm:$0xff] }
 0x43f   :  { %v4071_v40 = vrot.slane %v10333_v28, 6  ;;  %v4072_v2 = vrot.slane %v10338_v35, 6  ;;  %v4073_v14 = vrot.slane %v10342_v26, 6  ;;  %v4074_v9 = vrot.slane %v10346_v29, 6  ;;  %v13950_v58 = vld [vmem:[#allocation136_spill] sm:$0xff]  ;;  %v13951_v23 = vld [vmem:[#allocation39_spill] sm:$0xff] }
 0x440   :  { %v4075_v32 = vrot.slane %v13901_v61, 6  ;;  %v4078_v33 = vrot.slane %v10314_v16, 6  ;;  %v4079_v22 = vrot.slane %v13939_v47, 6  ;;  %v4076_v63 = vrot.slane %v13940_v38, 6  ;;  %v13952_v25 = vld [vmem:[#allocation116_spill] sm:$0xff] }
 0x441   :  { %v4080_v18 = vrot.slane %v13941_v0, 6  ;;  %v4081_v7 = vrot.slane %v13942_v51, 6  ;;  %v4082_v28 = vrot.slane %v13943_v45, 6  ;;  %v4083_v35 = vrot.slane %v13944_v62, 6 }
 0x442   :  { %v4084_v26 = vrot.slane %v13924_v10, 6  ;;  %v4085_v29 = vrot.slane %v13945_v53, 6  ;;  %v4086_v61 = vrot.slane %v13946_v46, 6  ;;  %v11071_v16 = vadd.f32 %v4044_v50, %v13947_v54 }
 0x443   :  { %v11074_v11 = vadd.f32 %v4045_v48, %v13948_v44  ;;  %v4077_v59 = vrot.slane %v13949_v30, 6  ;;  %v4087_v8 = vrot.slane %v13950_v58, 6  ;;  %v4066_v20 = vadd.f32 %v4046_v52, %v13951_v23 }
 0x444   :  { %v4067_v36 = vadd.f32 %v4047_v41, %v13952_v25  ;;  %v4088_v10 = vsel %vm1095_vm5, %v4068_v17, %v4078_v33  ;;  %v4089_v15 = vsel %vm1095_vm5, %v4069_v37, %v4079_v22  ;;  %v4090_v12 = vsel %vm1095_vm5, %v4070_v1, %v4080_v18 }
 0x445   :  { %v4091_v50 = vsel %vm1095_vm5, %v4071_v40, %v4081_v7  ;;  %v4092_v48 = vsel %vm1095_vm5, %v4072_v2, %v4082_v28  ;;  %v4098_v52 = vsel %vm1095_vm5, %v4078_v33, %v4068_v17  ;;  %v4093_v41 = vsel %vm1095_vm5, %v4073_v14, %v4083_v35 }
 0x446   :  { %v4094_v47 = vsel %vm1095_vm5, %v4074_v9, %v4084_v26  ;;  %v4095_v38 = vsel %vm1095_vm5, %v4075_v32, %v4085_v29  ;;  %v4096_v0 = vsel %vm1095_vm5, %v4076_v63, %v4086_v61  ;;  %v4097_v51 = vsel %vm1095_vm5, %v4077_v59, %v4087_v8 }
 0x447   :  { %v4099_v45 = vsel %vm1095_vm5, %v4079_v22, %v4069_v37  ;;  %v4100_v17 = vsel %vm1095_vm5, %v4080_v18, %v4070_v1  ;;  %v4108_v33 = vmul.f32 0.036632847, %v4088_v10  ;;  %v4101_v62 = vsel %vm1095_vm5, %v4081_v7, %v4071_v40 }
 0x448   :  { %v4102_v53 = vsel %vm1095_vm5, %v4082_v28, %v4072_v2  ;;  %v4103_v46 = vsel %vm1095_vm5, %v4083_v35, %v4073_v14  ;;  %v4109_v54 = vmul.f32 0.036632847, %v4098_v52  ;;  %v4104_v44 = vsel %vm1095_vm5, %v4084_v26, %v4074_v9  ;;  %v13953_v2 = vld [vmem:[#allocation77_spill] sm:$0xff] }
 0x449   :  { %v4105_v37 = vsel %vm1095_vm5, %v4085_v29, %v4075_v32  ;;  %v4106_v1 = vsel %vm1095_vm5, %v4086_v61, %v4076_v63  ;;  %v4110_v22 = vmul.f32 0.036632847, %v4089_v15  ;;  %v4107_v40 = vsel %vm1095_vm5, %v4087_v8, %v4077_v59 }
 0x44a   :  { %v4111_v18 = vmul.f32 0.036632847, %v4099_v45  ;;  %v4112_v7 = vmul.f32 0.036632847, %v4090_v12  ;;  %v11122_v28 = vmul.f32 %v13953_v2, %v13953_v2  ;;  %v4113_v14 = vmul.f32 0.036632847, %v4100_v17 }
 0x44b   :  { %v4114_v35 = vmul.f32 0.036632847, %v4091_v50  ;;  %v4115_v30 = vmul.f32 0.036632847, %v4101_v62  ;;  %v11125_v9 = vadd.f32 %v4108_v33, %v11006_v24  ;;  %v4116_v32 = vmul.f32 0.036632847, %v4092_v48 }
 0x44c   :  { %13954 = vst [vmem:[#allocation40_spill] sm:$0xff] %v11122_v28  ;;  %v4117_v26 = vmul.f32 0.036632847, %v4102_v53  ;;  %v4118_v29 = vmul.f32 0.036632847, %v4093_v41  ;;  %v11128_v63 = vadd.f32 %v4109_v54, %v11009_v19  ;;  %v11131_v8 = vadd.f32 %v4110_v22, %v11012_v4  ;;  %v13965_v45 = vld [vmem:[#allocation87_spill] sm:$0xff] }
 0x44d   :  { %v4119_v61 = vmul.f32 0.036632847, %v4103_v46  ;;  %v4120_v59 = vmul.f32 0.036632847, %v4094_v47  ;;  %v4121_v58 = vmul.f32 0.036632847, %v4104_v44  ;;  %v11134_v15 = vadd.f32 %v4111_v18, %v11015_v5 }
 0x44e   :  { %v4122_v23 = vmul.f32 0.036632847, %v4095_v38  ;;  %v4123_v25 = vmul.f32 0.036632847, %v4105_v37  ;;  %v4124_v10 = vmul.f32 0.036632847, %v4096_v0  ;;  %v11137_v48 = vadd.f32 %v4112_v7, %v11018_v21 }
 0x44f   :  { %v4125_v24 = vmul.f32 0.036632847, %v4106_v1  ;;  %v4126_v12 = vmul.f32 0.036632847, %v4097_v51  ;;  %v4127_v50 = vmul.f32 0.036632847, %v4107_v40  ;;  %v11140_v19 = vadd.f32 %v4113_v14, %v11021_v3 }
 0x450   :  { %v11143_v52 = vadd.f32 %v4114_v35, %v11024_v6  ;;  %v11146_v4 = vadd.f32 %v4115_v30, %v11027_v31  ;;  %v11149_v41 = vadd.f32 %v4116_v32, %v11030_v43  ;;  %v11152_v5 = vadd.f32 %v4117_v26, %v11033_v49  ;;  %v13957_v0 = vld [vmem:[#allocation79_spill] sm:$0xff]  ;;  %v13967_v33 = vld [vmem:[#allocation81_spill] sm:$0xff]  ;;  %v13970_v46 = vld [vmem:[#allocation16_spill] sm:$0xff] }
 0x451   :  { %v11155_v47 = vadd.f32 %v4118_v29, %v11036_v57  ;;  %v11158_v21 = vadd.f32 %v4119_v61, %v11039_v27  ;;  %v11161_v3 = vadd.f32 %v4120_v59, %v11042_v42  ;;  %v11164_v6 = vadd.f32 %v4121_v58, %v11045_v34  ;;  %v13955_v42 = vld [vmem:[#allocation78_spill] sm:$0xff]  ;;  %v13969_v53 = vld [vmem:[#allocation69_spill] sm:$0xff]  ;;  %v13972_v37 = vld [vmem:[#allocation148_spill] sm:$0xff] }
 0x452   :  { %v11167_v31 = vadd.f32 %v4122_v23, %v11048_v55  ;;  %v11170_v43 = vadd.f32 %v4123_v25, %v11050_v39  ;;  %v11173_v49 = vadd.f32 %v4124_v10, %v11071_v16  ;;  %v11176_v57 = vadd.f32 %v4125_v24, %v11074_v11  ;;  %v13959_v39 = vld [vmem:[#allocation97_spill] sm:$0xff]  ;;  %v13961_v16 = vld [vmem:[#allocation102_spill] sm:$0xff]  ;;  %v13973_v22 = vld [vmem:[#allocation111_spill] sm:$0xff] }
 0x453   :  { %v11178_v27 = vadd.f32 %v4126_v12, %v4066_v20  ;;  %v11180_v38 = vadd.f32 %v4127_v50, %v4067_v36  ;;  %v11184_v34 = vmul.f32 %v13955_v42, %v13955_v42  ;;  %v11188_v55 = vmul.f32 %v13957_v0, %v13957_v0  ;;  %v13963_v20 = vld [vmem:[#allocation84_spill] sm:$0xff]  ;;  %v13971_v44 = vld [vmem:[#allocation37_spill] sm:$0xff]  ;;  %v13975_v7 = vld [vmem:[#allocation151_spill] sm:$0xff] }
 0x454   :  { %v11192_v51 = vmul.f32 %v13959_v39, %v13959_v39  ;;  %v11196_v11 = vmul.f32 %v13961_v16, %v13961_v16  ;;  %v11200_v36 = vmul.f32 %v13963_v20, %v13963_v20  ;;  %v11204_v17 = vmul.f32 %v13965_v45, %v13965_v45  ;;  %v13974_v40 = vld [vmem:[#allocation149_spill] sm:$0xff]  ;;  %v13976_v14 = vld [vmem:[#allocation152_spill] sm:$0xff]  ;;  %v13977_v30 = vld [vmem:[#allocation35_spill] sm:$0xff] }
 0x455   :  { %13956 = vst [vmem:[#allocation42_spill] sm:$0xff] %v11184_v34  ;;  %13958 = vst [vmem:[#allocation44_spill] sm:$0xff] %v11188_v55  ;;  %v11208_v62 = vmul.f32 %v13967_v33, %v13967_v33  ;;  %v4168_v54 = vsub.f32 %v13970_v46, %v13969_v53  ;;  %v4169_v1 = vsub.f32 %v13972_v37, %v13971_v44  ;;  %v13978_v32 = vld [vmem:[#allocation154_spill] sm:$0xff]  ;;  %v13979_v29 = vld [vmem:[#allocation73_spill] sm:$0xff] }
 0x456   :  { %13960 = vst [vmem:[#allocation26_spill] sm:$0xff] %v11192_v51  ;;  %13962 = vst [vmem:[#allocation132_spill] sm:$0xff] %v11196_v11  ;;  %v4170_v18 = vsub.f32 %v13974_v40, %v13973_v22  ;;  %v4171_v35 = vsub.f32 %v13976_v14, %v13975_v7  ;;  %v4172_v26 = vsub.f32 %v13978_v32, %v13977_v30  ;;  %v13980_v61 = vld [vmem:[#allocation155_spill] sm:$0xff]  ;;  %v13981_v58 = vld [vmem:[#allocation74_spill] sm:$0xff] }
 0x457   :  { %13964 = vst [vmem:[#allocation109_spill] sm:$0xff] %v11200_v36  ;;  %13966 = vst [vmem:[#allocation110_spill] sm:$0xff] %v11204_v17  ;;  %v4173_v59 = vsub.f32 %v13980_v61, %v13979_v29  ;;  %v13982_v23 = vld [vmem:[#allocation135_spill] sm:$0xff]  ;;  %v13983_v10 = vld [vmem:[#allocation153_spill] sm:$0xff]  ;;  %v11250_v53 = vmul.f32 1.0208334, %v4168_v54 }
 0x458   :  { %13968 = vst [vmem:[#allocation137_spill] sm:$0xff] %v11208_v62  ;;  %v4174_v25 = vsub.f32 %v13982_v23, %v13981_v58  ;;  %v13984_v24 = vld [vmem:[#allocation45_spill] sm:$0xff]  ;;  %v13986_v46 = vld [vmem:[#allocation46_spill] sm:$0xff]  ;;  %v13988_v40 = vld [vmem:[#allocation47_spill] sm:$0xff] }
 0x459   :  { %v4175_v12 = vsub.f32 %v13984_v24, %v13983_v10  ;;  %v13985_v50 = vld [vmem:[#allocation61_spill] sm:$0xff]  ;;  %v4177_v22 = vsub.f32 %v13988_v40, %v13987_v60  ;;  %v13989_v44 = vld [vmem:[#allocation31_spill] sm:$0xff]  ;;  %v13990_v14 = vld [vmem:[#allocation48_spill] sm:$0xff]  ;;  %14000 = vst [vmem:[#allocation133_spill] sm:$0xff] %v11250_v53 }
 0x45a   :  { %v4176_v37 = vsub.f32 %v13986_v46, %v13985_v50  ;;  %v4178_v7 = vsub.f32 %v13990_v14, %v13989_v44  ;;  %v13991_v32 = vld [vmem:[#allocation49_spill] sm:$0xff]  ;;  %v13992_v61 = vld [vmem:[#allocation50_spill] sm:$0xff]  ;;  %v13993_v23 = vld [vmem:[#allocation51_spill] sm:$0xff] }
 0x45b   :  { %v4179_v30 = vsub.f32 %v13991_v32, %v11003_v56  ;;  %v4180_v29 = vsub.f32 %v13992_v61, %v11122_v28  ;;  %v4181_v58 = vsub.f32 %v13993_v23, %v11184_v34  ;;  %v13994_v24 = vld [vmem:[#allocation52_spill] sm:$0xff]  ;;  %v13995_v46 = vld [vmem:[#allocation14_spill] sm:$0xff]  ;;  %v13998_v32 = vld [vmem:[#allocation131_spill] sm:$0xff]  ;;  %v11252_v23 = vmul.f32 1.0208334, %v4169_v1 }
 0x45c   :  { %v4182_v10 = vsub.f32 %v13994_v24, %v11188_v55  ;;  %v4183_v50 = vsub.f32 %v13995_v46, %v11192_v51  ;;  %v13996_v40 = vld [vmem:[#allocation36_spill] sm:$0xff]  ;;  %v13997_v14 = vld [vmem:[#allocation130_spill] sm:$0xff]  ;;  %v4186_v56 = vsub.f32 %v13998_v32, %v11204_v17  ;;  %v13999_v61 = vld [vmem:[#allocation53_spill] sm:$0xff]  ;;  %v11254_v24 = vmul.f32 1.0208334, %v4170_v18 }
 0x45d   :  { %v4184_v60 = vsub.f32 %v13996_v40, %v11196_v11  ;;  %v4185_v44 = vsub.f32 %v13997_v14, %v11200_v36  ;;  %v4187_v28 = vsub.f32 %v13999_v61, %v11208_v62  ;;  %14001 = vst [vmem:[#allocation29_spill] sm:$0xff] %v11252_v23  ;;  %v11256_v55 = vmul.f32 1.0208334, %v4171_v35  ;;  %v14005_v40 = vld [vmem:[#allocation89_spill] sm:$0xff]  ;;  %v14009_v54 = vld [vmem:[#allocation112_spill] sm:$0xff]  ;;  %v14050_v45 = vld [vmem:[#allocation126_spill] sm:$0xff] }
 0x45e   :  { %14002 = vst [vmem:[#allocation30_spill] sm:$0xff] %v11254_v24  ;;  %v11258_v46 = vmul.f32 1.0208334, %v4172_v26  ;;  %v11262_v11 = vmul.f32 %v14005_v40, %v14005_v40  ;;  %v11264_v14 = vmul.f32 1.0208334, %v4173_v59  ;;  %v11272_v1 = vmul.f32 %v14009_v54, %v14009_v54  ;;  %v14013_v61 = vld [vmem:[#allocation117_spill] sm:$0xff] }
 0x45f   :  { %14003 = vst [vmem:[#allocation11_spill] sm:$0xff] %v11256_v55  ;;  %v11266_v32 = vmul.f32 1.0208334, %v4174_v25  ;;  %v11268_v17 = vmul.f32 1.0208334, %v4175_v12  ;;  %v14042_v24 = vld [vmem:[#allocation88_spill] sm:$0xff]  ;;  %v11364_v20 = vmul.f32 %v14050_v45, %v14050_v45 }
 0x460   :  { %14004 = vst [vmem:[#allocation55_spill] sm:$0xff] %v11258_v46  ;;  %14006 = vst [vmem:[#allocation146_spill] sm:$0xff] %v11264_v14  ;;  %v11274_v18 = vmul.f32 1.0208334, %v4176_v37  ;;  %v11276_v35 = vmul.f32 1.0208334, %v4177_v22  ;;  %v11282_v46 = vmul.f32 %v14013_v61, %v14013_v61  ;;  %v11348_v62 = vmul.f32 %v14042_v24, %v14042_v24 }
 0x461   :  { %14007 = vst [vmem:[#allocation56_spill] sm:$0xff] %v11266_v32  ;;  %14008 = vst [vmem:[#allocation33_spill] sm:$0xff] %v11268_v17  ;;  %v11278_v26 = vmul.f32 1.0208334, %v4178_v7  ;;  %v11284_v59 = vmul.f32 1.0208334, %v4179_v30  ;;  %v4229_v24 = vsub.f32 %v11128_v63, %v11272_v1 }
 0x462   :  { %14010 = vst [vmem:[#allocation34_spill] sm:$0xff] %v11274_v18  ;;  %14011 = vst [vmem:[#allocation12_spill] sm:$0xff] %v11276_v35  ;;  %v11286_v25 = vmul.f32 1.0208334, %v4180_v29  ;;  %v11288_v12 = vmul.f32 1.0208334, %v4181_v58 }
 0x463   :  { %14012 = vst [vmem:[#allocation57_spill] sm:$0xff] %v11278_v26  ;;  %14014 = vst [vmem:[#allocation70_spill] sm:$0xff] %v11284_v59  ;;  %v14017_v17 = vld [vmem:[#allocation118_spill] sm:$0xff]  ;;  %v11294_v37 = vmul.f32 1.0208334, %v4182_v10  ;;  %v14021_v26 = vld [vmem:[#allocation119_spill] sm:$0xff] }
 0x464   :  { %14015 = vst [vmem:[#allocation32_spill] sm:$0xff] %v11286_v25  ;;  %14016 = vst [vmem:[#allocation13_spill] sm:$0xff] %v11288_v12  ;;  %v11292_v32 = vmul.f32 %v14017_v17, %v14017_v17  ;;  %v11296_v22 = vmul.f32 1.0208334, %v4183_v50  ;;  %v11298_v7 = vmul.f32 1.0208334, %v4184_v60  ;;  %v11302_v35 = vmul.f32 %v14021_v26, %v14021_v26 }
 0x465   :  { %14018 = vst [vmem:[#allocation71_spill] sm:$0xff] %v11294_v37  ;;  %v11304_v30 = vmul.f32 1.0208334, %v4185_v44  ;;  %v11306_v29 = vmul.f32 1.0208334, %v4186_v56  ;;  %v14025_v12 = vld [vmem:[#allocation122_spill] sm:$0xff] }
 0x466   :  { %14019 = vst [vmem:[#allocation72_spill] sm:$0xff] %v11296_v22  ;;  %14020 = vst [vmem:[#allocation17_spill] sm:$0xff] %v11298_v7  ;;  %v11308_v58 = vmul.f32 1.0208334, %v4187_v28  ;;  %v11312_v25 = vmul.f32 %v14025_v12, %v14025_v12  ;;  %v14026_v10 = vld [vmem:[#allocation120_spill] sm:$0xff]  ;;  %v14028_v60 = vld [vmem:[#allocation121_spill] sm:$0xff]  ;;  %v4232_v45 = vsub.f32 %v11137_v48, %v11302_v35 }
 0x467   :  { %14022 = vst [vmem:[#allocation54_spill] sm:$0xff] %v11304_v30  ;;  %14023 = vst [vmem:[#allocation142_spill] sm:$0xff] %v11306_v29  ;;  %v11316_v50 = vmul.f32 %v14026_v10, %v14026_v10  ;;  %v11320_v7 = vmul.f32 %v14028_v60, %v14028_v60  ;;  %v14030_v22 = vld [vmem:[#allocation123_spill] sm:$0xff]  ;;  %v14032_v56 = vld [vmem:[#allocation96_spill] sm:$0xff] }
 0x468   :  { %14024 = vst [vmem:[#allocation28_spill] sm:$0xff] %v11308_v58  ;;  %v11324_v44 = vmul.f32 %v14030_v22, %v14030_v22  ;;  %v11328_v28 = vmul.f32 %v14032_v56, %v14032_v56  ;;  %v14034_v58 = vld [vmem:[#allocation106_spill] sm:$0xff]  ;;  %v14036_v30 = vld [vmem:[#allocation105_spill] sm:$0xff]  ;;  %v14038_v59 = vld [vmem:[#allocation107_spill] sm:$0xff]  ;;  %v4233_v0 = vsub.f32 %v11140_v19, %v11312_v25 }
 0x469   :  { %14027 = vst [vmem:[#allocation115_spill] sm:$0xff] %v11316_v50  ;;  %14029 = vst [vmem:[#allocation58_spill] sm:$0xff] %v11320_v7  ;;  %v11332_v29 = vmul.f32 %v14034_v58, %v14034_v58  ;;  %v11336_v37 = vmul.f32 %v14036_v30, %v14036_v30  ;;  %v11340_v18 = vmul.f32 %v14038_v59, %v14038_v59  ;;  %v14040_v14 = vld [vmem:[#allocation99_spill] sm:$0xff]  ;;  %v14044_v23 = vld [vmem:[#allocation85_spill] sm:$0xff] }
 0x46a   :  { %14031 = vst [vmem:[#allocation59_spill] sm:$0xff] %v11324_v44  ;;  %14033 = vst [vmem:[#allocation60_spill] sm:$0xff] %v11328_v28  ;;  %v11344_v55 = vmul.f32 %v14040_v14, %v14040_v14  ;;  %v11352_v36 = vmul.f32 %v14044_v23, %v14044_v23  ;;  %v14046_v51 = vld [vmem:[#allocation124_spill] sm:$0xff]  ;;  %v14048_v34 = vld [vmem:[#allocation125_spill] sm:$0xff]  ;;  %v4228_v23 = vsub.f32 %v11125_v9, %v11262_v11 }
 0x46b   :  { %14035 = vst [vmem:[#allocation114_spill] sm:$0xff] %v11332_v29  ;;  %14037 = vst [vmem:[#allocation62_spill] sm:$0xff] %v11336_v37  ;;  %v11356_v53 = vmul.f32 %v14046_v51, %v14046_v51  ;;  %v11360_v33 = vmul.f32 %v14048_v34, %v14048_v34  ;;  %v14052_v16 = vld [vmem:[#allocation127_spill] sm:$0xff]  ;;  %v4230_v51 = vsub.f32 %v11131_v8, %v11282_v46 }
 0x46c   :  { %14039 = vst [vmem:[#allocation63_spill] sm:$0xff] %v11340_v18  ;;  %14041 = vst [vmem:[#allocation64_spill] sm:$0xff] %v11344_v55  ;;  %v11368_v39 = vmul.f32 %v14052_v16, %v14052_v16  ;;  %v4231_v34 = vsub.f32 %v11134_v15, %v11292_v32  ;;  %v4234_v16 = vsub.f32 %v11143_v52, %v11316_v50  ;;  %v14095_v50 = vld [vmem:[#allocation81_spill] sm:$0xff] }
 0x46d   :  { %14043 = vst [vmem:[#allocation80_spill] sm:$0xff] %v11348_v62  ;;  %14045 = vst [vmem:[#allocation150_spill] sm:$0xff] %v11352_v36  ;;  %v4235_v9 = vsub.f32 %v11146_v4, %v11320_v7  ;;  %v4236_v63 = vsub.f32 %v11149_v41, %v11324_v44  ;;  %v4237_v8 = vsub.f32 %v11152_v5, %v11328_v28  ;;  %v14093_v28 = vld [vmem:[#allocation87_spill] sm:$0xff]  ;;  %v14094_v44 = vld [vmem:[#allocation126_spill] sm:$0xff] }
 0x46e   :  { %14047 = vst [vmem:[#allocation86_spill] sm:$0xff] %v11356_v53  ;;  %14049 = vst [vmem:[#allocation65_spill] sm:$0xff] %v11360_v33  ;;  %v4238_v15 = vsub.f32 %v11155_v47, %v11332_v29  ;;  %v4239_v48 = vsub.f32 %v11158_v21, %v11336_v37  ;;  %v4240_v19 = vsub.f32 %v11161_v3, %v11340_v18  ;;  %v11410_v18 = vmul.f32 1.0208334, %v4228_v23  ;;  %v14092_v37 = vld [vmem:[#allocation125_spill] sm:$0xff] }
 0x46f   :  { %14051 = vst [vmem:[#allocation68_spill] sm:$0xff] %v11364_v20  ;;  %14053 = vst [vmem:[#allocation66_spill] sm:$0xff] %v11368_v39  ;;  %v4241_v52 = vsub.f32 %v11164_v6, %v11344_v55  ;;  %v4242_v4 = vsub.f32 %v11167_v31, %v11348_v62  ;;  %v4243_v41 = vsub.f32 %v11170_v43, %v11352_v36  ;;  %v11412_v6 = vmul.f32 1.0208334, %v4229_v24  ;;  %v14090_v36 = vld [vmem:[#allocation124_spill] sm:$0xff] }
 0x470   :  { %v4244_v5 = vsub.f32 %v11173_v49, %v11356_v53  ;;  %v4245_v47 = vsub.f32 %v11176_v57, %v11360_v33  ;;  %v4246_v21 = vsub.f32 %v11178_v27, %v11364_v20  ;;  %v4247_v3 = vsub.f32 %v11180_v38, %v11368_v39  ;;  %14054 = vst [vmem:[#allocation140_spill] sm:$0xff] %v11410_v18  ;;  %v14059_v49 = vld [vmem:[#allocation82_spill] sm:$0xff]  ;;  %v14063_v38 = vld [vmem:[#allocation83_spill] sm:$0xff]  ;;  %v14088_v39 = vld [vmem:[#allocation85_spill] sm:$0xff] }
 0x471   :  { %14055 = vst [vmem:[#allocation38_spill] sm:$0xff] %v11412_v6  ;;  %v11414_v31 = vmul.f32 1.0208334, %v4230_v51  ;;  %v11416_v62 = vmul.f32 1.0208334, %v4231_v34  ;;  %v4268_v53 = vmul.f32 %v14005_v40, %v14059_v49  ;;  %v4269_v23 = vmul.f32 %v14009_v54, %v14063_v38  ;;  %v14089_v6 = vld [vmem:[#allocation102_spill] sm:$0xff] }
 0x472   :  { %v11418_v43 = vmul.f32 1.0208334, %v4232_v45  ;;  %v11422_v57 = vmul.f32 1.0208334, %v4233_v0  ;;  %v11424_v33 = vmul.f32 1.0208334, %v4234_v16  ;;  %v4284_v18 = vmul.f32 %v14090_v36, %v14089_v6 }
 0x473   :  { %14056 = vst [vmem:[#allocation67_spill] sm:$0xff] %v11414_v31  ;;  %14057 = vst [vmem:[#allocation27_spill] sm:$0xff] %v11416_v62  ;;  %v11426_v27 = vmul.f32 1.0208334, %v4235_v9  ;;  %v11430_v24 = vmul.f32 1.0208334, %v4236_v63  ;;  %v4286_v7 = vmul.f32 %v14094_v44, %v14093_v28 }
 0x474   :  { %14058 = vst [vmem:[#allocation108_spill] sm:$0xff] %v11418_v43  ;;  %14060 = vst [vmem:[#allocation41_spill] sm:$0xff] %v11422_v57  ;;  %v11432_v51 = vmul.f32 1.0208334, %v4237_v8  ;;  %v11434_v34 = vmul.f32 1.0208334, %v4238_v15 }
 0x475   :  { %14061 = vst [vmem:[#allocation104_spill] sm:$0xff] %v11424_v33  ;;  %14062 = vst [vmem:[#allocation15_spill] sm:$0xff] %v11426_v27  ;;  %v14067_v45 = vld [vmem:[#allocation90_spill] sm:$0xff]  ;;  %v11438_v62 = vmul.f32 1.0208334, %v4239_v48  ;;  %v14071_v9 = vld [vmem:[#allocation91_spill] sm:$0xff] }
 0x476   :  { %14064 = vst [vmem:[#allocation136_spill] sm:$0xff] %v11430_v24  ;;  %14065 = vst [vmem:[#allocation39_spill] sm:$0xff] %v11432_v51  ;;  %v4270_v43 = vmul.f32 %v14013_v61, %v14067_v45  ;;  %v11440_v0 = vmul.f32 1.0208334, %v4240_v19  ;;  %v11442_v16 = vmul.f32 1.0208334, %v4241_v52  ;;  %v4271_v27 = vmul.f32 %v14017_v17, %v14071_v9 }
 0x477   :  { %14066 = vst [vmem:[#allocation116_spill] sm:$0xff] %v11434_v34  ;;  %14068 = vst [vmem:[#allocation77_spill] sm:$0xff] %v11438_v62  ;;  %v11446_v33 = vmul.f32 1.0208334, %v4242_v4  ;;  %v11448_v63 = vmul.f32 1.0208334, %v4243_v41 }
 0x478   :  { %14069 = vst [vmem:[#allocation78_spill] sm:$0xff] %v11440_v0  ;;  %14070 = vst [vmem:[#allocation16_spill] sm:$0xff] %v11442_v16  ;;  %v11450_v8 = vmul.f32 1.0208334, %v4244_v5  ;;  %v14075_v15 = vld [vmem:[#allocation92_spill] sm:$0xff]  ;;  %v14079_v52 = vld [vmem:[#allocation93_spill] sm:$0xff] }
 0x479   :  { %14072 = vst [vmem:[#allocation148_spill] sm:$0xff] %v11446_v33  ;;  %14073 = vst [vmem:[#allocation149_spill] sm:$0xff] %v11448_v63  ;;  %v4272_v34 = vmul.f32 %v14021_v26, %v14075_v15  ;;  %v11454_v51 = vmul.f32 1.0208334, %v4245_v47  ;;  %v11456_v48 = vmul.f32 1.0208334, %v4246_v21  ;;  %v4273_v16 = vmul.f32 %v14025_v12, %v14079_v52 }
 0x47a   :  { %14074 = vst [vmem:[#allocation152_spill] sm:$0xff] %v11450_v8  ;;  %v11458_v19 = vmul.f32 1.0208334, %v4247_v3  ;;  %v14080_v0 = vld [vmem:[#allocation94_spill] sm:$0xff]  ;;  %v14081_v33 = vld [vmem:[#allocation95_spill] sm:$0xff]  ;;  %v14082_v5 = vld [vmem:[#allocation76_spill] sm:$0xff]  ;;  %v4279_v3 = vmul.f32 %v14036_v30, %v13937_v13 }
 0x47b   :  { %14076 = vst [vmem:[#allocation154_spill] sm:$0xff] %v11454_v51  ;;  %14077 = vst [vmem:[#allocation155_spill] sm:$0xff] %v11456_v48  ;;  %v4274_v4 = vmul.f32 %v14026_v10, %v14080_v0  ;;  %v4275_v41 = vmul.f32 %v14028_v60, %v14081_v33  ;;  %v4276_v8 = vmul.f32 %v14030_v22, %v14082_v5  ;;  %v14083_v63 = vld [vmem:[#allocation98_spill] sm:$0xff]  ;;  %v14084_v51 = vld [vmem:[#allocation100_spill] sm:$0xff] }
 0x47c   :  { %14078 = vst [vmem:[#allocation135_spill] sm:$0xff] %v11458_v19  ;;  %v4277_v47 = vmul.f32 %v14032_v56, %v14083_v63  ;;  %v4278_v21 = vmul.f32 %v14034_v58, %v14084_v51  ;;  %v4280_v19 = vmul.f32 %v14038_v59, %v13953_v2  ;;  %v4281_v48 = vmul.f32 %v14040_v14, %v13955_v42  ;;  %v14085_v62 = vld [vmem:[#allocation79_spill] sm:$0xff]  ;;  %v14086_v24 = vld [vmem:[#allocation88_spill] sm:$0xff]  ;;  %v14087_v31 = vld [vmem:[#allocation97_spill] sm:$0xff] }
 0x47d   :  { %v4282_v57 = vmul.f32 %v14086_v24, %v14085_v62  ;;  %v4283_v20 = vmul.f32 %v14088_v39, %v14087_v31  ;;  %v14091_v55 = vld [vmem:[#allocation84_spill] sm:$0xff]  ;;  %v14096_v59 = vld [vmem:[#allocation127_spill] sm:$0xff]  ;;  %v14097_v58 = vld [vmem:[#allocation18_spill] sm:$0xff] }
 0x47e   :  { %v4285_v29 = vmul.f32 %v14092_v37, %v14091_v55  ;;  %v4287_v30 = vmul.f32 %v14096_v59, %v14095_v50  ;;  %v4288_v14 = vsub.f32 %v14097_v58, %v4268_v53  ;;  %v14098_v56 = vld [vmem:[#allocation19_spill] sm:$0xff]  ;;  %v14099_v24 = vld [vmem:[#allocation20_spill] sm:$0xff]  ;;  %v14100_v10 = vld [vmem:[#allocation21_spill] sm:$0xff] }
 0x47f   :  { %v4289_v22 = vsub.f32 %v14098_v56, %v4269_v23  ;;  %v4290_v60 = vsub.f32 %v14099_v24, %v4270_v43  ;;  %v4291_v39 = vsub.f32 %v14100_v10, %v4271_v27  ;;  %v14101_v12 = vld [vmem:[#allocation22_spill] sm:$0xff]  ;;  %v14102_v36 = vld [vmem:[#allocation101_spill] sm:$0xff]  ;;  %v14104_v54 = vld [vmem:[#allocation139_spill] sm:$0xff] }
 0x480   :  { %v4292_v26 = vsub.f32 %v14101_v12, %v4272_v34  ;;  %v4293_v17 = vsub.f32 %v14102_v36, %v4273_v16  ;;  %v14103_v61 = vld [vmem:[#allocation138_spill] sm:$0xff]  ;;  %v4295_v40 = vsub.f32 %v14104_v54, %v4275_v41  ;;  %v14105_v44 = vld [vmem:[#allocation141_spill] sm:$0xff]  ;;  %v14106_v55 = vld [vmem:[#allocation23_spill] sm:$0xff] }
 0x481   :  { %v4294_v37 = vsub.f32 %v14103_v61, %v4274_v4  ;;  %v4296_v28 = vsub.f32 %v14105_v44, %v4276_v8  ;;  %v4297_v59 = vsub.f32 %v14106_v55, %v4277_v47  ;;  %v14107_v50 = vld [vmem:[#allocation143_spill] sm:$0xff]  ;;  %v14108_v58 = vld [vmem:[#allocation144_spill] sm:$0xff]  ;;  %v14109_v23 = vld [vmem:[#allocation145_spill] sm:$0xff]  ;;  %v11510_v47 = vmul.f32 1.0208334, %v4288_v14 }
 0x482   :  { %v4298_v53 = vsub.f32 %v14107_v50, %v4278_v21  ;;  %v4299_v56 = vsub.f32 %v14108_v58, %v4279_v3  ;;  %v4300_v43 = vsub.f32 %v14109_v23, %v4280_v19  ;;  %v14110_v24 = vld [vmem:[#allocation24_spill] sm:$0xff]  ;;  %v14111_v27 = vld [vmem:[#allocation25_spill] sm:$0xff]  ;;  %v14112_v34 = vld [vmem:[#allocation147_spill] sm:$0xff]  ;;  %v11512_v50 = vmul.f32 1.0208334, %v4289_v22 }
 0x483   :  { %v4301_v10 = vsub.f32 %v14110_v24, %v4281_v48  ;;  %v4302_v12 = vsub.f32 %v14111_v27, %v4282_v57  ;;  %v4303_v36 = vsub.f32 %v14112_v34, %v4283_v20  ;;  %v14113_v16 = vld [vmem:[#allocation128_spill] sm:$0xff]  ;;  %v14114_v4 = vld [vmem:[#allocation129_spill] sm:$0xff]  ;;  %v14116_v8 = vld [vmem:[#allocation103_spill] sm:$0xff]  ;;  %v11514_v21 = vmul.f32 1.0208334, %v4290_v60 }
 0x484   :  { %v4304_v61 = vsub.f32 %v14113_v16, %v4284_v18  ;;  %v4305_v54 = vsub.f32 %v14114_v4, %v4285_v29  ;;  %v14115_v41 = vld [vmem:[#allocation113_spill] sm:$0xff]  ;;  %v4307_v55 = vsub.f32 %v14116_v8, %v4287_v30  ;;  %v11516_v19 = vmul.f32 1.0208334, %v4291_v39  ;;  %v14119_v60 = vld [vmem:[#allocation111_spill] sm:$0xff] }
 0x485   :  { %v4306_v44 = vsub.f32 %v14115_v41, %v4286_v7  ;;  %v11518_v48 = vmul.f32 1.0208334, %v4292_v26  ;;  %v14117_v57 = vld [vmem:[#allocation69_spill] sm:$0xff]  ;;  %v11524_v18 = vmul.f32 1.0208334, %v4293_v17  ;;  %v14120_v3 = vld [vmem:[#allocation151_spill] sm:$0xff] }
 0x486   :  { %v11522_v20 = vadd.f32 %v11262_v11, %v14117_v57  ;;  %v11526_v29 = vmul.f32 1.0208334, %v4294_v37  ;;  %v11528_v7 = vmul.f32 1.0208334, %v4295_v40  ;;  %v14118_v14 = vld [vmem:[#allocation37_spill] sm:$0xff]  ;;  %v11542_v11 = vadd.f32 %v11282_v46, %v14119_v60  ;;  %v14122_v58 = vld [vmem:[#allocation35_spill] sm:$0xff] }
 0x487   :  { %v11532_v22 = vadd.f32 %v11272_v1, %v14118_v14  ;;  %v11534_v30 = vmul.f32 1.0208334, %v4296_v28  ;;  %v11536_v39 = vmul.f32 1.0208334, %v4297_v59  ;;  %v11538_v26 = vmul.f32 1.0208334, %v4298_v53 }
 0x488   :  { %v11544_v17 = vmul.f32 1.0208334, %v4299_v56  ;;  %v11546_v37 = vmul.f32 1.0208334, %v4300_v43  ;;  %v11548_v40 = vmul.f32 1.0208334, %v4301_v10  ;;  %v11552_v1 = vadd.f32 %v11292_v32, %v14120_v3 }
 0x489   :  { %v11554_v28 = vmul.f32 1.0208334, %v4302_v12  ;;  %v11556_v59 = vmul.f32 1.0208334, %v4303_v36  ;;  %v11558_v53 = vmul.f32 1.0208334, %v4304_v61  ;;  %v11562_v46 = vadd.f32 %v11302_v35, %v14122_v58 }
 0x48a   :  { %14121 = vst [vmem:[#allocation45_spill] sm:$0xff] %v11552_v1  ;;  %v11564_v56 = vmul.f32 1.0208334, %v4305_v54  ;;  %v11566_v23 = vmul.f32 1.0208334, %v4306_v44  ;;  %v14124_v24 = vld [vmem:[#allocation73_spill] sm:$0xff] }
 0x48b   :  { %14123 = vst [vmem:[#allocation46_spill] sm:$0xff] %v11562_v46  ;;  %v11568_v43 = vmul.f32 1.0208334, %v4307_v55  ;;  %v11572_v32 = vadd.f32 %v11312_v25, %v14124_v24  ;;  %v4328_v10 = vmul.f32 2.0, %v14059_v49  ;;  %v4329_v27 = vmul.f32 2.0, %v14063_v38  ;;  %v14126_v54 = vld [vmem:[#allocation84_spill] sm:$0xff] }
 0x48c   :  { %v4330_v12 = vmul.f32 2.0, %v14067_v45  ;;  %v4331_v34 = vmul.f32 2.0, %v14071_v9  ;;  %v4332_v35 = vmul.f32 2.0, %v14075_v15  ;;  %v4333_v36 = vmul.f32 2.0, %v14079_v52  ;;  %v14127_v41 = vld [vmem:[#allocation87_spill] sm:$0xff]  ;;  %v14128_v44 = vld [vmem:[#allocation81_spill] sm:$0xff] }
 0x48d   :  { %14125 = vst [vmem:[#allocation47_spill] sm:$0xff] %v11572_v32  ;;  %v4334_v16 = vmul.f32 2.0, %v14080_v0  ;;  %v4335_v61 = vmul.f32 2.0, %v14081_v33  ;;  %v4336_v4 = vmul.f32 2.0, %v14082_v5  ;;  %v4337_v25 = vmul.f32 2.0, %v14083_v63  ;;  %v14129_v8 = vld [vmem:[#allocation89_spill] sm:$0xff] }
 0x48e   :  { %v4338_v49 = vmul.f32 2.0, %v14084_v51  ;;  %v4339_v38 = vmul.f32 2.0, %v13937_v13  ;;  %v4340_v45 = vmul.f32 2.0, %v13953_v2  ;;  %v4341_v9 = vmul.f32 2.0, %v13955_v42  ;;  %v14130_v55 = vld [vmem:[#allocation112_spill] sm:$0xff]  ;;  %v14131_v57 = vld [vmem:[#allocation117_spill] sm:$0xff] }
 0x48f   :  { %v4342_v15 = vmul.f32 2.0, %v14085_v62  ;;  %v4343_v52 = vmul.f32 2.0, %v14087_v31  ;;  %v4344_v0 = vmul.f32 2.0, %v14089_v6  ;;  %v4345_v33 = vmul.f32 2.0, %v14126_v54  ;;  %v14132_v14 = vld [vmem:[#allocation118_spill] sm:$0xff]  ;;  %v14133_v60 = vld [vmem:[#allocation119_spill] sm:$0xff] }
 0x490   :  { %v4346_v5 = vmul.f32 2.0, %v14127_v41  ;;  %v4347_v63 = vmul.f32 2.0, %v14128_v44  ;;  %v4348_v51 = vmul.f32 %v4328_v10, %v14129_v8  ;;  %v4349_v13 = vmul.f32 %v4329_v27, %v14130_v55  ;;  %v14134_v3 = vld [vmem:[#allocation122_spill] sm:$0xff]  ;;  %v14135_v58 = vld [vmem:[#allocation120_spill] sm:$0xff]  ;;  %v14136_v24 = vld [vmem:[#allocation121_spill] sm:$0xff] }
 0x491   :  { %v4350_v2 = vmul.f32 %v4330_v12, %v14131_v57  ;;  %v4351_v42 = vmul.f32 %v4331_v34, %v14132_v14  ;;  %v4352_v62 = vmul.f32 %v4332_v35, %v14133_v60  ;;  %v4353_v31 = vmul.f32 %v4333_v36, %v14134_v3  ;;  %v14137_v32 = vld [vmem:[#allocation123_spill] sm:$0xff]  ;;  %v14138_v46 = vld [vmem:[#allocation96_spill] sm:$0xff]  ;;  %v14139_v1 = vld [vmem:[#allocation106_spill] sm:$0xff] }
 0x492   :  { %v4354_v6 = vmul.f32 %v4334_v16, %v14135_v58  ;;  %v4355_v54 = vmul.f32 %v4335_v61, %v14136_v24  ;;  %v4356_v41 = vmul.f32 %v4336_v4, %v14137_v32  ;;  %v4357_v44 = vmul.f32 %v4337_v25, %v14138_v46  ;;  %v14140_v8 = vld [vmem:[#allocation105_spill] sm:$0xff]  ;;  %v14141_v55 = vld [vmem:[#allocation107_spill] sm:$0xff]  ;;  %v14143_v14 = vld [vmem:[#allocation88_spill] sm:$0xff] }
 0x493   :  { %v4358_v10 = vmul.f32 %v4338_v49, %v14139_v1  ;;  %v4359_v27 = vmul.f32 %v4339_v38, %v14140_v8  ;;  %v4360_v12 = vmul.f32 %v4340_v45, %v14141_v55  ;;  %v14142_v57 = vld [vmem:[#allocation99_spill] sm:$0xff]  ;;  %v4362_v35 = vmul.f32 %v4342_v15, %v14143_v14  ;;  %v14144_v60 = vld [vmem:[#allocation85_spill] sm:$0xff]  ;;  %v14145_v3 = vld [vmem:[#allocation124_spill] sm:$0xff] }
 0x494   :  { %v4361_v34 = vmul.f32 %v4341_v9, %v14142_v57  ;;  %v4363_v36 = vmul.f32 %v4343_v52, %v14144_v60  ;;  %v4364_v16 = vmul.f32 %v4344_v0, %v14145_v3  ;;  %v14146_v58 = vld [vmem:[#allocation125_spill] sm:$0xff]  ;;  %v11612_v24 = vadd.f32 0.0001, %v4348_v51  ;;  %v14147_v46 = vld [vmem:[#allocation126_spill] sm:$0xff]  ;;  %v14148_v38 = vld [vmem:[#allocation127_spill] sm:$0xff] }
 0x495   :  { %v4365_v61 = vmul.f32 %v4345_v33, %v14146_v58  ;;  %v11614_v32 = vadd.f32 0.0001, %v4349_v13  ;;  %v4366_v1 = vmul.f32 %v4346_v5, %v14147_v46  ;;  %v11617_v4 = vadd.f32 0.0001, %v4350_v2  ;;  %v14154_v5 = vld [vmem:[#allocation74_spill] sm:$0xff]  ;;  %v14155_v13 = vld [vmem:[#allocation115_spill] sm:$0xff] }
 0x496   :  { %v11619_v25 = vadd.f32 0.0001, %v4351_v42  ;;  %v11621_v49 = vadd.f32 0.0001, %v4352_v62  ;;  %v4367_v45 = vmul.f32 %v4347_v63, %v14148_v38  ;;  %v11624_v9 = vadd.f32 0.0001, %v4353_v31 }
 0x497   :  { %v11626_v15 = vadd.f32 0.0001, %v4354_v6  ;;  %v11628_v52 = vadd.f32 0.0001, %v4355_v54  ;;  %v11630_v0 = vadd.f32 0.0001, %v4356_v41  ;;  %v11638_v2 = vadd.f32 %v14155_v13, %v14154_v5 }
 0x498   :  { %v11632_v33 = vadd.f32 0.0001, %v4357_v44  ;;  %v11634_v51 = vadd.f32 0.0001, %v4358_v10  ;;  %v11640_v42 = vadd.f32 0.0001, %v4359_v27 }
 0x499   :  { %14149 = vst [vmem:[#allocation48_spill] sm:$0xff] %v11626_v15  ;;  %14150 = vst [vmem:[#allocation49_spill] sm:$0xff] %v11628_v52  ;;  %v11642_v62 = vadd.f32 0.0001, %v4360_v12  ;;  %v11644_v63 = vadd.f32 0.0001, %v4361_v34 }
 0x49a   :  { %14151 = vst [vmem:[#allocation50_spill] sm:$0xff] %v11630_v0  ;;  %14152 = vst [vmem:[#allocation51_spill] sm:$0xff] %v11632_v33  ;;  %v14159_v31 = vld [vmem:[#allocation153_spill] sm:$0xff]  ;;  %v14160_v6 = vld [vmem:[#allocation58_spill] sm:$0xff]  ;;  %v11650_v41 = vadd.f32 0.0001, %v4362_v35 }
 0x49b   :  { %14153 = vst [vmem:[#allocation52_spill] sm:$0xff] %v11634_v51  ;;  %14156 = vst [vmem:[#allocation14_spill] sm:$0xff] %v11640_v42  ;;  %v11648_v54 = vadd.f32 %v14160_v6, %v14159_v31  ;;  %v11652_v44 = vadd.f32 0.0001, %v4363_v36  ;;  %v11654_v10 = vadd.f32 0.0001, %v4364_v16 }
 0x49c   :  { %14157 = vst [vmem:[#allocation36_spill] sm:$0xff] %v11642_v62  ;;  %14158 = vst [vmem:[#allocation130_spill] sm:$0xff] %v11644_v63  ;;  %v14164_v8 = vld [vmem:[#allocation61_spill] sm:$0xff]  ;;  %v14165_v55 = vld [vmem:[#allocation59_spill] sm:$0xff]  ;;  %v11660_v27 = vadd.f32 0.0001, %v4365_v61 }
 0x49d   :  { %14161 = vst [vmem:[#allocation131_spill] sm:$0xff] %v11650_v41  ;;  %14162 = vst [vmem:[#allocation53_spill] sm:$0xff] %v11652_v44  ;;  %v11658_v57 = vadd.f32 %v14165_v55, %v14164_v8  ;;  %v11662_v12 = vadd.f32 0.0001, %v4366_v1  ;;  %v11664_v34 = vadd.f32 0.0001, %v4367_v45 }
 0x49e   :  { %14163 = vst [vmem:[#allocation82_spill] sm:$0xff] %v11654_v10  ;;  %14166 = vst [vmem:[#allocation83_spill] sm:$0xff] %v11660_v27  ;;  %v14169_v14 = vld [vmem:[#allocation43_spill] sm:$0xff]  ;;  %v14170_v60 = vld [vmem:[#allocation60_spill] sm:$0xff]  ;;  %v4388_v35 = vmul.f32 2.0, %v11510_v47  ;;  %v4389_v36 = vmul.f32 2.0, %v11512_v50 }
 0x49f   :  { %14167 = vst [vmem:[#allocation90_spill] sm:$0xff] %v11662_v12  ;;  %14168 = vst [vmem:[#allocation91_spill] sm:$0xff] %v11664_v34  ;;  %v4437_v3 = vadd.f32 %v14170_v60, %v14169_v14  ;;  %v4390_v16 = vmul.f32 2.0, %v11514_v21  ;;  %v4391_v58 = vmul.f32 2.0, %v11516_v19  ;;  %v4392_v46 = vmul.f32 2.0, %v11518_v48  ;;  %v14175_v31 = vld [vmem:[#allocation62_spill] sm:$0xff] }
 0x4a0   :  { %v4393_v61 = vmul.f32 2.0, %v11524_v18  ;;  %v4394_v1 = vmul.f32 2.0, %v11526_v29  ;;  %v4395_v38 = vmul.f32 2.0, %v11528_v7  ;;  %v4396_v45 = vmul.f32 2.0, %v11534_v30  ;;  %v14179_v14 = vld [vmem:[#allocation40_spill] sm:$0xff]  ;;  %v14180_v60 = vld [vmem:[#allocation63_spill] sm:$0xff] }
 0x4a1   :  { %v4397_v5 = vmul.f32 2.0, %v11536_v39  ;;  %v4398_v47 = vmul.f32 2.0, %v11538_v26  ;;  %v4399_v50 = vmul.f32 2.0, %v11544_v17  ;;  %v4400_v21 = vmul.f32 2.0, %v11546_v37  ;;  %v14191_v34 = vld [vmem:[#allocation140_spill] sm:$0xff]  ;;  %v14195_v27 = vld [vmem:[#allocation86_spill] sm:$0xff] }
 0x4a2   :  { %v4401_v19 = vmul.f32 2.0, %v11548_v40  ;;  %v11683_v48 = vmul.f32 2.0, %v11554_v28  ;;  %v11686_v18 = vmul.f32 2.0, %v11556_v59  ;;  %v11689_v29 = vmul.f32 2.0, %v11558_v53  ;;  %v14171_v40 = vld [vmem:[#allocation31_spill] sm:$0xff]  ;;  %v14172_v28 = vld [vmem:[#allocation114_spill] sm:$0xff] }
 0x4a3   :  { %v11692_v7 = vmul.f32 2.0, %v11564_v56  ;;  %v11695_v30 = vmul.f32 2.0, %v11566_v23  ;;  %v11698_v39 = vmul.f32 2.0, %v11568_v43  ;;  %v11700_v26 = vadd.f32 0.0009, %v4388_v35  ;;  %v14174_v23 = vld [vmem:[#allocation134_spill] sm:$0xff] }
 0x4a4   :  { %v11702_v17 = vadd.f32 0.0009, %v4389_v36  ;;  %v11704_v37 = vadd.f32 0.0009, %v4390_v16  ;;  %v4438_v59 = vadd.f32 %v14172_v28, %v14171_v40  ;;  %v11708_v53 = vadd.f32 0.0009, %v4391_v58 }
 0x4a5   :  { %v11710_v13 = vadd.f32 0.0009, %v4392_v46  ;;  %v11712_v56 = vadd.f32 0.0009, %v4393_v61  ;;  %v4439_v6 = vadd.f32 %v14175_v31, %v14174_v23  ;;  %v11716_v43 = vadd.f32 0.0009, %v4394_v1 }
 0x4a6   :  { %v11718_v8 = vadd.f32 0.0009, %v4395_v38  ;;  %v11720_v55 = vadd.f32 0.0009, %v4396_v45  ;;  %v4440_v35 = vadd.f32 %v14180_v60, %v14179_v14  ;;  %v11724_v36 = vadd.f32 0.0009, %v4397_v5 }
 0x4a7   :  { %14173 = vst [vmem:[#allocation92_spill] sm:$0xff] %v11712_v56  ;;  %14176 = vst [vmem:[#allocation93_spill] sm:$0xff] %v11716_v43  ;;  %v11726_v16 = vadd.f32 0.0009, %v4398_v47  ;;  %v11728_v58 = vadd.f32 0.0009, %v4399_v50 }
 0x4a8   :  { %14177 = vst [vmem:[#allocation94_spill] sm:$0xff] %v11718_v8  ;;  %14178 = vst [vmem:[#allocation95_spill] sm:$0xff] %v11720_v55  ;;  %v14184_v46 = vld [vmem:[#allocation42_spill] sm:$0xff]  ;;  %v14185_v61 = vld [vmem:[#allocation64_spill] sm:$0xff]  ;;  %v11732_v28 = vadd.f32 0.0009, %v4400_v21 }
 0x4a9   :  { %14181 = vst [vmem:[#allocation76_spill] sm:$0xff] %v11724_v36  ;;  %14182 = vst [vmem:[#allocation98_spill] sm:$0xff] %v11726_v16  ;;  %v4441_v40 = vadd.f32 %v14185_v61, %v14184_v46  ;;  %v11734_v1 = vadd.f32 0.0009, %v4401_v19  ;;  %v14188_v38 = vld [vmem:[#allocation44_spill] sm:$0xff]  ;;  %v14190_v31 = vld [vmem:[#allocation133_spill] sm:$0xff] }
 0x4aa   :  { %14183 = vst [vmem:[#allocation100_spill] sm:$0xff] %v11728_v58  ;;  %14186 = vst [vmem:[#allocation79_spill] sm:$0xff] %v11732_v28  ;;  %v14189_v23 = vld [vmem:[#allocation80_spill] sm:$0xff]  ;;  %v4468_v12 = vadd.f32 %v14191_v34, %v14190_v31  ;;  %v14192_v14 = vld [vmem:[#allocation26_spill] sm:$0xff]  ;;  %v4448_v31 = vadd.f32 0.0001, %v11522_v20 }
 0x4ab   :  { %14187 = vst [vmem:[#allocation97_spill] sm:$0xff] %v11734_v1  ;;  %v4442_v45 = vadd.f32 %v14189_v23, %v14188_v38  ;;  %v14193_v5 = vld [vmem:[#allocation150_spill] sm:$0xff]  ;;  %v14194_v47 = vld [vmem:[#allocation132_spill] sm:$0xff]  ;;  %v14196_v10 = vld [vmem:[#allocation109_spill] sm:$0xff]  ;;  %v4454_v51 = vadd.f32 0.0001, %v11638_v2 }
 0x4ac   :  { %v4443_v60 = vadd.f32 %v14193_v5, %v14192_v14  ;;  %v4444_v50 = vadd.f32 %v14195_v27, %v14194_v47  ;;  %v14197_v44 = vld [vmem:[#allocation65_spill] sm:$0xff]  ;;  %v14199_v46 = vld [vmem:[#allocation38_spill] sm:$0xff]  ;;  %v14201_v1 = vld [vmem:[#allocation68_spill] sm:$0xff]  ;;  %v4449_v47 = vadd.f32 0.0001, %v11532_v22 }
 0x4ad   :  { %v11746_v41 = vadd.f32 %v14197_v44, %v14196_v10  ;;  %v14198_v21 = vld [vmem:[#allocation29_spill] sm:$0xff]  ;;  %v14200_v61 = vld [vmem:[#allocation110_spill] sm:$0xff]  ;;  %v14205_v5 = vld [vmem:[#allocation67_spill] sm:$0xff]  ;;  %v4450_v44 = vadd.f32 0.0001, %v11542_v11 }
 0x4ae   :  { %v4469_v19 = vadd.f32 %v14199_v46, %v14198_v21  ;;  %v11752_v63 = vadd.f32 %v14201_v1, %v14200_v61  ;;  %v14202_v38 = vld [vmem:[#allocation137_spill] sm:$0xff]  ;;  %v14203_v23 = vld [vmem:[#allocation66_spill] sm:$0xff]  ;;  %v14207_v21 = vld [vmem:[#allocation11_spill] sm:$0xff]  ;;  %v4488_v20 = vadd.f32 0.0009, %v4468_v12 }
 0x4af   :  { %v11756_v34 = vadd.f32 %v14203_v23, %v14202_v38  ;;  %v14204_v14 = vld [vmem:[#allocation30_spill] sm:$0xff]  ;;  %v14206_v10 = vld [vmem:[#allocation45_spill] sm:$0xff]  ;;  %v14208_v46 = vld [vmem:[#allocation27_spill] sm:$0xff]  ;;  %v4457_v33 = vadd.f32 0.0001, %v4437_v3 }
 0x4b0   :  { %v4470_v27 = vadd.f32 %v14205_v5, %v14204_v14  ;;  %v4451_v28 = vadd.f32 0.0001, %v14206_v10  ;;  %v4471_v62 = vadd.f32 %v14208_v46, %v14207_v21  ;;  %v14209_v1 = vld [vmem:[#allocation46_spill] sm:$0xff]  ;;  %v14210_v58 = vld [vmem:[#allocation47_spill] sm:$0xff]  ;;  %v14212_v23 = vld [vmem:[#allocation108_spill] sm:$0xff] }
 0x4b1   :  { %v4452_v61 = vadd.f32 0.0001, %v14209_v1  ;;  %v4453_v42 = vadd.f32 0.0001, %v14210_v58  ;;  %v14211_v38 = vld [vmem:[#allocation55_spill] sm:$0xff]  ;;  %v14213_v22 = vld [vmem:[#allocation146_spill] sm:$0xff] }
 0x4b2   :  { %v4472_v16 = vadd.f32 %v14212_v23, %v14211_v38  ;;  %v4455_v14 = vadd.f32 0.0001, %v11648_v54  ;;  %v14214_v5 = vld [vmem:[#allocation41_spill] sm:$0xff]  ;;  %v4489_v36 = vadd.f32 0.0009, %v4469_v19  ;;  %v14215_v21 = vld [vmem:[#allocation56_spill] sm:$0xff] }
 0x4b3   :  { %v4473_v11 = vadd.f32 %v14214_v5, %v14213_v22  ;;  %v4456_v10 = vadd.f32 0.0001, %v11658_v57  ;;  %v14216_v46 = vld [vmem:[#allocation104_spill] sm:$0xff]  ;;  %v4490_v55 = vadd.f32 0.0009, %v4470_v27  ;;  %v14217_v8 = vld [vmem:[#allocation33_spill] sm:$0xff]  ;;  %v11781_v22 = vmul.f32 %v4488_v20, %v4448_v31 }
 0x4b4   :  { %v4474_v1 = vadd.f32 %v14216_v46, %v14215_v21  ;;  %v4458_v58 = vadd.f32 0.0001, %v4438_v59  ;;  %v4459_v0 = vadd.f32 0.0001, %v4439_v6  ;;  %v14218_v38 = vld [vmem:[#allocation15_spill] sm:$0xff]  ;;  %v14219_v52 = vld [vmem:[#allocation34_spill] sm:$0xff]  ;;  %v11785_v21 = vmul.f32 %v4489_v36, %v4449_v47 }
 0x4b5   :  { %v4475_v12 = vadd.f32 %v14218_v38, %v14217_v8  ;;  %v4491_v23 = vadd.f32 0.0009, %v4471_v62  ;;  %v4460_v2 = vadd.f32 0.0001, %v4440_v35  ;;  %v14220_v54 = vld [vmem:[#allocation136_spill] sm:$0xff]  ;;  %v14222_v3 = vld [vmem:[#allocation39_spill] sm:$0xff]  ;;  %v11789_v62 = vmul.f32 %v4490_v55, %v4450_v44 }
 0x4b6   :  { %v4476_v43 = vadd.f32 %v14220_v54, %v14219_v52  ;;  %v4492_v15 = vadd.f32 0.0009, %v4472_v16  ;;  %v4461_v19 = vadd.f32 0.0001, %v4441_v40  ;;  %v14221_v57 = vld [vmem:[#allocation12_spill] sm:$0xff]  ;;  %v14223_v6 = vld [vmem:[#allocation57_spill] sm:$0xff]  ;;  %4858 = vrcp.f32 %v11781_v22 }
 0x4b7   :  { %v4477_v5 = vadd.f32 %v14222_v3, %v14221_v57  ;;  %v4493_v56 = vadd.f32 0.0009, %v4473_v11  ;;  %v4462_v59 = vadd.f32 0.0001, %v4442_v45  ;;  %v14224_v27 = vld [vmem:[#allocation116_spill] sm:$0xff]  ;;  %v14225_v38 = vld [vmem:[#allocation70_spill] sm:$0xff]  ;;  %v11793_v20 = vmul.f32 %v4491_v23, %v4451_v28 }
 0x4b8   :  { %v4478_v46 = vadd.f32 %v14224_v27, %v14223_v6  ;;  %v4494_v8 = vadd.f32 0.0009, %v4474_v1  ;;  %v4463_v35 = vadd.f32 0.0001, %v4443_v60  ;;  %v14226_v52 = vld [vmem:[#allocation77_spill] sm:$0xff]  ;;  %v11795_v57 = vmul.f32 %v4492_v15, %v4452_v61  ;;  %v14227_v36 = vld [vmem:[#allocation32_spill] sm:$0xff] }
 0x4b9   :  { %v4479_v16 = vadd.f32 %v14226_v52, %v14225_v38  ;;  %v4495_v31 = vadd.f32 0.0009, %v4475_v12  ;;  %v4464_v40 = vadd.f32 0.0001, %v4444_v50  ;;  %v4496_v54 = vadd.f32 0.0009, %v4476_v43 }
 0x4ba   :  { %v14228_v45 = vld [vmem:[#allocation78_spill] sm:$0xff]  ;;  %v4497_v11 = vadd.f32 0.0009, %v4477_v5  ;;  %v11800_v1 = vmul.f32 %v4493_v56, %v4453_v42  ;;  %4860 = vrcp.f32 %v11785_v21  ;;  %v14229_v55 = vld [vmem:[#allocation13_spill] sm:$0xff]  ;;  %v14230_v60 = vld [vmem:[#allocation16_spill] sm:$0xff]  ;;  %v11805_v28 = vmul.f32 %v4494_v8, %v4454_v51 }
 0x4bb   :  { %v4480_v47 = vadd.f32 %v14228_v45, %v14227_v36  ;;  %v4481_v44 = vadd.f32 %v14230_v60, %v14229_v55  ;;  %v4498_v12 = vadd.f32 0.0009, %v4478_v46  ;;  %4862 = vrcp.f32 %v11789_v62  ;;  %v14231_v15 = vld [vmem:[#allocation71_spill] sm:$0xff]  ;;  %v14232_v43 = vld [vmem:[#allocation148_spill] sm:$0xff]  ;;  %v14234_v56 = vld [vmem:[#allocation149_spill] sm:$0xff] }
 0x4bc   :  { %v4482_v50 = vadd.f32 %v14232_v43, %v14231_v15  ;;  %v4499_v61 = vadd.f32 0.0009, %v4479_v16  ;;  %v11810_v23 = vmul.f32 %v4495_v31, %v4455_v14  ;;  %4864 = vrcp.f32 %v11793_v20  ;;  %v14233_v42 = vld [vmem:[#allocation72_spill] sm:$0xff]  ;;  %v14235_v5 = vld [vmem:[#allocation17_spill] sm:$0xff]  ;;  %v14237_v51 = vld [vmem:[#allocation54_spill] sm:$0xff] }
 0x4bd   :  { %v4483_v3 = vadd.f32 %v14234_v56, %v14233_v42  ;;  %v14236_v6 = vld [vmem:[#allocation152_spill] sm:$0xff]  ;;  %v11817_v38 = vmul.f32 %v4496_v54, %v4456_v10  ;;  %4866 = vrcp.f32 %v11795_v57  ;;  %v14238_v46 = vld [vmem:[#allocation154_spill] sm:$0xff]  ;;  %v14240_v36 = vld [vmem:[#allocation155_spill] sm:$0xff]  ;;  %v11824_v14 = vmul.f32 %v4497_v11, %v4457_v33 }
 0x4be   :  { %v4484_v27 = vadd.f32 %v14236_v6, %v14235_v5  ;;  %v4485_v8 = vadd.f32 %v14238_v46, %v14237_v51  ;;  %v14239_v52 = vld [vmem:[#allocation142_spill] sm:$0xff]  ;;  %4868 = vrcp.f32 %v11800_v1  ;;  %v14241_v31 = vld [vmem:[#allocation28_spill] sm:$0xff]  ;;  %v14242_v45 = vld [vmem:[#allocation135_spill] sm:$0xff]  ;;  %v4500_v60 = vadd.f32 0.0009, %v4480_v47 }
 0x4bf   :  { %v4486_v16 = vadd.f32 %v14240_v36, %v14239_v52  ;;  %v4487_v55 = vadd.f32 %v14242_v45, %v14241_v31  ;;  %v11829_v15 = vmul.f32 %v4498_v12, %v4458_v58  ;;  %4870 = vrcp.f32 %v11805_v28  ;;  %v14247_v36 = vld [vmem:[#allocation93_spill] sm:$0xff]  ;;  %v14250_v45 = vld [vmem:[#allocation50_spill] sm:$0xff] }
 0x4c0   :  { %v4465_v10 = vadd.f32 0.0001, %v11746_v41  ;;  %v4501_v54 = vadd.f32 0.0009, %v4481_v44  ;;  %v11833_v43 = vmul.f32 %v4499_v61, %v4459_v0  ;;  %4872 = vrcp.f32 %v11810_v23  ;;  %v11840_v12 = vpop.eup %4858 }
 0x4c1   :  { %v4466_v33 = vadd.f32 0.0001, %v11752_v63  ;;  %v4467_v11 = vadd.f32 0.0001, %v11756_v34  ;;  %v4502_v42 = vadd.f32 0.0009, %v4482_v50  ;;  %4874 = vrcp.f32 %v11817_v38 }
 0x4c2   :  { %v4503_v56 = vadd.f32 0.0009, %v4483_v3  ;;  %v4504_v47 = vadd.f32 0.0009, %v4484_v27  ;;  %v4505_v58 = vadd.f32 0.0009, %v4485_v8  ;;  %4876 = vrcp.f32 %v11824_v14 }
 0x4c3   :  { %v4506_v41 = vadd.f32 0.0009, %v4486_v16  ;;  %v4507_v44 = vadd.f32 0.0009, %v4487_v55  ;;  %v11842_v0 = vmul.f32 %v4500_v60, %v4460_v2  ;;  %4878 = vrcp.f32 %v11829_v15  ;;  %v14251_v55 = vld [vmem:[#allocation95_spill] sm:$0xff] }
 0x4c4   :  { %v11845_v61 = vpop.eup %4860  ;;  %v11848_v63 = vadd.f32 0.0009, %v11683_v48  ;;  %v11851_v34 = vadd.f32 0.0009, %v11686_v18  ;;  %v11853_v50 = vmul.f32 %v4501_v54, %v4461_v19  ;;  %4880 = vrcp.f32 %v11833_v43  ;;  %v14252_v54 = vld [vmem:[#allocation51_spill] sm:$0xff] }
 0x4c5   :  { %v11856_v3 = vpop.eup %4862  ;;  %v11859_v5 = vadd.f32 0.0009, %v11689_v29  ;;  %v11862_v2 = vadd.f32 0.0009, %v11692_v7  ;;  %v11865_v6 = vadd.f32 0.0009, %v11695_v30  ;;  %v11867_v48 = vmul.f32 %v4502_v42, %v4462_v59 }
 0x4c6   :  { %v11869_v27 = vpop.eup %4864  ;;  %v11872_v18 = vadd.f32 0.0009, %v11698_v39  ;;  %v11874_v19 = vmul.f32 %v4503_v56, %v4463_v35  ;;  %v11876_v51 = vmul.f32 %v4504_v47, %v4464_v40  ;;  %v11880_v29 = vmul.f32 %v11700_v26, %v11612_v24  ;;  %v14254_v47 = vld [vmem:[#allocation52_spill] sm:$0xff] }
 0x4c7   :  { %14243 = vst [vmem:[#allocation102_spill] sm:$0xff] %v11865_v6  ;;  %v11882_v7 = vpop.eup %4866  ;;  %v11884_v46 = vmul.f32 %v4505_v58, %v4465_v10  ;;  %v11886_v30 = vmul.f32 %v4506_v41, %v4466_v33  ;;  %v11888_v59 = vmul.f32 %v4507_v44, %v4467_v11  ;;  %4882 = vrcp.f32 %v11842_v0  ;;  %v14253_v33 = vld [vmem:[#allocation76_spill] sm:$0xff]  ;;  %v14255_v58 = vld [vmem:[#allocation98_spill] sm:$0xff] }
 0x4c8   :  { %14244 = vst [vmem:[#allocation18_spill] sm:$0xff] %v11872_v18  ;;  %v4869_v39 = vpop.eup %4868  ;;  %4884 = vrcp.f32 %v11853_v50  ;;  %v11894_v35 = vmul.f32 %v11702_v17, %v11614_v32  ;;  %v11898_v24 = vmul.f32 %v11704_v37, %v11617_v4  ;;  %v11902_v26 = vmul.f32 %v11708_v53, %v11619_v25  ;;  %v14245_v32 = vld [vmem:[#allocation92_spill] sm:$0xff] }
 0x4c9   :  { %v4871_v40 = vpop.eup %4870  ;;  %4886 = vrcp.f32 %v11867_v48  ;;  %v4548_v8 = vmul.f32 %v11840_v12, %v11781_v22  ;;  %v11909_v52 = vmul.f32 %v11710_v13, %v11621_v49  ;;  %v11913_v17 = vmul.f32 %v14245_v32, %v11624_v9  ;;  %v14246_v53 = vld [vmem:[#allocation48_spill] sm:$0xff]  ;;  %v14248_v9 = vld [vmem:[#allocation49_spill] sm:$0xff]  ;;  %v14249_v13 = vld [vmem:[#allocation94_spill] sm:$0xff] }
 0x4ca   :  { %v4873_v4 = vpop.eup %4872  ;;  %4888 = vrcp.f32 %v11874_v19  ;;  %v4549_v25 = vmul.f32 %v11845_v61, %v11785_v21  ;;  %v4550_v37 = vmul.f32 %v11856_v3, %v11789_v62  ;;  %v11922_v22 = vmul.f32 %v14247_v36, %v14246_v53 }
 0x4cb   :  { %v4875_v16 = vpop.eup %4874  ;;  %4890 = vrcp.f32 %v11876_v51  ;;  %v4551_v49 = vmul.f32 %v11869_v27, %v11793_v20  ;;  %v11929_v31 = vmul.f32 %v14249_v13, %v14248_v9  ;;  %v11933_v21 = vmul.f32 %v14251_v55, %v14250_v45  ;;  %v14256_v13 = vld [vmem:[#allocation14_spill] sm:$0xff]  ;;  %v14257_v45 = vld [vmem:[#allocation100_spill] sm:$0xff] }
 0x4cc   :  { %v4877_v60 = vpop.eup %4876  ;;  %4892 = vrcp.f32 %v11884_v46  ;;  %v4552_v62 = vmul.f32 %v11882_v7, %v11795_v57  ;;  %v4553_v10 = vmul.f32 %v4869_v39, %v11800_v1  ;;  %v11941_v11 = vmul.f32 %v14253_v33, %v14252_v54  ;;  %v14258_v33 = vld [vmem:[#allocation36_spill] sm:$0xff] }
 0x4cd   :  { %v4879_v20 = vpop.eup %4878  ;;  %4894 = vrcp.f32 %v11886_v30  ;;  %v4554_v42 = vmul.f32 %v4871_v40, %v11805_v28  ;;  %v4568_v56 = vsub.f32 2.0, %v4548_v8  ;;  %v11947_v41 = vmul.f32 %v14255_v58, %v14254_v47  ;;  %v14259_v47 = vld [vmem:[#allocation79_spill] sm:$0xff] }
 0x4ce   :  { %v4881_v44 = vpop.eup %4880  ;;  %4896 = vrcp.f32 %v11888_v59  ;;  %v4555_v57 = vmul.f32 %v4873_v4, %v11810_v23  ;;  %v4569_v1 = vsub.f32 2.0, %v4549_v25  ;;  %v4570_v32 = vsub.f32 2.0, %v4550_v37 }
 0x4cf   :  { %v4556_v53 = vmul.f32 %v4875_v16, %v11817_v38  ;;  %v4557_v36 = vmul.f32 %v4877_v60, %v11824_v14  ;;  %v4571_v9 = vsub.f32 2.0, %v4551_v49  ;;  %v11955_v28 = vmul.f32 %v14257_v45, %v14256_v13  ;;  %v14260_v14 = vld [vmem:[#allocation130_spill] sm:$0xff]  ;;  %v14261_v49 = vld [vmem:[#allocation97_spill] sm:$0xff] }
 0x4d0   :  { %v4558_v8 = vmul.f32 %v4879_v20, %v11829_v15  ;;  %v4572_v55 = vsub.f32 2.0, %v4552_v62  ;;  %v4573_v54 = vsub.f32 2.0, %v4553_v10  ;;  %v11960_v58 = vmul.f32 %v14259_v47, %v14258_v33  ;;  %v14262_v10 = vld [vmem:[#allocation131_spill] sm:$0xff] }
 0x4d1   :  { %v4883_v23 = vpop.eup %4882  ;;  %v4559_v25 = vmul.f32 %v4881_v44, %v11833_v43  ;;  %v4574_v37 = vsub.f32 2.0, %v4554_v42  ;;  %v4588_v38 = vmul.f32 %v11840_v12, %v4568_v56  ;;  %v11966_v18 = vmul.f32 %v14261_v49, %v14260_v14  ;;  %v14263_v12 = vld [vmem:[#allocation53_spill] sm:$0xff] }
 0x4d2   :  { %v4885_v13 = vpop.eup %4884  ;;  %v4575_v45 = vsub.f32 2.0, %v4555_v57  ;;  %v4589_v15 = vmul.f32 %v11845_v61, %v4569_v1  ;;  %v4590_v62 = vmul.f32 %v11856_v3, %v4570_v32  ;;  %v11972_v33 = vmul.f32 %v11848_v63, %v14262_v10 }
 0x4d3   :  { %v4887_v47 = vpop.eup %4886  ;;  %v4576_v6 = vsub.f32 2.0, %v4556_v53  ;;  %v4577_v43 = vsub.f32 2.0, %v4557_v36  ;;  %v4591_v42 = vmul.f32 %v11869_v27, %v4571_v9  ;;  %v11977_v56 = vmul.f32 %v11851_v34, %v14263_v12 }
 0x4d4   :  { %v4889_v14 = vpop.eup %4888  ;;  %v4560_v57 = vmul.f32 %v4883_v23, %v11842_v0  ;;  %v4578_v49 = vsub.f32 2.0, %v4558_v8  ;;  %v4592_v61 = vmul.f32 %v11882_v7, %v4572_v55  ;;  %v4593_v3 = vmul.f32 %v4869_v39, %v4573_v54 }
 0x4d5   :  { %v4891_v1 = vpop.eup %4890  ;;  %v4561_v63 = vmul.f32 %v4885_v13, %v11853_v50  ;;  %v4579_v32 = vsub.f32 2.0, %v4559_v25  ;;  %v4594_v10 = vmul.f32 %v4871_v40, %v4574_v37  ;;  %v4628_v53 = vmul.f32 %v11880_v29, %v4588_v38 }
 0x4d6   :  { %v4893_v36 = vpop.eup %4892  ;;  %v4562_v27 = vmul.f32 %v4887_v47, %v11867_v48  ;;  %v4595_v9 = vmul.f32 %v4873_v4, %v4575_v45  ;;  %v4629_v34 = vmul.f32 %v11894_v35, %v4589_v15  ;;  %v4630_v12 = vmul.f32 %v11898_v24, %v4590_v62 }
 0x4d7   :  { %v4895_v0 = vpop.eup %4894  ;;  %v4563_v8 = vmul.f32 %v4889_v14, %v11874_v19  ;;  %v4596_v7 = vmul.f32 %v4875_v16, %v4576_v6  ;;  %v4597_v39 = vmul.f32 %v4877_v60, %v4577_v43  ;;  %v4631_v55 = vmul.f32 %v11902_v26, %v4591_v42 }
 0x4d8   :  { %v4897_v50 = vpop.eup %4896  ;;  %v4564_v40 = vmul.f32 %v4891_v1, %v11876_v51  ;;  %v4580_v54 = vsub.f32 2.0, %v4560_v57  ;;  %v4598_v29 = vmul.f32 %v4879_v20, %v4578_v49  ;;  %v4632_v25 = vmul.f32 %v11909_v52, %v4592_v61 }
 0x4d9   :  { %v4565_v48 = vmul.f32 %v4893_v36, %v11884_v46  ;;  %v4581_v4 = vsub.f32 2.0, %v4561_v63  ;;  %v4599_v35 = vmul.f32 %v4881_v44, %v4579_v32  ;;  %v4633_v24 = vmul.f32 %v11913_v17, %v4593_v3 }
 0x4da   :  { %v4566_v37 = vmul.f32 %v4895_v0, %v11886_v30  ;;  %v4582_v19 = vsub.f32 2.0, %v4562_v27  ;;  %v4634_v6 = vmul.f32 %v11922_v22, %v4594_v10  ;;  %v4648_v16 = vadd.f32 %v4630_v12, %v4628_v53  ;;  %v14266_v53 = vld [vmem:[#allocation90_spill] sm:$0xff] }
 0x4db   :  { %v4567_v26 = vmul.f32 %v4897_v50, %v11888_v59  ;;  %v4583_v60 = vsub.f32 2.0, %v4563_v8  ;;  %v4635_v51 = vmul.f32 %v11929_v31, %v4595_v9  ;;  %v4657_v20 = vadd.f32 %v4631_v55, %v4629_v34  ;;  %v14268_v34 = vld [vmem:[#allocation91_spill] sm:$0xff] }
 0x4dc   :  { %v4584_v38 = vsub.f32 2.0, %v4564_v40  ;;  %v4600_v52 = vmul.f32 %v4883_v23, %v4580_v54  ;;  %v4636_v46 = vmul.f32 %v11933_v21, %v4596_v7  ;;  %v4649_v45 = vadd.f32 %v4648_v16, %v4632_v25  ;;  %v14264_v23 = vld [vmem:[#allocation82_spill] sm:$0xff] }
 0x4dd   :  { %v4585_v44 = vsub.f32 2.0, %v4565_v48  ;;  %v4601_v15 = vmul.f32 %v4885_v13, %v4581_v4  ;;  %v4637_v17 = vmul.f32 %v11941_v11, %v4597_v39  ;;  %v4658_v30 = vadd.f32 %v4657_v20, %v4633_v24  ;;  %v14265_v11 = vld [vmem:[#allocation83_spill] sm:$0xff] }
 0x4de   :  { %v4586_v62 = vsub.f32 2.0, %v4566_v37  ;;  %v4602_v43 = vmul.f32 %v4887_v47, %v4582_v19  ;;  %v4638_v22 = vmul.f32 %v11947_v41, %v4598_v29  ;;  %v4650_v42 = vadd.f32 %v4649_v45, %v4634_v6 }
 0x4df   :  { %v4587_v59 = vsub.f32 2.0, %v4567_v26  ;;  %v4603_v57 = vmul.f32 %v4889_v14, %v4583_v60  ;;  %v4639_v31 = vmul.f32 %v11955_v28, %v4599_v35  ;;  %v4659_v49 = vadd.f32 %v4658_v30, %v4635_v51  ;;  %v14267_v14 = vld [vmem:[#allocation102_spill] sm:$0xff] }
 0x4e0   :  { %v4604_v61 = vmul.f32 %v4891_v1, %v4584_v38  ;;  %v4624_v21 = vmul.f32 %v11859_v5, %v14264_v23  ;;  %v4640_v3 = vmul.f32 %v11960_v58, %v4600_v52  ;;  %v4651_v13 = vadd.f32 %v4650_v42, %v4636_v46  ;;  %v14269_v5 = vld [vmem:[#allocation18_spill] sm:$0xff] }
 0x4e1   :  { %v4605_v63 = vmul.f32 %v4893_v36, %v4585_v44  ;;  %v4625_v32 = vmul.f32 %v11862_v2, %v14265_v11  ;;  %v4641_v47 = vmul.f32 %v11966_v18, %v4601_v15  ;;  %v4660_v41 = vadd.f32 %v4659_v49, %v4637_v17 }
 0x4e2   :  { %v4606_v10 = vmul.f32 %v4895_v0, %v4586_v62  ;;  %v4626_v27 = vmul.f32 %v14267_v14, %v14266_v53  ;;  %v4642_v28 = vmul.f32 %v11972_v33, %v4602_v43  ;;  %v4652_v1 = vadd.f32 %v4651_v13, %v4638_v22  ;;  %v14270_v0 = vld [vmem:[#allocation75_spill] sm:$0xff] }
 0x4e3   :  { %v4607_v9 = vmul.f32 %v4897_v50, %v4587_v59  ;;  %v4627_v12 = vmul.f32 %v14269_v5, %v14268_v34  ;;  %v4643_v58 = vmul.f32 %v11977_v56, %v4603_v57  ;;  %v4661_v36 = vadd.f32 %v4660_v41, %v4639_v31 }
 0x4e4   :  { %v4644_v8 = vmul.f32 %v4624_v21, %v4604_v61  ;;  %v4653_v7 = vadd.f32 %v4652_v1, %v4640_v3  ;;  %v4645_v2 = vmul.f32 %v4625_v32, %v4605_v63  ;;  %v4646_v18 = vmul.f32 %v4626_v27, %v4606_v10 }
 0x4e5   :  { %v4662_v39 = vadd.f32 %v4661_v36, %v4641_v47  ;;  %v4666_v40 = vadd.s32 8, %v14270_v0  ;;  %v4647_v54 = vmul.f32 %v4627_v12, %v4607_v9 }
 0x4e6   :  { %v4654_v55 = vadd.f32 %v4653_v7, %v4642_v28 }
 0x4e7   :  { %v4663_v29 = vadd.f32 %v4662_v39, %v4643_v58  ;;  %vm4668_vm6 = vcmp.lt.s32.totalorder %v4666_v40, 10 }
 0x4e8   :  { %v4655_v25 = vadd.f32 %v4654_v55, %v4644_v8 }
 0x4e9   :  { %v4664_v33 = vadd.f32 %v4663_v29, %v4645_v2 }
 0x4ea   :  { %v4656_v48 = vadd.f32 %v4655_v25, %v4646_v18 }
 0x4eb   :  { %v4665_v50 = vadd.f32 %v4664_v33, %v4647_v54 }
 0x4ed   :  { %v4670_v4 = vsel %vm4668_vm6, %v4665_v50, 0.0 }
 0x4ee   :  { %v4671_v35 = vadd.f32 %v4670_v4, %v4656_v48 }
 0x4f0   :  { %v4672_v24 = vrot.slane %v4671_v35, 4 }
 0x4f2   :  { %v4673_v56 = vadd.f32 %v4672_v24, %v4671_v35 }
 0x4f4   :  { %v4674_v37 = vrot.slane %v4673_v56, 2 }
 0x4f6   :  { %v4675_v19 = vadd.f32 %v4674_v37, %v4673_v56 }
 0x4f8   :  { %v4676_v6 = vrot.slane %v4675_v19, 1 }
 0x4fa   :  { %v4677_v16 = vadd.f32 %v4676_v6, %v4675_v19 }
 0x4fc   :  { %4678 = vst [vmem:[#allocation7] sm:$0x1] %v4677_v16 }
 0x4fd   :  { %4953 = shalt.err (!%p4950_p6)
}
 0x4fe   :  { %s4954_s11 = scalar_lea.hbm %s12027_s2, 16 }
 0x4ff   :  { %p4955_p7 = scmp.ne.s32.totalorder %s12027_s2, %s4954_s11  ;;  %p4958_p8 = scmp.lt.u32.totalorder %s4954_s11, %s12027_s2 }
 0x501   :  { %p4960_p9 = pnand %p4958_p8, %p4955_p7 }
 0x503   :  { %4963 = shalt.err (!%p4960_p9)
}
 0x504   :  { %4688 = dma.vmem_to_hbm [thread:$0]  %s4686_s6, 16, %s12027_s2, [#allocation4]  }
 0x505   :  { %4968 = dma.done.wait [#allocation4], 16  }
 0x506   :  { %4969 = vsyncadd [#allocation4], 4294967280 }
 0x507   :  { %4692 = vsyncpa [#allocation3], 1 }
 0x508   :  { %4693 = vsyncpa [#allocation6], 1 }
 0x509   :  { %4694 = vsyncpa [#allocation4], 1 }

</bundles_post_ra>
